<compile_context>
chip_gen: v7x
topology: tpu7x:2x2x1
jax: 0.10.0
libtpu: 0.0.40
codegen_flags: <defaults>
</compile_context>

<pallas_src>
import functools

import jax
import jax.numpy as jnp
from jax.experimental import pallas as pl
from jax.experimental.pallas import tpu as pltpu

EPS = 1e-5
NUM_CLASSES = 10
C = 64  # channel width of every conv in ResNet4


# ----------------------------- fused Pallas kernel ---------------------------

def _resnet4_kernel(p0_ref, w1_ref, scale1_ref, shift1_ref,
                    wr1_ref, scale_r1_ref, shift_r1_ref,
                    wr2_ref, scale_r2_ref, shift_r2_ref,
                    fcw_ref, fcb_ref,
                    o_ref,
                    a_ref, b_ref, c_ref, *, s0, s1):
    """Whole ResNet4 forward; all activations stay resident in VMEM scratch.

    Scratch layouts stack the batch along the leading (row) axis with
    per-image padding rows so convolution / pooling windows never cross
    image boundaries:
      a_ref: [N*(s0+2), s0+2, C]  stem output, -inf padded (maxpool input)
      b_ref: [N*(s1+2), s1+2, C]  maxpool output, zero padded (conv1 input,
                                  also the residual/skip tensor)
      c_ref: [N*(s1+2), s1+2, C]  conv1 output, zero padded (conv2 input)
    """
    n_batch = o_ref.shape[0]
    hp0 = s0 + 2
    hp1 = s1 + 2

    # ---- init padded VMEM scratch -------------------------------------------
    a_ref[...] = jnp.full(a_ref.shape, -jnp.inf, jnp.float32)   # maxpool pad
    b_ref[...] = jnp.zeros(b_ref.shape, jnp.float32)            # conv zero pad
    c_ref[...] = jnp.zeros(c_ref.shape, jnp.float32)

    scale1 = scale1_ref[...]
    shift1 = shift1_ref[...]
    scale_r1 = scale_r1_ref[...]
    shift_r1 = shift_r1_ref[...]
    scale_r2 = scale_r2_ref[...]
    shift_r2 = shift_r2_ref[...]

    # ---- stem: Conv2d(1, 64, 3, stride=2, pad=1) + BN + ReLU ----------------
    # Cin == 1, so do 9 VPU FMAs over pre-shifted input planes instead of a
    # K=9 matmul on the MXU (avoids a mostly-empty MXU pass).
    acc0 = jnp.zeros((n_batch * s0, s0, C), jnp.float32)
    for k in range(9):
        acc0 = acc0 + p0_ref[k] * w1_ref[k:k + 1, :]     # [N*s0,s0,1] * [1,C]
    y0 = jnp.maximum(acc0 * scale1 + shift1, 0.0)
    for n in range(n_batch):
        a_ref[n * hp0 + 1:n * hp0 + 1 + s0, 1:1 + s0, :] = (
            y0[n * s0:(n + 1) * s0])

    # ---- MaxPool2d(kernel=3, stride=2, pad=1):  s0 x s0 -> s1 x s1 ----------
    for n in range(n_batch):
        for i in range(s1):
            rows = a_ref[n * hp0 + 2 * i:n * hp0 + 2 * i + 3, :, :]
            rowmax = jnp.max(rows, axis=0)               # [hp0, C]
            for j in range(s1):
                m = jnp.max(rowmax[2 * j:2 * j + 3, :], axis=0, keepdims=True)
                b_ref[n * hp1 + 1 + i, 1 + j:2 + j, :] = m

    # ---- ResNet block conv1: Conv2d(64,64,3,1,1) + BN + ReLU ----------------
    # 3x3 conv = 9 accumulating matmuls over shifted views of the padded
    # activation already sitting in VMEM (no im2col materialization anywhere).
    for n in range(n_batch):
        for i in range(s1):
            acc = jnp.zeros((s1, C), jnp.float32)
            for ki in range(3):
                row = b_ref[n * hp1 + i + ki]            # [hp1, C]
                for kj in range(3):
                    acc = acc + jnp.dot(
                        row[kj:kj + s1, :], wr1_ref[3 * ki + kj],
                        preferred_element_type=jnp.float32)
            c_ref[n * hp1 + 1 + i, 1:1 + s1, :] = jnp.maximum(
                acc * scale_r1 + shift_r1, 0.0)

    # ---- conv2 + BN + skip-add + ReLU, fused global avg-pool + Linear -------
    fcw = fcw_ref[...]
    fcb = fcb_ref[...]
    inv_hw = 1.0 / float(s1 * s1)
    for n in range(n_batch):
        psum = jnp.zeros((1, C), jnp.float32)
        for i in range(s1):
            acc = jnp.zeros((s1, C), jnp.float32)
            for ki in range(3):
                row = c_ref[n * hp1 + i + ki]
                for kj in range(3):
                    acc = acc + jnp.dot(
                        row[kj:kj + s1, :], wr2_ref[3 * ki + kj],
                        preferred_element_type=jnp.float32)
            res = b_ref[n * hp1 + 1 + i, 1:1 + s1, :]    # skip connection
            y = jnp.maximum(acc * scale_r2 + shift_r2 + res, 0.0)
            psum = psum + jnp.sum(y, axis=0, keepdims=True)
        pooled = psum * inv_hw                           # AdaptiveAvgPool2d((1,1))
        o_ref[n:n + 1, :] = (
            jnp.dot(pooled, fcw, preferred_element_type=jnp.float32) + fcb)


# ----------------------------- host-side wrapper -----------------------------

def _vmem_spec():
    return pl.BlockSpec(memory_space=pltpu.MemorySpace.VMEM)


def resnet4_forward(x_nchw, p):
    n, cin, h, _ = x_nchw.shape
    assert cin == 1, "ResNet4 stem expects a single input channel"
    s0 = (h + 2 - 3) // 2 + 1          # after stem conv (stride 2, pad 1)
    s1 = (s0 + 2 - 3) // 2 + 1         # after maxpool   (stride 2, pad 1)

    # Stem patch planes: 9 stride-2 shifted views of the (tiny) raw input.
    xp = jnp.pad(x_nchw[:, 0, :, :], ((0, 0), (1, 1), (1, 1)))
    planes = [xp[:, ki:ki + 2 * s0:2, kj:kj + 2 * s0:2]
              for ki in range(3) for kj in range(3)]
    p0 = jnp.stack(planes, axis=0).reshape(9, n * s0, s0, 1)

    # Fold conv bias into the BN shift: (conv + b)*scale + shift.
    shift1 = p["b1"] * p["s1"] + p["sh1"]
    shift_r1 = p["rb1"] * p["rs1"] + p["rsh1"]
    shift_r2 = p["rb2"] * p["rs2"] + p["rsh2"]

    kernel = functools.partial(_resnet4_kernel, s0=s0, s1=s1)
    return pl.pallas_call(
        kernel,
        out_shape=jax.ShapeDtypeStruct((n, NUM_CLASSES), jnp.float32),
        in_specs=[_vmem_spec()] * 12,
        out_specs=_vmem_spec(),
        scratch_shapes=[
            pltpu.VMEM((n * (s0 + 2), s0 + 2, C), jnp.float32),  # stem out (pad)
            pltpu.VMEM((n * (s1 + 2), s1 + 2, C), jnp.float32),  # pool out (pad)
            pltpu.VMEM((n * (s1 + 2), s1 + 2, C), jnp.float32),  # conv1 out (pad)
        ],
    )(p0,
      p["w1"].reshape(9, C), p["s1"], shift1,
      p["rw1"].reshape(9, C, C), p["rs1"], shift_r1,
      p["rw2"].reshape(9, C, C), p["rs2"], shift_r2,
      p["fcw"], p["fcb"])


# ----------------------------- parameters ------------------------------------

def fold_bn(gamma, beta, mean, var):
    scale = gamma / jnp.sqrt(var + EPS)
    shift = beta - mean * scale
    return scale.reshape(1, -1), shift.reshape(1, -1)


def init_params(key):
    ks = iter(jax.random.split(key, 32))

    def conv_w(kh, kw, cin, cout):
        return jax.random.normal(next(ks), (kh, kw, cin, cout), jnp.float32) * 0.1

    def conv_b(cout):
        return (jax.random.normal(next(ks), (cout,), jnp.float32) * 0.05
                ).reshape(1, -1)

    def bn_params(c):
        gamma = jax.random.uniform(next(ks), (c,), jnp.float32, 0.5, 1.5)
        beta = jax.random.normal(next(ks), (c,), jnp.float32) * 0.1
        mean = jax.random.normal(next(ks), (c,), jnp.float32) * 0.1
        var = jax.random.uniform(next(ks), (c,), jnp.float32, 0.5, 1.5)
        return fold_bn(gamma, beta, mean, var)

    p = {}
    # stem: Conv2d(1, 64, 3, stride=2, pad=1) + BN(64)
    p["w1"] = conv_w(3, 3, 1, C)
    p["b1"] = conv_b(C)
    p["s1"], p["sh1"] = bn_params(C)
    # resblock conv1: Conv2d(64, 64, 3, 1, 1) + BN(64)
    p["rw1"] = conv_w(3, 3, C, C)
    p["rb1"] = conv_b(C)
    p["rs1"], p["rsh1"] = bn_params(C)
    # resblock conv2: Conv2d(64, 64, 3, 1, 1) + BN(64)
    p["rw2"] = conv_w(3, 3, C, C)
    p["rb2"] = conv_b(C)
    p["rs2"], p["rsh2"] = bn_params(C)
    # fc: Linear(64, NUM_CLASSES), stored as [64, NUM_CLASSES]
    p["fcw"] = jax.random.normal(next(ks), (C, NUM_CLASSES), jnp.float32) * 0.1
    p["fcb"] = (jax.random.normal(next(ks), (NUM_CLASSES,), jnp.float32) * 0.05
                ).reshape(1, -1)
    return p


# ----------------------------- pure-JAX reference ----------------------------

def resnet4_reference(x_nchw, p):
    x = jnp.transpose(x_nchw, (0, 2, 3, 1))
    dn = ("NHWC", "HWIO", "NHWC")

    def conv(z, w, b, s, pad):
        y = jax.lax.conv_general_dilated(z, w, (s, s), [(pad, pad), (pad, pad)],
                                         dimension_numbers=dn)
        return y + b.reshape(1, 1, 1, -1)

    def bn(z, scale, shift):
        return z * scale.reshape(1, 1, 1, -1) + shift.reshape(1, 1, 1, -1)

    y = jax.nn.relu(bn(conv(x, p["w1"], p["b1"], 2, 1), p["s1"], p["sh1"]))
    y = jax.lax.reduce_window(y, -jnp.inf, jax.lax.max, (1, 3, 3, 1),
                              (1, 2, 2, 1), [(0, 0), (1, 1), (1, 1), (0, 0)])
    r = jax.nn.relu(bn(conv(y, p["rw1"], p["rb1"], 1, 1), p["rs1"], p["rsh1"]))
    r = bn(conv(r, p["rw2"], p["rb2"], 1, 1), p["rs2"], p["rsh2"]) + y
    r = jax.nn.relu(r)
    pooled = jnp.mean(r, axis=(1, 2))
    return pooled @ p["fcw"] + p["fcb"]


# ----------------------------- main -------------------------------------------

if __name__ == "__main__":
    key = jax.random.PRNGKey(0)
    k_x, k_p = jax.random.split(key)
    # PyTorch module expects 1 input channel (Conv2d(1, 64, ...)).
    x = jax.random.normal(k_x, (2, 1, 16, 16), jnp.float32)  # NCHW
    params = init_params(k_p)

    fwd = jax.jit(resnet4_forward)
    out = jax.block_until_ready(fwd(x, params))
    assert out.shape == (2, NUM_CLASSES), out.shape

    ref = jax.block_until_ready(resnet4_reference(x, params))
    assert jnp.allclose(out, ref, atol=2e-4, rtol=2e-4), (
        "mismatch vs reference", out, ref)

    # TODO(synk): BatchNorm is implemented in eval (running-stats) mode only;
    # training-mode batch statistics / running-stat updates are not reproduced.
    print("KERNEL_OK")
</pallas_src>

<mosaic_0001>
module attributes {stable_mosaic.version = 11 : i64} {
  func.func @_resnet4_kernel(%arg0: memref<9x16x8x1xf32, #tpu.memory_space<vmem>>, %arg1: memref<9x64xf32, #tpu.memory_space<vmem>>, %arg2: memref<1x64xf32, #tpu.memory_space<vmem>>, %arg3: memref<1x64xf32, #tpu.memory_space<vmem>>, %arg4: memref<9x64x64xf32, #tpu.memory_space<vmem>>, %arg5: memref<1x64xf32, #tpu.memory_space<vmem>>, %arg6: memref<1x64xf32, #tpu.memory_space<vmem>>, %arg7: memref<9x64x64xf32, #tpu.memory_space<vmem>>, %arg8: memref<1x64xf32, #tpu.memory_space<vmem>>, %arg9: memref<1x64xf32, #tpu.memory_space<vmem>>, %arg10: memref<64x10xf32, #tpu.memory_space<vmem>>, %arg11: memref<1x10xf32, #tpu.memory_space<vmem>>, %arg12: memref<2x10xf32, #tpu.memory_space<vmem>>, %arg13: memref<20x10x64xf32, #tpu.memory_space<vmem>>, %arg14: memref<12x6x64xf32, #tpu.memory_space<vmem>>, %arg15: memref<12x6x64xf32, #tpu.memory_space<vmem>>) attributes {dimension_semantics = [], scalar_prefetch = 0 : i64, scratch_operands = 3 : i64, tpu.core_type = #tpu.core_type<tc>} {
    %cst = arith.constant 0xFF800000 : f32
    %0 = vector.broadcast %cst : f32 to vector<20x10x64xf32>
    %c0 = arith.constant 0 : index
    %c0_0 = arith.constant 0 : index
    %c0_1 = arith.constant 0 : index
    %1 = vector.load %arg13[%c0, %c0_0, %c0_1] : memref<20x10x64xf32, #tpu.memory_space<vmem>>, vector<20x10x64xf32>
    tpu.vector_store %arg13[%c0, %c0_0, %c0_1], %0 {strides = array<i32>} : memref<20x10x64xf32, #tpu.memory_space<vmem>>, vector<20x10x64xf32>,
    %cst_2 = arith.constant 0.000000e+00 : f32
    %2 = vector.broadcast %cst_2 : f32 to vector<12x6x64xf32>
    %c0_3 = arith.constant 0 : index
    %c0_4 = arith.constant 0 : index
    %c0_5 = arith.constant 0 : index
    %3 = vector.load %arg14[%c0_3, %c0_4, %c0_5] : memref<12x6x64xf32, #tpu.memory_space<vmem>>, vector<12x6x64xf32>
    tpu.vector_store %arg14[%c0_3, %c0_4, %c0_5], %2 {strides = array<i32>} : memref<12x6x64xf32, #tpu.memory_space<vmem>>, vector<12x6x64xf32>,
    %cst_6 = arith.constant 0.000000e+00 : f32
    %4 = vector.broadcast %cst_6 : f32 to vector<12x6x64xf32>
    %c0_7 = arith.constant 0 : index
    %c0_8 = arith.constant 0 : index
    %c0_9 = arith.constant 0 : index
    %5 = vector.load %arg15[%c0_7, %c0_8, %c0_9] : memref<12x6x64xf32, #tpu.memory_space<vmem>>, vector<12x6x64xf32>
    tpu.vector_store %arg15[%c0_7, %c0_8, %c0_9], %4 {strides = array<i32>} : memref<12x6x64xf32, #tpu.memory_space<vmem>>, vector<12x6x64xf32>,
    %c0_10 = arith.constant 0 : index
    %c0_11 = arith.constant 0 : index
    %6 = vector.load %arg2[%c0_10, %c0_11] : memref<1x64xf32, #tpu.memory_space<vmem>>, vector<1x64xf32>
    %c0_12 = arith.constant 0 : index
    %c0_13 = arith.constant 0 : index
    %7 = vector.load %arg3[%c0_12, %c0_13] : memref<1x64xf32, #tpu.memory_space<vmem>>, vector<1x64xf32>
    %c0_14 = arith.constant 0 : index
    %c0_15 = arith.constant 0 : index
    %8 = vector.load %arg5[%c0_14, %c0_15] : memref<1x64xf32, #tpu.memory_space<vmem>>, vector<1x64xf32>
    %c0_16 = arith.constant 0 : index
    %c0_17 = arith.constant 0 : index
    %9 = vector.load %arg6[%c0_16, %c0_17] : memref<1x64xf32, #tpu.memory_space<vmem>>, vector<1x64xf32>
    %c0_18 = arith.constant 0 : index
    %c0_19 = arith.constant 0 : index
    %10 = vector.load %arg8[%c0_18, %c0_19] : memref<1x64xf32, #tpu.memory_space<vmem>>, vector<1x64xf32>
    %c0_20 = arith.constant 0 : index
    %c0_21 = arith.constant 0 : index
    %11 = vector.load %arg9[%c0_20, %c0_21] : memref<1x64xf32, #tpu.memory_space<vmem>>, vector<1x64xf32>
    %cst_22 = arith.constant 0.000000e+00 : f32
    %12 = vector.broadcast %cst_22 : f32 to vector<16x8x64xf32>
    %c0_23 = arith.constant 0 : index
    %c0_24 = arith.constant 0 : index
    %c0_25 = arith.constant 0 : index
    %c0_26 = arith.constant 0 : index
    %13 = vector.load %arg0[%c0_23, %c0_24, %c0_25, %c0_26] : memref<9x16x8x1xf32, #tpu.memory_space<vmem>>, vector<1x16x8x1xf32>
    %14 = vector.shape_cast %13 : vector<1x16x8x1xf32> to vector<16x8x1xf32>
    %c0_27 = arith.constant 0 : index
    %c0_28 = arith.constant 0 : index
    %15 = vector.load %arg1[%c0_27, %c0_28] : memref<9x64xf32, #tpu.memory_space<vmem>>, vector<1x64xf32>
    %16 = vector.shape_cast %15 : vector<1x64xf32> to vector<1x1x64xf32>
    %17 = vector.broadcast %14 : vector<16x8x1xf32> to vector<16x8x64xf32>
    %18 = vector.broadcast %16 : vector<1x1x64xf32> to vector<16x8x64xf32>
    %19 = arith.mulf %17, %18 : vector<16x8x64xf32>
    %20 = arith.addf %12, %19 : vector<16x8x64xf32>
    %c1 = arith.constant 1 : index
    %c0_29 = arith.constant 0 : index
    %c0_30 = arith.constant 0 : index
    %c0_31 = arith.constant 0 : index
    %21 = vector.load %arg0[%c1, %c0_29, %c0_30, %c0_31] : memref<9x16x8x1xf32, #tpu.memory_space<vmem>>, vector<1x16x8x1xf32>
    %22 = vector.shape_cast %21 : vector<1x16x8x1xf32> to vector<16x8x1xf32>
    %c1_32 = arith.constant 1 : index
    %c0_33 = arith.constant 0 : index
    %23 = vector.load %arg1[%c1_32, %c0_33] : memref<9x64xf32, #tpu.memory_space<vmem>>, vector<1x64xf32>
    %24 = vector.shape_cast %23 : vector<1x64xf32> to vector<1x1x64xf32>
    %25 = vector.broadcast %22 : vector<16x8x1xf32> to vector<16x8x64xf32>
    %26 = vector.broadcast %24 : vector<1x1x64xf32> to vector<16x8x64xf32>
    %27 = arith.mulf %25, %26 : vector<16x8x64xf32>
    %28 = arith.addf %20, %27 : vector<16x8x64xf32>
    %c2 = arith.constant 2 : index
    %c0_34 = arith.constant 0 : index
    %c0_35 = arith.constant 0 : index
    %c0_36 = arith.constant 0 : index
    %29 = vector.load %arg0[%c2, %c0_34, %c0_35, %c0_36] : memref<9x16x8x1xf32, #tpu.memory_space<vmem>>, vector<1x16x8x1xf32>
    %30 = vector.shape_cast %29 : vector<1x16x8x1xf32> to vector<16x8x1xf32>
    %c2_37 = arith.constant 2 : index
    %c0_38 = arith.constant 0 : index
    %31 = vector.load %arg1[%c2_37, %c0_38] : memref<9x64xf32, #tpu.memory_space<vmem>>, vector<1x64xf32>
    %32 = vector.shape_cast %31 : vector<1x64xf32> to vector<1x1x64xf32>
    %33 = vector.broadcast %30 : vector<16x8x1xf32> to vector<16x8x64xf32>
    %34 = vector.broadcast %32 : vector<1x1x64xf32> to vector<16x8x64xf32>
    %35 = arith.mulf %33, %34 : vector<16x8x64xf32>
    %36 = arith.addf %28, %35 : vector<16x8x64xf32>
    %c3 = arith.constant 3 : index
    %c0_39 = arith.constant 0 : index
    %c0_40 = arith.constant 0 : index
    %c0_41 = arith.constant 0 : index
    %37 = vector.load %arg0[%c3, %c0_39, %c0_40, %c0_41] : memref<9x16x8x1xf32, #tpu.memory_space<vmem>>, vector<1x16x8x1xf32>
    %38 = vector.shape_cast %37 : vector<1x16x8x1xf32> to vector<16x8x1xf32>
    %c3_42 = arith.constant 3 : index
    %c0_43 = arith.constant 0 : index
    %39 = vector.load %arg1[%c3_42, %c0_43] : memref<9x64xf32, #tpu.memory_space<vmem>>, vector<1x64xf32>
    %40 = vector.shape_cast %39 : vector<1x64xf32> to vector<1x1x64xf32>
    %41 = vector.broadcast %38 : vector<16x8x1xf32> to vector<16x8x64xf32>
    %42 = vector.broadcast %40 : vector<1x1x64xf32> to vector<16x8x64xf32>
    %43 = arith.mulf %41, %42 : vector<16x8x64xf32>
    %44 = arith.addf %36, %43 : vector<16x8x64xf32>
    %c4 = arith.constant 4 : index
    %c0_44 = arith.constant 0 : index
    %c0_45 = arith.constant 0 : index
    %c0_46 = arith.constant 0 : index
    %45 = vector.load %arg0[%c4, %c0_44, %c0_45, %c0_46] : memref<9x16x8x1xf32, #tpu.memory_space<vmem>>, vector<1x16x8x1xf32>
    %46 = vector.shape_cast %45 : vector<1x16x8x1xf32> to vector<16x8x1xf32>
    %c4_47 = arith.constant 4 : index
    %c0_48 = arith.constant 0 : index
    %47 = vector.load %arg1[%c4_47, %c0_48] : memref<9x64xf32, #tpu.memory_space<vmem>>, vector<1x64xf32>
    %48 = vector.shape_cast %47 : vector<1x64xf32> to vector<1x1x64xf32>
    %49 = vector.broadcast %46 : vector<16x8x1xf32> to vector<16x8x64xf32>
    %50 = vector.broadcast %48 : vector<1x1x64xf32> to vector<16x8x64xf32>
    %51 = arith.mulf %49, %50 : vector<16x8x64xf32>
    %52 = arith.addf %44, %51 : vector<16x8x64xf32>
    %c5 = arith.constant 5 : index
    %c0_49 = arith.constant 0 : index
    %c0_50 = arith.constant 0 : index
    %c0_51 = arith.constant 0 : index
    %53 = vector.load %arg0[%c5, %c0_49, %c0_50, %c0_51] : memref<9x16x8x1xf32, #tpu.memory_space<vmem>>, vector<1x16x8x1xf32>
    %54 = vector.shape_cast %53 : vector<1x16x8x1xf32> to vector<16x8x1xf32>
    %c5_52 = arith.constant 5 : index
    %c0_53 = arith.constant 0 : index
    %55 = vector.load %arg1[%c5_52, %c0_53] : memref<9x64xf32, #tpu.memory_space<vmem>>, vector<1x64xf32>
    %56 = vector.shape_cast %55 : vector<1x64xf32> to vector<1x1x64xf32>
    %57 = vector.broadcast %54 : vector<16x8x1xf32> to vector<16x8x64xf32>
    %58 = vector.broadcast %56 : vector<1x1x64xf32> to vector<16x8x64xf32>
    %59 = arith.mulf %57, %58 : vector<16x8x64xf32>
    %60 = arith.addf %52, %59 : vector<16x8x64xf32>
    %c6 = arith.constant 6 : index
    %c0_54 = arith.constant 0 : index
    %c0_55 = arith.constant 0 : index
    %c0_56 = arith.constant 0 : index
    %61 = vector.load %arg0[%c6, %c0_54, %c0_55, %c0_56] : memref<9x16x8x1xf32, #tpu.memory_space<vmem>>, vector<1x16x8x1xf32>
    %62 = vector.shape_cast %61 : vector<1x16x8x1xf32> to vector<16x8x1xf32>
    %c6_57 = arith.constant 6 : index
    %c0_58 = arith.constant 0 : index
    %63 = vector.load %arg1[%c6_57, %c0_58] : memref<9x64xf32, #tpu.memory_space<vmem>>, vector<1x64xf32>
    %64 = vector.shape_cast %63 : vector<1x64xf32> to vector<1x1x64xf32>
    %65 = vector.broadcast %62 : vector<16x8x1xf32> to vector<16x8x64xf32>
    %66 = vector.broadcast %64 : vector<1x1x64xf32> to vector<16x8x64xf32>
    %67 = arith.mulf %65, %66 : vector<16x8x64xf32>
    %68 = arith.addf %60, %67 : vector<16x8x64xf32>
    %c7 = arith.constant 7 : index
    %c0_59 = arith.constant 0 : index
    %c0_60 = arith.constant 0 : index
    %c0_61 = arith.constant 0 : index
    %69 = vector.load %arg0[%c7, %c0_59, %c0_60, %c0_61] : memref<9x16x8x1xf32, #tpu.memory_space<vmem>>, vector<1x16x8x1xf32>
    %70 = vector.shape_cast %69 : vector<1x16x8x1xf32> to vector<16x8x1xf32>
    %c7_62 = arith.constant 7 : index
    %c0_63 = arith.constant 0 : index
    %71 = vector.load %arg1[%c7_62, %c0_63] : memref<9x64xf32, #tpu.memory_space<vmem>>, vector<1x64xf32>
    %72 = vector.shape_cast %71 : vector<1x64xf32> to vector<1x1x64xf32>
    %73 = vector.broadcast %70 : vector<16x8x1xf32> to vector<16x8x64xf32>
    %74 = vector.broadcast %72 : vector<1x1x64xf32> to vector<16x8x64xf32>
    %75 = arith.mulf %73, %74 : vector<16x8x64xf32>
    %76 = arith.addf %68, %75 : vector<16x8x64xf32>
    %c8 = arith.constant 8 : index
    %c0_64 = arith.constant 0 : index
    %c0_65 = arith.constant 0 : index
    %c0_66 = arith.constant 0 : index
    %77 = vector.load %arg0[%c8, %c0_64, %c0_65, %c0_66] : memref<9x16x8x1xf32, #tpu.memory_space<vmem>>, vector<1x16x8x1xf32>
    %78 = vector.shape_cast %77 : vector<1x16x8x1xf32> to vector<16x8x1xf32>
    %c8_67 = arith.constant 8 : index
    %c0_68 = arith.constant 0 : index
    %79 = vector.load %arg1[%c8_67, %c0_68] : memref<9x64xf32, #tpu.memory_space<vmem>>, vector<1x64xf32>
    %80 = vector.shape_cast %79 : vector<1x64xf32> to vector<1x1x64xf32>
    %81 = vector.broadcast %78 : vector<16x8x1xf32> to vector<16x8x64xf32>
    %82 = vector.broadcast %80 : vector<1x1x64xf32> to vector<16x8x64xf32>
    %83 = arith.mulf %81, %82 : vector<16x8x64xf32>
    %84 = arith.addf %76, %83 : vector<16x8x64xf32>
    %85 = vector.shape_cast %6 : vector<1x64xf32> to vector<1x1x64xf32>
    %86 = vector.broadcast %85 : vector<1x1x64xf32> to vector<16x8x64xf32>
    %87 = arith.mulf %84, %86 : vector<16x8x64xf32>
    %88 = vector.shape_cast %7 : vector<1x64xf32> to vector<1x1x64xf32>
    %89 = vector.broadcast %88 : vector<1x1x64xf32> to vector<16x8x64xf32>
    %90 = arith.addf %87, %89 : vector<16x8x64xf32>
    %cst_69 = arith.constant 0.000000e+00 : f32
    %91 = vector.broadcast %cst_69 : f32 to vector<16x8x64xf32>
    %92 = arith.maximumf %90, %91 : vector<16x8x64xf32>
    %93 = vector.extract_strided_slice %92 {offsets = [0, 0, 0], sizes = [8, 8, 64], strides = [1, 1, 1]} : vector<16x8x64xf32> to vector<8x8x64xf32>
    %c1_70 = arith.constant 1 : index
    %c1_71 = arith.constant 1 : index
    %c0_72 = arith.constant 0 : index
    %94 = vector.load %arg13[%c1_70, %c1_71, %c0_72] : memref<20x10x64xf32, #tpu.memory_space<vmem>>, vector<8x8x64xf32>
    tpu.vector_store %arg13[%c1_70, %c1_71, %c0_72], %93 {strides = array<i32>} : memref<20x10x64xf32, #tpu.memory_space<vmem>>, vector<8x8x64xf32>,
    %95 = vector.extract_strided_slice %92 {offsets = [8, 0, 0], sizes = [8, 8, 64], strides = [1, 1, 1]} : vector<16x8x64xf32> to vector<8x8x64xf32>
    %c11 = arith.constant 11 : index
    %c1_73 = arith.constant 1 : index
    %c0_74 = arith.constant 0 : index
    %96 = vector.load %arg13[%c11, %c1_73, %c0_74] : memref<20x10x64xf32, #tpu.memory_space<vmem>>, vector<8x8x64xf32>
    tpu.vector_store %arg13[%c11, %c1_73, %c0_74], %95 {strides = array<i32>} : memref<20x10x64xf32, #tpu.memory_space<vmem>>, vector<8x8x64xf32>,
    %c0_75 = arith.constant 0 : index
    %c0_76 = arith.constant 0 : index
    %c0_77 = arith.constant 0 : index
    %97 = vector.load %arg13[%c0_75, %c0_76, %c0_77] : memref<20x10x64xf32, #tpu.memory_space<vmem>>, vector<3x10x64xf32>
    %cst_78 = arith.constant dense<0xFF800000> : vector<10x64xf32>
    %98 = vector.multi_reduction <maximumf>, %97, %cst_78 [0] : vector<3x10x64xf32> to vector<10x64xf32>
    %99 = vector.extract_strided_slice %98 {offsets = [0, 0], sizes = [3, 64], strides = [1, 1]} : vector<10x64xf32> to vector<3x64xf32>
    %cst_79 = arith.constant dense<0xFF800000> : vector<64xf32>
    %100 = vector.multi_reduction <maximumf>, %99, %cst_79 [0] : vector<3x64xf32> to vector<64xf32>
    %101 = vector.shape_cast %100 : vector<64xf32> to vector<1x64xf32>
    %c1_80 = arith.constant 1 : index
    %c1_81 = arith.constant 1 : index
    %c0_82 = arith.constant 0 : index
    %102 = vector.load %arg14[%c1_80, %c1_81, %c0_82] : memref<12x6x64xf32, #tpu.memory_space<vmem>>, vector<1x1x64xf32>
    %103 = vector.shape_cast %102 : vector<1x1x64xf32> to vector<1x64xf32>
    %104 = vector.shape_cast %101 : vector<1x64xf32> to vector<1x1x64xf32>
    tpu.vector_store %arg14[%c1_80, %c1_81, %c0_82], %104 {strides = array<i32>} : memref<12x6x64xf32, #tpu.memory_space<vmem>>, vector<1x1x64xf32>,
    %105 = vector.extract_strided_slice %98 {offsets = [2, 0], sizes = [3, 64], strides = [1, 1]} : vector<10x64xf32> to vector<3x64xf32>
    %cst_83 = arith.constant dense<0xFF800000> : vector<64xf32>
    %106 = vector.multi_reduction <maximumf>, %105, %cst_83 [0] : vector<3x64xf32> to vector<64xf32>
    %107 = vector.shape_cast %106 : vector<64xf32> to vector<1x64xf32>
    %c1_84 = arith.constant 1 : index
    %c2_85 = arith.constant 2 : index
    %c0_86 = arith.constant 0 : index
    %108 = vector.load %arg14[%c1_84, %c2_85, %c0_86] : memref<12x6x64xf32, #tpu.memory_space<vmem>>, vector<1x1x64xf32>
    %109 = vector.shape_cast %108 : vector<1x1x64xf32> to vector<1x64xf32>
    %110 = vector.shape_cast %107 : vector<1x64xf32> to vector<1x1x64xf32>
    tpu.vector_store %arg14[%c1_84, %c2_85, %c0_86], %110 {strides = array<i32>} : memref<12x6x64xf32, #tpu.memory_space<vmem>>, vector<1x1x64xf32>,
    %111 = vector.extract_strided_slice %98 {offsets = [4, 0], sizes = [3, 64], strides = [1, 1]} : vector<10x64xf32> to vector<3x64xf32>
    %cst_87 = arith.constant dense<0xFF800000> : vector<64xf32>
    %112 = vector.multi_reduction <maximumf>, %111, %cst_87 [0] : vector<3x64xf32> to vector<64xf32>
    %113 = vector.shape_cast %112 : vector<64xf32> to vector<1x64xf32>
    %c1_88 = arith.constant 1 : index
    %c3_89 = arith.constant 3 : index
    %c0_90 = arith.constant 0 : index
    %114 = vector.load %arg14[%c1_88, %c3_89, %c0_90] : memref<12x6x64xf32, #tpu.memory_space<vmem>>, vector<1x1x64xf32>
    %115 = vector.shape_cast %114 : vector<1x1x64xf32> to vector<1x64xf32>
    %116 = vector.shape_cast %113 : vector<1x64xf32> to vector<1x1x64xf32>
    tpu.vector_store %arg14[%c1_88, %c3_89, %c0_90], %116 {strides = array<i32>} : memref<12x6x64xf32, #tpu.memory_space<vmem>>, vector<1x1x64xf32>,
    %117 = vector.extract_strided_slice %98 {offsets = [6, 0], sizes = [3, 64], strides = [1, 1]} : vector<10x64xf32> to vector<3x64xf32>
    %cst_91 = arith.constant dense<0xFF800000> : vector<64xf32>
    %118 = vector.multi_reduction <maximumf>, %117, %cst_91 [0] : vector<3x64xf32> to vector<64xf32>
    %119 = vector.shape_cast %118 : vector<64xf32> to vector<1x64xf32>
    %c1_92 = arith.constant 1 : index
    %c4_93 = arith.constant 4 : index
    %c0_94 = arith.constant 0 : index
    %120 = vector.load %arg14[%c1_92, %c4_93, %c0_94] : memref<12x6x64xf32, #tpu.memory_space<vmem>>, vector<1x1x64xf32>
    %121 = vector.shape_cast %120 : vector<1x1x64xf32> to vector<1x64xf32>
    %122 = vector.shape_cast %119 : vector<1x64xf32> to vector<1x1x64xf32>
    tpu.vector_store %arg14[%c1_92, %c4_93, %c0_94], %122 {strides = array<i32>} : memref<12x6x64xf32, #tpu.memory_space<vmem>>, vector<1x1x64xf32>,
    %c2_95 = arith.constant 2 : index
    %c0_96 = arith.constant 0 : index
    %c0_97 = arith.constant 0 : index
    %123 = vector.load %arg13[%c2_95, %c0_96, %c0_97] : memref<20x10x64xf32, #tpu.memory_space<vmem>>, vector<3x10x64xf32>
    %cst_98 = arith.constant dense<0xFF800000> : vector<10x64xf32>
    %124 = vector.multi_reduction <maximumf>, %123, %cst_98 [0] : vector<3x10x64xf32> to vector<10x64xf32>
    %125 = vector.extract_strided_slice %124 {offsets = [0, 0], sizes = [3, 64], strides = [1, 1]} : vector<10x64xf32> to vector<3x64xf32>
    %cst_99 = arith.constant dense<0xFF800000> : vector<64xf32>
    %126 = vector.multi_reduction <maximumf>, %125, %cst_99 [0] : vector<3x64xf32> to vector<64xf32>
    %127 = vector.shape_cast %126 : vector<64xf32> to vector<1x64xf32>
    %c2_100 = arith.constant 2 : index
    %c1_101 = arith.constant 1 : index
    %c0_102 = arith.constant 0 : index
    %128 = vector.load %arg14[%c2_100, %c1_101, %c0_102] : memref<12x6x64xf32, #tpu.memory_space<vmem>>, vector<1x1x64xf32>
    %129 = vector.shape_cast %128 : vector<1x1x64xf32> to vector<1x64xf32>
    %130 = vector.shape_cast %127 : vector<1x64xf32> to vector<1x1x64xf32>
    tpu.vector_store %arg14[%c2_100, %c1_101, %c0_102], %130 {strides = array<i32>} : memref<12x6x64xf32, #tpu.memory_space<vmem>>, vector<1x1x64xf32>,
    %131 = vector.extract_strided_slice %124 {offsets = [2, 0], sizes = [3, 64], strides = [1, 1]} : vector<10x64xf32> to vector<3x64xf32>
    %cst_103 = arith.constant dense<0xFF800000> : vector<64xf32>
    %132 = vector.multi_reduction <maximumf>, %131, %cst_103 [0] : vector<3x64xf32> to vector<64xf32>
    %133 = vector.shape_cast %132 : vector<64xf32> to vector<1x64xf32>
    %c2_104 = arith.constant 2 : index
    %c2_105 = arith.constant 2 : index
    %c0_106 = arith.constant 0 : index
    %134 = vector.load %arg14[%c2_104, %c2_105, %c0_106] : memref<12x6x64xf32, #tpu.memory_space<vmem>>, vector<1x1x64xf32>
    %135 = vector.shape_cast %134 : vector<1x1x64xf32> to vector<1x64xf32>
    %136 = vector.shape_cast %133 : vector<1x64xf32> to vector<1x1x64xf32>
    tpu.vector_store %arg14[%c2_104, %c2_105, %c0_106], %136 {strides = array<i32>} : memref<12x6x64xf32, #tpu.memory_space<vmem>>, vector<1x1x64xf32>,
    %137 = vector.extract_strided_slice %124 {offsets = [4, 0], sizes = [3, 64], strides = [1, 1]} : vector<10x64xf32> to vector<3x64xf32>
    %cst_107 = arith.constant dense<0xFF800000> : vector<64xf32>
    %138 = vector.multi_reduction <maximumf>, %137, %cst_107 [0] : vector<3x64xf32> to vector<64xf32>
    %139 = vector.shape_cast %138 : vector<64xf32> to vector<1x64xf32>
    %c2_108 = arith.constant 2 : index
    %c3_109 = arith.constant 3 : index
    %c0_110 = arith.constant 0 : index
    %140 = vector.load %arg14[%c2_108, %c3_109, %c0_110] : memref<12x6x64xf32, #tpu.memory_space<vmem>>, vector<1x1x64xf32>
    %141 = vector.shape_cast %140 : vector<1x1x64xf32> to vector<1x64xf32>
    %142 = vector.shape_cast %139 : vector<1x64xf32> to vector<1x1x64xf32>
    tpu.vector_store %arg14[%c2_108, %c3_109, %c0_110], %142 {strides = array<i32>} : memref<12x6x64xf32, #tpu.memory_space<vmem>>, vector<1x1x64xf32>,
    %143 = vector.extract_strided_slice %124 {offsets = [6, 0], sizes = [3, 64], strides = [1, 1]} : vector<10x64xf32> to vector<3x64xf32>
    %cst_111 = arith.constant dense<0xFF800000> : vector<64xf32>
    %144 = vector.multi_reduction <maximumf>, %143, %cst_111 [0] : vector<3x64xf32> to vector<64xf32>
    %145 = vector.shape_cast %144 : vector<64xf32> to vector<1x64xf32>
    %c2_112 = arith.constant 2 : index
    %c4_113 = arith.constant 4 : index
    %c0_114 = arith.constant 0 : index
    %146 = vector.load %arg14[%c2_112, %c4_113, %c0_114] : memref<12x6x64xf32, #tpu.memory_space<vmem>>, vector<1x1x64xf32>
    %147 = vector.shape_cast %146 : vector<1x1x64xf32> to vector<1x64xf32>
    %148 = vector.shape_cast %145 : vector<1x64xf32> to vector<1x1x64xf32>
    tpu.vector_store %arg14[%c2_112, %c4_113, %c0_114], %148 {strides = array<i32>} : memref<12x6x64xf32, #tpu.memory_space<vmem>>, vector<1x1x64xf32>,
    %c4_115 = arith.constant 4 : index
    %c0_116 = arith.constant 0 : index
    %c0_117 = arith.constant 0 : index
    %149 = vector.load %arg13[%c4_115, %c0_116, %c0_117] : memref<20x10x64xf32, #tpu.memory_space<vmem>>, vector<3x10x64xf32>
    %cst_118 = arith.constant dense<0xFF800000> : vector<10x64xf32>
    %150 = vector.multi_reduction <maximumf>, %149, %cst_118 [0] : vector<3x10x64xf32> to vector<10x64xf32>
    %151 = vector.extract_strided_slice %150 {offsets = [0, 0], sizes = [3, 64], strides = [1, 1]} : vector<10x64xf32> to vector<3x64xf32>
    %cst_119 = arith.constant dense<0xFF800000> : vector<64xf32>
    %152 = vector.multi_reduction <maximumf>, %151, %cst_119 [0] : vector<3x64xf32> to vector<64xf32>
    %153 = vector.shape_cast %152 : vector<64xf32> to vector<1x64xf32>
    %c3_120 = arith.constant 3 : index
    %c1_121 = arith.constant 1 : index
    %c0_122 = arith.constant 0 : index
    %154 = vector.load %arg14[%c3_120, %c1_121, %c0_122] : memref<12x6x64xf32, #tpu.memory_space<vmem>>, vector<1x1x64xf32>
    %155 = vector.shape_cast %154 : vector<1x1x64xf32> to vector<1x64xf32>
    %156 = vector.shape_cast %153 : vector<1x64xf32> to vector<1x1x64xf32>
    tpu.vector_store %arg14[%c3_120, %c1_121, %c0_122], %156 {strides = array<i32>} : memref<12x6x64xf32, #tpu.memory_space<vmem>>, vector<1x1x64xf32>,
    %157 = vector.extract_strided_slice %150 {offsets = [2, 0], sizes = [3, 64], strides = [1, 1]} : vector<10x64xf32> to vector<3x64xf32>
    %cst_123 = arith.constant dense<0xFF800000> : vector<64xf32>
    %158 = vector.multi_reduction <maximumf>, %157, %cst_123 [0] : vector<3x64xf32> to vector<64xf32>
    %159 = vector.shape_cast %158 : vector<64xf32> to vector<1x64xf32>
    %c3_124 = arith.constant 3 : index
    %c2_125 = arith.constant 2 : index
    %c0_126 = arith.constant 0 : index
    %160 = vector.load %arg14[%c3_124, %c2_125, %c0_126] : memref<12x6x64xf32, #tpu.memory_space<vmem>>, vector<1x1x64xf32>
    %161 = vector.shape_cast %160 : vector<1x1x64xf32> to vector<1x64xf32>
    %162 = vector.shape_cast %159 : vector<1x64xf32> to vector<1x1x64xf32>
    tpu.vector_store %arg14[%c3_124, %c2_125, %c0_126], %162 {strides = array<i32>} : memref<12x6x64xf32, #tpu.memory_space<vmem>>, vector<1x1x64xf32>,
    %163 = vector.extract_strided_slice %150 {offsets = [4, 0], sizes = [3, 64], strides = [1, 1]} : vector<10x64xf32> to vector<3x64xf32>
    %cst_127 = arith.constant dense<0xFF800000> : vector<64xf32>
    %164 = vector.multi_reduction <maximumf>, %163, %cst_127 [0] : vector<3x64xf32> to vector<64xf32>
    %165 = vector.shape_cast %164 : vector<64xf32> to vector<1x64xf32>
    %c3_128 = arith.constant 3 : index
    %c3_129 = arith.constant 3 : index
    %c0_130 = arith.constant 0 : index
    %166 = vector.load %arg14[%c3_128, %c3_129, %c0_130] : memref<12x6x64xf32, #tpu.memory_space<vmem>>, vector<1x1x64xf32>
    %167 = vector.shape_cast %166 : vector<1x1x64xf32> to vector<1x64xf32>
    %168 = vector.shape_cast %165 : vector<1x64xf32> to vector<1x1x64xf32>
    tpu.vector_store %arg14[%c3_128, %c3_129, %c0_130], %168 {strides = array<i32>} : memref<12x6x64xf32, #tpu.memory_space<vmem>>, vector<1x1x64xf32>,
    %169 = vector.extract_strided_slice %150 {offsets = [6, 0], sizes = [3, 64], strides = [1, 1]} : vector<10x64xf32> to vector<3x64xf32>
    %cst_131 = arith.constant dense<0xFF800000> : vector<64xf32>
    %170 = vector.multi_reduction <maximumf>, %169, %cst_131 [0] : vector<3x64xf32> to vector<64xf32>
    %171 = vector.shape_cast %170 : vector<64xf32> to vector<1x64xf32>
    %c3_132 = arith.constant 3 : index
    %c4_133 = arith.constant 4 : index
    %c0_134 = arith.constant 0 : index
    %172 = vector.load %arg14[%c3_132, %c4_133, %c0_134] : memref<12x6x64xf32, #tpu.memory_space<vmem>>, vector<1x1x64xf32>
    %173 = vector.shape_cast %172 : vector<1x1x64xf32> to vector<1x64xf32>
    %174 = vector.shape_cast %171 : vector<1x64xf32> to vector<1x1x64xf32>
    tpu.vector_store %arg14[%c3_132, %c4_133, %c0_134], %174 {strides = array<i32>} : memref<12x6x64xf32, #tpu.memory_space<vmem>>, vector<1x1x64xf32>,
    %c6_135 = arith.constant 6 : index
    %c0_136 = arith.constant 0 : index
    %c0_137 = arith.constant 0 : index
    %175 = vector.load %arg13[%c6_135, %c0_136, %c0_137] : memref<20x10x64xf32, #tpu.memory_space<vmem>>, vector<3x10x64xf32>
    %cst_138 = arith.constant dense<0xFF800000> : vector<10x64xf32>
    %176 = vector.multi_reduction <maximumf>, %175, %cst_138 [0] : vector<3x10x64xf32> to vector<10x64xf32>
    %177 = vector.extract_strided_slice %176 {offsets = [0, 0], sizes = [3, 64], strides = [1, 1]} : vector<10x64xf32> to vector<3x64xf32>
    %cst_139 = arith.constant dense<0xFF800000> : vector<64xf32>
    %178 = vector.multi_reduction <maximumf>, %177, %cst_139 [0] : vector<3x64xf32> to vector<64xf32>
    %179 = vector.shape_cast %178 : vector<64xf32> to vector<1x64xf32>
    %c4_140 = arith.constant 4 : index
    %c1_141 = arith.constant 1 : index
    %c0_142 = arith.constant 0 : index
    %180 = vector.load %arg14[%c4_140, %c1_141, %c0_142] : memref<12x6x64xf32, #tpu.memory_space<vmem>>, vector<1x1x64xf32>
    %181 = vector.shape_cast %180 : vector<1x1x64xf32> to vector<1x64xf32>
    %182 = vector.shape_cast %179 : vector<1x64xf32> to vector<1x1x64xf32>
    tpu.vector_store %arg14[%c4_140, %c1_141, %c0_142], %182 {strides = array<i32>} : memref<12x6x64xf32, #tpu.memory_space<vmem>>, vector<1x1x64xf32>,
    %183 = vector.extract_strided_slice %176 {offsets = [2, 0], sizes = [3, 64], strides = [1, 1]} : vector<10x64xf32> to vector<3x64xf32>
    %cst_143 = arith.constant dense<0xFF800000> : vector<64xf32>
    %184 = vector.multi_reduction <maximumf>, %183, %cst_143 [0] : vector<3x64xf32> to vector<64xf32>
    %185 = vector.shape_cast %184 : vector<64xf32> to vector<1x64xf32>
    %c4_144 = arith.constant 4 : index
    %c2_145 = arith.constant 2 : index
    %c0_146 = arith.constant 0 : index
    %186 = vector.load %arg14[%c4_144, %c2_145, %c0_146] : memref<12x6x64xf32, #tpu.memory_space<vmem>>, vector<1x1x64xf32>
    %187 = vector.shape_cast %186 : vector<1x1x64xf32> to vector<1x64xf32>
    %188 = vector.shape_cast %185 : vector<1x64xf32> to vector<1x1x64xf32>
    tpu.vector_store %arg14[%c4_144, %c2_145, %c0_146], %188 {strides = array<i32>} : memref<12x6x64xf32, #tpu.memory_space<vmem>>, vector<1x1x64xf32>,
    %189 = vector.extract_strided_slice %176 {offsets = [4, 0], sizes = [3, 64], strides = [1, 1]} : vector<10x64xf32> to vector<3x64xf32>
    %cst_147 = arith.constant dense<0xFF800000> : vector<64xf32>
    %190 = vector.multi_reduction <maximumf>, %189, %cst_147 [0] : vector<3x64xf32> to vector<64xf32>
    %191 = vector.shape_cast %190 : vector<64xf32> to vector<1x64xf32>
    %c4_148 = arith.constant 4 : index
    %c3_149 = arith.constant 3 : index
    %c0_150 = arith.constant 0 : index
    %192 = vector.load %arg14[%c4_148, %c3_149, %c0_150] : memref<12x6x64xf32, #tpu.memory_space<vmem>>, vector<1x1x64xf32>
    %193 = vector.shape_cast %192 : vector<1x1x64xf32> to vector<1x64xf32>
    %194 = vector.shape_cast %191 : vector<1x64xf32> to vector<1x1x64xf32>
    tpu.vector_store %arg14[%c4_148, %c3_149, %c0_150], %194 {strides = array<i32>} : memref<12x6x64xf32, #tpu.memory_space<vmem>>, vector<1x1x64xf32>,
    %195 = vector.extract_strided_slice %176 {offsets = [6, 0], sizes = [3, 64], strides = [1, 1]} : vector<10x64xf32> to vector<3x64xf32>
    %cst_151 = arith.constant dense<0xFF800000> : vector<64xf32>
    %196 = vector.multi_reduction <maximumf>, %195, %cst_151 [0] : vector<3x64xf32> to vector<64xf32>
    %197 = vector.shape_cast %196 : vector<64xf32> to vector<1x64xf32>
    %c4_152 = arith.constant 4 : index
    %c4_153 = arith.constant 4 : index
    %c0_154 = arith.constant 0 : index
    %198 = vector.load %arg14[%c4_152, %c4_153, %c0_154] : memref<12x6x64xf32, #tpu.memory_space<vmem>>, vector<1x1x64xf32>
    %199 = vector.shape_cast %198 : vector<1x1x64xf32> to vector<1x64xf32>
    %200 = vector.shape_cast %197 : vector<1x64xf32> to vector<1x1x64xf32>
    tpu.vector_store %arg14[%c4_152, %c4_153, %c0_154], %200 {strides = array<i32>} : memref<12x6x64xf32, #tpu.memory_space<vmem>>, vector<1x1x64xf32>,
    %c10 = arith.constant 10 : index
    %c0_155 = arith.constant 0 : index
    %c0_156 = arith.constant 0 : index
    %201 = vector.load %arg13[%c10, %c0_155, %c0_156] : memref<20x10x64xf32, #tpu.memory_space<vmem>>, vector<3x10x64xf32>
    %cst_157 = arith.constant dense<0xFF800000> : vector<10x64xf32>
    %202 = vector.multi_reduction <maximumf>, %201, %cst_157 [0] : vector<3x10x64xf32> to vector<10x64xf32>
    %203 = vector.extract_strided_slice %202 {offsets = [0, 0], sizes = [3, 64], strides = [1, 1]} : vector<10x64xf32> to vector<3x64xf32>
    %cst_158 = arith.constant dense<0xFF800000> : vector<64xf32>
    %204 = vector.multi_reduction <maximumf>, %203, %cst_158 [0] : vector<3x64xf32> to vector<64xf32>
    %205 = vector.shape_cast %204 : vector<64xf32> to vector<1x64xf32>
    %c7_159 = arith.constant 7 : index
    %c1_160 = arith.constant 1 : index
    %c0_161 = arith.constant 0 : index
    %206 = vector.load %arg14[%c7_159, %c1_160, %c0_161] : memref<12x6x64xf32, #tpu.memory_space<vmem>>, vector<1x1x64xf32>
    %207 = vector.shape_cast %206 : vector<1x1x64xf32> to vector<1x64xf32>
    %208 = vector.shape_cast %205 : vector<1x64xf32> to vector<1x1x64xf32>
    tpu.vector_store %arg14[%c7_159, %c1_160, %c0_161], %208 {strides = array<i32>} : memref<12x6x64xf32, #tpu.memory_space<vmem>>, vector<1x1x64xf32>,
    %209 = vector.extract_strided_slice %202 {offsets = [2, 0], sizes = [3, 64], strides = [1, 1]} : vector<10x64xf32> to vector<3x64xf32>
    %cst_162 = arith.constant dense<0xFF800000> : vector<64xf32>
    %210 = vector.multi_reduction <maximumf>, %209, %cst_162 [0] : vector<3x64xf32> to vector<64xf32>
    %211 = vector.shape_cast %210 : vector<64xf32> to vector<1x64xf32>
    %c7_163 = arith.constant 7 : index
    %c2_164 = arith.constant 2 : index
    %c0_165 = arith.constant 0 : index
    %212 = vector.load %arg14[%c7_163, %c2_164, %c0_165] : memref<12x6x64xf32, #tpu.memory_space<vmem>>, vector<1x1x64xf32>
    %213 = vector.shape_cast %212 : vector<1x1x64xf32> to vector<1x64xf32>
    %214 = vector.shape_cast %211 : vector<1x64xf32> to vector<1x1x64xf32>
    tpu.vector_store %arg14[%c7_163, %c2_164, %c0_165], %214 {strides = array<i32>} : memref<12x6x64xf32, #tpu.memory_space<vmem>>, vector<1x1x64xf32>,
    %215 = vector.extract_strided_slice %202 {offsets = [4, 0], sizes = [3, 64], strides = [1, 1]} : vector<10x64xf32> to vector<3x64xf32>
    %cst_166 = arith.constant dense<0xFF800000> : vector<64xf32>
    %216 = vector.multi_reduction <maximumf>, %215, %cst_166 [0] : vector<3x64xf32> to vector<64xf32>
    %217 = vector.shape_cast %216 : vector<64xf32> to vector<1x64xf32>
    %c7_167 = arith.constant 7 : index
    %c3_168 = arith.constant 3 : index
    %c0_169 = arith.constant 0 : index
    %218 = vector.load %arg14[%c7_167, %c3_168, %c0_169] : memref<12x6x64xf32, #tpu.memory_space<vmem>>, vector<1x1x64xf32>
    %219 = vector.shape_cast %218 : vector<1x1x64xf32> to vector<1x64xf32>
    %220 = vector.shape_cast %217 : vector<1x64xf32> to vector<1x1x64xf32>
    tpu.vector_store %arg14[%c7_167, %c3_168, %c0_169], %220 {strides = array<i32>} : memref<12x6x64xf32, #tpu.memory_space<vmem>>, vector<1x1x64xf32>,
    %221 = vector.extract_strided_slice %202 {offsets = [6, 0], sizes = [3, 64], strides = [1, 1]} : vector<10x64xf32> to vector<3x64xf32>
    %cst_170 = arith.constant dense<0xFF800000> : vector<64xf32>
    %222 = vector.multi_reduction <maximumf>, %221, %cst_170 [0] : vector<3x64xf32> to vector<64xf32>
    %223 = vector.shape_cast %222 : vector<64xf32> to vector<1x64xf32>
    %c7_171 = arith.constant 7 : index
    %c4_172 = arith.constant 4 : index
    %c0_173 = arith.constant 0 : index
    %224 = vector.load %arg14[%c7_171, %c4_172, %c0_173] : memref<12x6x64xf32, #tpu.memory_space<vmem>>, vector<1x1x64xf32>
    %225 = vector.shape_cast %224 : vector<1x1x64xf32> to vector<1x64xf32>
    %226 = vector.shape_cast %223 : vector<1x64xf32> to vector<1x1x64xf32>
    tpu.vector_store %arg14[%c7_171, %c4_172, %c0_173], %226 {strides = array<i32>} : memref<12x6x64xf32, #tpu.memory_space<vmem>>, vector<1x1x64xf32>,
    %c12 = arith.constant 12 : index
    %c0_174 = arith.constant 0 : index
    %c0_175 = arith.constant 0 : index
    %227 = vector.load %arg13[%c12, %c0_174, %c0_175] : memref<20x10x64xf32, #tpu.memory_space<vmem>>, vector<3x10x64xf32>
    %cst_176 = arith.constant dense<0xFF800000> : vector<10x64xf32>
    %228 = vector.multi_reduction <maximumf>, %227, %cst_176 [0] : vector<3x10x64xf32> to vector<10x64xf32>
    %229 = vector.extract_strided_slice %228 {offsets = [0, 0], sizes = [3, 64], strides = [1, 1]} : vector<10x64xf32> to vector<3x64xf32>
    %cst_177 = arith.constant dense<0xFF800000> : vector<64xf32>
    %230 = vector.multi_reduction <maximumf>, %229, %cst_177 [0] : vector<3x64xf32> to vector<64xf32>
    %231 = vector.shape_cast %230 : vector<64xf32> to vector<1x64xf32>
    %c8_178 = arith.constant 8 : index
    %c1_179 = arith.constant 1 : index
    %c0_180 = arith.constant 0 : index
    %232 = vector.load %arg14[%c8_178, %c1_179, %c0_180] : memref<12x6x64xf32, #tpu.memory_space<vmem>>, vector<1x1x64xf32>
    %233 = vector.shape_cast %232 : vector<1x1x64xf32> to vector<1x64xf32>
    %234 = vector.shape_cast %231 : vector<1x64xf32> to vector<1x1x64xf32>
    tpu.vector_store %arg14[%c8_178, %c1_179, %c0_180], %234 {strides = array<i32>} : memref<12x6x64xf32, #tpu.memory_space<vmem>>, vector<1x1x64xf32>,
    %235 = vector.extract_strided_slice %228 {offsets = [2, 0], sizes = [3, 64], strides = [1, 1]} : vector<10x64xf32> to vector<3x64xf32>
    %cst_181 = arith.constant dense<0xFF800000> : vector<64xf32>
    %236 = vector.multi_reduction <maximumf>, %235, %cst_181 [0] : vector<3x64xf32> to vector<64xf32>
    %237 = vector.shape_cast %236 : vector<64xf32> to vector<1x64xf32>
    %c8_182 = arith.constant 8 : index
    %c2_183 = arith.constant 2 : index
    %c0_184 = arith.constant 0 : index
    %238 = vector.load %arg14[%c8_182, %c2_183, %c0_184] : memref<12x6x64xf32, #tpu.memory_space<vmem>>, vector<1x1x64xf32>
    %239 = vector.shape_cast %238 : vector<1x1x64xf32> to vector<1x64xf32>
    %240 = vector.shape_cast %237 : vector<1x64xf32> to vector<1x1x64xf32>
    tpu.vector_store %arg14[%c8_182, %c2_183, %c0_184], %240 {strides = array<i32>} : memref<12x6x64xf32, #tpu.memory_space<vmem>>, vector<1x1x64xf32>,
    %241 = vector.extract_strided_slice %228 {offsets = [4, 0], sizes = [3, 64], strides = [1, 1]} : vector<10x64xf32> to vector<3x64xf32>
    %cst_185 = arith.constant dense<0xFF800000> : vector<64xf32>
    %242 = vector.multi_reduction <maximumf>, %241, %cst_185 [0] : vector<3x64xf32> to vector<64xf32>
    %243 = vector.shape_cast %242 : vector<64xf32> to vector<1x64xf32>
    %c8_186 = arith.constant 8 : index
    %c3_187 = arith.constant 3 : index
    %c0_188 = arith.constant 0 : index
    %244 = vector.load %arg14[%c8_186, %c3_187, %c0_188] : memref<12x6x64xf32, #tpu.memory_space<vmem>>, vector<1x1x64xf32>
    %245 = vector.shape_cast %244 : vector<1x1x64xf32> to vector<1x64xf32>
    %246 = vector.shape_cast %243 : vector<1x64xf32> to vector<1x1x64xf32>
    tpu.vector_store %arg14[%c8_186, %c3_187, %c0_188], %246 {strides = array<i32>} : memref<12x6x64xf32, #tpu.memory_space<vmem>>, vector<1x1x64xf32>,
    %247 = vector.extract_strided_slice %228 {offsets = [6, 0], sizes = [3, 64], strides = [1, 1]} : vector<10x64xf32> to vector<3x64xf32>
    %cst_189 = arith.constant dense<0xFF800000> : vector<64xf32>
    %248 = vector.multi_reduction <maximumf>, %247, %cst_189 [0] : vector<3x64xf32> to vector<64xf32>
    %249 = vector.shape_cast %248 : vector<64xf32> to vector<1x64xf32>
    %c8_190 = arith.constant 8 : index
    %c4_191 = arith.constant 4 : index
    %c0_192 = arith.constant 0 : index
    %250 = vector.load %arg14[%c8_190, %c4_191, %c0_192] : memref<12x6x64xf32, #tpu.memory_space<vmem>>, vector<1x1x64xf32>
    %251 = vector.shape_cast %250 : vector<1x1x64xf32> to vector<1x64xf32>
    %252 = vector.shape_cast %249 : vector<1x64xf32> to vector<1x1x64xf32>
    tpu.vector_store %arg14[%c8_190, %c4_191, %c0_192], %252 {strides = array<i32>} : memref<12x6x64xf32, #tpu.memory_space<vmem>>, vector<1x1x64xf32>,
    %c14 = arith.constant 14 : index
    %c0_193 = arith.constant 0 : index
    %c0_194 = arith.constant 0 : index
    %253 = vector.load %arg13[%c14, %c0_193, %c0_194] : memref<20x10x64xf32, #tpu.memory_space<vmem>>, vector<3x10x64xf32>
    %cst_195 = arith.constant dense<0xFF800000> : vector<10x64xf32>
    %254 = vector.multi_reduction <maximumf>, %253, %cst_195 [0] : vector<3x10x64xf32> to vector<10x64xf32>
    %255 = vector.extract_strided_slice %254 {offsets = [0, 0], sizes = [3, 64], strides = [1, 1]} : vector<10x64xf32> to vector<3x64xf32>
    %cst_196 = arith.constant dense<0xFF800000> : vector<64xf32>
    %256 = vector.multi_reduction <maximumf>, %255, %cst_196 [0] : vector<3x64xf32> to vector<64xf32>
    %257 = vector.shape_cast %256 : vector<64xf32> to vector<1x64xf32>
    %c9 = arith.constant 9 : index
    %c1_197 = arith.constant 1 : index
    %c0_198 = arith.constant 0 : index
    %258 = vector.load %arg14[%c9, %c1_197, %c0_198] : memref<12x6x64xf32, #tpu.memory_space<vmem>>, vector<1x1x64xf32>
    %259 = vector.shape_cast %258 : vector<1x1x64xf32> to vector<1x64xf32>
    %260 = vector.shape_cast %257 : vector<1x64xf32> to vector<1x1x64xf32>
    tpu.vector_store %arg14[%c9, %c1_197, %c0_198], %260 {strides = array<i32>} : memref<12x6x64xf32, #tpu.memory_space<vmem>>, vector<1x1x64xf32>,
    %261 = vector.extract_strided_slice %254 {offsets = [2, 0], sizes = [3, 64], strides = [1, 1]} : vector<10x64xf32> to vector<3x64xf32>
    %cst_199 = arith.constant dense<0xFF800000> : vector<64xf32>
    %262 = vector.multi_reduction <maximumf>, %261, %cst_199 [0] : vector<3x64xf32> to vector<64xf32>
    %263 = vector.shape_cast %262 : vector<64xf32> to vector<1x64xf32>
    %c9_200 = arith.constant 9 : index
    %c2_201 = arith.constant 2 : index
    %c0_202 = arith.constant 0 : index
    %264 = vector.load %arg14[%c9_200, %c2_201, %c0_202] : memref<12x6x64xf32, #tpu.memory_space<vmem>>, vector<1x1x64xf32>
    %265 = vector.shape_cast %264 : vector<1x1x64xf32> to vector<1x64xf32>
    %266 = vector.shape_cast %263 : vector<1x64xf32> to vector<1x1x64xf32>
    tpu.vector_store %arg14[%c9_200, %c2_201, %c0_202], %266 {strides = array<i32>} : memref<12x6x64xf32, #tpu.memory_space<vmem>>, vector<1x1x64xf32>,
    %267 = vector.extract_strided_slice %254 {offsets = [4, 0], sizes = [3, 64], strides = [1, 1]} : vector<10x64xf32> to vector<3x64xf32>
    %cst_203 = arith.constant dense<0xFF800000> : vector<64xf32>
    %268 = vector.multi_reduction <maximumf>, %267, %cst_203 [0] : vector<3x64xf32> to vector<64xf32>
    %269 = vector.shape_cast %268 : vector<64xf32> to vector<1x64xf32>
    %c9_204 = arith.constant 9 : index
    %c3_205 = arith.constant 3 : index
    %c0_206 = arith.constant 0 : index
    %270 = vector.load %arg14[%c9_204, %c3_205, %c0_206] : memref<12x6x64xf32, #tpu.memory_space<vmem>>, vector<1x1x64xf32>
    %271 = vector.shape_cast %270 : vector<1x1x64xf32> to vector<1x64xf32>
    %272 = vector.shape_cast %269 : vector<1x64xf32> to vector<1x1x64xf32>
    tpu.vector_store %arg14[%c9_204, %c3_205, %c0_206], %272 {strides = array<i32>} : memref<12x6x64xf32, #tpu.memory_space<vmem>>, vector<1x1x64xf32>,
    %273 = vector.extract_strided_slice %254 {offsets = [6, 0], sizes = [3, 64], strides = [1, 1]} : vector<10x64xf32> to vector<3x64xf32>
    %cst_207 = arith.constant dense<0xFF800000> : vector<64xf32>
    %274 = vector.multi_reduction <maximumf>, %273, %cst_207 [0] : vector<3x64xf32> to vector<64xf32>
    %275 = vector.shape_cast %274 : vector<64xf32> to vector<1x64xf32>
    %c9_208 = arith.constant 9 : index
    %c4_209 = arith.constant 4 : index
    %c0_210 = arith.constant 0 : index
    %276 = vector.load %arg14[%c9_208, %c4_209, %c0_210] : memref<12x6x64xf32, #tpu.memory_space<vmem>>, vector<1x1x64xf32>
    %277 = vector.shape_cast %276 : vector<1x1x64xf32> to vector<1x64xf32>
    %278 = vector.shape_cast %275 : vector<1x64xf32> to vector<1x1x64xf32>
    tpu.vector_store %arg14[%c9_208, %c4_209, %c0_210], %278 {strides = array<i32>} : memref<12x6x64xf32, #tpu.memory_space<vmem>>, vector<1x1x64xf32>,
    %c16 = arith.constant 16 : index
    %c0_211 = arith.constant 0 : index
    %c0_212 = arith.constant 0 : index
    %279 = vector.load %arg13[%c16, %c0_211, %c0_212] : memref<20x10x64xf32, #tpu.memory_space<vmem>>, vector<3x10x64xf32>
    %cst_213 = arith.constant dense<0xFF800000> : vector<10x64xf32>
    %280 = vector.multi_reduction <maximumf>, %279, %cst_213 [0] : vector<3x10x64xf32> to vector<10x64xf32>
    %281 = vector.extract_strided_slice %280 {offsets = [0, 0], sizes = [3, 64], strides = [1, 1]} : vector<10x64xf32> to vector<3x64xf32>
    %cst_214 = arith.constant dense<0xFF800000> : vector<64xf32>
    %282 = vector.multi_reduction <maximumf>, %281, %cst_214 [0] : vector<3x64xf32> to vector<64xf32>
    %283 = vector.shape_cast %282 : vector<64xf32> to vector<1x64xf32>
    %c10_215 = arith.constant 10 : index
    %c1_216 = arith.constant 1 : index
    %c0_217 = arith.constant 0 : index
    %284 = vector.load %arg14[%c10_215, %c1_216, %c0_217] : memref<12x6x64xf32, #tpu.memory_space<vmem>>, vector<1x1x64xf32>
    %285 = vector.shape_cast %284 : vector<1x1x64xf32> to vector<1x64xf32>
    %286 = vector.shape_cast %283 : vector<1x64xf32> to vector<1x1x64xf32>
    tpu.vector_store %arg14[%c10_215, %c1_216, %c0_217], %286 {strides = array<i32>} : memref<12x6x64xf32, #tpu.memory_space<vmem>>, vector<1x1x64xf32>,
    %287 = vector.extract_strided_slice %280 {offsets = [2, 0], sizes = [3, 64], strides = [1, 1]} : vector<10x64xf32> to vector<3x64xf32>
    %cst_218 = arith.constant dense<0xFF800000> : vector<64xf32>
    %288 = vector.multi_reduction <maximumf>, %287, %cst_218 [0] : vector<3x64xf32> to vector<64xf32>
    %289 = vector.shape_cast %288 : vector<64xf32> to vector<1x64xf32>
    %c10_219 = arith.constant 10 : index
    %c2_220 = arith.constant 2 : index
    %c0_221 = arith.constant 0 : index
    %290 = vector.load %arg14[%c10_219, %c2_220, %c0_221] : memref<12x6x64xf32, #tpu.memory_space<vmem>>, vector<1x1x64xf32>
    %291 = vector.shape_cast %290 : vector<1x1x64xf32> to vector<1x64xf32>
    %292 = vector.shape_cast %289 : vector<1x64xf32> to vector<1x1x64xf32>
    tpu.vector_store %arg14[%c10_219, %c2_220, %c0_221], %292 {strides = array<i32>} : memref<12x6x64xf32, #tpu.memory_space<vmem>>, vector<1x1x64xf32>,
    %293 = vector.extract_strided_slice %280 {offsets = [4, 0], sizes = [3, 64], strides = [1, 1]} : vector<10x64xf32> to vector<3x64xf32>
    %cst_222 = arith.constant dense<0xFF800000> : vector<64xf32>
    %294 = vector.multi_reduction <maximumf>, %293, %cst_222 [0] : vector<3x64xf32> to vector<64xf32>
    %295 = vector.shape_cast %294 : vector<64xf32> to vector<1x64xf32>
    %c10_223 = arith.constant 10 : index
    %c3_224 = arith.constant 3 : index
    %c0_225 = arith.constant 0 : index
    %296 = vector.load %arg14[%c10_223, %c3_224, %c0_225] : memref<12x6x64xf32, #tpu.memory_space<vmem>>, vector<1x1x64xf32>
    %297 = vector.shape_cast %296 : vector<1x1x64xf32> to vector<1x64xf32>
    %298 = vector.shape_cast %295 : vector<1x64xf32> to vector<1x1x64xf32>
    tpu.vector_store %arg14[%c10_223, %c3_224, %c0_225], %298 {strides = array<i32>} : memref<12x6x64xf32, #tpu.memory_space<vmem>>, vector<1x1x64xf32>,
    %299 = vector.extract_strided_slice %280 {offsets = [6, 0], sizes = [3, 64], strides = [1, 1]} : vector<10x64xf32> to vector<3x64xf32>
    %cst_226 = arith.constant dense<0xFF800000> : vector<64xf32>
    %300 = vector.multi_reduction <maximumf>, %299, %cst_226 [0] : vector<3x64xf32> to vector<64xf32>
    %301 = vector.shape_cast %300 : vector<64xf32> to vector<1x64xf32>
    %c10_227 = arith.constant 10 : index
    %c4_228 = arith.constant 4 : index
    %c0_229 = arith.constant 0 : index
    %302 = vector.load %arg14[%c10_227, %c4_228, %c0_229] : memref<12x6x64xf32, #tpu.memory_space<vmem>>, vector<1x1x64xf32>
    %303 = vector.shape_cast %302 : vector<1x1x64xf32> to vector<1x64xf32>
    %304 = vector.shape_cast %301 : vector<1x64xf32> to vector<1x1x64xf32>
    tpu.vector_store %arg14[%c10_227, %c4_228, %c0_229], %304 {strides = array<i32>} : memref<12x6x64xf32, #tpu.memory_space<vmem>>, vector<1x1x64xf32>,
    %cst_230 = arith.constant 0.000000e+00 : f32
    %305 = vector.broadcast %cst_230 : f32 to vector<4x64xf32>
    %c0_231 = arith.constant 0 : index
    %c0_232 = arith.constant 0 : index
    %c0_233 = arith.constant 0 : index
    %306 = vector.load %arg14[%c0_231, %c0_232, %c0_233] : memref<12x6x64xf32, #tpu.memory_space<vmem>>, vector<1x6x64xf32>
    %307 = vector.shape_cast %306 : vector<1x6x64xf32> to vector<6x64xf32>
    %308 = vector.extract_strided_slice %307 {offsets = [0, 0], sizes = [4, 64], strides = [1, 1]} : vector<6x64xf32> to vector<4x64xf32>
    %c0_234 = arith.constant 0 : index
    %c0_235 = arith.constant 0 : index
    %c0_236 = arith.constant 0 : index
    %309 = vector.load %arg4[%c0_234, %c0_235, %c0_236] : memref<9x64x64xf32, #tpu.memory_space<vmem>>, vector<1x64x64xf32>
    %310 = vector.shape_cast %309 : vector<1x64x64xf32> to vector<64x64xf32>
    %cst_237 = arith.constant dense<0.000000e+00> : vector<4x64xf32>
    %311 = tpu.matmul %308, %310, %cst_237 {dimension_numbers = #tpu.dot_dimension_numbers<[1], [0], [0], [1], [0, 0, 1, 1], [], []>} : vector<4x64xf32>, vector<64x64xf32>, vector<4x64xf32> -> vector<4x64xf32>
    %312 = arith.addf %305, %311 : vector<4x64xf32>
    %313 = vector.extract_strided_slice %307 {offsets = [1, 0], sizes = [4, 64], strides = [1, 1]} : vector<6x64xf32> to vector<4x64xf32>
    %c1_238 = arith.constant 1 : index
    %c0_239 = arith.constant 0 : index
    %c0_240 = arith.constant 0 : index
    %314 = vector.load %arg4[%c1_238, %c0_239, %c0_240] : memref<9x64x64xf32, #tpu.memory_space<vmem>>, vector<1x64x64xf32>
    %315 = vector.shape_cast %314 : vector<1x64x64xf32> to vector<64x64xf32>
    %cst_241 = arith.constant dense<0.000000e+00> : vector<4x64xf32>
    %316 = tpu.matmul %313, %315, %cst_241 {dimension_numbers = #tpu.dot_dimension_numbers<[1], [0], [0], [1], [0, 0, 1, 1], [], []>} : vector<4x64xf32>, vector<64x64xf32>, vector<4x64xf32> -> vector<4x64xf32>
    %317 = arith.addf %312, %316 : vector<4x64xf32>
    %318 = vector.extract_strided_slice %307 {offsets = [2, 0], sizes = [4, 64], strides = [1, 1]} : vector<6x64xf32> to vector<4x64xf32>
    %c2_242 = arith.constant 2 : index
    %c0_243 = arith.constant 0 : index
    %c0_244 = arith.constant 0 : index
    %319 = vector.load %arg4[%c2_242, %c0_243, %c0_244] : memref<9x64x64xf32, #tpu.memory_space<vmem>>, vector<1x64x64xf32>
    %320 = vector.shape_cast %319 : vector<1x64x64xf32> to vector<64x64xf32>
    %cst_245 = arith.constant dense<0.000000e+00> : vector<4x64xf32>
    %321 = tpu.matmul %318, %320, %cst_245 {dimension_numbers = #tpu.dot_dimension_numbers<[1], [0], [0], [1], [0, 0, 1, 1], [], []>} : vector<4x64xf32>, vector<64x64xf32>, vector<4x64xf32> -> vector<4x64xf32>
    %322 = arith.addf %317, %321 : vector<4x64xf32>
    %c1_246 = arith.constant 1 : index
    %c0_247 = arith.constant 0 : index
    %c0_248 = arith.constant 0 : index
    %323 = vector.load %arg14[%c1_246, %c0_247, %c0_248] : memref<12x6x64xf32, #tpu.memory_space<vmem>>, vector<1x6x64xf32>
    %324 = vector.shape_cast %323 : vector<1x6x64xf32> to vector<6x64xf32>
    %325 = vector.extract_strided_slice %324 {offsets = [0, 0], sizes = [4, 64], strides = [1, 1]} : vector<6x64xf32> to vector<4x64xf32>
    %c3_249 = arith.constant 3 : index
    %c0_250 = arith.constant 0 : index
    %c0_251 = arith.constant 0 : index
    %326 = vector.load %arg4[%c3_249, %c0_250, %c0_251] : memref<9x64x64xf32, #tpu.memory_space<vmem>>, vector<1x64x64xf32>
    %327 = vector.shape_cast %326 : vector<1x64x64xf32> to vector<64x64xf32>
    %cst_252 = arith.constant dense<0.000000e+00> : vector<4x64xf32>
    %328 = tpu.matmul %325, %327, %cst_252 {dimension_numbers = #tpu.dot_dimension_numbers<[1], [0], [0], [1], [0, 0, 1, 1], [], []>} : vector<4x64xf32>, vector<64x64xf32>, vector<4x64xf32> -> vector<4x64xf32>
    %329 = arith.addf %322, %328 : vector<4x64xf32>
    %330 = vector.extract_strided_slice %324 {offsets = [1, 0], sizes = [4, 64], strides = [1, 1]} : vector<6x64xf32> to vector<4x64xf32>
    %c4_253 = arith.constant 4 : index
    %c0_254 = arith.constant 0 : index
    %c0_255 = arith.constant 0 : index
    %331 = vector.load %arg4[%c4_253, %c0_254, %c0_255] : memref<9x64x64xf32, #tpu.memory_space<vmem>>, vector<1x64x64xf32>
    %332 = vector.shape_cast %331 : vector<1x64x64xf32> to vector<64x64xf32>
    %cst_256 = arith.constant dense<0.000000e+00> : vector<4x64xf32>
    %333 = tpu.matmul %330, %332, %cst_256 {dimension_numbers = #tpu.dot_dimension_numbers<[1], [0], [0], [1], [0, 0, 1, 1], [], []>} : vector<4x64xf32>, vector<64x64xf32>, vector<4x64xf32> -> vector<4x64xf32>
    %334 = arith.addf %329, %333 : vector<4x64xf32>
    %335 = vector.extract_strided_slice %324 {offsets = [2, 0], sizes = [4, 64], strides = [1, 1]} : vector<6x64xf32> to vector<4x64xf32>
    %c5_257 = arith.constant 5 : index
    %c0_258 = arith.constant 0 : index
    %c0_259 = arith.constant 0 : index
    %336 = vector.load %arg4[%c5_257, %c0_258, %c0_259] : memref<9x64x64xf32, #tpu.memory_space<vmem>>, vector<1x64x64xf32>
    %337 = vector.shape_cast %336 : vector<1x64x64xf32> to vector<64x64xf32>
    %cst_260 = arith.constant dense<0.000000e+00> : vector<4x64xf32>
    %338 = tpu.matmul %335, %337, %cst_260 {dimension_numbers = #tpu.dot_dimension_numbers<[1], [0], [0], [1], [0, 0, 1, 1], [], []>} : vector<4x64xf32>, vector<64x64xf32>, vector<4x64xf32> -> vector<4x64xf32>
    %339 = arith.addf %334, %338 : vector<4x64xf32>
    %c2_261 = arith.constant 2 : index
    %c0_262 = arith.constant 0 : index
    %c0_263 = arith.constant 0 : index
    %340 = vector.load %arg14[%c2_261, %c0_262, %c0_263] : memref<12x6x64xf32, #tpu.memory_space<vmem>>, vector<1x6x64xf32>
    %341 = vector.shape_cast %340 : vector<1x6x64xf32> to vector<6x64xf32>
    %342 = vector.extract_strided_slice %341 {offsets = [0, 0], sizes = [4, 64], strides = [1, 1]} : vector<6x64xf32> to vector<4x64xf32>
    %c6_264 = arith.constant 6 : index
    %c0_265 = arith.constant 0 : index
    %c0_266 = arith.constant 0 : index
    %343 = vector.load %arg4[%c6_264, %c0_265, %c0_266] : memref<9x64x64xf32, #tpu.memory_space<vmem>>, vector<1x64x64xf32>
    %344 = vector.shape_cast %343 : vector<1x64x64xf32> to vector<64x64xf32>
    %cst_267 = arith.constant dense<0.000000e+00> : vector<4x64xf32>
    %345 = tpu.matmul %342, %344, %cst_267 {dimension_numbers = #tpu.dot_dimension_numbers<[1], [0], [0], [1], [0, 0, 1, 1], [], []>} : vector<4x64xf32>, vector<64x64xf32>, vector<4x64xf32> -> vector<4x64xf32>
    %346 = arith.addf %339, %345 : vector<4x64xf32>
    %347 = vector.extract_strided_slice %341 {offsets = [1, 0], sizes = [4, 64], strides = [1, 1]} : vector<6x64xf32> to vector<4x64xf32>
    %c7_268 = arith.constant 7 : index
    %c0_269 = arith.constant 0 : index
    %c0_270 = arith.constant 0 : index
    %348 = vector.load %arg4[%c7_268, %c0_269, %c0_270] : memref<9x64x64xf32, #tpu.memory_space<vmem>>, vector<1x64x64xf32>
    %349 = vector.shape_cast %348 : vector<1x64x64xf32> to vector<64x64xf32>
    %cst_271 = arith.constant dense<0.000000e+00> : vector<4x64xf32>
    %350 = tpu.matmul %347, %349, %cst_271 {dimension_numbers = #tpu.dot_dimension_numbers<[1], [0], [0], [1], [0, 0, 1, 1], [], []>} : vector<4x64xf32>, vector<64x64xf32>, vector<4x64xf32> -> vector<4x64xf32>
    %351 = arith.addf %346, %350 : vector<4x64xf32>
    %352 = vector.extract_strided_slice %341 {offsets = [2, 0], sizes = [4, 64], strides = [1, 1]} : vector<6x64xf32> to vector<4x64xf32>
    %c8_272 = arith.constant 8 : index
    %c0_273 = arith.constant 0 : index
    %c0_274 = arith.constant 0 : index
    %353 = vector.load %arg4[%c8_272, %c0_273, %c0_274] : memref<9x64x64xf32, #tpu.memory_space<vmem>>, vector<1x64x64xf32>
    %354 = vector.shape_cast %353 : vector<1x64x64xf32> to vector<64x64xf32>
    %cst_275 = arith.constant dense<0.000000e+00> : vector<4x64xf32>
    %355 = tpu.matmul %352, %354, %cst_275 {dimension_numbers = #tpu.dot_dimension_numbers<[1], [0], [0], [1], [0, 0, 1, 1], [], []>} : vector<4x64xf32>, vector<64x64xf32>, vector<4x64xf32> -> vector<4x64xf32>
    %356 = arith.addf %351, %355 : vector<4x64xf32>
    %357 = vector.broadcast %8 : vector<1x64xf32> to vector<4x64xf32>
    %358 = arith.mulf %356, %357 : vector<4x64xf32>
    %359 = vector.broadcast %9 : vector<1x64xf32> to vector<4x64xf32>
    %360 = arith.addf %358, %359 : vector<4x64xf32>
    %cst_276 = arith.constant 0.000000e+00 : f32
    %361 = vector.broadcast %cst_276 : f32 to vector<4x64xf32>
    %362 = arith.maximumf %360, %361 : vector<4x64xf32>
    %c1_277 = arith.constant 1 : index
    %c1_278 = arith.constant 1 : index
    %c0_279 = arith.constant 0 : index
    %363 = vector.load %arg15[%c1_277, %c1_278, %c0_279] : memref<12x6x64xf32, #tpu.memory_space<vmem>>, vector<1x4x64xf32>
    %364 = vector.shape_cast %363 : vector<1x4x64xf32> to vector<4x64xf32>
    %365 = vector.shape_cast %362 : vector<4x64xf32> to vector<1x4x64xf32>
    tpu.vector_store %arg15[%c1_277, %c1_278, %c0_279], %365 {strides = array<i32>} : memref<12x6x64xf32, #tpu.memory_space<vmem>>, vector<1x4x64xf32>,
    %cst_280 = arith.constant 0.000000e+00 : f32
    %366 = vector.broadcast %cst_280 : f32 to vector<4x64xf32>
    %c1_281 = arith.constant 1 : index
    %c0_282 = arith.constant 0 : index
    %c0_283 = arith.constant 0 : index
    %367 = vector.load %arg14[%c1_281, %c0_282, %c0_283] : memref<12x6x64xf32, #tpu.memory_space<vmem>>, vector<1x6x64xf32>
    %368 = vector.shape_cast %367 : vector<1x6x64xf32> to vector<6x64xf32>
    %369 = vector.extract_strided_slice %368 {offsets = [0, 0], sizes = [4, 64], strides = [1, 1]} : vector<6x64xf32> to vector<4x64xf32>
    %c0_284 = arith.constant 0 : index
    %c0_285 = arith.constant 0 : index
    %c0_286 = arith.constant 0 : index
    %370 = vector.load %arg4[%c0_284, %c0_285, %c0_286] : memref<9x64x64xf32, #tpu.memory_space<vmem>>, vector<1x64x64xf32>
    %371 = vector.shape_cast %370 : vector<1x64x64xf32> to vector<64x64xf32>
    %cst_287 = arith.constant dense<0.000000e+00> : vector<4x64xf32>
    %372 = tpu.matmul %369, %371, %cst_287 {dimension_numbers = #tpu.dot_dimension_numbers<[1], [0], [0], [1], [0, 0, 1, 1], [], []>} : vector<4x64xf32>, vector<64x64xf32>, vector<4x64xf32> -> vector<4x64xf32>
    %373 = arith.addf %366, %372 : vector<4x64xf32>
    %374 = vector.extract_strided_slice %368 {offsets = [1, 0], sizes = [4, 64], strides = [1, 1]} : vector<6x64xf32> to vector<4x64xf32>
    %c1_288 = arith.constant 1 : index
    %c0_289 = arith.constant 0 : index
    %c0_290 = arith.constant 0 : index
    %375 = vector.load %arg4[%c1_288, %c0_289, %c0_290] : memref<9x64x64xf32, #tpu.memory_space<vmem>>, vector<1x64x64xf32>
    %376 = vector.shape_cast %375 : vector<1x64x64xf32> to vector<64x64xf32>
    %cst_291 = arith.constant dense<0.000000e+00> : vector<4x64xf32>
    %377 = tpu.matmul %374, %376, %cst_291 {dimension_numbers = #tpu.dot_dimension_numbers<[1], [0], [0], [1], [0, 0, 1, 1], [], []>} : vector<4x64xf32>, vector<64x64xf32>, vector<4x64xf32> -> vector<4x64xf32>
    %378 = arith.addf %373, %377 : vector<4x64xf32>
    %379 = vector.extract_strided_slice %368 {offsets = [2, 0], sizes = [4, 64], strides = [1, 1]} : vector<6x64xf32> to vector<4x64xf32>
    %c2_292 = arith.constant 2 : index
    %c0_293 = arith.constant 0 : index
    %c0_294 = arith.constant 0 : index
    %380 = vector.load %arg4[%c2_292, %c0_293, %c0_294] : memref<9x64x64xf32, #tpu.memory_space<vmem>>, vector<1x64x64xf32>
    %381 = vector.shape_cast %380 : vector<1x64x64xf32> to vector<64x64xf32>
    %cst_295 = arith.constant dense<0.000000e+00> : vector<4x64xf32>
    %382 = tpu.matmul %379, %381, %cst_295 {dimension_numbers = #tpu.dot_dimension_numbers<[1], [0], [0], [1], [0, 0, 1, 1], [], []>} : vector<4x64xf32>, vector<64x64xf32>, vector<4x64xf32> -> vector<4x64xf32>
    %383 = arith.addf %378, %382 : vector<4x64xf32>
    %c2_296 = arith.constant 2 : index
    %c0_297 = arith.constant 0 : index
    %c0_298 = arith.constant 0 : index
    %384 = vector.load %arg14[%c2_296, %c0_297, %c0_298] : memref<12x6x64xf32, #tpu.memory_space<vmem>>, vector<1x6x64xf32>
    %385 = vector.shape_cast %384 : vector<1x6x64xf32> to vector<6x64xf32>
    %386 = vector.extract_strided_slice %385 {offsets = [0, 0], sizes = [4, 64], strides = [1, 1]} : vector<6x64xf32> to vector<4x64xf32>
    %c3_299 = arith.constant 3 : index
    %c0_300 = arith.constant 0 : index
    %c0_301 = arith.constant 0 : index
    %387 = vector.load %arg4[%c3_299, %c0_300, %c0_301] : memref<9x64x64xf32, #tpu.memory_space<vmem>>, vector<1x64x64xf32>
    %388 = vector.shape_cast %387 : vector<1x64x64xf32> to vector<64x64xf32>
    %cst_302 = arith.constant dense<0.000000e+00> : vector<4x64xf32>
    %389 = tpu.matmul %386, %388, %cst_302 {dimension_numbers = #tpu.dot_dimension_numbers<[1], [0], [0], [1], [0, 0, 1, 1], [], []>} : vector<4x64xf32>, vector<64x64xf32>, vector<4x64xf32> -> vector<4x64xf32>
    %390 = arith.addf %383, %389 : vector<4x64xf32>
    %391 = vector.extract_strided_slice %385 {offsets = [1, 0], sizes = [4, 64], strides = [1, 1]} : vector<6x64xf32> to vector<4x64xf32>
    %c4_303 = arith.constant 4 : index
    %c0_304 = arith.constant 0 : index
    %c0_305 = arith.constant 0 : index
    %392 = vector.load %arg4[%c4_303, %c0_304, %c0_305] : memref<9x64x64xf32, #tpu.memory_space<vmem>>, vector<1x64x64xf32>
    %393 = vector.shape_cast %392 : vector<1x64x64xf32> to vector<64x64xf32>
    %cst_306 = arith.constant dense<0.000000e+00> : vector<4x64xf32>
    %394 = tpu.matmul %391, %393, %cst_306 {dimension_numbers = #tpu.dot_dimension_numbers<[1], [0], [0], [1], [0, 0, 1, 1], [], []>} : vector<4x64xf32>, vector<64x64xf32>, vector<4x64xf32> -> vector<4x64xf32>
    %395 = arith.addf %390, %394 : vector<4x64xf32>
    %396 = vector.extract_strided_slice %385 {offsets = [2, 0], sizes = [4, 64], strides = [1, 1]} : vector<6x64xf32> to vector<4x64xf32>
    %c5_307 = arith.constant 5 : index
    %c0_308 = arith.constant 0 : index
    %c0_309 = arith.constant 0 : index
    %397 = vector.load %arg4[%c5_307, %c0_308, %c0_309] : memref<9x64x64xf32, #tpu.memory_space<vmem>>, vector<1x64x64xf32>
    %398 = vector.shape_cast %397 : vector<1x64x64xf32> to vector<64x64xf32>
    %cst_310 = arith.constant dense<0.000000e+00> : vector<4x64xf32>
    %399 = tpu.matmul %396, %398, %cst_310 {dimension_numbers = #tpu.dot_dimension_numbers<[1], [0], [0], [1], [0, 0, 1, 1], [], []>} : vector<4x64xf32>, vector<64x64xf32>, vector<4x64xf32> -> vector<4x64xf32>
    %400 = arith.addf %395, %399 : vector<4x64xf32>
    %c3_311 = arith.constant 3 : index
    %c0_312 = arith.constant 0 : index
    %c0_313 = arith.constant 0 : index
    %401 = vector.load %arg14[%c3_311, %c0_312, %c0_313] : memref<12x6x64xf32, #tpu.memory_space<vmem>>, vector<1x6x64xf32>
    %402 = vector.shape_cast %401 : vector<1x6x64xf32> to vector<6x64xf32>
    %403 = vector.extract_strided_slice %402 {offsets = [0, 0], sizes = [4, 64], strides = [1, 1]} : vector<6x64xf32> to vector<4x64xf32>
    %c6_314 = arith.constant 6 : index
    %c0_315 = arith.constant 0 : index
    %c0_316 = arith.constant 0 : index
    %404 = vector.load %arg4[%c6_314, %c0_315, %c0_316] : memref<9x64x64xf32, #tpu.memory_space<vmem>>, vector<1x64x64xf32>
    %405 = vector.shape_cast %404 : vector<1x64x64xf32> to vector<64x64xf32>
    %cst_317 = arith.constant dense<0.000000e+00> : vector<4x64xf32>
    %406 = tpu.matmul %403, %405, %cst_317 {dimension_numbers = #tpu.dot_dimension_numbers<[1], [0], [0], [1], [0, 0, 1, 1], [], []>} : vector<4x64xf32>, vector<64x64xf32>, vector<4x64xf32> -> vector<4x64xf32>
    %407 = arith.addf %400, %406 : vector<4x64xf32>
    %408 = vector.extract_strided_slice %402 {offsets = [1, 0], sizes = [4, 64], strides = [1, 1]} : vector<6x64xf32> to vector<4x64xf32>
    %c7_318 = arith.constant 7 : index
    %c0_319 = arith.constant 0 : index
    %c0_320 = arith.constant 0 : index
    %409 = vector.load %arg4[%c7_318, %c0_319, %c0_320] : memref<9x64x64xf32, #tpu.memory_space<vmem>>, vector<1x64x64xf32>
    %410 = vector.shape_cast %409 : vector<1x64x64xf32> to vector<64x64xf32>
    %cst_321 = arith.constant dense<0.000000e+00> : vector<4x64xf32>
    %411 = tpu.matmul %408, %410, %cst_321 {dimension_numbers = #tpu.dot_dimension_numbers<[1], [0], [0], [1], [0, 0, 1, 1], [], []>} : vector<4x64xf32>, vector<64x64xf32>, vector<4x64xf32> -> vector<4x64xf32>
    %412 = arith.addf %407, %411 : vector<4x64xf32>
    %413 = vector.extract_strided_slice %402 {offsets = [2, 0], sizes = [4, 64], strides = [1, 1]} : vector<6x64xf32> to vector<4x64xf32>
    %c8_322 = arith.constant 8 : index
    %c0_323 = arith.constant 0 : index
    %c0_324 = arith.constant 0 : index
    %414 = vector.load %arg4[%c8_322, %c0_323, %c0_324] : memref<9x64x64xf32, #tpu.memory_space<vmem>>, vector<1x64x64xf32>
    %415 = vector.shape_cast %414 : vector<1x64x64xf32> to vector<64x64xf32>
    %cst_325 = arith.constant dense<0.000000e+00> : vector<4x64xf32>
    %416 = tpu.matmul %413, %415, %cst_325 {dimension_numbers = #tpu.dot_dimension_numbers<[1], [0], [0], [1], [0, 0, 1, 1], [], []>} : vector<4x64xf32>, vector<64x64xf32>, vector<4x64xf32> -> vector<4x64xf32>
    %417 = arith.addf %412, %416 : vector<4x64xf32>
    %418 = vector.broadcast %8 : vector<1x64xf32> to vector<4x64xf32>
    %419 = arith.mulf %417, %418 : vector<4x64xf32>
    %420 = vector.broadcast %9 : vector<1x64xf32> to vector<4x64xf32>
    %421 = arith.addf %419, %420 : vector<4x64xf32>
    %cst_326 = arith.constant 0.000000e+00 : f32
    %422 = vector.broadcast %cst_326 : f32 to vector<4x64xf32>
    %423 = arith.maximumf %421, %422 : vector<4x64xf32>
    %c2_327 = arith.constant 2 : index
    %c1_328 = arith.constant 1 : index
    %c0_329 = arith.constant 0 : index
    %424 = vector.load %arg15[%c2_327, %c1_328, %c0_329] : memref<12x6x64xf32, #tpu.memory_space<vmem>>, vector<1x4x64xf32>
    %425 = vector.shape_cast %424 : vector<1x4x64xf32> to vector<4x64xf32>
    %426 = vector.shape_cast %423 : vector<4x64xf32> to vector<1x4x64xf32>
    tpu.vector_store %arg15[%c2_327, %c1_328, %c0_329], %426 {strides = array<i32>} : memref<12x6x64xf32, #tpu.memory_space<vmem>>, vector<1x4x64xf32>,
    %cst_330 = arith.constant 0.000000e+00 : f32
    %427 = vector.broadcast %cst_330 : f32 to vector<4x64xf32>
    %c2_331 = arith.constant 2 : index
    %c0_332 = arith.constant 0 : index
    %c0_333 = arith.constant 0 : index
    %428 = vector.load %arg14[%c2_331, %c0_332, %c0_333] : memref<12x6x64xf32, #tpu.memory_space<vmem>>, vector<1x6x64xf32>
    %429 = vector.shape_cast %428 : vector<1x6x64xf32> to vector<6x64xf32>
    %430 = vector.extract_strided_slice %429 {offsets = [0, 0], sizes = [4, 64], strides = [1, 1]} : vector<6x64xf32> to vector<4x64xf32>
    %c0_334 = arith.constant 0 : index
    %c0_335 = arith.constant 0 : index
    %c0_336 = arith.constant 0 : index
    %431 = vector.load %arg4[%c0_334, %c0_335, %c0_336] : memref<9x64x64xf32, #tpu.memory_space<vmem>>, vector<1x64x64xf32>
    %432 = vector.shape_cast %431 : vector<1x64x64xf32> to vector<64x64xf32>
    %cst_337 = arith.constant dense<0.000000e+00> : vector<4x64xf32>
    %433 = tpu.matmul %430, %432, %cst_337 {dimension_numbers = #tpu.dot_dimension_numbers<[1], [0], [0], [1], [0, 0, 1, 1], [], []>} : vector<4x64xf32>, vector<64x64xf32>, vector<4x64xf32> -> vector<4x64xf32>
    %434 = arith.addf %427, %433 : vector<4x64xf32>
    %435 = vector.extract_strided_slice %429 {offsets = [1, 0], sizes = [4, 64], strides = [1, 1]} : vector<6x64xf32> to vector<4x64xf32>
    %c1_338 = arith.constant 1 : index
    %c0_339 = arith.constant 0 : index
    %c0_340 = arith.constant 0 : index
    %436 = vector.load %arg4[%c1_338, %c0_339, %c0_340] : memref<9x64x64xf32, #tpu.memory_space<vmem>>, vector<1x64x64xf32>
    %437 = vector.shape_cast %436 : vector<1x64x64xf32> to vector<64x64xf32>
    %cst_341 = arith.constant dense<0.000000e+00> : vector<4x64xf32>
    %438 = tpu.matmul %435, %437, %cst_341 {dimension_numbers = #tpu.dot_dimension_numbers<[1], [0], [0], [1], [0, 0, 1, 1], [], []>} : vector<4x64xf32>, vector<64x64xf32>, vector<4x64xf32> -> vector<4x64xf32>
    %439 = arith.addf %434, %438 : vector<4x64xf32>
    %440 = vector.extract_strided_slice %429 {offsets = [2, 0], sizes = [4, 64], strides = [1, 1]} : vector<6x64xf32> to vector<4x64xf32>
    %c2_342 = arith.constant 2 : index
    %c0_343 = arith.constant 0 : index
    %c0_344 = arith.constant 0 : index
    %441 = vector.load %arg4[%c2_342, %c0_343, %c0_344] : memref<9x64x64xf32, #tpu.memory_space<vmem>>, vector<1x64x64xf32>
    %442 = vector.shape_cast %441 : vector<1x64x64xf32> to vector<64x64xf32>
    %cst_345 = arith.constant dense<0.000000e+00> : vector<4x64xf32>
    %443 = tpu.matmul %440, %442, %cst_345 {dimension_numbers = #tpu.dot_dimension_numbers<[1], [0], [0], [1], [0, 0, 1, 1], [], []>} : vector<4x64xf32>, vector<64x64xf32>, vector<4x64xf32> -> vector<4x64xf32>
    %444 = arith.addf %439, %443 : vector<4x64xf32>
    %c3_346 = arith.constant 3 : index
    %c0_347 = arith.constant 0 : index
    %c0_348 = arith.constant 0 : index
    %445 = vector.load %arg14[%c3_346, %c0_347, %c0_348] : memref<12x6x64xf32, #tpu.memory_space<vmem>>, vector<1x6x64xf32>
    %446 = vector.shape_cast %445 : vector<1x6x64xf32> to vector<6x64xf32>
    %447 = vector.extract_strided_slice %446 {offsets = [0, 0], sizes = [4, 64], strides = [1, 1]} : vector<6x64xf32> to vector<4x64xf32>
    %c3_349 = arith.constant 3 : index
    %c0_350 = arith.constant 0 : index
    %c0_351 = arith.constant 0 : index
    %448 = vector.load %arg4[%c3_349, %c0_350, %c0_351] : memref<9x64x64xf32, #tpu.memory_space<vmem>>, vector<1x64x64xf32>
    %449 = vector.shape_cast %448 : vector<1x64x64xf32> to vector<64x64xf32>
    %cst_352 = arith.constant dense<0.000000e+00> : vector<4x64xf32>
    %450 = tpu.matmul %447, %449, %cst_352 {dimension_numbers = #tpu.dot_dimension_numbers<[1], [0], [0], [1], [0, 0, 1, 1], [], []>} : vector<4x64xf32>, vector<64x64xf32>, vector<4x64xf32> -> vector<4x64xf32>
    %451 = arith.addf %444, %450 : vector<4x64xf32>
    %452 = vector.extract_strided_slice %446 {offsets = [1, 0], sizes = [4, 64], strides = [1, 1]} : vector<6x64xf32> to vector<4x64xf32>
    %c4_353 = arith.constant 4 : index
    %c0_354 = arith.constant 0 : index
    %c0_355 = arith.constant 0 : index
    %453 = vector.load %arg4[%c4_353, %c0_354, %c0_355] : memref<9x64x64xf32, #tpu.memory_space<vmem>>, vector<1x64x64xf32>
    %454 = vector.shape_cast %453 : vector<1x64x64xf32> to vector<64x64xf32>
    %cst_356 = arith.constant dense<0.000000e+00> : vector<4x64xf32>
    %455 = tpu.matmul %452, %454, %cst_356 {dimension_numbers = #tpu.dot_dimension_numbers<[1], [0], [0], [1], [0, 0, 1, 1], [], []>} : vector<4x64xf32>, vector<64x64xf32>, vector<4x64xf32> -> vector<4x64xf32>
    %456 = arith.addf %451, %455 : vector<4x64xf32>
    %457 = vector.extract_strided_slice %446 {offsets = [2, 0], sizes = [4, 64], strides = [1, 1]} : vector<6x64xf32> to vector<4x64xf32>
    %c5_357 = arith.constant 5 : index
    %c0_358 = arith.constant 0 : index
    %c0_359 = arith.constant 0 : index
    %458 = vector.load %arg4[%c5_357, %c0_358, %c0_359] : memref<9x64x64xf32, #tpu.memory_space<vmem>>, vector<1x64x64xf32>
    %459 = vector.shape_cast %458 : vector<1x64x64xf32> to vector<64x64xf32>
    %cst_360 = arith.constant dense<0.000000e+00> : vector<4x64xf32>
    %460 = tpu.matmul %457, %459, %cst_360 {dimension_numbers = #tpu.dot_dimension_numbers<[1], [0], [0], [1], [0, 0, 1, 1], [], []>} : vector<4x64xf32>, vector<64x64xf32>, vector<4x64xf32> -> vector<4x64xf32>
    %461 = arith.addf %456, %460 : vector<4x64xf32>
    %c4_361 = arith.constant 4 : index
    %c0_362 = arith.constant 0 : index
    %c0_363 = arith.constant 0 : index
    %462 = vector.load %arg14[%c4_361, %c0_362, %c0_363] : memref<12x6x64xf32, #tpu.memory_space<vmem>>, vector<1x6x64xf32>
    %463 = vector.shape_cast %462 : vector<1x6x64xf32> to vector<6x64xf32>
    %464 = vector.extract_strided_slice %463 {offsets = [0, 0], sizes = [4, 64], strides = [1, 1]} : vector<6x64xf32> to vector<4x64xf32>
    %c6_364 = arith.constant 6 : index
    %c0_365 = arith.constant 0 : index
    %c0_366 = arith.constant 0 : index
    %465 = vector.load %arg4[%c6_364, %c0_365, %c0_366] : memref<9x64x64xf32, #tpu.memory_space<vmem>>, vector<1x64x64xf32>
    %466 = vector.shape_cast %465 : vector<1x64x64xf32> to vector<64x64xf32>
    %cst_367 = arith.constant dense<0.000000e+00> : vector<4x64xf32>
    %467 = tpu.matmul %464, %466, %cst_367 {dimension_numbers = #tpu.dot_dimension_numbers<[1], [0], [0], [1], [0, 0, 1, 1], [], []>} : vector<4x64xf32>, vector<64x64xf32>, vector<4x64xf32> -> vector<4x64xf32>
    %468 = arith.addf %461, %467 : vector<4x64xf32>
    %469 = vector.extract_strided_slice %463 {offsets = [1, 0], sizes = [4, 64], strides = [1, 1]} : vector<6x64xf32> to vector<4x64xf32>
    %c7_368 = arith.constant 7 : index
    %c0_369 = arith.constant 0 : index
    %c0_370 = arith.constant 0 : index
    %470 = vector.load %arg4[%c7_368, %c0_369, %c0_370] : memref<9x64x64xf32, #tpu.memory_space<vmem>>, vector<1x64x64xf32>
    %471 = vector.shape_cast %470 : vector<1x64x64xf32> to vector<64x64xf32>
    %cst_371 = arith.constant dense<0.000000e+00> : vector<4x64xf32>
    %472 = tpu.matmul %469, %471, %cst_371 {dimension_numbers = #tpu.dot_dimension_numbers<[1], [0], [0], [1], [0, 0, 1, 1], [], []>} : vector<4x64xf32>, vector<64x64xf32>, vector<4x64xf32> -> vector<4x64xf32>
    %473 = arith.addf %468, %472 : vector<4x64xf32>
    %474 = vector.extract_strided_slice %463 {offsets = [2, 0], sizes = [4, 64], strides = [1, 1]} : vector<6x64xf32> to vector<4x64xf32>
    %c8_372 = arith.constant 8 : index
    %c0_373 = arith.constant 0 : index
    %c0_374 = arith.constant 0 : index
    %475 = vector.load %arg4[%c8_372, %c0_373, %c0_374] : memref<9x64x64xf32, #tpu.memory_space<vmem>>, vector<1x64x64xf32>
    %476 = vector.shape_cast %475 : vector<1x64x64xf32> to vector<64x64xf32>
    %cst_375 = arith.constant dense<0.000000e+00> : vector<4x64xf32>
    %477 = tpu.matmul %474, %476, %cst_375 {dimension_numbers = #tpu.dot_dimension_numbers<[1], [0], [0], [1], [0, 0, 1, 1], [], []>} : vector<4x64xf32>, vector<64x64xf32>, vector<4x64xf32> -> vector<4x64xf32>
    %478 = arith.addf %473, %477 : vector<4x64xf32>
    %479 = vector.broadcast %8 : vector<1x64xf32> to vector<4x64xf32>
    %480 = arith.mulf %478, %479 : vector<4x64xf32>
    %481 = vector.broadcast %9 : vector<1x64xf32> to vector<4x64xf32>
    %482 = arith.addf %480, %481 : vector<4x64xf32>
    %cst_376 = arith.constant 0.000000e+00 : f32
    %483 = vector.broadcast %cst_376 : f32 to vector<4x64xf32>
    %484 = arith.maximumf %482, %483 : vector<4x64xf32>
    %c3_377 = arith.constant 3 : index
    %c1_378 = arith.constant 1 : index
    %c0_379 = arith.constant 0 : index
    %485 = vector.load %arg15[%c3_377, %c1_378, %c0_379] : memref<12x6x64xf32, #tpu.memory_space<vmem>>, vector<1x4x64xf32>
    %486 = vector.shape_cast %485 : vector<1x4x64xf32> to vector<4x64xf32>
    %487 = vector.shape_cast %484 : vector<4x64xf32> to vector<1x4x64xf32>
    tpu.vector_store %arg15[%c3_377, %c1_378, %c0_379], %487 {strides = array<i32>} : memref<12x6x64xf32, #tpu.memory_space<vmem>>, vector<1x4x64xf32>,
    %cst_380 = arith.constant 0.000000e+00 : f32
    %488 = vector.broadcast %cst_380 : f32 to vector<4x64xf32>
    %c3_381 = arith.constant 3 : index
    %c0_382 = arith.constant 0 : index
    %c0_383 = arith.constant 0 : index
    %489 = vector.load %arg14[%c3_381, %c0_382, %c0_383] : memref<12x6x64xf32, #tpu.memory_space<vmem>>, vector<1x6x64xf32>
    %490 = vector.shape_cast %489 : vector<1x6x64xf32> to vector<6x64xf32>
    %491 = vector.extract_strided_slice %490 {offsets = [0, 0], sizes = [4, 64], strides = [1, 1]} : vector<6x64xf32> to vector<4x64xf32>
    %c0_384 = arith.constant 0 : index
    %c0_385 = arith.constant 0 : index
    %c0_386 = arith.constant 0 : index
    %492 = vector.load %arg4[%c0_384, %c0_385, %c0_386] : memref<9x64x64xf32, #tpu.memory_space<vmem>>, vector<1x64x64xf32>
    %493 = vector.shape_cast %492 : vector<1x64x64xf32> to vector<64x64xf32>
    %cst_387 = arith.constant dense<0.000000e+00> : vector<4x64xf32>
    %494 = tpu.matmul %491, %493, %cst_387 {dimension_numbers = #tpu.dot_dimension_numbers<[1], [0], [0], [1], [0, 0, 1, 1], [], []>} : vector<4x64xf32>, vector<64x64xf32>, vector<4x64xf32> -> vector<4x64xf32>
    %495 = arith.addf %488, %494 : vector<4x64xf32>
    %496 = vector.extract_strided_slice %490 {offsets = [1, 0], sizes = [4, 64], strides = [1, 1]} : vector<6x64xf32> to vector<4x64xf32>
    %c1_388 = arith.constant 1 : index
    %c0_389 = arith.constant 0 : index
    %c0_390 = arith.constant 0 : index
    %497 = vector.load %arg4[%c1_388, %c0_389, %c0_390] : memref<9x64x64xf32, #tpu.memory_space<vmem>>, vector<1x64x64xf32>
    %498 = vector.shape_cast %497 : vector<1x64x64xf32> to vector<64x64xf32>
    %cst_391 = arith.constant dense<0.000000e+00> : vector<4x64xf32>
    %499 = tpu.matmul %496, %498, %cst_391 {dimension_numbers = #tpu.dot_dimension_numbers<[1], [0], [0], [1], [0, 0, 1, 1], [], []>} : vector<4x64xf32>, vector<64x64xf32>, vector<4x64xf32> -> vector<4x64xf32>
    %500 = arith.addf %495, %499 : vector<4x64xf32>
    %501 = vector.extract_strided_slice %490 {offsets = [2, 0], sizes = [4, 64], strides = [1, 1]} : vector<6x64xf32> to vector<4x64xf32>
    %c2_392 = arith.constant 2 : index
    %c0_393 = arith.constant 0 : index
    %c0_394 = arith.constant 0 : index
    %502 = vector.load %arg4[%c2_392, %c0_393, %c0_394] : memref<9x64x64xf32, #tpu.memory_space<vmem>>, vector<1x64x64xf32>
    %503 = vector.shape_cast %502 : vector<1x64x64xf32> to vector<64x64xf32>
    %cst_395 = arith.constant dense<0.000000e+00> : vector<4x64xf32>
    %504 = tpu.matmul %501, %503, %cst_395 {dimension_numbers = #tpu.dot_dimension_numbers<[1], [0], [0], [1], [0, 0, 1, 1], [], []>} : vector<4x64xf32>, vector<64x64xf32>, vector<4x64xf32> -> vector<4x64xf32>
    %505 = arith.addf %500, %504 : vector<4x64xf32>
    %c4_396 = arith.constant 4 : index
    %c0_397 = arith.constant 0 : index
    %c0_398 = arith.constant 0 : index
    %506 = vector.load %arg14[%c4_396, %c0_397, %c0_398] : memref<12x6x64xf32, #tpu.memory_space<vmem>>, vector<1x6x64xf32>
    %507 = vector.shape_cast %506 : vector<1x6x64xf32> to vector<6x64xf32>
    %508 = vector.extract_strided_slice %507 {offsets = [0, 0], sizes = [4, 64], strides = [1, 1]} : vector<6x64xf32> to vector<4x64xf32>
    %c3_399 = arith.constant 3 : index
    %c0_400 = arith.constant 0 : index
    %c0_401 = arith.constant 0 : index
    %509 = vector.load %arg4[%c3_399, %c0_400, %c0_401] : memref<9x64x64xf32, #tpu.memory_space<vmem>>, vector<1x64x64xf32>
    %510 = vector.shape_cast %509 : vector<1x64x64xf32> to vector<64x64xf32>
    %cst_402 = arith.constant dense<0.000000e+00> : vector<4x64xf32>
    %511 = tpu.matmul %508, %510, %cst_402 {dimension_numbers = #tpu.dot_dimension_numbers<[1], [0], [0], [1], [0, 0, 1, 1], [], []>} : vector<4x64xf32>, vector<64x64xf32>, vector<4x64xf32> -> vector<4x64xf32>
    %512 = arith.addf %505, %511 : vector<4x64xf32>
    %513 = vector.extract_strided_slice %507 {offsets = [1, 0], sizes = [4, 64], strides = [1, 1]} : vector<6x64xf32> to vector<4x64xf32>
    %c4_403 = arith.constant 4 : index
    %c0_404 = arith.constant 0 : index
    %c0_405 = arith.constant 0 : index
    %514 = vector.load %arg4[%c4_403, %c0_404, %c0_405] : memref<9x64x64xf32, #tpu.memory_space<vmem>>, vector<1x64x64xf32>
    %515 = vector.shape_cast %514 : vector<1x64x64xf32> to vector<64x64xf32>
    %cst_406 = arith.constant dense<0.000000e+00> : vector<4x64xf32>
    %516 = tpu.matmul %513, %515, %cst_406 {dimension_numbers = #tpu.dot_dimension_numbers<[1], [0], [0], [1], [0, 0, 1, 1], [], []>} : vector<4x64xf32>, vector<64x64xf32>, vector<4x64xf32> -> vector<4x64xf32>
    %517 = arith.addf %512, %516 : vector<4x64xf32>
    %518 = vector.extract_strided_slice %507 {offsets = [2, 0], sizes = [4, 64], strides = [1, 1]} : vector<6x64xf32> to vector<4x64xf32>
    %c5_407 = arith.constant 5 : index
    %c0_408 = arith.constant 0 : index
    %c0_409 = arith.constant 0 : index
    %519 = vector.load %arg4[%c5_407, %c0_408, %c0_409] : memref<9x64x64xf32, #tpu.memory_space<vmem>>, vector<1x64x64xf32>
    %520 = vector.shape_cast %519 : vector<1x64x64xf32> to vector<64x64xf32>
    %cst_410 = arith.constant dense<0.000000e+00> : vector<4x64xf32>
    %521 = tpu.matmul %518, %520, %cst_410 {dimension_numbers = #tpu.dot_dimension_numbers<[1], [0], [0], [1], [0, 0, 1, 1], [], []>} : vector<4x64xf32>, vector<64x64xf32>, vector<4x64xf32> -> vector<4x64xf32>
    %522 = arith.addf %517, %521 : vector<4x64xf32>
    %c5_411 = arith.constant 5 : index
    %c0_412 = arith.constant 0 : index
    %c0_413 = arith.constant 0 : index
    %523 = vector.load %arg14[%c5_411, %c0_412, %c0_413] : memref<12x6x64xf32, #tpu.memory_space<vmem>>, vector<1x6x64xf32>
    %524 = vector.shape_cast %523 : vector<1x6x64xf32> to vector<6x64xf32>
    %525 = vector.extract_strided_slice %524 {offsets = [0, 0], sizes = [4, 64], strides = [1, 1]} : vector<6x64xf32> to vector<4x64xf32>
    %c6_414 = arith.constant 6 : index
    %c0_415 = arith.constant 0 : index
    %c0_416 = arith.constant 0 : index
    %526 = vector.load %arg4[%c6_414, %c0_415, %c0_416] : memref<9x64x64xf32, #tpu.memory_space<vmem>>, vector<1x64x64xf32>
    %527 = vector.shape_cast %526 : vector<1x64x64xf32> to vector<64x64xf32>
    %cst_417 = arith.constant dense<0.000000e+00> : vector<4x64xf32>
    %528 = tpu.matmul %525, %527, %cst_417 {dimension_numbers = #tpu.dot_dimension_numbers<[1], [0], [0], [1], [0, 0, 1, 1], [], []>} : vector<4x64xf32>, vector<64x64xf32>, vector<4x64xf32> -> vector<4x64xf32>
    %529 = arith.addf %522, %528 : vector<4x64xf32>
    %530 = vector.extract_strided_slice %524 {offsets = [1, 0], sizes = [4, 64], strides = [1, 1]} : vector<6x64xf32> to vector<4x64xf32>
    %c7_418 = arith.constant 7 : index
    %c0_419 = arith.constant 0 : index
    %c0_420 = arith.constant 0 : index
    %531 = vector.load %arg4[%c7_418, %c0_419, %c0_420] : memref<9x64x64xf32, #tpu.memory_space<vmem>>, vector<1x64x64xf32>
    %532 = vector.shape_cast %531 : vector<1x64x64xf32> to vector<64x64xf32>
    %cst_421 = arith.constant dense<0.000000e+00> : vector<4x64xf32>
    %533 = tpu.matmul %530, %532, %cst_421 {dimension_numbers = #tpu.dot_dimension_numbers<[1], [0], [0], [1], [0, 0, 1, 1], [], []>} : vector<4x64xf32>, vector<64x64xf32>, vector<4x64xf32> -> vector<4x64xf32>
    %534 = arith.addf %529, %533 : vector<4x64xf32>
    %535 = vector.extract_strided_slice %524 {offsets = [2, 0], sizes = [4, 64], strides = [1, 1]} : vector<6x64xf32> to vector<4x64xf32>
    %c8_422 = arith.constant 8 : index
    %c0_423 = arith.constant 0 : index
    %c0_424 = arith.constant 0 : index
    %536 = vector.load %arg4[%c8_422, %c0_423, %c0_424] : memref<9x64x64xf32, #tpu.memory_space<vmem>>, vector<1x64x64xf32>
    %537 = vector.shape_cast %536 : vector<1x64x64xf32> to vector<64x64xf32>
    %cst_425 = arith.constant dense<0.000000e+00> : vector<4x64xf32>
    %538 = tpu.matmul %535, %537, %cst_425 {dimension_numbers = #tpu.dot_dimension_numbers<[1], [0], [0], [1], [0, 0, 1, 1], [], []>} : vector<4x64xf32>, vector<64x64xf32>, vector<4x64xf32> -> vector<4x64xf32>
    %539 = arith.addf %534, %538 : vector<4x64xf32>
    %540 = vector.broadcast %8 : vector<1x64xf32> to vector<4x64xf32>
    %541 = arith.mulf %539, %540 : vector<4x64xf32>
    %542 = vector.broadcast %9 : vector<1x64xf32> to vector<4x64xf32>
    %543 = arith.addf %541, %542 : vector<4x64xf32>
    %cst_426 = arith.constant 0.000000e+00 : f32
    %544 = vector.broadcast %cst_426 : f32 to vector<4x64xf32>
    %545 = arith.maximumf %543, %544 : vector<4x64xf32>
    %c4_427 = arith.constant 4 : index
    %c1_428 = arith.constant 1 : index
    %c0_429 = arith.constant 0 : index
    %546 = vector.load %arg15[%c4_427, %c1_428, %c0_429] : memref<12x6x64xf32, #tpu.memory_space<vmem>>, vector<1x4x64xf32>
    %547 = vector.shape_cast %546 : vector<1x4x64xf32> to vector<4x64xf32>
    %548 = vector.shape_cast %545 : vector<4x64xf32> to vector<1x4x64xf32>
    tpu.vector_store %arg15[%c4_427, %c1_428, %c0_429], %548 {strides = array<i32>} : memref<12x6x64xf32, #tpu.memory_space<vmem>>, vector<1x4x64xf32>,
    %cst_430 = arith.constant 0.000000e+00 : f32
    %549 = vector.broadcast %cst_430 : f32 to vector<4x64xf32>
    %c6_431 = arith.constant 6 : index
    %c0_432 = arith.constant 0 : index
    %c0_433 = arith.constant 0 : index
    %550 = vector.load %arg14[%c6_431, %c0_432, %c0_433] : memref<12x6x64xf32, #tpu.memory_space<vmem>>, vector<1x6x64xf32>
    %551 = vector.shape_cast %550 : vector<1x6x64xf32> to vector<6x64xf32>
    %552 = vector.extract_strided_slice %551 {offsets = [0, 0], sizes = [4, 64], strides = [1, 1]} : vector<6x64xf32> to vector<4x64xf32>
    %c0_434 = arith.constant 0 : index
    %c0_435 = arith.constant 0 : index
    %c0_436 = arith.constant 0 : index
    %553 = vector.load %arg4[%c0_434, %c0_435, %c0_436] : memref<9x64x64xf32, #tpu.memory_space<vmem>>, vector<1x64x64xf32>
    %554 = vector.shape_cast %553 : vector<1x64x64xf32> to vector<64x64xf32>
    %cst_437 = arith.constant dense<0.000000e+00> : vector<4x64xf32>
    %555 = tpu.matmul %552, %554, %cst_437 {dimension_numbers = #tpu.dot_dimension_numbers<[1], [0], [0], [1], [0, 0, 1, 1], [], []>} : vector<4x64xf32>, vector<64x64xf32>, vector<4x64xf32> -> vector<4x64xf32>
    %556 = arith.addf %549, %555 : vector<4x64xf32>
    %557 = vector.extract_strided_slice %551 {offsets = [1, 0], sizes = [4, 64], strides = [1, 1]} : vector<6x64xf32> to vector<4x64xf32>
    %c1_438 = arith.constant 1 : index
    %c0_439 = arith.constant 0 : index
    %c0_440 = arith.constant 0 : index
    %558 = vector.load %arg4[%c1_438, %c0_439, %c0_440] : memref<9x64x64xf32, #tpu.memory_space<vmem>>, vector<1x64x64xf32>
    %559 = vector.shape_cast %558 : vector<1x64x64xf32> to vector<64x64xf32>
    %cst_441 = arith.constant dense<0.000000e+00> : vector<4x64xf32>
    %560 = tpu.matmul %557, %559, %cst_441 {dimension_numbers = #tpu.dot_dimension_numbers<[1], [0], [0], [1], [0, 0, 1, 1], [], []>} : vector<4x64xf32>, vector<64x64xf32>, vector<4x64xf32> -> vector<4x64xf32>
    %561 = arith.addf %556, %560 : vector<4x64xf32>
    %562 = vector.extract_strided_slice %551 {offsets = [2, 0], sizes = [4, 64], strides = [1, 1]} : vector<6x64xf32> to vector<4x64xf32>
    %c2_442 = arith.constant 2 : index
    %c0_443 = arith.constant 0 : index
    %c0_444 = arith.constant 0 : index
    %563 = vector.load %arg4[%c2_442, %c0_443, %c0_444] : memref<9x64x64xf32, #tpu.memory_space<vmem>>, vector<1x64x64xf32>
    %564 = vector.shape_cast %563 : vector<1x64x64xf32> to vector<64x64xf32>
    %cst_445 = arith.constant dense<0.000000e+00> : vector<4x64xf32>
    %565 = tpu.matmul %562, %564, %cst_445 {dimension_numbers = #tpu.dot_dimension_numbers<[1], [0], [0], [1], [0, 0, 1, 1], [], []>} : vector<4x64xf32>, vector<64x64xf32>, vector<4x64xf32> -> vector<4x64xf32>
    %566 = arith.addf %561, %565 : vector<4x64xf32>
    %c7_446 = arith.constant 7 : index
    %c0_447 = arith.constant 0 : index
    %c0_448 = arith.constant 0 : index
    %567 = vector.load %arg14[%c7_446, %c0_447, %c0_448] : memref<12x6x64xf32, #tpu.memory_space<vmem>>, vector<1x6x64xf32>
    %568 = vector.shape_cast %567 : vector<1x6x64xf32> to vector<6x64xf32>
    %569 = vector.extract_strided_slice %568 {offsets = [0, 0], sizes = [4, 64], strides = [1, 1]} : vector<6x64xf32> to vector<4x64xf32>
    %c3_449 = arith.constant 3 : index
    %c0_450 = arith.constant 0 : index
    %c0_451 = arith.constant 0 : index
    %570 = vector.load %arg4[%c3_449, %c0_450, %c0_451] : memref<9x64x64xf32, #tpu.memory_space<vmem>>, vector<1x64x64xf32>
    %571 = vector.shape_cast %570 : vector<1x64x64xf32> to vector<64x64xf32>
    %cst_452 = arith.constant dense<0.000000e+00> : vector<4x64xf32>
    %572 = tpu.matmul %569, %571, %cst_452 {dimension_numbers = #tpu.dot_dimension_numbers<[1], [0], [0], [1], [0, 0, 1, 1], [], []>} : vector<4x64xf32>, vector<64x64xf32>, vector<4x64xf32> -> vector<4x64xf32>
    %573 = arith.addf %566, %572 : vector<4x64xf32>
    %574 = vector.extract_strided_slice %568 {offsets = [1, 0], sizes = [4, 64], strides = [1, 1]} : vector<6x64xf32> to vector<4x64xf32>
    %c4_453 = arith.constant 4 : index
    %c0_454 = arith.constant 0 : index
    %c0_455 = arith.constant 0 : index
    %575 = vector.load %arg4[%c4_453, %c0_454, %c0_455] : memref<9x64x64xf32, #tpu.memory_space<vmem>>, vector<1x64x64xf32>
    %576 = vector.shape_cast %575 : vector<1x64x64xf32> to vector<64x64xf32>
    %cst_456 = arith.constant dense<0.000000e+00> : vector<4x64xf32>
    %577 = tpu.matmul %574, %576, %cst_456 {dimension_numbers = #tpu.dot_dimension_numbers<[1], [0], [0], [1], [0, 0, 1, 1], [], []>} : vector<4x64xf32>, vector<64x64xf32>, vector<4x64xf32> -> vector<4x64xf32>
    %578 = arith.addf %573, %577 : vector<4x64xf32>
    %579 = vector.extract_strided_slice %568 {offsets = [2, 0], sizes = [4, 64], strides = [1, 1]} : vector<6x64xf32> to vector<4x64xf32>
    %c5_457 = arith.constant 5 : index
    %c0_458 = arith.constant 0 : index
    %c0_459 = arith.constant 0 : index
    %580 = vector.load %arg4[%c5_457, %c0_458, %c0_459] : memref<9x64x64xf32, #tpu.memory_space<vmem>>, vector<1x64x64xf32>
    %581 = vector.shape_cast %580 : vector<1x64x64xf32> to vector<64x64xf32>
    %cst_460 = arith.constant dense<0.000000e+00> : vector<4x64xf32>
    %582 = tpu.matmul %579, %581, %cst_460 {dimension_numbers = #tpu.dot_dimension_numbers<[1], [0], [0], [1], [0, 0, 1, 1], [], []>} : vector<4x64xf32>, vector<64x64xf32>, vector<4x64xf32> -> vector<4x64xf32>
    %583 = arith.addf %578, %582 : vector<4x64xf32>
    %c8_461 = arith.constant 8 : index
    %c0_462 = arith.constant 0 : index
    %c0_463 = arith.constant 0 : index
    %584 = vector.load %arg14[%c8_461, %c0_462, %c0_463] : memref<12x6x64xf32, #tpu.memory_space<vmem>>, vector<1x6x64xf32>
    %585 = vector.shape_cast %584 : vector<1x6x64xf32> to vector<6x64xf32>
    %586 = vector.extract_strided_slice %585 {offsets = [0, 0], sizes = [4, 64], strides = [1, 1]} : vector<6x64xf32> to vector<4x64xf32>
    %c6_464 = arith.constant 6 : index
    %c0_465 = arith.constant 0 : index
    %c0_466 = arith.constant 0 : index
    %587 = vector.load %arg4[%c6_464, %c0_465, %c0_466] : memref<9x64x64xf32, #tpu.memory_space<vmem>>, vector<1x64x64xf32>
    %588 = vector.shape_cast %587 : vector<1x64x64xf32> to vector<64x64xf32>
    %cst_467 = arith.constant dense<0.000000e+00> : vector<4x64xf32>
    %589 = tpu.matmul %586, %588, %cst_467 {dimension_numbers = #tpu.dot_dimension_numbers<[1], [0], [0], [1], [0, 0, 1, 1], [], []>} : vector<4x64xf32>, vector<64x64xf32>, vector<4x64xf32> -> vector<4x64xf32>
    %590 = arith.addf %583, %589 : vector<4x64xf32>
    %591 = vector.extract_strided_slice %585 {offsets = [1, 0], sizes = [4, 64], strides = [1, 1]} : vector<6x64xf32> to vector<4x64xf32>
    %c7_468 = arith.constant 7 : index
    %c0_469 = arith.constant 0 : index
    %c0_470 = arith.constant 0 : index
    %592 = vector.load %arg4[%c7_468, %c0_469, %c0_470] : memref<9x64x64xf32, #tpu.memory_space<vmem>>, vector<1x64x64xf32>
    %593 = vector.shape_cast %592 : vector<1x64x64xf32> to vector<64x64xf32>
    %cst_471 = arith.constant dense<0.000000e+00> : vector<4x64xf32>
    %594 = tpu.matmul %591, %593, %cst_471 {dimension_numbers = #tpu.dot_dimension_numbers<[1], [0], [0], [1], [0, 0, 1, 1], [], []>} : vector<4x64xf32>, vector<64x64xf32>, vector<4x64xf32> -> vector<4x64xf32>
    %595 = arith.addf %590, %594 : vector<4x64xf32>
    %596 = vector.extract_strided_slice %585 {offsets = [2, 0], sizes = [4, 64], strides = [1, 1]} : vector<6x64xf32> to vector<4x64xf32>
    %c8_472 = arith.constant 8 : index
    %c0_473 = arith.constant 0 : index
    %c0_474 = arith.constant 0 : index
    %597 = vector.load %arg4[%c8_472, %c0_473, %c0_474] : memref<9x64x64xf32, #tpu.memory_space<vmem>>, vector<1x64x64xf32>
    %598 = vector.shape_cast %597 : vector<1x64x64xf32> to vector<64x64xf32>
    %cst_475 = arith.constant dense<0.000000e+00> : vector<4x64xf32>
    %599 = tpu.matmul %596, %598, %cst_475 {dimension_numbers = #tpu.dot_dimension_numbers<[1], [0], [0], [1], [0, 0, 1, 1], [], []>} : vector<4x64xf32>, vector<64x64xf32>, vector<4x64xf32> -> vector<4x64xf32>
    %600 = arith.addf %595, %599 : vector<4x64xf32>
    %601 = vector.broadcast %8 : vector<1x64xf32> to vector<4x64xf32>
    %602 = arith.mulf %600, %601 : vector<4x64xf32>
    %603 = vector.broadcast %9 : vector<1x64xf32> to vector<4x64xf32>
    %604 = arith.addf %602, %603 : vector<4x64xf32>
    %cst_476 = arith.constant 0.000000e+00 : f32
    %605 = vector.broadcast %cst_476 : f32 to vector<4x64xf32>
    %606 = arith.maximumf %604, %605 : vector<4x64xf32>
    %c7_477 = arith.constant 7 : index
    %c1_478 = arith.constant 1 : index
    %c0_479 = arith.constant 0 : index
    %607 = vector.load %arg15[%c7_477, %c1_478, %c0_479] : memref<12x6x64xf32, #tpu.memory_space<vmem>>, vector<1x4x64xf32>
    %608 = vector.shape_cast %607 : vector<1x4x64xf32> to vector<4x64xf32>
    %609 = vector.shape_cast %606 : vector<4x64xf32> to vector<1x4x64xf32>
    tpu.vector_store %arg15[%c7_477, %c1_478, %c0_479], %609 {strides = array<i32>} : memref<12x6x64xf32, #tpu.memory_space<vmem>>, vector<1x4x64xf32>,
    %cst_480 = arith.constant 0.000000e+00 : f32
    %610 = vector.broadcast %cst_480 : f32 to vector<4x64xf32>
    %c7_481 = arith.constant 7 : index
    %c0_482 = arith.constant 0 : index
    %c0_483 = arith.constant 0 : index
    %611 = vector.load %arg14[%c7_481, %c0_482, %c0_483] : memref<12x6x64xf32, #tpu.memory_space<vmem>>, vector<1x6x64xf32>
    %612 = vector.shape_cast %611 : vector<1x6x64xf32> to vector<6x64xf32>
    %613 = vector.extract_strided_slice %612 {offsets = [0, 0], sizes = [4, 64], strides = [1, 1]} : vector<6x64xf32> to vector<4x64xf32>
    %c0_484 = arith.constant 0 : index
    %c0_485 = arith.constant 0 : index
    %c0_486 = arith.constant 0 : index
    %614 = vector.load %arg4[%c0_484, %c0_485, %c0_486] : memref<9x64x64xf32, #tpu.memory_space<vmem>>, vector<1x64x64xf32>
    %615 = vector.shape_cast %614 : vector<1x64x64xf32> to vector<64x64xf32>
    %cst_487 = arith.constant dense<0.000000e+00> : vector<4x64xf32>
    %616 = tpu.matmul %613, %615, %cst_487 {dimension_numbers = #tpu.dot_dimension_numbers<[1], [0], [0], [1], [0, 0, 1, 1], [], []>} : vector<4x64xf32>, vector<64x64xf32>, vector<4x64xf32> -> vector<4x64xf32>
    %617 = arith.addf %610, %616 : vector<4x64xf32>
    %618 = vector.extract_strided_slice %612 {offsets = [1, 0], sizes = [4, 64], strides = [1, 1]} : vector<6x64xf32> to vector<4x64xf32>
    %c1_488 = arith.constant 1 : index
    %c0_489 = arith.constant 0 : index
    %c0_490 = arith.constant 0 : index
    %619 = vector.load %arg4[%c1_488, %c0_489, %c0_490] : memref<9x64x64xf32, #tpu.memory_space<vmem>>, vector<1x64x64xf32>
    %620 = vector.shape_cast %619 : vector<1x64x64xf32> to vector<64x64xf32>
    %cst_491 = arith.constant dense<0.000000e+00> : vector<4x64xf32>
    %621 = tpu.matmul %618, %620, %cst_491 {dimension_numbers = #tpu.dot_dimension_numbers<[1], [0], [0], [1], [0, 0, 1, 1], [], []>} : vector<4x64xf32>, vector<64x64xf32>, vector<4x64xf32> -> vector<4x64xf32>
    %622 = arith.addf %617, %621 : vector<4x64xf32>
    %623 = vector.extract_strided_slice %612 {offsets = [2, 0], sizes = [4, 64], strides = [1, 1]} : vector<6x64xf32> to vector<4x64xf32>
    %c2_492 = arith.constant 2 : index
    %c0_493 = arith.constant 0 : index
    %c0_494 = arith.constant 0 : index
    %624 = vector.load %arg4[%c2_492, %c0_493, %c0_494] : memref<9x64x64xf32, #tpu.memory_space<vmem>>, vector<1x64x64xf32>
    %625 = vector.shape_cast %624 : vector<1x64x64xf32> to vector<64x64xf32>
    %cst_495 = arith.constant dense<0.000000e+00> : vector<4x64xf32>
    %626 = tpu.matmul %623, %625, %cst_495 {dimension_numbers = #tpu.dot_dimension_numbers<[1], [0], [0], [1], [0, 0, 1, 1], [], []>} : vector<4x64xf32>, vector<64x64xf32>, vector<4x64xf32> -> vector<4x64xf32>
    %627 = arith.addf %622, %626 : vector<4x64xf32>
    %c8_496 = arith.constant 8 : index
    %c0_497 = arith.constant 0 : index
    %c0_498 = arith.constant 0 : index
    %628 = vector.load %arg14[%c8_496, %c0_497, %c0_498] : memref<12x6x64xf32, #tpu.memory_space<vmem>>, vector<1x6x64xf32>
    %629 = vector.shape_cast %628 : vector<1x6x64xf32> to vector<6x64xf32>
    %630 = vector.extract_strided_slice %629 {offsets = [0, 0], sizes = [4, 64], strides = [1, 1]} : vector<6x64xf32> to vector<4x64xf32>
    %c3_499 = arith.constant 3 : index
    %c0_500 = arith.constant 0 : index
    %c0_501 = arith.constant 0 : index
    %631 = vector.load %arg4[%c3_499, %c0_500, %c0_501] : memref<9x64x64xf32, #tpu.memory_space<vmem>>, vector<1x64x64xf32>
    %632 = vector.shape_cast %631 : vector<1x64x64xf32> to vector<64x64xf32>
    %cst_502 = arith.constant dense<0.000000e+00> : vector<4x64xf32>
    %633 = tpu.matmul %630, %632, %cst_502 {dimension_numbers = #tpu.dot_dimension_numbers<[1], [0], [0], [1], [0, 0, 1, 1], [], []>} : vector<4x64xf32>, vector<64x64xf32>, vector<4x64xf32> -> vector<4x64xf32>
    %634 = arith.addf %627, %633 : vector<4x64xf32>
    %635 = vector.extract_strided_slice %629 {offsets = [1, 0], sizes = [4, 64], strides = [1, 1]} : vector<6x64xf32> to vector<4x64xf32>
    %c4_503 = arith.constant 4 : index
    %c0_504 = arith.constant 0 : index
    %c0_505 = arith.constant 0 : index
    %636 = vector.load %arg4[%c4_503, %c0_504, %c0_505] : memref<9x64x64xf32, #tpu.memory_space<vmem>>, vector<1x64x64xf32>
    %637 = vector.shape_cast %636 : vector<1x64x64xf32> to vector<64x64xf32>
    %cst_506 = arith.constant dense<0.000000e+00> : vector<4x64xf32>
    %638 = tpu.matmul %635, %637, %cst_506 {dimension_numbers = #tpu.dot_dimension_numbers<[1], [0], [0], [1], [0, 0, 1, 1], [], []>} : vector<4x64xf32>, vector<64x64xf32>, vector<4x64xf32> -> vector<4x64xf32>
    %639 = arith.addf %634, %638 : vector<4x64xf32>
    %640 = vector.extract_strided_slice %629 {offsets = [2, 0], sizes = [4, 64], strides = [1, 1]} : vector<6x64xf32> to vector<4x64xf32>
    %c5_507 = arith.constant 5 : index
    %c0_508 = arith.constant 0 : index
    %c0_509 = arith.constant 0 : index
    %641 = vector.load %arg4[%c5_507, %c0_508, %c0_509] : memref<9x64x64xf32, #tpu.memory_space<vmem>>, vector<1x64x64xf32>
    %642 = vector.shape_cast %641 : vector<1x64x64xf32> to vector<64x64xf32>
    %cst_510 = arith.constant dense<0.000000e+00> : vector<4x64xf32>
    %643 = tpu.matmul %640, %642, %cst_510 {dimension_numbers = #tpu.dot_dimension_numbers<[1], [0], [0], [1], [0, 0, 1, 1], [], []>} : vector<4x64xf32>, vector<64x64xf32>, vector<4x64xf32> -> vector<4x64xf32>
    %644 = arith.addf %639, %643 : vector<4x64xf32>
    %c9_511 = arith.constant 9 : index
    %c0_512 = arith.constant 0 : index
    %c0_513 = arith.constant 0 : index
    %645 = vector.load %arg14[%c9_511, %c0_512, %c0_513] : memref<12x6x64xf32, #tpu.memory_space<vmem>>, vector<1x6x64xf32>
    %646 = vector.shape_cast %645 : vector<1x6x64xf32> to vector<6x64xf32>
    %647 = vector.extract_strided_slice %646 {offsets = [0, 0], sizes = [4, 64], strides = [1, 1]} : vector<6x64xf32> to vector<4x64xf32>
    %c6_514 = arith.constant 6 : index
    %c0_515 = arith.constant 0 : index
    %c0_516 = arith.constant 0 : index
    %648 = vector.load %arg4[%c6_514, %c0_515, %c0_516] : memref<9x64x64xf32, #tpu.memory_space<vmem>>, vector<1x64x64xf32>
    %649 = vector.shape_cast %648 : vector<1x64x64xf32> to vector<64x64xf32>
    %cst_517 = arith.constant dense<0.000000e+00> : vector<4x64xf32>
    %650 = tpu.matmul %647, %649, %cst_517 {dimension_numbers = #tpu.dot_dimension_numbers<[1], [0], [0], [1], [0, 0, 1, 1], [], []>} : vector<4x64xf32>, vector<64x64xf32>, vector<4x64xf32> -> vector<4x64xf32>
    %651 = arith.addf %644, %650 : vector<4x64xf32>
    %652 = vector.extract_strided_slice %646 {offsets = [1, 0], sizes = [4, 64], strides = [1, 1]} : vector<6x64xf32> to vector<4x64xf32>
    %c7_518 = arith.constant 7 : index
    %c0_519 = arith.constant 0 : index
    %c0_520 = arith.constant 0 : index
    %653 = vector.load %arg4[%c7_518, %c0_519, %c0_520] : memref<9x64x64xf32, #tpu.memory_space<vmem>>, vector<1x64x64xf32>
    %654 = vector.shape_cast %653 : vector<1x64x64xf32> to vector<64x64xf32>
    %cst_521 = arith.constant dense<0.000000e+00> : vector<4x64xf32>
    %655 = tpu.matmul %652, %654, %cst_521 {dimension_numbers = #tpu.dot_dimension_numbers<[1], [0], [0], [1], [0, 0, 1, 1], [], []>} : vector<4x64xf32>, vector<64x64xf32>, vector<4x64xf32> -> vector<4x64xf32>
    %656 = arith.addf %651, %655 : vector<4x64xf32>
    %657 = vector.extract_strided_slice %646 {offsets = [2, 0], sizes = [4, 64], strides = [1, 1]} : vector<6x64xf32> to vector<4x64xf32>
    %c8_522 = arith.constant 8 : index
    %c0_523 = arith.constant 0 : index
    %c0_524 = arith.constant 0 : index
    %658 = vector.load %arg4[%c8_522, %c0_523, %c0_524] : memref<9x64x64xf32, #tpu.memory_space<vmem>>, vector<1x64x64xf32>
    %659 = vector.shape_cast %658 : vector<1x64x64xf32> to vector<64x64xf32>
    %cst_525 = arith.constant dense<0.000000e+00> : vector<4x64xf32>
    %660 = tpu.matmul %657, %659, %cst_525 {dimension_numbers = #tpu.dot_dimension_numbers<[1], [0], [0], [1], [0, 0, 1, 1], [], []>} : vector<4x64xf32>, vector<64x64xf32>, vector<4x64xf32> -> vector<4x64xf32>
    %661 = arith.addf %656, %660 : vector<4x64xf32>
    %662 = vector.broadcast %8 : vector<1x64xf32> to vector<4x64xf32>
    %663 = arith.mulf %661, %662 : vector<4x64xf32>
    %664 = vector.broadcast %9 : vector<1x64xf32> to vector<4x64xf32>
    %665 = arith.addf %663, %664 : vector<4x64xf32>
    %cst_526 = arith.constant 0.000000e+00 : f32
    %666 = vector.broadcast %cst_526 : f32 to vector<4x64xf32>
    %667 = arith.maximumf %665, %666 : vector<4x64xf32>
    %c8_527 = arith.constant 8 : index
    %c1_528 = arith.constant 1 : index
    %c0_529 = arith.constant 0 : index
    %668 = vector.load %arg15[%c8_527, %c1_528, %c0_529] : memref<12x6x64xf32, #tpu.memory_space<vmem>>, vector<1x4x64xf32>
    %669 = vector.shape_cast %668 : vector<1x4x64xf32> to vector<4x64xf32>
    %670 = vector.shape_cast %667 : vector<4x64xf32> to vector<1x4x64xf32>
    tpu.vector_store %arg15[%c8_527, %c1_528, %c0_529], %670 {strides = array<i32>} : memref<12x6x64xf32, #tpu.memory_space<vmem>>, vector<1x4x64xf32>,
    %cst_530 = arith.constant 0.000000e+00 : f32
    %671 = vector.broadcast %cst_530 : f32 to vector<4x64xf32>
    %c8_531 = arith.constant 8 : index
    %c0_532 = arith.constant 0 : index
    %c0_533 = arith.constant 0 : index
    %672 = vector.load %arg14[%c8_531, %c0_532, %c0_533] : memref<12x6x64xf32, #tpu.memory_space<vmem>>, vector<1x6x64xf32>
    %673 = vector.shape_cast %672 : vector<1x6x64xf32> to vector<6x64xf32>
    %674 = vector.extract_strided_slice %673 {offsets = [0, 0], sizes = [4, 64], strides = [1, 1]} : vector<6x64xf32> to vector<4x64xf32>
    %c0_534 = arith.constant 0 : index
    %c0_535 = arith.constant 0 : index
    %c0_536 = arith.constant 0 : index
    %675 = vector.load %arg4[%c0_534, %c0_535, %c0_536] : memref<9x64x64xf32, #tpu.memory_space<vmem>>, vector<1x64x64xf32>
    %676 = vector.shape_cast %675 : vector<1x64x64xf32> to vector<64x64xf32>
    %cst_537 = arith.constant dense<0.000000e+00> : vector<4x64xf32>
    %677 = tpu.matmul %674, %676, %cst_537 {dimension_numbers = #tpu.dot_dimension_numbers<[1], [0], [0], [1], [0, 0, 1, 1], [], []>} : vector<4x64xf32>, vector<64x64xf32>, vector<4x64xf32> -> vector<4x64xf32>
    %678 = arith.addf %671, %677 : vector<4x64xf32>
    %679 = vector.extract_strided_slice %673 {offsets = [1, 0], sizes = [4, 64], strides = [1, 1]} : vector<6x64xf32> to vector<4x64xf32>
    %c1_538 = arith.constant 1 : index
    %c0_539 = arith.constant 0 : index
    %c0_540 = arith.constant 0 : index
    %680 = vector.load %arg4[%c1_538, %c0_539, %c0_540] : memref<9x64x64xf32, #tpu.memory_space<vmem>>, vector<1x64x64xf32>
    %681 = vector.shape_cast %680 : vector<1x64x64xf32> to vector<64x64xf32>
    %cst_541 = arith.constant dense<0.000000e+00> : vector<4x64xf32>
    %682 = tpu.matmul %679, %681, %cst_541 {dimension_numbers = #tpu.dot_dimension_numbers<[1], [0], [0], [1], [0, 0, 1, 1], [], []>} : vector<4x64xf32>, vector<64x64xf32>, vector<4x64xf32> -> vector<4x64xf32>
    %683 = arith.addf %678, %682 : vector<4x64xf32>
    %684 = vector.extract_strided_slice %673 {offsets = [2, 0], sizes = [4, 64], strides = [1, 1]} : vector<6x64xf32> to vector<4x64xf32>
    %c2_542 = arith.constant 2 : index
    %c0_543 = arith.constant 0 : index
    %c0_544 = arith.constant 0 : index
    %685 = vector.load %arg4[%c2_542, %c0_543, %c0_544] : memref<9x64x64xf32, #tpu.memory_space<vmem>>, vector<1x64x64xf32>
    %686 = vector.shape_cast %685 : vector<1x64x64xf32> to vector<64x64xf32>
    %cst_545 = arith.constant dense<0.000000e+00> : vector<4x64xf32>
    %687 = tpu.matmul %684, %686, %cst_545 {dimension_numbers = #tpu.dot_dimension_numbers<[1], [0], [0], [1], [0, 0, 1, 1], [], []>} : vector<4x64xf32>, vector<64x64xf32>, vector<4x64xf32> -> vector<4x64xf32>
    %688 = arith.addf %683, %687 : vector<4x64xf32>
    %c9_546 = arith.constant 9 : index
    %c0_547 = arith.constant 0 : index
    %c0_548 = arith.constant 0 : index
    %689 = vector.load %arg14[%c9_546, %c0_547, %c0_548] : memref<12x6x64xf32, #tpu.memory_space<vmem>>, vector<1x6x64xf32>
    %690 = vector.shape_cast %689 : vector<1x6x64xf32> to vector<6x64xf32>
    %691 = vector.extract_strided_slice %690 {offsets = [0, 0], sizes = [4, 64], strides = [1, 1]} : vector<6x64xf32> to vector<4x64xf32>
    %c3_549 = arith.constant 3 : index
    %c0_550 = arith.constant 0 : index
    %c0_551 = arith.constant 0 : index
    %692 = vector.load %arg4[%c3_549, %c0_550, %c0_551] : memref<9x64x64xf32, #tpu.memory_space<vmem>>, vector<1x64x64xf32>
    %693 = vector.shape_cast %692 : vector<1x64x64xf32> to vector<64x64xf32>
    %cst_552 = arith.constant dense<0.000000e+00> : vector<4x64xf32>
    %694 = tpu.matmul %691, %693, %cst_552 {dimension_numbers = #tpu.dot_dimension_numbers<[1], [0], [0], [1], [0, 0, 1, 1], [], []>} : vector<4x64xf32>, vector<64x64xf32>, vector<4x64xf32> -> vector<4x64xf32>
    %695 = arith.addf %688, %694 : vector<4x64xf32>
    %696 = vector.extract_strided_slice %690 {offsets = [1, 0], sizes = [4, 64], strides = [1, 1]} : vector<6x64xf32> to vector<4x64xf32>
    %c4_553 = arith.constant 4 : index
    %c0_554 = arith.constant 0 : index
    %c0_555 = arith.constant 0 : index
    %697 = vector.load %arg4[%c4_553, %c0_554, %c0_555] : memref<9x64x64xf32, #tpu.memory_space<vmem>>, vector<1x64x64xf32>
    %698 = vector.shape_cast %697 : vector<1x64x64xf32> to vector<64x64xf32>
    %cst_556 = arith.constant dense<0.000000e+00> : vector<4x64xf32>
    %699 = tpu.matmul %696, %698, %cst_556 {dimension_numbers = #tpu.dot_dimension_numbers<[1], [0], [0], [1], [0, 0, 1, 1], [], []>} : vector<4x64xf32>, vector<64x64xf32>, vector<4x64xf32> -> vector<4x64xf32>
    %700 = arith.addf %695, %699 : vector<4x64xf32>
    %701 = vector.extract_strided_slice %690 {offsets = [2, 0], sizes = [4, 64], strides = [1, 1]} : vector<6x64xf32> to vector<4x64xf32>
    %c5_557 = arith.constant 5 : index
    %c0_558 = arith.constant 0 : index
    %c0_559 = arith.constant 0 : index
    %702 = vector.load %arg4[%c5_557, %c0_558, %c0_559] : memref<9x64x64xf32, #tpu.memory_space<vmem>>, vector<1x64x64xf32>
    %703 = vector.shape_cast %702 : vector<1x64x64xf32> to vector<64x64xf32>
    %cst_560 = arith.constant dense<0.000000e+00> : vector<4x64xf32>
    %704 = tpu.matmul %701, %703, %cst_560 {dimension_numbers = #tpu.dot_dimension_numbers<[1], [0], [0], [1], [0, 0, 1, 1], [], []>} : vector<4x64xf32>, vector<64x64xf32>, vector<4x64xf32> -> vector<4x64xf32>
    %705 = arith.addf %700, %704 : vector<4x64xf32>
    %c10_561 = arith.constant 10 : index
    %c0_562 = arith.constant 0 : index
    %c0_563 = arith.constant 0 : index
    %706 = vector.load %arg14[%c10_561, %c0_562, %c0_563] : memref<12x6x64xf32, #tpu.memory_space<vmem>>, vector<1x6x64xf32>
    %707 = vector.shape_cast %706 : vector<1x6x64xf32> to vector<6x64xf32>
    %708 = vector.extract_strided_slice %707 {offsets = [0, 0], sizes = [4, 64], strides = [1, 1]} : vector<6x64xf32> to vector<4x64xf32>
    %c6_564 = arith.constant 6 : index
    %c0_565 = arith.constant 0 : index
    %c0_566 = arith.constant 0 : index
    %709 = vector.load %arg4[%c6_564, %c0_565, %c0_566] : memref<9x64x64xf32, #tpu.memory_space<vmem>>, vector<1x64x64xf32>
    %710 = vector.shape_cast %709 : vector<1x64x64xf32> to vector<64x64xf32>
    %cst_567 = arith.constant dense<0.000000e+00> : vector<4x64xf32>
    %711 = tpu.matmul %708, %710, %cst_567 {dimension_numbers = #tpu.dot_dimension_numbers<[1], [0], [0], [1], [0, 0, 1, 1], [], []>} : vector<4x64xf32>, vector<64x64xf32>, vector<4x64xf32> -> vector<4x64xf32>
    %712 = arith.addf %705, %711 : vector<4x64xf32>
    %713 = vector.extract_strided_slice %707 {offsets = [1, 0], sizes = [4, 64], strides = [1, 1]} : vector<6x64xf32> to vector<4x64xf32>
    %c7_568 = arith.constant 7 : index
    %c0_569 = arith.constant 0 : index
    %c0_570 = arith.constant 0 : index
    %714 = vector.load %arg4[%c7_568, %c0_569, %c0_570] : memref<9x64x64xf32, #tpu.memory_space<vmem>>, vector<1x64x64xf32>
    %715 = vector.shape_cast %714 : vector<1x64x64xf32> to vector<64x64xf32>
    %cst_571 = arith.constant dense<0.000000e+00> : vector<4x64xf32>
    %716 = tpu.matmul %713, %715, %cst_571 {dimension_numbers = #tpu.dot_dimension_numbers<[1], [0], [0], [1], [0, 0, 1, 1], [], []>} : vector<4x64xf32>, vector<64x64xf32>, vector<4x64xf32> -> vector<4x64xf32>
    %717 = arith.addf %712, %716 : vector<4x64xf32>
    %718 = vector.extract_strided_slice %707 {offsets = [2, 0], sizes = [4, 64], strides = [1, 1]} : vector<6x64xf32> to vector<4x64xf32>
    %c8_572 = arith.constant 8 : index
    %c0_573 = arith.constant 0 : index
    %c0_574 = arith.constant 0 : index
    %719 = vector.load %arg4[%c8_572, %c0_573, %c0_574] : memref<9x64x64xf32, #tpu.memory_space<vmem>>, vector<1x64x64xf32>
    %720 = vector.shape_cast %719 : vector<1x64x64xf32> to vector<64x64xf32>
    %cst_575 = arith.constant dense<0.000000e+00> : vector<4x64xf32>
    %721 = tpu.matmul %718, %720, %cst_575 {dimension_numbers = #tpu.dot_dimension_numbers<[1], [0], [0], [1], [0, 0, 1, 1], [], []>} : vector<4x64xf32>, vector<64x64xf32>, vector<4x64xf32> -> vector<4x64xf32>
    %722 = arith.addf %717, %721 : vector<4x64xf32>
    %723 = vector.broadcast %8 : vector<1x64xf32> to vector<4x64xf32>
    %724 = arith.mulf %722, %723 : vector<4x64xf32>
    %725 = vector.broadcast %9 : vector<1x64xf32> to vector<4x64xf32>
    %726 = arith.addf %724, %725 : vector<4x64xf32>
    %cst_576 = arith.constant 0.000000e+00 : f32
    %727 = vector.broadcast %cst_576 : f32 to vector<4x64xf32>
    %728 = arith.maximumf %726, %727 : vector<4x64xf32>
    %c9_577 = arith.constant 9 : index
    %c1_578 = arith.constant 1 : index
    %c0_579 = arith.constant 0 : index
    %729 = vector.load %arg15[%c9_577, %c1_578, %c0_579] : memref<12x6x64xf32, #tpu.memory_space<vmem>>, vector<1x4x64xf32>
    %730 = vector.shape_cast %729 : vector<1x4x64xf32> to vector<4x64xf32>
    %731 = vector.shape_cast %728 : vector<4x64xf32> to vector<1x4x64xf32>
    tpu.vector_store %arg15[%c9_577, %c1_578, %c0_579], %731 {strides = array<i32>} : memref<12x6x64xf32, #tpu.memory_space<vmem>>, vector<1x4x64xf32>,
    %cst_580 = arith.constant 0.000000e+00 : f32
    %732 = vector.broadcast %cst_580 : f32 to vector<4x64xf32>
    %c9_581 = arith.constant 9 : index
    %c0_582 = arith.constant 0 : index
    %c0_583 = arith.constant 0 : index
    %733 = vector.load %arg14[%c9_581, %c0_582, %c0_583] : memref<12x6x64xf32, #tpu.memory_space<vmem>>, vector<1x6x64xf32>
    %734 = vector.shape_cast %733 : vector<1x6x64xf32> to vector<6x64xf32>
    %735 = vector.extract_strided_slice %734 {offsets = [0, 0], sizes = [4, 64], strides = [1, 1]} : vector<6x64xf32> to vector<4x64xf32>
    %c0_584 = arith.constant 0 : index
    %c0_585 = arith.constant 0 : index
    %c0_586 = arith.constant 0 : index
    %736 = vector.load %arg4[%c0_584, %c0_585, %c0_586] : memref<9x64x64xf32, #tpu.memory_space<vmem>>, vector<1x64x64xf32>
    %737 = vector.shape_cast %736 : vector<1x64x64xf32> to vector<64x64xf32>
    %cst_587 = arith.constant dense<0.000000e+00> : vector<4x64xf32>
    %738 = tpu.matmul %735, %737, %cst_587 {dimension_numbers = #tpu.dot_dimension_numbers<[1], [0], [0], [1], [0, 0, 1, 1], [], []>} : vector<4x64xf32>, vector<64x64xf32>, vector<4x64xf32> -> vector<4x64xf32>
    %739 = arith.addf %732, %738 : vector<4x64xf32>
    %740 = vector.extract_strided_slice %734 {offsets = [1, 0], sizes = [4, 64], strides = [1, 1]} : vector<6x64xf32> to vector<4x64xf32>
    %c1_588 = arith.constant 1 : index
    %c0_589 = arith.constant 0 : index
    %c0_590 = arith.constant 0 : index
    %741 = vector.load %arg4[%c1_588, %c0_589, %c0_590] : memref<9x64x64xf32, #tpu.memory_space<vmem>>, vector<1x64x64xf32>
    %742 = vector.shape_cast %741 : vector<1x64x64xf32> to vector<64x64xf32>
    %cst_591 = arith.constant dense<0.000000e+00> : vector<4x64xf32>
    %743 = tpu.matmul %740, %742, %cst_591 {dimension_numbers = #tpu.dot_dimension_numbers<[1], [0], [0], [1], [0, 0, 1, 1], [], []>} : vector<4x64xf32>, vector<64x64xf32>, vector<4x64xf32> -> vector<4x64xf32>
    %744 = arith.addf %739, %743 : vector<4x64xf32>
    %745 = vector.extract_strided_slice %734 {offsets = [2, 0], sizes = [4, 64], strides = [1, 1]} : vector<6x64xf32> to vector<4x64xf32>
    %c2_592 = arith.constant 2 : index
    %c0_593 = arith.constant 0 : index
    %c0_594 = arith.constant 0 : index
    %746 = vector.load %arg4[%c2_592, %c0_593, %c0_594] : memref<9x64x64xf32, #tpu.memory_space<vmem>>, vector<1x64x64xf32>
    %747 = vector.shape_cast %746 : vector<1x64x64xf32> to vector<64x64xf32>
    %cst_595 = arith.constant dense<0.000000e+00> : vector<4x64xf32>
    %748 = tpu.matmul %745, %747, %cst_595 {dimension_numbers = #tpu.dot_dimension_numbers<[1], [0], [0], [1], [0, 0, 1, 1], [], []>} : vector<4x64xf32>, vector<64x64xf32>, vector<4x64xf32> -> vector<4x64xf32>
    %749 = arith.addf %744, %748 : vector<4x64xf32>
    %c10_596 = arith.constant 10 : index
    %c0_597 = arith.constant 0 : index
    %c0_598 = arith.constant 0 : index
    %750 = vector.load %arg14[%c10_596, %c0_597, %c0_598] : memref<12x6x64xf32, #tpu.memory_space<vmem>>, vector<1x6x64xf32>
    %751 = vector.shape_cast %750 : vector<1x6x64xf32> to vector<6x64xf32>
    %752 = vector.extract_strided_slice %751 {offsets = [0, 0], sizes = [4, 64], strides = [1, 1]} : vector<6x64xf32> to vector<4x64xf32>
    %c3_599 = arith.constant 3 : index
    %c0_600 = arith.constant 0 : index
    %c0_601 = arith.constant 0 : index
    %753 = vector.load %arg4[%c3_599, %c0_600, %c0_601] : memref<9x64x64xf32, #tpu.memory_space<vmem>>, vector<1x64x64xf32>
    %754 = vector.shape_cast %753 : vector<1x64x64xf32> to vector<64x64xf32>
    %cst_602 = arith.constant dense<0.000000e+00> : vector<4x64xf32>
    %755 = tpu.matmul %752, %754, %cst_602 {dimension_numbers = #tpu.dot_dimension_numbers<[1], [0], [0], [1], [0, 0, 1, 1], [], []>} : vector<4x64xf32>, vector<64x64xf32>, vector<4x64xf32> -> vector<4x64xf32>
    %756 = arith.addf %749, %755 : vector<4x64xf32>
    %757 = vector.extract_strided_slice %751 {offsets = [1, 0], sizes = [4, 64], strides = [1, 1]} : vector<6x64xf32> to vector<4x64xf32>
    %c4_603 = arith.constant 4 : index
    %c0_604 = arith.constant 0 : index
    %c0_605 = arith.constant 0 : index
    %758 = vector.load %arg4[%c4_603, %c0_604, %c0_605] : memref<9x64x64xf32, #tpu.memory_space<vmem>>, vector<1x64x64xf32>
    %759 = vector.shape_cast %758 : vector<1x64x64xf32> to vector<64x64xf32>
    %cst_606 = arith.constant dense<0.000000e+00> : vector<4x64xf32>
    %760 = tpu.matmul %757, %759, %cst_606 {dimension_numbers = #tpu.dot_dimension_numbers<[1], [0], [0], [1], [0, 0, 1, 1], [], []>} : vector<4x64xf32>, vector<64x64xf32>, vector<4x64xf32> -> vector<4x64xf32>
    %761 = arith.addf %756, %760 : vector<4x64xf32>
    %762 = vector.extract_strided_slice %751 {offsets = [2, 0], sizes = [4, 64], strides = [1, 1]} : vector<6x64xf32> to vector<4x64xf32>
    %c5_607 = arith.constant 5 : index
    %c0_608 = arith.constant 0 : index
    %c0_609 = arith.constant 0 : index
    %763 = vector.load %arg4[%c5_607, %c0_608, %c0_609] : memref<9x64x64xf32, #tpu.memory_space<vmem>>, vector<1x64x64xf32>
    %764 = vector.shape_cast %763 : vector<1x64x64xf32> to vector<64x64xf32>
    %cst_610 = arith.constant dense<0.000000e+00> : vector<4x64xf32>
    %765 = tpu.matmul %762, %764, %cst_610 {dimension_numbers = #tpu.dot_dimension_numbers<[1], [0], [0], [1], [0, 0, 1, 1], [], []>} : vector<4x64xf32>, vector<64x64xf32>, vector<4x64xf32> -> vector<4x64xf32>
    %766 = arith.addf %761, %765 : vector<4x64xf32>
    %c11_611 = arith.constant 11 : index
    %c0_612 = arith.constant 0 : index
    %c0_613 = arith.constant 0 : index
    %767 = vector.load %arg14[%c11_611, %c0_612, %c0_613] : memref<12x6x64xf32, #tpu.memory_space<vmem>>, vector<1x6x64xf32>
    %768 = vector.shape_cast %767 : vector<1x6x64xf32> to vector<6x64xf32>
    %769 = vector.extract_strided_slice %768 {offsets = [0, 0], sizes = [4, 64], strides = [1, 1]} : vector<6x64xf32> to vector<4x64xf32>
    %c6_614 = arith.constant 6 : index
    %c0_615 = arith.constant 0 : index
    %c0_616 = arith.constant 0 : index
    %770 = vector.load %arg4[%c6_614, %c0_615, %c0_616] : memref<9x64x64xf32, #tpu.memory_space<vmem>>, vector<1x64x64xf32>
    %771 = vector.shape_cast %770 : vector<1x64x64xf32> to vector<64x64xf32>
    %cst_617 = arith.constant dense<0.000000e+00> : vector<4x64xf32>
    %772 = tpu.matmul %769, %771, %cst_617 {dimension_numbers = #tpu.dot_dimension_numbers<[1], [0], [0], [1], [0, 0, 1, 1], [], []>} : vector<4x64xf32>, vector<64x64xf32>, vector<4x64xf32> -> vector<4x64xf32>
    %773 = arith.addf %766, %772 : vector<4x64xf32>
    %774 = vector.extract_strided_slice %768 {offsets = [1, 0], sizes = [4, 64], strides = [1, 1]} : vector<6x64xf32> to vector<4x64xf32>
    %c7_618 = arith.constant 7 : index
    %c0_619 = arith.constant 0 : index
    %c0_620 = arith.constant 0 : index
    %775 = vector.load %arg4[%c7_618, %c0_619, %c0_620] : memref<9x64x64xf32, #tpu.memory_space<vmem>>, vector<1x64x64xf32>
    %776 = vector.shape_cast %775 : vector<1x64x64xf32> to vector<64x64xf32>
    %cst_621 = arith.constant dense<0.000000e+00> : vector<4x64xf32>
    %777 = tpu.matmul %774, %776, %cst_621 {dimension_numbers = #tpu.dot_dimension_numbers<[1], [0], [0], [1], [0, 0, 1, 1], [], []>} : vector<4x64xf32>, vector<64x64xf32>, vector<4x64xf32> -> vector<4x64xf32>
    %778 = arith.addf %773, %777 : vector<4x64xf32>
    %779 = vector.extract_strided_slice %768 {offsets = [2, 0], sizes = [4, 64], strides = [1, 1]} : vector<6x64xf32> to vector<4x64xf32>
    %c8_622 = arith.constant 8 : index
    %c0_623 = arith.constant 0 : index
    %c0_624 = arith.constant 0 : index
    %780 = vector.load %arg4[%c8_622, %c0_623, %c0_624] : memref<9x64x64xf32, #tpu.memory_space<vmem>>, vector<1x64x64xf32>
    %781 = vector.shape_cast %780 : vector<1x64x64xf32> to vector<64x64xf32>
    %cst_625 = arith.constant dense<0.000000e+00> : vector<4x64xf32>
    %782 = tpu.matmul %779, %781, %cst_625 {dimension_numbers = #tpu.dot_dimension_numbers<[1], [0], [0], [1], [0, 0, 1, 1], [], []>} : vector<4x64xf32>, vector<64x64xf32>, vector<4x64xf32> -> vector<4x64xf32>
    %783 = arith.addf %778, %782 : vector<4x64xf32>
    %784 = vector.broadcast %8 : vector<1x64xf32> to vector<4x64xf32>
    %785 = arith.mulf %783, %784 : vector<4x64xf32>
    %786 = vector.broadcast %9 : vector<1x64xf32> to vector<4x64xf32>
    %787 = arith.addf %785, %786 : vector<4x64xf32>
    %cst_626 = arith.constant 0.000000e+00 : f32
    %788 = vector.broadcast %cst_626 : f32 to vector<4x64xf32>
    %789 = arith.maximumf %787, %788 : vector<4x64xf32>
    %c10_627 = arith.constant 10 : index
    %c1_628 = arith.constant 1 : index
    %c0_629 = arith.constant 0 : index
    %790 = vector.load %arg15[%c10_627, %c1_628, %c0_629] : memref<12x6x64xf32, #tpu.memory_space<vmem>>, vector<1x4x64xf32>
    %791 = vector.shape_cast %790 : vector<1x4x64xf32> to vector<4x64xf32>
    %792 = vector.shape_cast %789 : vector<4x64xf32> to vector<1x4x64xf32>
    tpu.vector_store %arg15[%c10_627, %c1_628, %c0_629], %792 {strides = array<i32>} : memref<12x6x64xf32, #tpu.memory_space<vmem>>, vector<1x4x64xf32>,
    %c0_630 = arith.constant 0 : index
    %c0_631 = arith.constant 0 : index
    %793 = vector.load %arg10[%c0_630, %c0_631] : memref<64x10xf32, #tpu.memory_space<vmem>>, vector<64x10xf32>
    %c0_632 = arith.constant 0 : index
    %c0_633 = arith.constant 0 : index
    %794 = vector.load %arg11[%c0_632, %c0_633] : memref<1x10xf32, #tpu.memory_space<vmem>>, vector<1x10xf32>
    %cst_634 = arith.constant 0.000000e+00 : f32
    %795 = vector.broadcast %cst_634 : f32 to vector<1x64xf32>
    %cst_635 = arith.constant 0.000000e+00 : f32
    %796 = vector.broadcast %cst_635 : f32 to vector<4x64xf32>
    %c0_636 = arith.constant 0 : index
    %c0_637 = arith.constant 0 : index
    %c0_638 = arith.constant 0 : index
    %797 = vector.load %arg15[%c0_636, %c0_637, %c0_638] : memref<12x6x64xf32, #tpu.memory_space<vmem>>, vector<1x6x64xf32>
    %798 = vector.shape_cast %797 : vector<1x6x64xf32> to vector<6x64xf32>
    %799 = vector.extract_strided_slice %798 {offsets = [0, 0], sizes = [4, 64], strides = [1, 1]} : vector<6x64xf32> to vector<4x64xf32>
    %c0_639 = arith.constant 0 : index
    %c0_640 = arith.constant 0 : index
    %c0_641 = arith.constant 0 : index
    %800 = vector.load %arg7[%c0_639, %c0_640, %c0_641] : memref<9x64x64xf32, #tpu.memory_space<vmem>>, vector<1x64x64xf32>
    %801 = vector.shape_cast %800 : vector<1x64x64xf32> to vector<64x64xf32>
    %cst_642 = arith.constant dense<0.000000e+00> : vector<4x64xf32>
    %802 = tpu.matmul %799, %801, %cst_642 {dimension_numbers = #tpu.dot_dimension_numbers<[1], [0], [0], [1], [0, 0, 1, 1], [], []>} : vector<4x64xf32>, vector<64x64xf32>, vector<4x64xf32> -> vector<4x64xf32>
    %803 = arith.addf %796, %802 : vector<4x64xf32>
    %804 = vector.extract_strided_slice %798 {offsets = [1, 0], sizes = [4, 64], strides = [1, 1]} : vector<6x64xf32> to vector<4x64xf32>
    %c1_643 = arith.constant 1 : index
    %c0_644 = arith.constant 0 : index
    %c0_645 = arith.constant 0 : index
    %805 = vector.load %arg7[%c1_643, %c0_644, %c0_645] : memref<9x64x64xf32, #tpu.memory_space<vmem>>, vector<1x64x64xf32>
    %806 = vector.shape_cast %805 : vector<1x64x64xf32> to vector<64x64xf32>
    %cst_646 = arith.constant dense<0.000000e+00> : vector<4x64xf32>
    %807 = tpu.matmul %804, %806, %cst_646 {dimension_numbers = #tpu.dot_dimension_numbers<[1], [0], [0], [1], [0, 0, 1, 1], [], []>} : vector<4x64xf32>, vector<64x64xf32>, vector<4x64xf32> -> vector<4x64xf32>
    %808 = arith.addf %803, %807 : vector<4x64xf32>
    %809 = vector.extract_strided_slice %798 {offsets = [2, 0], sizes = [4, 64], strides = [1, 1]} : vector<6x64xf32> to vector<4x64xf32>
    %c2_647 = arith.constant 2 : index
    %c0_648 = arith.constant 0 : index
    %c0_649 = arith.constant 0 : index
    %810 = vector.load %arg7[%c2_647, %c0_648, %c0_649] : memref<9x64x64xf32, #tpu.memory_space<vmem>>, vector<1x64x64xf32>
    %811 = vector.shape_cast %810 : vector<1x64x64xf32> to vector<64x64xf32>
    %cst_650 = arith.constant dense<0.000000e+00> : vector<4x64xf32>
    %812 = tpu.matmul %809, %811, %cst_650 {dimension_numbers = #tpu.dot_dimension_numbers<[1], [0], [0], [1], [0, 0, 1, 1], [], []>} : vector<4x64xf32>, vector<64x64xf32>, vector<4x64xf32> -> vector<4x64xf32>
    %813 = arith.addf %808, %812 : vector<4x64xf32>
    %c1_651 = arith.constant 1 : index
    %c0_652 = arith.constant 0 : index
    %c0_653 = arith.constant 0 : index
    %814 = vector.load %arg15[%c1_651, %c0_652, %c0_653] : memref<12x6x64xf32, #tpu.memory_space<vmem>>, vector<1x6x64xf32>
    %815 = vector.shape_cast %814 : vector<1x6x64xf32> to vector<6x64xf32>
    %816 = vector.extract_strided_slice %815 {offsets = [0, 0], sizes = [4, 64], strides = [1, 1]} : vector<6x64xf32> to vector<4x64xf32>
    %c3_654 = arith.constant 3 : index
    %c0_655 = arith.constant 0 : index
    %c0_656 = arith.constant 0 : index
    %817 = vector.load %arg7[%c3_654, %c0_655, %c0_656] : memref<9x64x64xf32, #tpu.memory_space<vmem>>, vector<1x64x64xf32>
    %818 = vector.shape_cast %817 : vector<1x64x64xf32> to vector<64x64xf32>
    %cst_657 = arith.constant dense<0.000000e+00> : vector<4x64xf32>
    %819 = tpu.matmul %816, %818, %cst_657 {dimension_numbers = #tpu.dot_dimension_numbers<[1], [0], [0], [1], [0, 0, 1, 1], [], []>} : vector<4x64xf32>, vector<64x64xf32>, vector<4x64xf32> -> vector<4x64xf32>
    %820 = arith.addf %813, %819 : vector<4x64xf32>
    %821 = vector.extract_strided_slice %815 {offsets = [1, 0], sizes = [4, 64], strides = [1, 1]} : vector<6x64xf32> to vector<4x64xf32>
    %c4_658 = arith.constant 4 : index
    %c0_659 = arith.constant 0 : index
    %c0_660 = arith.constant 0 : index
    %822 = vector.load %arg7[%c4_658, %c0_659, %c0_660] : memref<9x64x64xf32, #tpu.memory_space<vmem>>, vector<1x64x64xf32>
    %823 = vector.shape_cast %822 : vector<1x64x64xf32> to vector<64x64xf32>
    %cst_661 = arith.constant dense<0.000000e+00> : vector<4x64xf32>
    %824 = tpu.matmul %821, %823, %cst_661 {dimension_numbers = #tpu.dot_dimension_numbers<[1], [0], [0], [1], [0, 0, 1, 1], [], []>} : vector<4x64xf32>, vector<64x64xf32>, vector<4x64xf32> -> vector<4x64xf32>
    %825 = arith.addf %820, %824 : vector<4x64xf32>
    %826 = vector.extract_strided_slice %815 {offsets = [2, 0], sizes = [4, 64], strides = [1, 1]} : vector<6x64xf32> to vector<4x64xf32>
    %c5_662 = arith.constant 5 : index
    %c0_663 = arith.constant 0 : index
    %c0_664 = arith.constant 0 : index
    %827 = vector.load %arg7[%c5_662, %c0_663, %c0_664] : memref<9x64x64xf32, #tpu.memory_space<vmem>>, vector<1x64x64xf32>
    %828 = vector.shape_cast %827 : vector<1x64x64xf32> to vector<64x64xf32>
    %cst_665 = arith.constant dense<0.000000e+00> : vector<4x64xf32>
    %829 = tpu.matmul %826, %828, %cst_665 {dimension_numbers = #tpu.dot_dimension_numbers<[1], [0], [0], [1], [0, 0, 1, 1], [], []>} : vector<4x64xf32>, vector<64x64xf32>, vector<4x64xf32> -> vector<4x64xf32>
    %830 = arith.addf %825, %829 : vector<4x64xf32>
    %c2_666 = arith.constant 2 : index
    %c0_667 = arith.constant 0 : index
    %c0_668 = arith.constant 0 : index
    %831 = vector.load %arg15[%c2_666, %c0_667, %c0_668] : memref<12x6x64xf32, #tpu.memory_space<vmem>>, vector<1x6x64xf32>
    %832 = vector.shape_cast %831 : vector<1x6x64xf32> to vector<6x64xf32>
    %833 = vector.extract_strided_slice %832 {offsets = [0, 0], sizes = [4, 64], strides = [1, 1]} : vector<6x64xf32> to vector<4x64xf32>
    %c6_669 = arith.constant 6 : index
    %c0_670 = arith.constant 0 : index
    %c0_671 = arith.constant 0 : index
    %834 = vector.load %arg7[%c6_669, %c0_670, %c0_671] : memref<9x64x64xf32, #tpu.memory_space<vmem>>, vector<1x64x64xf32>
    %835 = vector.shape_cast %834 : vector<1x64x64xf32> to vector<64x64xf32>
    %cst_672 = arith.constant dense<0.000000e+00> : vector<4x64xf32>
    %836 = tpu.matmul %833, %835, %cst_672 {dimension_numbers = #tpu.dot_dimension_numbers<[1], [0], [0], [1], [0, 0, 1, 1], [], []>} : vector<4x64xf32>, vector<64x64xf32>, vector<4x64xf32> -> vector<4x64xf32>
    %837 = arith.addf %830, %836 : vector<4x64xf32>
    %838 = vector.extract_strided_slice %832 {offsets = [1, 0], sizes = [4, 64], strides = [1, 1]} : vector<6x64xf32> to vector<4x64xf32>
    %c7_673 = arith.constant 7 : index
    %c0_674 = arith.constant 0 : index
    %c0_675 = arith.constant 0 : index
    %839 = vector.load %arg7[%c7_673, %c0_674, %c0_675] : memref<9x64x64xf32, #tpu.memory_space<vmem>>, vector<1x64x64xf32>
    %840 = vector.shape_cast %839 : vector<1x64x64xf32> to vector<64x64xf32>
    %cst_676 = arith.constant dense<0.000000e+00> : vector<4x64xf32>
    %841 = tpu.matmul %838, %840, %cst_676 {dimension_numbers = #tpu.dot_dimension_numbers<[1], [0], [0], [1], [0, 0, 1, 1], [], []>} : vector<4x64xf32>, vector<64x64xf32>, vector<4x64xf32> -> vector<4x64xf32>
    %842 = arith.addf %837, %841 : vector<4x64xf32>
    %843 = vector.extract_strided_slice %832 {offsets = [2, 0], sizes = [4, 64], strides = [1, 1]} : vector<6x64xf32> to vector<4x64xf32>
    %c8_677 = arith.constant 8 : index
    %c0_678 = arith.constant 0 : index
    %c0_679 = arith.constant 0 : index
    %844 = vector.load %arg7[%c8_677, %c0_678, %c0_679] : memref<9x64x64xf32, #tpu.memory_space<vmem>>, vector<1x64x64xf32>
    %845 = vector.shape_cast %844 : vector<1x64x64xf32> to vector<64x64xf32>
    %cst_680 = arith.constant dense<0.000000e+00> : vector<4x64xf32>
    %846 = tpu.matmul %843, %845, %cst_680 {dimension_numbers = #tpu.dot_dimension_numbers<[1], [0], [0], [1], [0, 0, 1, 1], [], []>} : vector<4x64xf32>, vector<64x64xf32>, vector<4x64xf32> -> vector<4x64xf32>
    %847 = arith.addf %842, %846 : vector<4x64xf32>
    %c1_681 = arith.constant 1 : index
    %c1_682 = arith.constant 1 : index
    %c0_683 = arith.constant 0 : index
    %848 = vector.load %arg14[%c1_681, %c1_682, %c0_683] : memref<12x6x64xf32, #tpu.memory_space<vmem>>, vector<1x4x64xf32>
    %849 = vector.shape_cast %848 : vector<1x4x64xf32> to vector<4x64xf32>
    %850 = vector.broadcast %10 : vector<1x64xf32> to vector<4x64xf32>
    %851 = arith.mulf %847, %850 : vector<4x64xf32>
    %852 = vector.broadcast %11 : vector<1x64xf32> to vector<4x64xf32>
    %853 = arith.addf %851, %852 : vector<4x64xf32>
    %854 = arith.addf %853, %849 : vector<4x64xf32>
    %cst_684 = arith.constant 0.000000e+00 : f32
    %855 = vector.broadcast %cst_684 : f32 to vector<4x64xf32>
    %856 = arith.maximumf %854, %855 : vector<4x64xf32>
    %cst_685 = arith.constant dense<0.000000e+00> : vector<64xf32>
    %857 = vector.multi_reduction <add>, %856, %cst_685 [0] : vector<4x64xf32> to vector<64xf32>
    %858 = vector.shape_cast %857 : vector<64xf32> to vector<1x64xf32>
    %859 = arith.addf %795, %858 : vector<1x64xf32>
    %cst_686 = arith.constant 0.000000e+00 : f32
    %860 = vector.broadcast %cst_686 : f32 to vector<4x64xf32>
    %c1_687 = arith.constant 1 : index
    %c0_688 = arith.constant 0 : index
    %c0_689 = arith.constant 0 : index
    %861 = vector.load %arg15[%c1_687, %c0_688, %c0_689] : memref<12x6x64xf32, #tpu.memory_space<vmem>>, vector<1x6x64xf32>
    %862 = vector.shape_cast %861 : vector<1x6x64xf32> to vector<6x64xf32>
    %863 = vector.extract_strided_slice %862 {offsets = [0, 0], sizes = [4, 64], strides = [1, 1]} : vector<6x64xf32> to vector<4x64xf32>
    %c0_690 = arith.constant 0 : index
    %c0_691 = arith.constant 0 : index
    %c0_692 = arith.constant 0 : index
    %864 = vector.load %arg7[%c0_690, %c0_691, %c0_692] : memref<9x64x64xf32, #tpu.memory_space<vmem>>, vector<1x64x64xf32>
    %865 = vector.shape_cast %864 : vector<1x64x64xf32> to vector<64x64xf32>
    %cst_693 = arith.constant dense<0.000000e+00> : vector<4x64xf32>
    %866 = tpu.matmul %863, %865, %cst_693 {dimension_numbers = #tpu.dot_dimension_numbers<[1], [0], [0], [1], [0, 0, 1, 1], [], []>} : vector<4x64xf32>, vector<64x64xf32>, vector<4x64xf32> -> vector<4x64xf32>
    %867 = arith.addf %860, %866 : vector<4x64xf32>
    %868 = vector.extract_strided_slice %862 {offsets = [1, 0], sizes = [4, 64], strides = [1, 1]} : vector<6x64xf32> to vector<4x64xf32>
    %c1_694 = arith.constant 1 : index
    %c0_695 = arith.constant 0 : index
    %c0_696 = arith.constant 0 : index
    %869 = vector.load %arg7[%c1_694, %c0_695, %c0_696] : memref<9x64x64xf32, #tpu.memory_space<vmem>>, vector<1x64x64xf32>
    %870 = vector.shape_cast %869 : vector<1x64x64xf32> to vector<64x64xf32>
    %cst_697 = arith.constant dense<0.000000e+00> : vector<4x64xf32>
    %871 = tpu.matmul %868, %870, %cst_697 {dimension_numbers = #tpu.dot_dimension_numbers<[1], [0], [0], [1], [0, 0, 1, 1], [], []>} : vector<4x64xf32>, vector<64x64xf32>, vector<4x64xf32> -> vector<4x64xf32>
    %872 = arith.addf %867, %871 : vector<4x64xf32>
    %873 = vector.extract_strided_slice %862 {offsets = [2, 0], sizes = [4, 64], strides = [1, 1]} : vector<6x64xf32> to vector<4x64xf32>
    %c2_698 = arith.constant 2 : index
    %c0_699 = arith.constant 0 : index
    %c0_700 = arith.constant 0 : index
    %874 = vector.load %arg7[%c2_698, %c0_699, %c0_700] : memref<9x64x64xf32, #tpu.memory_space<vmem>>, vector<1x64x64xf32>
    %875 = vector.shape_cast %874 : vector<1x64x64xf32> to vector<64x64xf32>
    %cst_701 = arith.constant dense<0.000000e+00> : vector<4x64xf32>
    %876 = tpu.matmul %873, %875, %cst_701 {dimension_numbers = #tpu.dot_dimension_numbers<[1], [0], [0], [1], [0, 0, 1, 1], [], []>} : vector<4x64xf32>, vector<64x64xf32>, vector<4x64xf32> -> vector<4x64xf32>
    %877 = arith.addf %872, %876 : vector<4x64xf32>
    %c2_702 = arith.constant 2 : index
    %c0_703 = arith.constant 0 : index
    %c0_704 = arith.constant 0 : index
    %878 = vector.load %arg15[%c2_702, %c0_703, %c0_704] : memref<12x6x64xf32, #tpu.memory_space<vmem>>, vector<1x6x64xf32>
    %879 = vector.shape_cast %878 : vector<1x6x64xf32> to vector<6x64xf32>
    %880 = vector.extract_strided_slice %879 {offsets = [0, 0], sizes = [4, 64], strides = [1, 1]} : vector<6x64xf32> to vector<4x64xf32>
    %c3_705 = arith.constant 3 : index
    %c0_706 = arith.constant 0 : index
    %c0_707 = arith.constant 0 : index
    %881 = vector.load %arg7[%c3_705, %c0_706, %c0_707] : memref<9x64x64xf32, #tpu.memory_space<vmem>>, vector<1x64x64xf32>
    %882 = vector.shape_cast %881 : vector<1x64x64xf32> to vector<64x64xf32>
    %cst_708 = arith.constant dense<0.000000e+00> : vector<4x64xf32>
    %883 = tpu.matmul %880, %882, %cst_708 {dimension_numbers = #tpu.dot_dimension_numbers<[1], [0], [0], [1], [0, 0, 1, 1], [], []>} : vector<4x64xf32>, vector<64x64xf32>, vector<4x64xf32> -> vector<4x64xf32>
    %884 = arith.addf %877, %883 : vector<4x64xf32>
    %885 = vector.extract_strided_slice %879 {offsets = [1, 0], sizes = [4, 64], strides = [1, 1]} : vector<6x64xf32> to vector<4x64xf32>
    %c4_709 = arith.constant 4 : index
    %c0_710 = arith.constant 0 : index
    %c0_711 = arith.constant 0 : index
    %886 = vector.load %arg7[%c4_709, %c0_710, %c0_711] : memref<9x64x64xf32, #tpu.memory_space<vmem>>, vector<1x64x64xf32>
    %887 = vector.shape_cast %886 : vector<1x64x64xf32> to vector<64x64xf32>
    %cst_712 = arith.constant dense<0.000000e+00> : vector<4x64xf32>
    %888 = tpu.matmul %885, %887, %cst_712 {dimension_numbers = #tpu.dot_dimension_numbers<[1], [0], [0], [1], [0, 0, 1, 1], [], []>} : vector<4x64xf32>, vector<64x64xf32>, vector<4x64xf32> -> vector<4x64xf32>
    %889 = arith.addf %884, %888 : vector<4x64xf32>
    %890 = vector.extract_strided_slice %879 {offsets = [2, 0], sizes = [4, 64], strides = [1, 1]} : vector<6x64xf32> to vector<4x64xf32>
    %c5_713 = arith.constant 5 : index
    %c0_714 = arith.constant 0 : index
    %c0_715 = arith.constant 0 : index
    %891 = vector.load %arg7[%c5_713, %c0_714, %c0_715] : memref<9x64x64xf32, #tpu.memory_space<vmem>>, vector<1x64x64xf32>
    %892 = vector.shape_cast %891 : vector<1x64x64xf32> to vector<64x64xf32>
    %cst_716 = arith.constant dense<0.000000e+00> : vector<4x64xf32>
    %893 = tpu.matmul %890, %892, %cst_716 {dimension_numbers = #tpu.dot_dimension_numbers<[1], [0], [0], [1], [0, 0, 1, 1], [], []>} : vector<4x64xf32>, vector<64x64xf32>, vector<4x64xf32> -> vector<4x64xf32>
    %894 = arith.addf %889, %893 : vector<4x64xf32>
    %c3_717 = arith.constant 3 : index
    %c0_718 = arith.constant 0 : index
    %c0_719 = arith.constant 0 : index
    %895 = vector.load %arg15[%c3_717, %c0_718, %c0_719] : memref<12x6x64xf32, #tpu.memory_space<vmem>>, vector<1x6x64xf32>
    %896 = vector.shape_cast %895 : vector<1x6x64xf32> to vector<6x64xf32>
    %897 = vector.extract_strided_slice %896 {offsets = [0, 0], sizes = [4, 64], strides = [1, 1]} : vector<6x64xf32> to vector<4x64xf32>
    %c6_720 = arith.constant 6 : index
    %c0_721 = arith.constant 0 : index
    %c0_722 = arith.constant 0 : index
    %898 = vector.load %arg7[%c6_720, %c0_721, %c0_722] : memref<9x64x64xf32, #tpu.memory_space<vmem>>, vector<1x64x64xf32>
    %899 = vector.shape_cast %898 : vector<1x64x64xf32> to vector<64x64xf32>
    %cst_723 = arith.constant dense<0.000000e+00> : vector<4x64xf32>
    %900 = tpu.matmul %897, %899, %cst_723 {dimension_numbers = #tpu.dot_dimension_numbers<[1], [0], [0], [1], [0, 0, 1, 1], [], []>} : vector<4x64xf32>, vector<64x64xf32>, vector<4x64xf32> -> vector<4x64xf32>
    %901 = arith.addf %894, %900 : vector<4x64xf32>
    %902 = vector.extract_strided_slice %896 {offsets = [1, 0], sizes = [4, 64], strides = [1, 1]} : vector<6x64xf32> to vector<4x64xf32>
    %c7_724 = arith.constant 7 : index
    %c0_725 = arith.constant 0 : index
    %c0_726 = arith.constant 0 : index
    %903 = vector.load %arg7[%c7_724, %c0_725, %c0_726] : memref<9x64x64xf32, #tpu.memory_space<vmem>>, vector<1x64x64xf32>
    %904 = vector.shape_cast %903 : vector<1x64x64xf32> to vector<64x64xf32>
    %cst_727 = arith.constant dense<0.000000e+00> : vector<4x64xf32>
    %905 = tpu.matmul %902, %904, %cst_727 {dimension_numbers = #tpu.dot_dimension_numbers<[1], [0], [0], [1], [0, 0, 1, 1], [], []>} : vector<4x64xf32>, vector<64x64xf32>, vector<4x64xf32> -> vector<4x64xf32>
    %906 = arith.addf %901, %905 : vector<4x64xf32>
    %907 = vector.extract_strided_slice %896 {offsets = [2, 0], sizes = [4, 64], strides = [1, 1]} : vector<6x64xf32> to vector<4x64xf32>
    %c8_728 = arith.constant 8 : index
    %c0_729 = arith.constant 0 : index
    %c0_730 = arith.constant 0 : index
    %908 = vector.load %arg7[%c8_728, %c0_729, %c0_730] : memref<9x64x64xf32, #tpu.memory_space<vmem>>, vector<1x64x64xf32>
    %909 = vector.shape_cast %908 : vector<1x64x64xf32> to vector<64x64xf32>
    %cst_731 = arith.constant dense<0.000000e+00> : vector<4x64xf32>
    %910 = tpu.matmul %907, %909, %cst_731 {dimension_numbers = #tpu.dot_dimension_numbers<[1], [0], [0], [1], [0, 0, 1, 1], [], []>} : vector<4x64xf32>, vector<64x64xf32>, vector<4x64xf32> -> vector<4x64xf32>
    %911 = arith.addf %906, %910 : vector<4x64xf32>
    %c2_732 = arith.constant 2 : index
    %c1_733 = arith.constant 1 : index
    %c0_734 = arith.constant 0 : index
    %912 = vector.load %arg14[%c2_732, %c1_733, %c0_734] : memref<12x6x64xf32, #tpu.memory_space<vmem>>, vector<1x4x64xf32>
    %913 = vector.shape_cast %912 : vector<1x4x64xf32> to vector<4x64xf32>
    %914 = vector.broadcast %10 : vector<1x64xf32> to vector<4x64xf32>
    %915 = arith.mulf %911, %914 : vector<4x64xf32>
    %916 = vector.broadcast %11 : vector<1x64xf32> to vector<4x64xf32>
    %917 = arith.addf %915, %916 : vector<4x64xf32>
    %918 = arith.addf %917, %913 : vector<4x64xf32>
    %cst_735 = arith.constant 0.000000e+00 : f32
    %919 = vector.broadcast %cst_735 : f32 to vector<4x64xf32>
    %920 = arith.maximumf %918, %919 : vector<4x64xf32>
    %cst_736 = arith.constant dense<0.000000e+00> : vector<64xf32>
    %921 = vector.multi_reduction <add>, %920, %cst_736 [0] : vector<4x64xf32> to vector<64xf32>
    %922 = vector.shape_cast %921 : vector<64xf32> to vector<1x64xf32>
    %923 = arith.addf %859, %922 : vector<1x64xf32>
    %cst_737 = arith.constant 0.000000e+00 : f32
    %924 = vector.broadcast %cst_737 : f32 to vector<4x64xf32>
    %c2_738 = arith.constant 2 : index
    %c0_739 = arith.constant 0 : index
    %c0_740 = arith.constant 0 : index
    %925 = vector.load %arg15[%c2_738, %c0_739, %c0_740] : memref<12x6x64xf32, #tpu.memory_space<vmem>>, vector<1x6x64xf32>
    %926 = vector.shape_cast %925 : vector<1x6x64xf32> to vector<6x64xf32>
    %927 = vector.extract_strided_slice %926 {offsets = [0, 0], sizes = [4, 64], strides = [1, 1]} : vector<6x64xf32> to vector<4x64xf32>
    %c0_741 = arith.constant 0 : index
    %c0_742 = arith.constant 0 : index
    %c0_743 = arith.constant 0 : index
    %928 = vector.load %arg7[%c0_741, %c0_742, %c0_743] : memref<9x64x64xf32, #tpu.memory_space<vmem>>, vector<1x64x64xf32>
    %929 = vector.shape_cast %928 : vector<1x64x64xf32> to vector<64x64xf32>
    %cst_744 = arith.constant dense<0.000000e+00> : vector<4x64xf32>
    %930 = tpu.matmul %927, %929, %cst_744 {dimension_numbers = #tpu.dot_dimension_numbers<[1], [0], [0], [1], [0, 0, 1, 1], [], []>} : vector<4x64xf32>, vector<64x64xf32>, vector<4x64xf32> -> vector<4x64xf32>
    %931 = arith.addf %924, %930 : vector<4x64xf32>
    %932 = vector.extract_strided_slice %926 {offsets = [1, 0], sizes = [4, 64], strides = [1, 1]} : vector<6x64xf32> to vector<4x64xf32>
    %c1_745 = arith.constant 1 : index
    %c0_746 = arith.constant 0 : index
    %c0_747 = arith.constant 0 : index
    %933 = vector.load %arg7[%c1_745, %c0_746, %c0_747] : memref<9x64x64xf32, #tpu.memory_space<vmem>>, vector<1x64x64xf32>
    %934 = vector.shape_cast %933 : vector<1x64x64xf32> to vector<64x64xf32>
    %cst_748 = arith.constant dense<0.000000e+00> : vector<4x64xf32>
    %935 = tpu.matmul %932, %934, %cst_748 {dimension_numbers = #tpu.dot_dimension_numbers<[1], [0], [0], [1], [0, 0, 1, 1], [], []>} : vector<4x64xf32>, vector<64x64xf32>, vector<4x64xf32> -> vector<4x64xf32>
    %936 = arith.addf %931, %935 : vector<4x64xf32>
    %937 = vector.extract_strided_slice %926 {offsets = [2, 0], sizes = [4, 64], strides = [1, 1]} : vector<6x64xf32> to vector<4x64xf32>
    %c2_749 = arith.constant 2 : index
    %c0_750 = arith.constant 0 : index
    %c0_751 = arith.constant 0 : index
    %938 = vector.load %arg7[%c2_749, %c0_750, %c0_751] : memref<9x64x64xf32, #tpu.memory_space<vmem>>, vector<1x64x64xf32>
    %939 = vector.shape_cast %938 : vector<1x64x64xf32> to vector<64x64xf32>
    %cst_752 = arith.constant dense<0.000000e+00> : vector<4x64xf32>
    %940 = tpu.matmul %937, %939, %cst_752 {dimension_numbers = #tpu.dot_dimension_numbers<[1], [0], [0], [1], [0, 0, 1, 1], [], []>} : vector<4x64xf32>, vector<64x64xf32>, vector<4x64xf32> -> vector<4x64xf32>
    %941 = arith.addf %936, %940 : vector<4x64xf32>
    %c3_753 = arith.constant 3 : index
    %c0_754 = arith.constant 0 : index
    %c0_755 = arith.constant 0 : index
    %942 = vector.load %arg15[%c3_753, %c0_754, %c0_755] : memref<12x6x64xf32, #tpu.memory_space<vmem>>, vector<1x6x64xf32>
    %943 = vector.shape_cast %942 : vector<1x6x64xf32> to vector<6x64xf32>
    %944 = vector.extract_strided_slice %943 {offsets = [0, 0], sizes = [4, 64], strides = [1, 1]} : vector<6x64xf32> to vector<4x64xf32>
    %c3_756 = arith.constant 3 : index
    %c0_757 = arith.constant 0 : index
    %c0_758 = arith.constant 0 : index
    %945 = vector.load %arg7[%c3_756, %c0_757, %c0_758] : memref<9x64x64xf32, #tpu.memory_space<vmem>>, vector<1x64x64xf32>
    %946 = vector.shape_cast %945 : vector<1x64x64xf32> to vector<64x64xf32>
    %cst_759 = arith.constant dense<0.000000e+00> : vector<4x64xf32>
    %947 = tpu.matmul %944, %946, %cst_759 {dimension_numbers = #tpu.dot_dimension_numbers<[1], [0], [0], [1], [0, 0, 1, 1], [], []>} : vector<4x64xf32>, vector<64x64xf32>, vector<4x64xf32> -> vector<4x64xf32>
    %948 = arith.addf %941, %947 : vector<4x64xf32>
    %949 = vector.extract_strided_slice %943 {offsets = [1, 0], sizes = [4, 64], strides = [1, 1]} : vector<6x64xf32> to vector<4x64xf32>
    %c4_760 = arith.constant 4 : index
    %c0_761 = arith.constant 0 : index
    %c0_762 = arith.constant 0 : index
    %950 = vector.load %arg7[%c4_760, %c0_761, %c0_762] : memref<9x64x64xf32, #tpu.memory_space<vmem>>, vector<1x64x64xf32>
    %951 = vector.shape_cast %950 : vector<1x64x64xf32> to vector<64x64xf32>
    %cst_763 = arith.constant dense<0.000000e+00> : vector<4x64xf32>
    %952 = tpu.matmul %949, %951, %cst_763 {dimension_numbers = #tpu.dot_dimension_numbers<[1], [0], [0], [1], [0, 0, 1, 1], [], []>} : vector<4x64xf32>, vector<64x64xf32>, vector<4x64xf32> -> vector<4x64xf32>
    %953 = arith.addf %948, %952 : vector<4x64xf32>
    %954 = vector.extract_strided_slice %943 {offsets = [2, 0], sizes = [4, 64], strides = [1, 1]} : vector<6x64xf32> to vector<4x64xf32>
    %c5_764 = arith.constant 5 : index
    %c0_765 = arith.constant 0 : index
    %c0_766 = arith.constant 0 : index
    %955 = vector.load %arg7[%c5_764, %c0_765, %c0_766] : memref<9x64x64xf32, #tpu.memory_space<vmem>>, vector<1x64x64xf32>
    %956 = vector.shape_cast %955 : vector<1x64x64xf32> to vector<64x64xf32>
    %cst_767 = arith.constant dense<0.000000e+00> : vector<4x64xf32>
    %957 = tpu.matmul %954, %956, %cst_767 {dimension_numbers = #tpu.dot_dimension_numbers<[1], [0], [0], [1], [0, 0, 1, 1], [], []>} : vector<4x64xf32>, vector<64x64xf32>, vector<4x64xf32> -> vector<4x64xf32>
    %958 = arith.addf %953, %957 : vector<4x64xf32>
    %c4_768 = arith.constant 4 : index
    %c0_769 = arith.constant 0 : index
    %c0_770 = arith.constant 0 : index
    %959 = vector.load %arg15[%c4_768, %c0_769, %c0_770] : memref<12x6x64xf32, #tpu.memory_space<vmem>>, vector<1x6x64xf32>
    %960 = vector.shape_cast %959 : vector<1x6x64xf32> to vector<6x64xf32>
    %961 = vector.extract_strided_slice %960 {offsets = [0, 0], sizes = [4, 64], strides = [1, 1]} : vector<6x64xf32> to vector<4x64xf32>
    %c6_771 = arith.constant 6 : index
    %c0_772 = arith.constant 0 : index
    %c0_773 = arith.constant 0 : index
    %962 = vector.load %arg7[%c6_771, %c0_772, %c0_773] : memref<9x64x64xf32, #tpu.memory_space<vmem>>, vector<1x64x64xf32>
    %963 = vector.shape_cast %962 : vector<1x64x64xf32> to vector<64x64xf32>
    %cst_774 = arith.constant dense<0.000000e+00> : vector<4x64xf32>
    %964 = tpu.matmul %961, %963, %cst_774 {dimension_numbers = #tpu.dot_dimension_numbers<[1], [0], [0], [1], [0, 0, 1, 1], [], []>} : vector<4x64xf32>, vector<64x64xf32>, vector<4x64xf32> -> vector<4x64xf32>
    %965 = arith.addf %958, %964 : vector<4x64xf32>
    %966 = vector.extract_strided_slice %960 {offsets = [1, 0], sizes = [4, 64], strides = [1, 1]} : vector<6x64xf32> to vector<4x64xf32>
    %c7_775 = arith.constant 7 : index
    %c0_776 = arith.constant 0 : index
    %c0_777 = arith.constant 0 : index
    %967 = vector.load %arg7[%c7_775, %c0_776, %c0_777] : memref<9x64x64xf32, #tpu.memory_space<vmem>>, vector<1x64x64xf32>
    %968 = vector.shape_cast %967 : vector<1x64x64xf32> to vector<64x64xf32>
    %cst_778 = arith.constant dense<0.000000e+00> : vector<4x64xf32>
    %969 = tpu.matmul %966, %968, %cst_778 {dimension_numbers = #tpu.dot_dimension_numbers<[1], [0], [0], [1], [0, 0, 1, 1], [], []>} : vector<4x64xf32>, vector<64x64xf32>, vector<4x64xf32> -> vector<4x64xf32>
    %970 = arith.addf %965, %969 : vector<4x64xf32>
    %971 = vector.extract_strided_slice %960 {offsets = [2, 0], sizes = [4, 64], strides = [1, 1]} : vector<6x64xf32> to vector<4x64xf32>
    %c8_779 = arith.constant 8 : index
    %c0_780 = arith.constant 0 : index
    %c0_781 = arith.constant 0 : index
    %972 = vector.load %arg7[%c8_779, %c0_780, %c0_781] : memref<9x64x64xf32, #tpu.memory_space<vmem>>, vector<1x64x64xf32>
    %973 = vector.shape_cast %972 : vector<1x64x64xf32> to vector<64x64xf32>
    %cst_782 = arith.constant dense<0.000000e+00> : vector<4x64xf32>
    %974 = tpu.matmul %971, %973, %cst_782 {dimension_numbers = #tpu.dot_dimension_numbers<[1], [0], [0], [1], [0, 0, 1, 1], [], []>} : vector<4x64xf32>, vector<64x64xf32>, vector<4x64xf32> -> vector<4x64xf32>
    %975 = arith.addf %970, %974 : vector<4x64xf32>
    %c3_783 = arith.constant 3 : index
    %c1_784 = arith.constant 1 : index
    %c0_785 = arith.constant 0 : index
    %976 = vector.load %arg14[%c3_783, %c1_784, %c0_785] : memref<12x6x64xf32, #tpu.memory_space<vmem>>, vector<1x4x64xf32>
    %977 = vector.shape_cast %976 : vector<1x4x64xf32> to vector<4x64xf32>
    %978 = vector.broadcast %10 : vector<1x64xf32> to vector<4x64xf32>
    %979 = arith.mulf %975, %978 : vector<4x64xf32>
    %980 = vector.broadcast %11 : vector<1x64xf32> to vector<4x64xf32>
    %981 = arith.addf %979, %980 : vector<4x64xf32>
    %982 = arith.addf %981, %977 : vector<4x64xf32>
    %cst_786 = arith.constant 0.000000e+00 : f32
    %983 = vector.broadcast %cst_786 : f32 to vector<4x64xf32>
    %984 = arith.maximumf %982, %983 : vector<4x64xf32>
    %cst_787 = arith.constant dense<0.000000e+00> : vector<64xf32>
    %985 = vector.multi_reduction <add>, %984, %cst_787 [0] : vector<4x64xf32> to vector<64xf32>
    %986 = vector.shape_cast %985 : vector<64xf32> to vector<1x64xf32>
    %987 = arith.addf %923, %986 : vector<1x64xf32>
    %cst_788 = arith.constant 0.000000e+00 : f32
    %988 = vector.broadcast %cst_788 : f32 to vector<4x64xf32>
    %c3_789 = arith.constant 3 : index
    %c0_790 = arith.constant 0 : index
    %c0_791 = arith.constant 0 : index
    %989 = vector.load %arg15[%c3_789, %c0_790, %c0_791] : memref<12x6x64xf32, #tpu.memory_space<vmem>>, vector<1x6x64xf32>
    %990 = vector.shape_cast %989 : vector<1x6x64xf32> to vector<6x64xf32>
    %991 = vector.extract_strided_slice %990 {offsets = [0, 0], sizes = [4, 64], strides = [1, 1]} : vector<6x64xf32> to vector<4x64xf32>
    %c0_792 = arith.constant 0 : index
    %c0_793 = arith.constant 0 : index
    %c0_794 = arith.constant 0 : index
    %992 = vector.load %arg7[%c0_792, %c0_793, %c0_794] : memref<9x64x64xf32, #tpu.memory_space<vmem>>, vector<1x64x64xf32>
    %993 = vector.shape_cast %992 : vector<1x64x64xf32> to vector<64x64xf32>
    %cst_795 = arith.constant dense<0.000000e+00> : vector<4x64xf32>
    %994 = tpu.matmul %991, %993, %cst_795 {dimension_numbers = #tpu.dot_dimension_numbers<[1], [0], [0], [1], [0, 0, 1, 1], [], []>} : vector<4x64xf32>, vector<64x64xf32>, vector<4x64xf32> -> vector<4x64xf32>
    %995 = arith.addf %988, %994 : vector<4x64xf32>
    %996 = vector.extract_strided_slice %990 {offsets = [1, 0], sizes = [4, 64], strides = [1, 1]} : vector<6x64xf32> to vector<4x64xf32>
    %c1_796 = arith.constant 1 : index
    %c0_797 = arith.constant 0 : index
    %c0_798 = arith.constant 0 : index
    %997 = vector.load %arg7[%c1_796, %c0_797, %c0_798] : memref<9x64x64xf32, #tpu.memory_space<vmem>>, vector<1x64x64xf32>
    %998 = vector.shape_cast %997 : vector<1x64x64xf32> to vector<64x64xf32>
    %cst_799 = arith.constant dense<0.000000e+00> : vector<4x64xf32>
    %999 = tpu.matmul %996, %998, %cst_799 {dimension_numbers = #tpu.dot_dimension_numbers<[1], [0], [0], [1], [0, 0, 1, 1], [], []>} : vector<4x64xf32>, vector<64x64xf32>, vector<4x64xf32> -> vector<4x64xf32>
    %1000 = arith.addf %995, %999 : vector<4x64xf32>
    %1001 = vector.extract_strided_slice %990 {offsets = [2, 0], sizes = [4, 64], strides = [1, 1]} : vector<6x64xf32> to vector<4x64xf32>
    %c2_800 = arith.constant 2 : index
    %c0_801 = arith.constant 0 : index
    %c0_802 = arith.constant 0 : index
    %1002 = vector.load %arg7[%c2_800, %c0_801, %c0_802] : memref<9x64x64xf32, #tpu.memory_space<vmem>>, vector<1x64x64xf32>
    %1003 = vector.shape_cast %1002 : vector<1x64x64xf32> to vector<64x64xf32>
    %cst_803 = arith.constant dense<0.000000e+00> : vector<4x64xf32>
    %1004 = tpu.matmul %1001, %1003, %cst_803 {dimension_numbers = #tpu.dot_dimension_numbers<[1], [0], [0], [1], [0, 0, 1, 1], [], []>} : vector<4x64xf32>, vector<64x64xf32>, vector<4x64xf32> -> vector<4x64xf32>
    %1005 = arith.addf %1000, %1004 : vector<4x64xf32>
    %c4_804 = arith.constant 4 : index
    %c0_805 = arith.constant 0 : index
    %c0_806 = arith.constant 0 : index
    %1006 = vector.load %arg15[%c4_804, %c0_805, %c0_806] : memref<12x6x64xf32, #tpu.memory_space<vmem>>, vector<1x6x64xf32>
    %1007 = vector.shape_cast %1006 : vector<1x6x64xf32> to vector<6x64xf32>
    %1008 = vector.extract_strided_slice %1007 {offsets = [0, 0], sizes = [4, 64], strides = [1, 1]} : vector<6x64xf32> to vector<4x64xf32>
    %c3_807 = arith.constant 3 : index
    %c0_808 = arith.constant 0 : index
    %c0_809 = arith.constant 0 : index
    %1009 = vector.load %arg7[%c3_807, %c0_808, %c0_809] : memref<9x64x64xf32, #tpu.memory_space<vmem>>, vector<1x64x64xf32>
    %1010 = vector.shape_cast %1009 : vector<1x64x64xf32> to vector<64x64xf32>
    %cst_810 = arith.constant dense<0.000000e+00> : vector<4x64xf32>
    %1011 = tpu.matmul %1008, %1010, %cst_810 {dimension_numbers = #tpu.dot_dimension_numbers<[1], [0], [0], [1], [0, 0, 1, 1], [], []>} : vector<4x64xf32>, vector<64x64xf32>, vector<4x64xf32> -> vector<4x64xf32>
    %1012 = arith.addf %1005, %1011 : vector<4x64xf32>
    %1013 = vector.extract_strided_slice %1007 {offsets = [1, 0], sizes = [4, 64], strides = [1, 1]} : vector<6x64xf32> to vector<4x64xf32>
    %c4_811 = arith.constant 4 : index
    %c0_812 = arith.constant 0 : index
    %c0_813 = arith.constant 0 : index
    %1014 = vector.load %arg7[%c4_811, %c0_812, %c0_813] : memref<9x64x64xf32, #tpu.memory_space<vmem>>, vector<1x64x64xf32>
    %1015 = vector.shape_cast %1014 : vector<1x64x64xf32> to vector<64x64xf32>
    %cst_814 = arith.constant dense<0.000000e+00> : vector<4x64xf32>
    %1016 = tpu.matmul %1013, %1015, %cst_814 {dimension_numbers = #tpu.dot_dimension_numbers<[1], [0], [0], [1], [0, 0, 1, 1], [], []>} : vector<4x64xf32>, vector<64x64xf32>, vector<4x64xf32> -> vector<4x64xf32>
    %1017 = arith.addf %1012, %1016 : vector<4x64xf32>
    %1018 = vector.extract_strided_slice %1007 {offsets = [2, 0], sizes = [4, 64], strides = [1, 1]} : vector<6x64xf32> to vector<4x64xf32>
    %c5_815 = arith.constant 5 : index
    %c0_816 = arith.constant 0 : index
    %c0_817 = arith.constant 0 : index
    %1019 = vector.load %arg7[%c5_815, %c0_816, %c0_817] : memref<9x64x64xf32, #tpu.memory_space<vmem>>, vector<1x64x64xf32>
    %1020 = vector.shape_cast %1019 : vector<1x64x64xf32> to vector<64x64xf32>
    %cst_818 = arith.constant dense<0.000000e+00> : vector<4x64xf32>
    %1021 = tpu.matmul %1018, %1020, %cst_818 {dimension_numbers = #tpu.dot_dimension_numbers<[1], [0], [0], [1], [0, 0, 1, 1], [], []>} : vector<4x64xf32>, vector<64x64xf32>, vector<4x64xf32> -> vector<4x64xf32>
    %1022 = arith.addf %1017, %1021 : vector<4x64xf32>
    %c5_819 = arith.constant 5 : index
    %c0_820 = arith.constant 0 : index
    %c0_821 = arith.constant 0 : index
    %1023 = vector.load %arg15[%c5_819, %c0_820, %c0_821] : memref<12x6x64xf32, #tpu.memory_space<vmem>>, vector<1x6x64xf32>
    %1024 = vector.shape_cast %1023 : vector<1x6x64xf32> to vector<6x64xf32>
    %1025 = vector.extract_strided_slice %1024 {offsets = [0, 0], sizes = [4, 64], strides = [1, 1]} : vector<6x64xf32> to vector<4x64xf32>
    %c6_822 = arith.constant 6 : index
    %c0_823 = arith.constant 0 : index
    %c0_824 = arith.constant 0 : index
    %1026 = vector.load %arg7[%c6_822, %c0_823, %c0_824] : memref<9x64x64xf32, #tpu.memory_space<vmem>>, vector<1x64x64xf32>
    %1027 = vector.shape_cast %1026 : vector<1x64x64xf32> to vector<64x64xf32>
    %cst_825 = arith.constant dense<0.000000e+00> : vector<4x64xf32>
    %1028 = tpu.matmul %1025, %1027, %cst_825 {dimension_numbers = #tpu.dot_dimension_numbers<[1], [0], [0], [1], [0, 0, 1, 1], [], []>} : vector<4x64xf32>, vector<64x64xf32>, vector<4x64xf32> -> vector<4x64xf32>
    %1029 = arith.addf %1022, %1028 : vector<4x64xf32>
    %1030 = vector.extract_strided_slice %1024 {offsets = [1, 0], sizes = [4, 64], strides = [1, 1]} : vector<6x64xf32> to vector<4x64xf32>
    %c7_826 = arith.constant 7 : index
    %c0_827 = arith.constant 0 : index
    %c0_828 = arith.constant 0 : index
    %1031 = vector.load %arg7[%c7_826, %c0_827, %c0_828] : memref<9x64x64xf32, #tpu.memory_space<vmem>>, vector<1x64x64xf32>
    %1032 = vector.shape_cast %1031 : vector<1x64x64xf32> to vector<64x64xf32>
    %cst_829 = arith.constant dense<0.000000e+00> : vector<4x64xf32>
    %1033 = tpu.matmul %1030, %1032, %cst_829 {dimension_numbers = #tpu.dot_dimension_numbers<[1], [0], [0], [1], [0, 0, 1, 1], [], []>} : vector<4x64xf32>, vector<64x64xf32>, vector<4x64xf32> -> vector<4x64xf32>
    %1034 = arith.addf %1029, %1033 : vector<4x64xf32>
    %1035 = vector.extract_strided_slice %1024 {offsets = [2, 0], sizes = [4, 64], strides = [1, 1]} : vector<6x64xf32> to vector<4x64xf32>
    %c8_830 = arith.constant 8 : index
    %c0_831 = arith.constant 0 : index
    %c0_832 = arith.constant 0 : index
    %1036 = vector.load %arg7[%c8_830, %c0_831, %c0_832] : memref<9x64x64xf32, #tpu.memory_space<vmem>>, vector<1x64x64xf32>
    %1037 = vector.shape_cast %1036 : vector<1x64x64xf32> to vector<64x64xf32>
    %cst_833 = arith.constant dense<0.000000e+00> : vector<4x64xf32>
    %1038 = tpu.matmul %1035, %1037, %cst_833 {dimension_numbers = #tpu.dot_dimension_numbers<[1], [0], [0], [1], [0, 0, 1, 1], [], []>} : vector<4x64xf32>, vector<64x64xf32>, vector<4x64xf32> -> vector<4x64xf32>
    %1039 = arith.addf %1034, %1038 : vector<4x64xf32>
    %c4_834 = arith.constant 4 : index
    %c1_835 = arith.constant 1 : index
    %c0_836 = arith.constant 0 : index
    %1040 = vector.load %arg14[%c4_834, %c1_835, %c0_836] : memref<12x6x64xf32, #tpu.memory_space<vmem>>, vector<1x4x64xf32>
    %1041 = vector.shape_cast %1040 : vector<1x4x64xf32> to vector<4x64xf32>
    %1042 = vector.broadcast %10 : vector<1x64xf32> to vector<4x64xf32>
    %1043 = arith.mulf %1039, %1042 : vector<4x64xf32>
    %1044 = vector.broadcast %11 : vector<1x64xf32> to vector<4x64xf32>
    %1045 = arith.addf %1043, %1044 : vector<4x64xf32>
    %1046 = arith.addf %1045, %1041 : vector<4x64xf32>
    %cst_837 = arith.constant 0.000000e+00 : f32
    %1047 = vector.broadcast %cst_837 : f32 to vector<4x64xf32>
    %1048 = arith.maximumf %1046, %1047 : vector<4x64xf32>
    %cst_838 = arith.constant dense<0.000000e+00> : vector<64xf32>
    %1049 = vector.multi_reduction <add>, %1048, %cst_838 [0] : vector<4x64xf32> to vector<64xf32>
    %1050 = vector.shape_cast %1049 : vector<64xf32> to vector<1x64xf32>
    %1051 = arith.addf %987, %1050 : vector<1x64xf32>
    %cst_839 = arith.constant 6.250000e-02 : f32
    %1052 = vector.broadcast %cst_839 : f32 to vector<1x64xf32>
    %1053 = arith.mulf %1051, %1052 : vector<1x64xf32>
    %cst_840 = arith.constant dense<0.000000e+00> : vector<1x10xf32>
    %1054 = tpu.matmul %1053, %793, %cst_840 {dimension_numbers = #tpu.dot_dimension_numbers<[1], [0], [0], [1], [0, 0, 1, 1], [], []>} : vector<1x64xf32>, vector<64x10xf32>, vector<1x10xf32> -> vector<1x10xf32>
    %1055 = arith.addf %1054, %794 : vector<1x10xf32>
    %c0_841 = arith.constant 0 : index
    %c0_842 = arith.constant 0 : index
    %1056 = vector.load %arg12[%c0_841, %c0_842] : memref<2x10xf32, #tpu.memory_space<vmem>>, vector<1x10xf32>
    tpu.vector_store %arg12[%c0_841, %c0_842], %1055 {strides = array<i32>} : memref<2x10xf32, #tpu.memory_space<vmem>>, vector<1x10xf32>,
    %cst_843 = arith.constant 0.000000e+00 : f32
    %1057 = vector.broadcast %cst_843 : f32 to vector<1x64xf32>
    %cst_844 = arith.constant 0.000000e+00 : f32
    %1058 = vector.broadcast %cst_844 : f32 to vector<4x64xf32>
    %c6_845 = arith.constant 6 : index
    %c0_846 = arith.constant 0 : index
    %c0_847 = arith.constant 0 : index
    %1059 = vector.load %arg15[%c6_845, %c0_846, %c0_847] : memref<12x6x64xf32, #tpu.memory_space<vmem>>, vector<1x6x64xf32>
    %1060 = vector.shape_cast %1059 : vector<1x6x64xf32> to vector<6x64xf32>
    %1061 = vector.extract_strided_slice %1060 {offsets = [0, 0], sizes = [4, 64], strides = [1, 1]} : vector<6x64xf32> to vector<4x64xf32>
    %c0_848 = arith.constant 0 : index
    %c0_849 = arith.constant 0 : index
    %c0_850 = arith.constant 0 : index
    %1062 = vector.load %arg7[%c0_848, %c0_849, %c0_850] : memref<9x64x64xf32, #tpu.memory_space<vmem>>, vector<1x64x64xf32>
    %1063 = vector.shape_cast %1062 : vector<1x64x64xf32> to vector<64x64xf32>
    %cst_851 = arith.constant dense<0.000000e+00> : vector<4x64xf32>
    %1064 = tpu.matmul %1061, %1063, %cst_851 {dimension_numbers = #tpu.dot_dimension_numbers<[1], [0], [0], [1], [0, 0, 1, 1], [], []>} : vector<4x64xf32>, vector<64x64xf32>, vector<4x64xf32> -> vector<4x64xf32>
    %1065 = arith.addf %1058, %1064 : vector<4x64xf32>
    %1066 = vector.extract_strided_slice %1060 {offsets = [1, 0], sizes = [4, 64], strides = [1, 1]} : vector<6x64xf32> to vector<4x64xf32>
    %c1_852 = arith.constant 1 : index
    %c0_853 = arith.constant 0 : index
    %c0_854 = arith.constant 0 : index
    %1067 = vector.load %arg7[%c1_852, %c0_853, %c0_854] : memref<9x64x64xf32, #tpu.memory_space<vmem>>, vector<1x64x64xf32>
    %1068 = vector.shape_cast %1067 : vector<1x64x64xf32> to vector<64x64xf32>
    %cst_855 = arith.constant dense<0.000000e+00> : vector<4x64xf32>
    %1069 = tpu.matmul %1066, %1068, %cst_855 {dimension_numbers = #tpu.dot_dimension_numbers<[1], [0], [0], [1], [0, 0, 1, 1], [], []>} : vector<4x64xf32>, vector<64x64xf32>, vector<4x64xf32> -> vector<4x64xf32>
    %1070 = arith.addf %1065, %1069 : vector<4x64xf32>
    %1071 = vector.extract_strided_slice %1060 {offsets = [2, 0], sizes = [4, 64], strides = [1, 1]} : vector<6x64xf32> to vector<4x64xf32>
    %c2_856 = arith.constant 2 : index
    %c0_857 = arith.constant 0 : index
    %c0_858 = arith.constant 0 : index
    %1072 = vector.load %arg7[%c2_856, %c0_857, %c0_858] : memref<9x64x64xf32, #tpu.memory_space<vmem>>, vector<1x64x64xf32>
    %1073 = vector.shape_cast %1072 : vector<1x64x64xf32> to vector<64x64xf32>
    %cst_859 = arith.constant dense<0.000000e+00> : vector<4x64xf32>
    %1074 = tpu.matmul %1071, %1073, %cst_859 {dimension_numbers = #tpu.dot_dimension_numbers<[1], [0], [0], [1], [0, 0, 1, 1], [], []>} : vector<4x64xf32>, vector<64x64xf32>, vector<4x64xf32> -> vector<4x64xf32>
    %1075 = arith.addf %1070, %1074 : vector<4x64xf32>
    %c7_860 = arith.constant 7 : index
    %c0_861 = arith.constant 0 : index
    %c0_862 = arith.constant 0 : index
    %1076 = vector.load %arg15[%c7_860, %c0_861, %c0_862] : memref<12x6x64xf32, #tpu.memory_space<vmem>>, vector<1x6x64xf32>
    %1077 = vector.shape_cast %1076 : vector<1x6x64xf32> to vector<6x64xf32>
    %1078 = vector.extract_strided_slice %1077 {offsets = [0, 0], sizes = [4, 64], strides = [1, 1]} : vector<6x64xf32> to vector<4x64xf32>
    %c3_863 = arith.constant 3 : index
    %c0_864 = arith.constant 0 : index
    %c0_865 = arith.constant 0 : index
    %1079 = vector.load %arg7[%c3_863, %c0_864, %c0_865] : memref<9x64x64xf32, #tpu.memory_space<vmem>>, vector<1x64x64xf32>
    %1080 = vector.shape_cast %1079 : vector<1x64x64xf32> to vector<64x64xf32>
    %cst_866 = arith.constant dense<0.000000e+00> : vector<4x64xf32>
    %1081 = tpu.matmul %1078, %1080, %cst_866 {dimension_numbers = #tpu.dot_dimension_numbers<[1], [0], [0], [1], [0, 0, 1, 1], [], []>} : vector<4x64xf32>, vector<64x64xf32>, vector<4x64xf32> -> vector<4x64xf32>
    %1082 = arith.addf %1075, %1081 : vector<4x64xf32>
    %1083 = vector.extract_strided_slice %1077 {offsets = [1, 0], sizes = [4, 64], strides = [1, 1]} : vector<6x64xf32> to vector<4x64xf32>
    %c4_867 = arith.constant 4 : index
    %c0_868 = arith.constant 0 : index
    %c0_869 = arith.constant 0 : index
    %1084 = vector.load %arg7[%c4_867, %c0_868, %c0_869] : memref<9x64x64xf32, #tpu.memory_space<vmem>>, vector<1x64x64xf32>
    %1085 = vector.shape_cast %1084 : vector<1x64x64xf32> to vector<64x64xf32>
    %cst_870 = arith.constant dense<0.000000e+00> : vector<4x64xf32>
    %1086 = tpu.matmul %1083, %1085, %cst_870 {dimension_numbers = #tpu.dot_dimension_numbers<[1], [0], [0], [1], [0, 0, 1, 1], [], []>} : vector<4x64xf32>, vector<64x64xf32>, vector<4x64xf32> -> vector<4x64xf32>
    %1087 = arith.addf %1082, %1086 : vector<4x64xf32>
    %1088 = vector.extract_strided_slice %1077 {offsets = [2, 0], sizes = [4, 64], strides = [1, 1]} : vector<6x64xf32> to vector<4x64xf32>
    %c5_871 = arith.constant 5 : index
    %c0_872 = arith.constant 0 : index
    %c0_873 = arith.constant 0 : index
    %1089 = vector.load %arg7[%c5_871, %c0_872, %c0_873] : memref<9x64x64xf32, #tpu.memory_space<vmem>>, vector<1x64x64xf32>
    %1090 = vector.shape_cast %1089 : vector<1x64x64xf32> to vector<64x64xf32>
    %cst_874 = arith.constant dense<0.000000e+00> : vector<4x64xf32>
    %1091 = tpu.matmul %1088, %1090, %cst_874 {dimension_numbers = #tpu.dot_dimension_numbers<[1], [0], [0], [1], [0, 0, 1, 1], [], []>} : vector<4x64xf32>, vector<64x64xf32>, vector<4x64xf32> -> vector<4x64xf32>
    %1092 = arith.addf %1087, %1091 : vector<4x64xf32>
    %c8_875 = arith.constant 8 : index
    %c0_876 = arith.constant 0 : index
    %c0_877 = arith.constant 0 : index
    %1093 = vector.load %arg15[%c8_875, %c0_876, %c0_877] : memref<12x6x64xf32, #tpu.memory_space<vmem>>, vector<1x6x64xf32>
    %1094 = vector.shape_cast %1093 : vector<1x6x64xf32> to vector<6x64xf32>
    %1095 = vector.extract_strided_slice %1094 {offsets = [0, 0], sizes = [4, 64], strides = [1, 1]} : vector<6x64xf32> to vector<4x64xf32>
    %c6_878 = arith.constant 6 : index
    %c0_879 = arith.constant 0 : index
    %c0_880 = arith.constant 0 : index
    %1096 = vector.load %arg7[%c6_878, %c0_879, %c0_880] : memref<9x64x64xf32, #tpu.memory_space<vmem>>, vector<1x64x64xf32>
    %1097 = vector.shape_cast %1096 : vector<1x64x64xf32> to vector<64x64xf32>
    %cst_881 = arith.constant dense<0.000000e+00> : vector<4x64xf32>
    %1098 = tpu.matmul %1095, %1097, %cst_881 {dimension_numbers = #tpu.dot_dimension_numbers<[1], [0], [0], [1], [0, 0, 1, 1], [], []>} : vector<4x64xf32>, vector<64x64xf32>, vector<4x64xf32> -> vector<4x64xf32>
    %1099 = arith.addf %1092, %1098 : vector<4x64xf32>
    %1100 = vector.extract_strided_slice %1094 {offsets = [1, 0], sizes = [4, 64], strides = [1, 1]} : vector<6x64xf32> to vector<4x64xf32>
    %c7_882 = arith.constant 7 : index
    %c0_883 = arith.constant 0 : index
    %c0_884 = arith.constant 0 : index
    %1101 = vector.load %arg7[%c7_882, %c0_883, %c0_884] : memref<9x64x64xf32, #tpu.memory_space<vmem>>, vector<1x64x64xf32>
    %1102 = vector.shape_cast %1101 : vector<1x64x64xf32> to vector<64x64xf32>
    %cst_885 = arith.constant dense<0.000000e+00> : vector<4x64xf32>
    %1103 = tpu.matmul %1100, %1102, %cst_885 {dimension_numbers = #tpu.dot_dimension_numbers<[1], [0], [0], [1], [0, 0, 1, 1], [], []>} : vector<4x64xf32>, vector<64x64xf32>, vector<4x64xf32> -> vector<4x64xf32>
    %1104 = arith.addf %1099, %1103 : vector<4x64xf32>
    %1105 = vector.extract_strided_slice %1094 {offsets = [2, 0], sizes = [4, 64], strides = [1, 1]} : vector<6x64xf32> to vector<4x64xf32>
    %c8_886 = arith.constant 8 : index
    %c0_887 = arith.constant 0 : index
    %c0_888 = arith.constant 0 : index
    %1106 = vector.load %arg7[%c8_886, %c0_887, %c0_888] : memref<9x64x64xf32, #tpu.memory_space<vmem>>, vector<1x64x64xf32>
    %1107 = vector.shape_cast %1106 : vector<1x64x64xf32> to vector<64x64xf32>
    %cst_889 = arith.constant dense<0.000000e+00> : vector<4x64xf32>
    %1108 = tpu.matmul %1105, %1107, %cst_889 {dimension_numbers = #tpu.dot_dimension_numbers<[1], [0], [0], [1], [0, 0, 1, 1], [], []>} : vector<4x64xf32>, vector<64x64xf32>, vector<4x64xf32> -> vector<4x64xf32>
    %1109 = arith.addf %1104, %1108 : vector<4x64xf32>
    %c7_890 = arith.constant 7 : index
    %c1_891 = arith.constant 1 : index
    %c0_892 = arith.constant 0 : index
    %1110 = vector.load %arg14[%c7_890, %c1_891, %c0_892] : memref<12x6x64xf32, #tpu.memory_space<vmem>>, vector<1x4x64xf32>
    %1111 = vector.shape_cast %1110 : vector<1x4x64xf32> to vector<4x64xf32>
    %1112 = vector.broadcast %10 : vector<1x64xf32> to vector<4x64xf32>
    %1113 = arith.mulf %1109, %1112 : vector<4x64xf32>
    %1114 = vector.broadcast %11 : vector<1x64xf32> to vector<4x64xf32>
    %1115 = arith.addf %1113, %1114 : vector<4x64xf32>
    %1116 = arith.addf %1115, %1111 : vector<4x64xf32>
    %cst_893 = arith.constant 0.000000e+00 : f32
    %1117 = vector.broadcast %cst_893 : f32 to vector<4x64xf32>
    %1118 = arith.maximumf %1116, %1117 : vector<4x64xf32>
    %cst_894 = arith.constant dense<0.000000e+00> : vector<64xf32>
    %1119 = vector.multi_reduction <add>, %1118, %cst_894 [0] : vector<4x64xf32> to vector<64xf32>
    %1120 = vector.shape_cast %1119 : vector<64xf32> to vector<1x64xf32>
    %1121 = arith.addf %1057, %1120 : vector<1x64xf32>
    %cst_895 = arith.constant 0.000000e+00 : f32
    %1122 = vector.broadcast %cst_895 : f32 to vector<4x64xf32>
    %c7_896 = arith.constant 7 : index
    %c0_897 = arith.constant 0 : index
    %c0_898 = arith.constant 0 : index
    %1123 = vector.load %arg15[%c7_896, %c0_897, %c0_898] : memref<12x6x64xf32, #tpu.memory_space<vmem>>, vector<1x6x64xf32>
    %1124 = vector.shape_cast %1123 : vector<1x6x64xf32> to vector<6x64xf32>
    %1125 = vector.extract_strided_slice %1124 {offsets = [0, 0], sizes = [4, 64], strides = [1, 1]} : vector<6x64xf32> to vector<4x64xf32>
    %c0_899 = arith.constant 0 : index
    %c0_900 = arith.constant 0 : index
    %c0_901 = arith.constant 0 : index
    %1126 = vector.load %arg7[%c0_899, %c0_900, %c0_901] : memref<9x64x64xf32, #tpu.memory_space<vmem>>, vector<1x64x64xf32>
    %1127 = vector.shape_cast %1126 : vector<1x64x64xf32> to vector<64x64xf32>
    %cst_902 = arith.constant dense<0.000000e+00> : vector<4x64xf32>
    %1128 = tpu.matmul %1125, %1127, %cst_902 {dimension_numbers = #tpu.dot_dimension_numbers<[1], [0], [0], [1], [0, 0, 1, 1], [], []>} : vector<4x64xf32>, vector<64x64xf32>, vector<4x64xf32> -> vector<4x64xf32>
    %1129 = arith.addf %1122, %1128 : vector<4x64xf32>
    %1130 = vector.extract_strided_slice %1124 {offsets = [1, 0], sizes = [4, 64], strides = [1, 1]} : vector<6x64xf32> to vector<4x64xf32>
    %c1_903 = arith.constant 1 : index
    %c0_904 = arith.constant 0 : index
    %c0_905 = arith.constant 0 : index
    %1131 = vector.load %arg7[%c1_903, %c0_904, %c0_905] : memref<9x64x64xf32, #tpu.memory_space<vmem>>, vector<1x64x64xf32>
    %1132 = vector.shape_cast %1131 : vector<1x64x64xf32> to vector<64x64xf32>
    %cst_906 = arith.constant dense<0.000000e+00> : vector<4x64xf32>
    %1133 = tpu.matmul %1130, %1132, %cst_906 {dimension_numbers = #tpu.dot_dimension_numbers<[1], [0], [0], [1], [0, 0, 1, 1], [], []>} : vector<4x64xf32>, vector<64x64xf32>, vector<4x64xf32> -> vector<4x64xf32>
    %1134 = arith.addf %1129, %1133 : vector<4x64xf32>
    %1135 = vector.extract_strided_slice %1124 {offsets = [2, 0], sizes = [4, 64], strides = [1, 1]} : vector<6x64xf32> to vector<4x64xf32>
    %c2_907 = arith.constant 2 : index
    %c0_908 = arith.constant 0 : index
    %c0_909 = arith.constant 0 : index
    %1136 = vector.load %arg7[%c2_907, %c0_908, %c0_909] : memref<9x64x64xf32, #tpu.memory_space<vmem>>, vector<1x64x64xf32>
    %1137 = vector.shape_cast %1136 : vector<1x64x64xf32> to vector<64x64xf32>
    %cst_910 = arith.constant dense<0.000000e+00> : vector<4x64xf32>
    %1138 = tpu.matmul %1135, %1137, %cst_910 {dimension_numbers = #tpu.dot_dimension_numbers<[1], [0], [0], [1], [0, 0, 1, 1], [], []>} : vector<4x64xf32>, vector<64x64xf32>, vector<4x64xf32> -> vector<4x64xf32>
    %1139 = arith.addf %1134, %1138 : vector<4x64xf32>
    %c8_911 = arith.constant 8 : index
    %c0_912 = arith.constant 0 : index
    %c0_913 = arith.constant 0 : index
    %1140 = vector.load %arg15[%c8_911, %c0_912, %c0_913] : memref<12x6x64xf32, #tpu.memory_space<vmem>>, vector<1x6x64xf32>
    %1141 = vector.shape_cast %1140 : vector<1x6x64xf32> to vector<6x64xf32>
    %1142 = vector.extract_strided_slice %1141 {offsets = [0, 0], sizes = [4, 64], strides = [1, 1]} : vector<6x64xf32> to vector<4x64xf32>
    %c3_914 = arith.constant 3 : index
    %c0_915 = arith.constant 0 : index
    %c0_916 = arith.constant 0 : index
    %1143 = vector.load %arg7[%c3_914, %c0_915, %c0_916] : memref<9x64x64xf32, #tpu.memory_space<vmem>>, vector<1x64x64xf32>
    %1144 = vector.shape_cast %1143 : vector<1x64x64xf32> to vector<64x64xf32>
    %cst_917 = arith.constant dense<0.000000e+00> : vector<4x64xf32>
    %1145 = tpu.matmul %1142, %1144, %cst_917 {dimension_numbers = #tpu.dot_dimension_numbers<[1], [0], [0], [1], [0, 0, 1, 1], [], []>} : vector<4x64xf32>, vector<64x64xf32>, vector<4x64xf32> -> vector<4x64xf32>
    %1146 = arith.addf %1139, %1145 : vector<4x64xf32>
    %1147 = vector.extract_strided_slice %1141 {offsets = [1, 0], sizes = [4, 64], strides = [1, 1]} : vector<6x64xf32> to vector<4x64xf32>
    %c4_918 = arith.constant 4 : index
    %c0_919 = arith.constant 0 : index
    %c0_920 = arith.constant 0 : index
    %1148 = vector.load %arg7[%c4_918, %c0_919, %c0_920] : memref<9x64x64xf32, #tpu.memory_space<vmem>>, vector<1x64x64xf32>
    %1149 = vector.shape_cast %1148 : vector<1x64x64xf32> to vector<64x64xf32>
    %cst_921 = arith.constant dense<0.000000e+00> : vector<4x64xf32>
    %1150 = tpu.matmul %1147, %1149, %cst_921 {dimension_numbers = #tpu.dot_dimension_numbers<[1], [0], [0], [1], [0, 0, 1, 1], [], []>} : vector<4x64xf32>, vector<64x64xf32>, vector<4x64xf32> -> vector<4x64xf32>
    %1151 = arith.addf %1146, %1150 : vector<4x64xf32>
    %1152 = vector.extract_strided_slice %1141 {offsets = [2, 0], sizes = [4, 64], strides = [1, 1]} : vector<6x64xf32> to vector<4x64xf32>
    %c5_922 = arith.constant 5 : index
    %c0_923 = arith.constant 0 : index
    %c0_924 = arith.constant 0 : index
    %1153 = vector.load %arg7[%c5_922, %c0_923, %c0_924] : memref<9x64x64xf32, #tpu.memory_space<vmem>>, vector<1x64x64xf32>
    %1154 = vector.shape_cast %1153 : vector<1x64x64xf32> to vector<64x64xf32>
    %cst_925 = arith.constant dense<0.000000e+00> : vector<4x64xf32>
    %1155 = tpu.matmul %1152, %1154, %cst_925 {dimension_numbers = #tpu.dot_dimension_numbers<[1], [0], [0], [1], [0, 0, 1, 1], [], []>} : vector<4x64xf32>, vector<64x64xf32>, vector<4x64xf32> -> vector<4x64xf32>
    %1156 = arith.addf %1151, %1155 : vector<4x64xf32>
    %c9_926 = arith.constant 9 : index
    %c0_927 = arith.constant 0 : index
    %c0_928 = arith.constant 0 : index
    %1157 = vector.load %arg15[%c9_926, %c0_927, %c0_928] : memref<12x6x64xf32, #tpu.memory_space<vmem>>, vector<1x6x64xf32>
    %1158 = vector.shape_cast %1157 : vector<1x6x64xf32> to vector<6x64xf32>
    %1159 = vector.extract_strided_slice %1158 {offsets = [0, 0], sizes = [4, 64], strides = [1, 1]} : vector<6x64xf32> to vector<4x64xf32>
    %c6_929 = arith.constant 6 : index
    %c0_930 = arith.constant 0 : index
    %c0_931 = arith.constant 0 : index
    %1160 = vector.load %arg7[%c6_929, %c0_930, %c0_931] : memref<9x64x64xf32, #tpu.memory_space<vmem>>, vector<1x64x64xf32>
    %1161 = vector.shape_cast %1160 : vector<1x64x64xf32> to vector<64x64xf32>
    %cst_932 = arith.constant dense<0.000000e+00> : vector<4x64xf32>
    %1162 = tpu.matmul %1159, %1161, %cst_932 {dimension_numbers = #tpu.dot_dimension_numbers<[1], [0], [0], [1], [0, 0, 1, 1], [], []>} : vector<4x64xf32>, vector<64x64xf32>, vector<4x64xf32> -> vector<4x64xf32>
    %1163 = arith.addf %1156, %1162 : vector<4x64xf32>
    %1164 = vector.extract_strided_slice %1158 {offsets = [1, 0], sizes = [4, 64], strides = [1, 1]} : vector<6x64xf32> to vector<4x64xf32>
    %c7_933 = arith.constant 7 : index
    %c0_934 = arith.constant 0 : index
    %c0_935 = arith.constant 0 : index
    %1165 = vector.load %arg7[%c7_933, %c0_934, %c0_935] : memref<9x64x64xf32, #tpu.memory_space<vmem>>, vector<1x64x64xf32>
    %1166 = vector.shape_cast %1165 : vector<1x64x64xf32> to vector<64x64xf32>
    %cst_936 = arith.constant dense<0.000000e+00> : vector<4x64xf32>
    %1167 = tpu.matmul %1164, %1166, %cst_936 {dimension_numbers = #tpu.dot_dimension_numbers<[1], [0], [0], [1], [0, 0, 1, 1], [], []>} : vector<4x64xf32>, vector<64x64xf32>, vector<4x64xf32> -> vector<4x64xf32>
    %1168 = arith.addf %1163, %1167 : vector<4x64xf32>
    %1169 = vector.extract_strided_slice %1158 {offsets = [2, 0], sizes = [4, 64], strides = [1, 1]} : vector<6x64xf32> to vector<4x64xf32>
    %c8_937 = arith.constant 8 : index
    %c0_938 = arith.constant 0 : index
    %c0_939 = arith.constant 0 : index
    %1170 = vector.load %arg7[%c8_937, %c0_938, %c0_939] : memref<9x64x64xf32, #tpu.memory_space<vmem>>, vector<1x64x64xf32>
    %1171 = vector.shape_cast %1170 : vector<1x64x64xf32> to vector<64x64xf32>
    %cst_940 = arith.constant dense<0.000000e+00> : vector<4x64xf32>
    %1172 = tpu.matmul %1169, %1171, %cst_940 {dimension_numbers = #tpu.dot_dimension_numbers<[1], [0], [0], [1], [0, 0, 1, 1], [], []>} : vector<4x64xf32>, vector<64x64xf32>, vector<4x64xf32> -> vector<4x64xf32>
    %1173 = arith.addf %1168, %1172 : vector<4x64xf32>
    %c8_941 = arith.constant 8 : index
    %c1_942 = arith.constant 1 : index
    %c0_943 = arith.constant 0 : index
    %1174 = vector.load %arg14[%c8_941, %c1_942, %c0_943] : memref<12x6x64xf32, #tpu.memory_space<vmem>>, vector<1x4x64xf32>
    %1175 = vector.shape_cast %1174 : vector<1x4x64xf32> to vector<4x64xf32>
    %1176 = vector.broadcast %10 : vector<1x64xf32> to vector<4x64xf32>
    %1177 = arith.mulf %1173, %1176 : vector<4x64xf32>
    %1178 = vector.broadcast %11 : vector<1x64xf32> to vector<4x64xf32>
    %1179 = arith.addf %1177, %1178 : vector<4x64xf32>
    %1180 = arith.addf %1179, %1175 : vector<4x64xf32>
    %cst_944 = arith.constant 0.000000e+00 : f32
    %1181 = vector.broadcast %cst_944 : f32 to vector<4x64xf32>
    %1182 = arith.maximumf %1180, %1181 : vector<4x64xf32>
    %cst_945 = arith.constant dense<0.000000e+00> : vector<64xf32>
    %1183 = vector.multi_reduction <add>, %1182, %cst_945 [0] : vector<4x64xf32> to vector<64xf32>
    %1184 = vector.shape_cast %1183 : vector<64xf32> to vector<1x64xf32>
    %1185 = arith.addf %1121, %1184 : vector<1x64xf32>
    %cst_946 = arith.constant 0.000000e+00 : f32
    %1186 = vector.broadcast %cst_946 : f32 to vector<4x64xf32>
    %c8_947 = arith.constant 8 : index
    %c0_948 = arith.constant 0 : index
    %c0_949 = arith.constant 0 : index
    %1187 = vector.load %arg15[%c8_947, %c0_948, %c0_949] : memref<12x6x64xf32, #tpu.memory_space<vmem>>, vector<1x6x64xf32>
    %1188 = vector.shape_cast %1187 : vector<1x6x64xf32> to vector<6x64xf32>
    %1189 = vector.extract_strided_slice %1188 {offsets = [0, 0], sizes = [4, 64], strides = [1, 1]} : vector<6x64xf32> to vector<4x64xf32>
    %c0_950 = arith.constant 0 : index
    %c0_951 = arith.constant 0 : index
    %c0_952 = arith.constant 0 : index
    %1190 = vector.load %arg7[%c0_950, %c0_951, %c0_952] : memref<9x64x64xf32, #tpu.memory_space<vmem>>, vector<1x64x64xf32>
    %1191 = vector.shape_cast %1190 : vector<1x64x64xf32> to vector<64x64xf32>
    %cst_953 = arith.constant dense<0.000000e+00> : vector<4x64xf32>
    %1192 = tpu.matmul %1189, %1191, %cst_953 {dimension_numbers = #tpu.dot_dimension_numbers<[1], [0], [0], [1], [0, 0, 1, 1], [], []>} : vector<4x64xf32>, vector<64x64xf32>, vector<4x64xf32> -> vector<4x64xf32>
    %1193 = arith.addf %1186, %1192 : vector<4x64xf32>
    %1194 = vector.extract_strided_slice %1188 {offsets = [1, 0], sizes = [4, 64], strides = [1, 1]} : vector<6x64xf32> to vector<4x64xf32>
    %c1_954 = arith.constant 1 : index
    %c0_955 = arith.constant 0 : index
    %c0_956 = arith.constant 0 : index
    %1195 = vector.load %arg7[%c1_954, %c0_955, %c0_956] : memref<9x64x64xf32, #tpu.memory_space<vmem>>, vector<1x64x64xf32>
    %1196 = vector.shape_cast %1195 : vector<1x64x64xf32> to vector<64x64xf32>
    %cst_957 = arith.constant dense<0.000000e+00> : vector<4x64xf32>
    %1197 = tpu.matmul %1194, %1196, %cst_957 {dimension_numbers = #tpu.dot_dimension_numbers<[1], [0], [0], [1], [0, 0, 1, 1], [], []>} : vector<4x64xf32>, vector<64x64xf32>, vector<4x64xf32> -> vector<4x64xf32>
    %1198 = arith.addf %1193, %1197 : vector<4x64xf32>
    %1199 = vector.extract_strided_slice %1188 {offsets = [2, 0], sizes = [4, 64], strides = [1, 1]} : vector<6x64xf32> to vector<4x64xf32>
    %c2_958 = arith.constant 2 : index
    %c0_959 = arith.constant 0 : index
    %c0_960 = arith.constant 0 : index
    %1200 = vector.load %arg7[%c2_958, %c0_959, %c0_960] : memref<9x64x64xf32, #tpu.memory_space<vmem>>, vector<1x64x64xf32>
    %1201 = vector.shape_cast %1200 : vector<1x64x64xf32> to vector<64x64xf32>
    %cst_961 = arith.constant dense<0.000000e+00> : vector<4x64xf32>
    %1202 = tpu.matmul %1199, %1201, %cst_961 {dimension_numbers = #tpu.dot_dimension_numbers<[1], [0], [0], [1], [0, 0, 1, 1], [], []>} : vector<4x64xf32>, vector<64x64xf32>, vector<4x64xf32> -> vector<4x64xf32>
    %1203 = arith.addf %1198, %1202 : vector<4x64xf32>
    %c9_962 = arith.constant 9 : index
    %c0_963 = arith.constant 0 : index
    %c0_964 = arith.constant 0 : index
    %1204 = vector.load %arg15[%c9_962, %c0_963, %c0_964] : memref<12x6x64xf32, #tpu.memory_space<vmem>>, vector<1x6x64xf32>
    %1205 = vector.shape_cast %1204 : vector<1x6x64xf32> to vector<6x64xf32>
    %1206 = vector.extract_strided_slice %1205 {offsets = [0, 0], sizes = [4, 64], strides = [1, 1]} : vector<6x64xf32> to vector<4x64xf32>
    %c3_965 = arith.constant 3 : index
    %c0_966 = arith.constant 0 : index
    %c0_967 = arith.constant 0 : index
    %1207 = vector.load %arg7[%c3_965, %c0_966, %c0_967] : memref<9x64x64xf32, #tpu.memory_space<vmem>>, vector<1x64x64xf32>
    %1208 = vector.shape_cast %1207 : vector<1x64x64xf32> to vector<64x64xf32>
    %cst_968 = arith.constant dense<0.000000e+00> : vector<4x64xf32>
    %1209 = tpu.matmul %1206, %1208, %cst_968 {dimension_numbers = #tpu.dot_dimension_numbers<[1], [0], [0], [1], [0, 0, 1, 1], [], []>} : vector<4x64xf32>, vector<64x64xf32>, vector<4x64xf32> -> vector<4x64xf32>
    %1210 = arith.addf %1203, %1209 : vector<4x64xf32>
    %1211 = vector.extract_strided_slice %1205 {offsets = [1, 0], sizes = [4, 64], strides = [1, 1]} : vector<6x64xf32> to vector<4x64xf32>
    %c4_969 = arith.constant 4 : index
    %c0_970 = arith.constant 0 : index
    %c0_971 = arith.constant 0 : index
    %1212 = vector.load %arg7[%c4_969, %c0_970, %c0_971] : memref<9x64x64xf32, #tpu.memory_space<vmem>>, vector<1x64x64xf32>
    %1213 = vector.shape_cast %1212 : vector<1x64x64xf32> to vector<64x64xf32>
    %cst_972 = arith.constant dense<0.000000e+00> : vector<4x64xf32>
    %1214 = tpu.matmul %1211, %1213, %cst_972 {dimension_numbers = #tpu.dot_dimension_numbers<[1], [0], [0], [1], [0, 0, 1, 1], [], []>} : vector<4x64xf32>, vector<64x64xf32>, vector<4x64xf32> -> vector<4x64xf32>
    %1215 = arith.addf %1210, %1214 : vector<4x64xf32>
    %1216 = vector.extract_strided_slice %1205 {offsets = [2, 0], sizes = [4, 64], strides = [1, 1]} : vector<6x64xf32> to vector<4x64xf32>
    %c5_973 = arith.constant 5 : index
    %c0_974 = arith.constant 0 : index
    %c0_975 = arith.constant 0 : index
    %1217 = vector.load %arg7[%c5_973, %c0_974, %c0_975] : memref<9x64x64xf32, #tpu.memory_space<vmem>>, vector<1x64x64xf32>
    %1218 = vector.shape_cast %1217 : vector<1x64x64xf32> to vector<64x64xf32>
    %cst_976 = arith.constant dense<0.000000e+00> : vector<4x64xf32>
    %1219 = tpu.matmul %1216, %1218, %cst_976 {dimension_numbers = #tpu.dot_dimension_numbers<[1], [0], [0], [1], [0, 0, 1, 1], [], []>} : vector<4x64xf32>, vector<64x64xf32>, vector<4x64xf32> -> vector<4x64xf32>
    %1220 = arith.addf %1215, %1219 : vector<4x64xf32>
    %c10_977 = arith.constant 10 : index
    %c0_978 = arith.constant 0 : index
    %c0_979 = arith.constant 0 : index
    %1221 = vector.load %arg15[%c10_977, %c0_978, %c0_979] : memref<12x6x64xf32, #tpu.memory_space<vmem>>, vector<1x6x64xf32>
    %1222 = vector.shape_cast %1221 : vector<1x6x64xf32> to vector<6x64xf32>
    %1223 = vector.extract_strided_slice %1222 {offsets = [0, 0], sizes = [4, 64], strides = [1, 1]} : vector<6x64xf32> to vector<4x64xf32>
    %c6_980 = arith.constant 6 : index
    %c0_981 = arith.constant 0 : index
    %c0_982 = arith.constant 0 : index
    %1224 = vector.load %arg7[%c6_980, %c0_981, %c0_982] : memref<9x64x64xf32, #tpu.memory_space<vmem>>, vector<1x64x64xf32>
    %1225 = vector.shape_cast %1224 : vector<1x64x64xf32> to vector<64x64xf32>
    %cst_983 = arith.constant dense<0.000000e+00> : vector<4x64xf32>
    %1226 = tpu.matmul %1223, %1225, %cst_983 {dimension_numbers = #tpu.dot_dimension_numbers<[1], [0], [0], [1], [0, 0, 1, 1], [], []>} : vector<4x64xf32>, vector<64x64xf32>, vector<4x64xf32> -> vector<4x64xf32>
    %1227 = arith.addf %1220, %1226 : vector<4x64xf32>
    %1228 = vector.extract_strided_slice %1222 {offsets = [1, 0], sizes = [4, 64], strides = [1, 1]} : vector<6x64xf32> to vector<4x64xf32>
    %c7_984 = arith.constant 7 : index
    %c0_985 = arith.constant 0 : index
    %c0_986 = arith.constant 0 : index
    %1229 = vector.load %arg7[%c7_984, %c0_985, %c0_986] : memref<9x64x64xf32, #tpu.memory_space<vmem>>, vector<1x64x64xf32>
    %1230 = vector.shape_cast %1229 : vector<1x64x64xf32> to vector<64x64xf32>
    %cst_987 = arith.constant dense<0.000000e+00> : vector<4x64xf32>
    %1231 = tpu.matmul %1228, %1230, %cst_987 {dimension_numbers = #tpu.dot_dimension_numbers<[1], [0], [0], [1], [0, 0, 1, 1], [], []>} : vector<4x64xf32>, vector<64x64xf32>, vector<4x64xf32> -> vector<4x64xf32>
    %1232 = arith.addf %1227, %1231 : vector<4x64xf32>
    %1233 = vector.extract_strided_slice %1222 {offsets = [2, 0], sizes = [4, 64], strides = [1, 1]} : vector<6x64xf32> to vector<4x64xf32>
    %c8_988 = arith.constant 8 : index
    %c0_989 = arith.constant 0 : index
    %c0_990 = arith.constant 0 : index
    %1234 = vector.load %arg7[%c8_988, %c0_989, %c0_990] : memref<9x64x64xf32, #tpu.memory_space<vmem>>, vector<1x64x64xf32>
    %1235 = vector.shape_cast %1234 : vector<1x64x64xf32> to vector<64x64xf32>
    %cst_991 = arith.constant dense<0.000000e+00> : vector<4x64xf32>
    %1236 = tpu.matmul %1233, %1235, %cst_991 {dimension_numbers = #tpu.dot_dimension_numbers<[1], [0], [0], [1], [0, 0, 1, 1], [], []>} : vector<4x64xf32>, vector<64x64xf32>, vector<4x64xf32> -> vector<4x64xf32>
    %1237 = arith.addf %1232, %1236 : vector<4x64xf32>
    %c9_992 = arith.constant 9 : index
    %c1_993 = arith.constant 1 : index
    %c0_994 = arith.constant 0 : index
    %1238 = vector.load %arg14[%c9_992, %c1_993, %c0_994] : memref<12x6x64xf32, #tpu.memory_space<vmem>>, vector<1x4x64xf32>
    %1239 = vector.shape_cast %1238 : vector<1x4x64xf32> to vector<4x64xf32>
    %1240 = vector.broadcast %10 : vector<1x64xf32> to vector<4x64xf32>
    %1241 = arith.mulf %1237, %1240 : vector<4x64xf32>
    %1242 = vector.broadcast %11 : vector<1x64xf32> to vector<4x64xf32>
    %1243 = arith.addf %1241, %1242 : vector<4x64xf32>
    %1244 = arith.addf %1243, %1239 : vector<4x64xf32>
    %cst_995 = arith.constant 0.000000e+00 : f32
    %1245 = vector.broadcast %cst_995 : f32 to vector<4x64xf32>
    %1246 = arith.maximumf %1244, %1245 : vector<4x64xf32>
    %cst_996 = arith.constant dense<0.000000e+00> : vector<64xf32>
    %1247 = vector.multi_reduction <add>, %1246, %cst_996 [0] : vector<4x64xf32> to vector<64xf32>
    %1248 = vector.shape_cast %1247 : vector<64xf32> to vector<1x64xf32>
    %1249 = arith.addf %1185, %1248 : vector<1x64xf32>
    %cst_997 = arith.constant 0.000000e+00 : f32
    %1250 = vector.broadcast %cst_997 : f32 to vector<4x64xf32>
    %c9_998 = arith.constant 9 : index
    %c0_999 = arith.constant 0 : index
    %c0_1000 = arith.constant 0 : index
    %1251 = vector.load %arg15[%c9_998, %c0_999, %c0_1000] : memref<12x6x64xf32, #tpu.memory_space<vmem>>, vector<1x6x64xf32>
    %1252 = vector.shape_cast %1251 : vector<1x6x64xf32> to vector<6x64xf32>
    %1253 = vector.extract_strided_slice %1252 {offsets = [0, 0], sizes = [4, 64], strides = [1, 1]} : vector<6x64xf32> to vector<4x64xf32>
    %c0_1001 = arith.constant 0 : index
    %c0_1002 = arith.constant 0 : index
    %c0_1003 = arith.constant 0 : index
    %1254 = vector.load %arg7[%c0_1001, %c0_1002, %c0_1003] : memref<9x64x64xf32, #tpu.memory_space<vmem>>, vector<1x64x64xf32>
    %1255 = vector.shape_cast %1254 : vector<1x64x64xf32> to vector<64x64xf32>
    %cst_1004 = arith.constant dense<0.000000e+00> : vector<4x64xf32>
    %1256 = tpu.matmul %1253, %1255, %cst_1004 {dimension_numbers = #tpu.dot_dimension_numbers<[1], [0], [0], [1], [0, 0, 1, 1], [], []>} : vector<4x64xf32>, vector<64x64xf32>, vector<4x64xf32> -> vector<4x64xf32>
    %1257 = arith.addf %1250, %1256 : vector<4x64xf32>
    %1258 = vector.extract_strided_slice %1252 {offsets = [1, 0], sizes = [4, 64], strides = [1, 1]} : vector<6x64xf32> to vector<4x64xf32>
    %c1_1005 = arith.constant 1 : index
    %c0_1006 = arith.constant 0 : index
    %c0_1007 = arith.constant 0 : index
    %1259 = vector.load %arg7[%c1_1005, %c0_1006, %c0_1007] : memref<9x64x64xf32, #tpu.memory_space<vmem>>, vector<1x64x64xf32>
    %1260 = vector.shape_cast %1259 : vector<1x64x64xf32> to vector<64x64xf32>
    %cst_1008 = arith.constant dense<0.000000e+00> : vector<4x64xf32>
    %1261 = tpu.matmul %1258, %1260, %cst_1008 {dimension_numbers = #tpu.dot_dimension_numbers<[1], [0], [0], [1], [0, 0, 1, 1], [], []>} : vector<4x64xf32>, vector<64x64xf32>, vector<4x64xf32> -> vector<4x64xf32>
    %1262 = arith.addf %1257, %1261 : vector<4x64xf32>
    %1263 = vector.extract_strided_slice %1252 {offsets = [2, 0], sizes = [4, 64], strides = [1, 1]} : vector<6x64xf32> to vector<4x64xf32>
    %c2_1009 = arith.constant 2 : index
    %c0_1010 = arith.constant 0 : index
    %c0_1011 = arith.constant 0 : index
    %1264 = vector.load %arg7[%c2_1009, %c0_1010, %c0_1011] : memref<9x64x64xf32, #tpu.memory_space<vmem>>, vector<1x64x64xf32>
    %1265 = vector.shape_cast %1264 : vector<1x64x64xf32> to vector<64x64xf32>
    %cst_1012 = arith.constant dense<0.000000e+00> : vector<4x64xf32>
    %1266 = tpu.matmul %1263, %1265, %cst_1012 {dimension_numbers = #tpu.dot_dimension_numbers<[1], [0], [0], [1], [0, 0, 1, 1], [], []>} : vector<4x64xf32>, vector<64x64xf32>, vector<4x64xf32> -> vector<4x64xf32>
    %1267 = arith.addf %1262, %1266 : vector<4x64xf32>
    %c10_1013 = arith.constant 10 : index
    %c0_1014 = arith.constant 0 : index
    %c0_1015 = arith.constant 0 : index
    %1268 = vector.load %arg15[%c10_1013, %c0_1014, %c0_1015] : memref<12x6x64xf32, #tpu.memory_space<vmem>>, vector<1x6x64xf32>
    %1269 = vector.shape_cast %1268 : vector<1x6x64xf32> to vector<6x64xf32>
    %1270 = vector.extract_strided_slice %1269 {offsets = [0, 0], sizes = [4, 64], strides = [1, 1]} : vector<6x64xf32> to vector<4x64xf32>
    %c3_1016 = arith.constant 3 : index
    %c0_1017 = arith.constant 0 : index
    %c0_1018 = arith.constant 0 : index
    %1271 = vector.load %arg7[%c3_1016, %c0_1017, %c0_1018] : memref<9x64x64xf32, #tpu.memory_space<vmem>>, vector<1x64x64xf32>
    %1272 = vector.shape_cast %1271 : vector<1x64x64xf32> to vector<64x64xf32>
    %cst_1019 = arith.constant dense<0.000000e+00> : vector<4x64xf32>
    %1273 = tpu.matmul %1270, %1272, %cst_1019 {dimension_numbers = #tpu.dot_dimension_numbers<[1], [0], [0], [1], [0, 0, 1, 1], [], []>} : vector<4x64xf32>, vector<64x64xf32>, vector<4x64xf32> -> vector<4x64xf32>
    %1274 = arith.addf %1267, %1273 : vector<4x64xf32>
    %1275 = vector.extract_strided_slice %1269 {offsets = [1, 0], sizes = [4, 64], strides = [1, 1]} : vector<6x64xf32> to vector<4x64xf32>
    %c4_1020 = arith.constant 4 : index
    %c0_1021 = arith.constant 0 : index
    %c0_1022 = arith.constant 0 : index
    %1276 = vector.load %arg7[%c4_1020, %c0_1021, %c0_1022] : memref<9x64x64xf32, #tpu.memory_space<vmem>>, vector<1x64x64xf32>
    %1277 = vector.shape_cast %1276 : vector<1x64x64xf32> to vector<64x64xf32>
    %cst_1023 = arith.constant dense<0.000000e+00> : vector<4x64xf32>
    %1278 = tpu.matmul %1275, %1277, %cst_1023 {dimension_numbers = #tpu.dot_dimension_numbers<[1], [0], [0], [1], [0, 0, 1, 1], [], []>} : vector<4x64xf32>, vector<64x64xf32>, vector<4x64xf32> -> vector<4x64xf32>
    %1279 = arith.addf %1274, %1278 : vector<4x64xf32>
    %1280 = vector.extract_strided_slice %1269 {offsets = [2, 0], sizes = [4, 64], strides = [1, 1]} : vector<6x64xf32> to vector<4x64xf32>
    %c5_1024 = arith.constant 5 : index
    %c0_1025 = arith.constant 0 : index
    %c0_1026 = arith.constant 0 : index
    %1281 = vector.load %arg7[%c5_1024, %c0_1025, %c0_1026] : memref<9x64x64xf32, #tpu.memory_space<vmem>>, vector<1x64x64xf32>
    %1282 = vector.shape_cast %1281 : vector<1x64x64xf32> to vector<64x64xf32>
    %cst_1027 = arith.constant dense<0.000000e+00> : vector<4x64xf32>
    %1283 = tpu.matmul %1280, %1282, %cst_1027 {dimension_numbers = #tpu.dot_dimension_numbers<[1], [0], [0], [1], [0, 0, 1, 1], [], []>} : vector<4x64xf32>, vector<64x64xf32>, vector<4x64xf32> -> vector<4x64xf32>
    %1284 = arith.addf %1279, %1283 : vector<4x64xf32>
    %c11_1028 = arith.constant 11 : index
    %c0_1029 = arith.constant 0 : index
    %c0_1030 = arith.constant 0 : index
    %1285 = vector.load %arg15[%c11_1028, %c0_1029, %c0_1030] : memref<12x6x64xf32, #tpu.memory_space<vmem>>, vector<1x6x64xf32>
    %1286 = vector.shape_cast %1285 : vector<1x6x64xf32> to vector<6x64xf32>
    %1287 = vector.extract_strided_slice %1286 {offsets = [0, 0], sizes = [4, 64], strides = [1, 1]} : vector<6x64xf32> to vector<4x64xf32>
    %c6_1031 = arith.constant 6 : index
    %c0_1032 = arith.constant 0 : index
    %c0_1033 = arith.constant 0 : index
    %1288 = vector.load %arg7[%c6_1031, %c0_1032, %c0_1033] : memref<9x64x64xf32, #tpu.memory_space<vmem>>, vector<1x64x64xf32>
    %1289 = vector.shape_cast %1288 : vector<1x64x64xf32> to vector<64x64xf32>
    %cst_1034 = arith.constant dense<0.000000e+00> : vector<4x64xf32>
    %1290 = tpu.matmul %1287, %1289, %cst_1034 {dimension_numbers = #tpu.dot_dimension_numbers<[1], [0], [0], [1], [0, 0, 1, 1], [], []>} : vector<4x64xf32>, vector<64x64xf32>, vector<4x64xf32> -> vector<4x64xf32>
    %1291 = arith.addf %1284, %1290 : vector<4x64xf32>
    %1292 = vector.extract_strided_slice %1286 {offsets = [1, 0], sizes = [4, 64], strides = [1, 1]} : vector<6x64xf32> to vector<4x64xf32>
    %c7_1035 = arith.constant 7 : index
    %c0_1036 = arith.constant 0 : index
    %c0_1037 = arith.constant 0 : index
    %1293 = vector.load %arg7[%c7_1035, %c0_1036, %c0_1037] : memref<9x64x64xf32, #tpu.memory_space<vmem>>, vector<1x64x64xf32>
    %1294 = vector.shape_cast %1293 : vector<1x64x64xf32> to vector<64x64xf32>
    %cst_1038 = arith.constant dense<0.000000e+00> : vector<4x64xf32>
    %1295 = tpu.matmul %1292, %1294, %cst_1038 {dimension_numbers = #tpu.dot_dimension_numbers<[1], [0], [0], [1], [0, 0, 1, 1], [], []>} : vector<4x64xf32>, vector<64x64xf32>, vector<4x64xf32> -> vector<4x64xf32>
    %1296 = arith.addf %1291, %1295 : vector<4x64xf32>
    %1297 = vector.extract_strided_slice %1286 {offsets = [2, 0], sizes = [4, 64], strides = [1, 1]} : vector<6x64xf32> to vector<4x64xf32>
    %c8_1039 = arith.constant 8 : index
    %c0_1040 = arith.constant 0 : index
    %c0_1041 = arith.constant 0 : index
    %1298 = vector.load %arg7[%c8_1039, %c0_1040, %c0_1041] : memref<9x64x64xf32, #tpu.memory_space<vmem>>, vector<1x64x64xf32>
    %1299 = vector.shape_cast %1298 : vector<1x64x64xf32> to vector<64x64xf32>
    %cst_1042 = arith.constant dense<0.000000e+00> : vector<4x64xf32>
    %1300 = tpu.matmul %1297, %1299, %cst_1042 {dimension_numbers = #tpu.dot_dimension_numbers<[1], [0], [0], [1], [0, 0, 1, 1], [], []>} : vector<4x64xf32>, vector<64x64xf32>, vector<4x64xf32> -> vector<4x64xf32>
    %1301 = arith.addf %1296, %1300 : vector<4x64xf32>
    %c10_1043 = arith.constant 10 : index
    %c1_1044 = arith.constant 1 : index
    %c0_1045 = arith.constant 0 : index
    %1302 = vector.load %arg14[%c10_1043, %c1_1044, %c0_1045] : memref<12x6x64xf32, #tpu.memory_space<vmem>>, vector<1x4x64xf32>
    %1303 = vector.shape_cast %1302 : vector<1x4x64xf32> to vector<4x64xf32>
    %1304 = vector.broadcast %10 : vector<1x64xf32> to vector<4x64xf32>
    %1305 = arith.mulf %1301, %1304 : vector<4x64xf32>
    %1306 = vector.broadcast %11 : vector<1x64xf32> to vector<4x64xf32>
    %1307 = arith.addf %1305, %1306 : vector<4x64xf32>
    %1308 = arith.addf %1307, %1303 : vector<4x64xf32>
    %cst_1046 = arith.constant 0.000000e+00 : f32
    %1309 = vector.broadcast %cst_1046 : f32 to vector<4x64xf32>
    %1310 = arith.maximumf %1308, %1309 : vector<4x64xf32>
    %cst_1047 = arith.constant dense<0.000000e+00> : vector<64xf32>
    %1311 = vector.multi_reduction <add>, %1310, %cst_1047 [0] : vector<4x64xf32> to vector<64xf32>
    %1312 = vector.shape_cast %1311 : vector<64xf32> to vector<1x64xf32>
    %1313 = arith.addf %1249, %1312 : vector<1x64xf32>
    %cst_1048 = arith.constant 6.250000e-02 : f32
    %1314 = vector.broadcast %cst_1048 : f32 to vector<1x64xf32>
    %1315 = arith.mulf %1313, %1314 : vector<1x64xf32>
    %cst_1049 = arith.constant dense<0.000000e+00> : vector<1x10xf32>
    %1316 = tpu.matmul %1315, %793, %cst_1049 {dimension_numbers = #tpu.dot_dimension_numbers<[1], [0], [0], [1], [0, 0, 1, 1], [], []>} : vector<1x64xf32>, vector<64x10xf32>, vector<1x10xf32> -> vector<1x10xf32>
    %1317 = arith.addf %1316, %794 : vector<1x10xf32>
    %c1_1050 = arith.constant 1 : index
    %c0_1051 = arith.constant 0 : index
    %1318 = vector.load %arg12[%c1_1050, %c0_1051] : memref<2x10xf32, #tpu.memory_space<vmem>>, vector<1x10xf32>
    tpu.vector_store %arg12[%c1_1050, %c0_1051], %1317 {strides = array<i32>} : memref<2x10xf32, #tpu.memory_space<vmem>>, vector<1x10xf32>,
    return
  }
}

</mosaic_0001>

<bundles_post_ra>
// kernel: resnet4_forward.1
= control target key start
LH: loop header
LB: loop body
LE: loop exit
PB: predicated region body
PF: predicated region fallthrough
CT: control target
= control target key end

     0   :  { %v20537_v2 = vmov 0   ;;  %v20538_v11 = vmov 0.0|0.0   ;;  %vm84_vm0 = vcmask 521216   ;;  %v20539_v14 = vmov 0.0   ;;  %s25080_s0 = inlined_call_operand.vmem [shape: f32[9,16,8,1], index: 0, kind: input, shape index: {}]   ;;  %s25081_s1 = inlined_call_operand.vmem [shape: f32[9,64], index: 1, kind: input, shape index: {}]   ;;  %s25082_s2 = inlined_call_operand.vmem [shape: f32[1,64], index: 2, kind: input, shape index: {}]   ;;  %s25083_s3 = inlined_call_operand.vmem [shape: f32[1,64], index: 3, kind: input, shape index: {}]   ;;  %s25084_s4 = inlined_call_operand.vmem [shape: f32[9,64,64], index: 4, kind: input, shape index: {}]   ;;  %s25085_s5 = inlined_call_operand.vmem [shape: f32[1,64], index: 5, kind: input, shape index: {}]   ;;  %s25086_s6 = inlined_call_operand.vmem [shape: f32[1,64], index: 6, kind: input, shape index: {}]   ;;  %s25087_s7 = inlined_call_operand.vmem [shape: f32[9,64,64], index: 7, kind: input, shape index: {}]   ;;  %s25088_s8 = inlined_call_operand.vmem [shape: f32[1,64], index: 8, kind: input, shape index: {}]   ;;  %s25089_s9 = inlined_call_operand.vmem [shape: f32[1,64], index: 9, kind: input, shape index: {}]   ;;  %s25090_s10 = inlined_call_operand.vmem [shape: f32[64,10], index: 10, kind: input, shape index: {}]   ;;  %s25091_s11 = inlined_call_operand.vmem [shape: f32[1,10], index: 11, kind: input, shape index: {}]   ;;  %s25092_s12 = inlined_call_operand.hbm [shape: f32[2,10], index: 12, kind: output, shape index: {}]  }
   0x1   :  { %v116_v0 = vld [vmem:[%s25080_s0 + $0x8] sm:$0xff]  ;;  %v115_v1 = vld [vmem:[%s25080_s0] sm:$0xff]  ;;  %20487 = vset.pattern.permute.xlu1 %v20537_v2  ;;  %20486 = vset.pattern.permute.xlu0 %v20537_v2  ;;  %85 = vst.msk [vmem:[#allocation3] sm:$0x3f] %vm84_vm0, %v20539_v14  ;;  %86 = vst.msk [vmem:[#allocation3 + $0x8] sm:$0x3f] %vm84_vm0, %v20539_v14 }
   0x2   :  { %139 = vperm.xlu0 %20486, %v116_v0   ;;  %134 = vperm.xlu1 %20487, %v115_v1   ;;  %v13457_v3 = vld [vmem:[%s25080_s0 + $0x88] sm:$0xff]  ;;  %v13456_v4 = vld [vmem:[%s25080_s0 + $0x80] sm:$0xff]  ;;  %87 = vst.msk [vmem:[#allocation3 + $0x10] sm:$0x3f] %vm84_vm0, %v20539_v14  ;;  %88 = vst.msk [vmem:[#allocation3 + $0x18] sm:$0x3f] %vm84_vm0, %v20539_v14 }
   0x3   :  { %v13474_v5 = vld [vmem:[%s25080_s0 + $0x108] sm:$0xff]  ;;  %v13473_v6 = vld [vmem:[%s25080_s0 + $0x100] sm:$0xff]  ;;  %18472 = vmatprep.subr.bf16.mxu0 %v20538_v11  ;;  %18580 = vmatprep.subr.bf16.mxu1 %v20538_v11  ;;  %89 = vst.msk [vmem:[#allocation3 + $0x20] sm:$0x3f] %vm84_vm0, %v20539_v14  ;;  %90 = vst.msk [vmem:[#allocation3 + $0x28] sm:$0x3f] %vm84_vm0, %v20539_v14 }
   0x4   :  { %v13491_v7 = vld [vmem:[%s25080_s0 + $0x188] sm:$0xff]  ;;  %v13490_v8 = vld [vmem:[%s25080_s0 + $0x180] sm:$0xff]  ;;  %91 = vst.msk [vmem:[#allocation3 + $0x30] sm:$0x3f] %vm84_vm0, %v20539_v14  ;;  %92 = vst.msk [vmem:[#allocation3 + $0x38] sm:$0x3f] %vm84_vm0, %v20539_v14 }
   0x5   :  { %v13508_v9 = vld [vmem:[%s25080_s0 + $0x208] sm:$0xff]  ;;  %v13507_v10 = vld [vmem:[%s25080_s0 + $0x200] sm:$0xff]  ;;  %93 = vst.msk [vmem:[#allocation3 + $0x40] sm:$0x3f] %vm84_vm0, %v20539_v14  ;;  %94 = vst.msk [vmem:[#allocation3 + $0x48] sm:$0x3f] %vm84_vm0, %v20539_v14 }
   0x6   :  { %273 = vperm.xlu0 %20486, %v13457_v3   ;;  %268 = vperm.xlu1 %20487, %v13456_v4   ;;  %v13525_v12 = vld [vmem:[%s25080_s0 + $0x288] sm:$0xff]  ;;  %v13524_v13 = vld [vmem:[%s25080_s0 + $0x280] sm:$0xff]  ;;  %95 = vst.msk [vmem:[#allocation3 + $0x50] sm:$0x3f] %vm84_vm0, %v20539_v14  ;;  %96 = vst.msk [vmem:[#allocation3 + $0x58] sm:$0x3f] %vm84_vm0, %v20539_v14 }
   0x7   :  { %97 = vst.msk [vmem:[#allocation4] sm:$0x3f] %vm84_vm0, %v20539_v14  ;;  %98 = vst.msk [vmem:[#allocation4 + $0x8] sm:$0x3f] %vm84_vm0, %v20539_v14  ;;  %v13542_v15 = vld [vmem:[%s25080_s0 + $0x308] sm:$0xff]  ;;  %v13541_v16 = vld [vmem:[%s25080_s0 + $0x300] sm:$0xff] }
   0x8   :  { %99 = vst.msk [vmem:[#allocation4 + $0x10] sm:$0x3f] %vm84_vm0, %v20539_v14  ;;  %100 = vst.msk [vmem:[#allocation4 + $0x18] sm:$0x3f] %vm84_vm0, %v20539_v14  ;;  %v13594_v17 = vld [vmem:[%s25084_s4 + $0x40] sm:$0xff]  ;;  %v13595_v18 = vld [vmem:[%s25084_s4 + $0x48] sm:$0xff] }
   0x9   :  { %101 = vst.msk [vmem:[#allocation4 + $0x20] sm:$0x3f] %vm84_vm0, %v20539_v14  ;;  %102 = vst.msk [vmem:[#allocation4 + $0x28] sm:$0x3f] %vm84_vm0, %v20539_v14  ;;  %v13559_v19 = vld [vmem:[%s25080_s0 + $0x388] sm:$0xff]  ;;  %v18473_v20 = vpack.c.bf16 %v13595_v18, %v13594_v17  ;;  %v13558_v21 = vld [vmem:[%s25080_s0 + $0x380] sm:$0xff] }
   0xa   :  { %407 = vperm.xlu0 %20486, %v13474_v5   ;;  %402 = vperm.xlu1 %20487, %v13473_v6   ;;  %103 = vst.msk [vmem:[#allocation4 + $0x30] sm:$0x3f] %vm84_vm0, %v20539_v14  ;;  %104 = vst.msk [vmem:[#allocation4 + $0x38] sm:$0x3f] %vm84_vm0, %v20539_v14  ;;  %v13596_v22 = vld [vmem:[%s25084_s4 + $0x50] sm:$0xff]  ;;  %v13597_v23 = vld [vmem:[%s25084_s4 + $0x58] sm:$0xff] }
   0xb   :  { %105 = vst.msk [vmem:[#allocation4 + $0x40] sm:$0x3f] %vm84_vm0, %v20539_v14  ;;  %106 = vst.msk [vmem:[#allocation4 + $0x48] sm:$0x3f] %vm84_vm0, %v20539_v14  ;;  %18474 = vmatpush3.bf16.msra.mxu0 %v18473_v20  ;;  %v18476_v24 = vpack.c.bf16 %v13597_v23, %v13596_v22  ;;  %18582 = vmatpush3.bf16.msra.mxu1 %v18473_v20  ;;  %v13598_v25 = vld [vmem:[%s25084_s4 + $0x60] sm:$0xff]  ;;  %v13599_v26 = vld [vmem:[%s25084_s4 + $0x68] sm:$0xff] }
   0xc   :  { %107 = vst.msk [vmem:[#allocation4 + $0x50] sm:$0x3f] %vm84_vm0, %v20539_v14  ;;  %108 = vst.msk [vmem:[#allocation4 + $0x58] sm:$0x3f] %vm84_vm0, %v20539_v14  ;;  %18475 = vmatprep.subr.bf16.mxu0 %v20538_v11  ;;  %18583 = vmatprep.subr.bf16.mxu1 %v20538_v11  ;;  %v13576_v27 = vld [vmem:[%s25080_s0 + $0x408] sm:$0xff]  ;;  %v13575_v28 = vld [vmem:[%s25080_s0 + $0x400] sm:$0xff]  ;;  %v18479_v29 = vpack.c.bf16 %v13599_v26, %v13598_v25 }
   0xd   :  { %vm20540_vm1 = vmmov 0   ;;  %v13600_v30 = vld [vmem:[%s25084_s4 + $0x70] sm:$0xff]  ;;  %v13601_v31 = vld [vmem:[%s25084_s4 + $0x78] sm:$0xff]  ;;  %vm42_vm2 = vcmask 523264   ;;  %vm44_vm3 = vcmask 517120   ;;  %v20541_v32 = vmov -inf  }
   0xe   :  { %541 = vperm.xlu0 %20486, %v13491_v7   ;;  %536 = vperm.xlu1 %20487, %v13490_v8   ;;  %43 = vst.msk [vmem:[#allocation2] sm:$0xff] %vm42_vm2, %v20541_v32  ;;  %48 = vst.msk [vmem:[#allocation2 + $0x20] sm:$0xff] %vm42_vm2, %v20541_v32  ;;  %v118_v33 = vld [vmem:[%s25080_s0 + $0x18] sm:$0xff]  ;;  %v18482_v35 = vpack.c.bf16 %v13601_v31, %v13600_v30  ;;  %v20786_v36 = vld [vmem:[#allocation3] sm:$0x3f] }
   0xf   :  { %15714 = vmatprep.mubr.msk.f32.mxu0 %vm20540_vm1, %v20539_v14  ;;  %15885 = vmatprep.mubr.msk.f32.mxu1 %vm20540_vm1, %v20539_v14  ;;  %45 = vst.msk [vmem:[#allocation2 + $0x8] sm:$0x3] %vm44_vm3, %v20541_v32  ;;  %49 = vst.msk [vmem:[#allocation2 + $0x28] sm:$0x3] %vm44_vm3, %v20541_v32  ;;  %v13459_v34 = vld [vmem:[%s25080_s0 + $0x98] sm:$0xff] }
  0x10   :  { %18477 = vmatpush3.bf16.msra.mxu0 %v18476_v24  ;;  %18585 = vmatpush3.bf16.msra.mxu1 %v18476_v24  ;;  %46 = vst.msk [vmem:[#allocation2 + $0x10] sm:$0xff] %vm42_vm2, %v20541_v32  ;;  %50 = vst.msk [vmem:[#allocation2 + $0x30] sm:$0xff] %vm42_vm2, %v20541_v32 }
  0x11   :  { %18478 = vmatprep.subr.bf16.mxu0 %v20538_v11  ;;  %18586 = vmatprep.subr.bf16.mxu1 %v20538_v11  ;;  %47 = vst.msk [vmem:[#allocation2 + $0x18] sm:$0x3] %vm44_vm3, %v20541_v32  ;;  %51 = vst.msk [vmem:[#allocation2 + $0x38] sm:$0x3] %vm44_vm3, %v20541_v32 }
  0x12   :  { %675 = vperm.xlu0 %20486, %v13508_v9   ;;  %670 = vperm.xlu1 %20487, %v13507_v10   ;;  %52 = vst.msk [vmem:[#allocation2 + $0x40] sm:$0xff] %vm42_vm2, %v20541_v32  ;;  %54 = vst.msk [vmem:[#allocation2 + $0x50] sm:$0xff] %vm42_vm2, %v20541_v32 }
  0x13   :  { %53 = vst.msk [vmem:[#allocation2 + $0x48] sm:$0x3] %vm44_vm3, %v20541_v32  ;;  %55 = vst.msk [vmem:[#allocation2 + $0x58] sm:$0x3] %vm44_vm3, %v20541_v32 }
  0x14   :  { %56 = vst.msk [vmem:[#allocation2 + $0x60] sm:$0xff] %vm42_vm2, %v20541_v32  ;;  %58 = vst.msk [vmem:[#allocation2 + $0x70] sm:$0xff] %vm42_vm2, %v20541_v32  ;;  %18480 = vmatpush3.bf16.msra.mxu0 %v18479_v29  ;;  %18588 = vmatpush3.bf16.msra.mxu1 %v18479_v29 }
  0x15   :  { %57 = vst.msk [vmem:[#allocation2 + $0x68] sm:$0x3] %vm44_vm3, %v20541_v32  ;;  %59 = vst.msk [vmem:[#allocation2 + $0x78] sm:$0x3] %vm44_vm3, %v20541_v32 }
  0x16   :  { %809 = vperm.xlu0 %20486, %v13525_v12   ;;  %804 = vperm.xlu1 %20487, %v13524_v13   ;;  %60 = vst.msk [vmem:[#allocation2 + $0x80] sm:$0xff] %vm42_vm2, %v20541_v32  ;;  %64 = vst.msk [vmem:[#allocation2 + $0xa0] sm:$0xff] %vm42_vm2, %v20541_v32 }
  0x17   :  { %61 = vst.msk [vmem:[#allocation2 + $0x88] sm:$0x3] %vm44_vm3, %v20541_v32  ;;  %65 = vst.msk [vmem:[#allocation2 + $0xa8] sm:$0x3] %vm44_vm3, %v20541_v32 }
  0x18   :  { %66 = vst.msk [vmem:[#allocation2 + $0xb0] sm:$0xff] %vm42_vm2, %v20541_v32  ;;  %68 = vst.msk [vmem:[#allocation2 + $0xc0] sm:$0xff] %vm42_vm2, %v20541_v32 }
  0x19   :  { %67 = vst.msk [vmem:[#allocation2 + $0xb8] sm:$0x3] %vm44_vm3, %v20541_v32  ;;  %69 = vst.msk [vmem:[#allocation2 + $0xc8] sm:$0x3] %vm44_vm3, %v20541_v32 }
  0x1a   :  { %943 = vperm.xlu0 %20486, %v13542_v15   ;;  %938 = vperm.xlu1 %20487, %v13541_v16   ;;  %70 = vst.msk [vmem:[#allocation2 + $0xd0] sm:$0xff] %vm42_vm2, %v20541_v32  ;;  %72 = vst.msk [vmem:[#allocation2 + $0xe0] sm:$0xff] %vm42_vm2, %v20541_v32 }
  0x1b   :  { %71 = vst.msk [vmem:[#allocation2 + $0xd8] sm:$0x3] %vm44_vm3, %v20541_v32  ;;  %73 = vst.msk [vmem:[#allocation2 + $0xe8] sm:$0x3] %vm44_vm3, %v20541_v32 }
  0x1c   :  { %74 = vst.msk [vmem:[#allocation2 + $0xf0] sm:$0xff] %vm42_vm2, %v20541_v32  ;;  %76 = vst.msk [vmem:[#allocation2 + $0x100] sm:$0xff] %vm42_vm2, %v20541_v32 }
  0x1d   :  { %75 = vst.msk [vmem:[#allocation2 + $0xf8] sm:$0x3] %vm44_vm3, %v20541_v32  ;;  %77 = vst.msk [vmem:[#allocation2 + $0x108] sm:$0x3] %vm44_vm3, %v20541_v32 }
  0x1e   :  { %1077 = vperm.xlu0 %20486, %v13559_v19   ;;  %1072 = vperm.xlu1 %20487, %v13558_v21   ;;  %78 = vst.msk [vmem:[#allocation2 + $0x110] sm:$0xff] %vm42_vm2, %v20541_v32  ;;  %80 = vst.msk [vmem:[#allocation2 + $0x120] sm:$0xff] %vm42_vm2, %v20541_v32 }
  0x1f   :  { %79 = vst.msk [vmem:[#allocation2 + $0x118] sm:$0x3] %vm44_vm3, %v20541_v32  ;;  %81 = vst.msk [vmem:[#allocation2 + $0x128] sm:$0x3] %vm44_vm3, %v20541_v32 }
  0x22   :  { %1211 = vperm.xlu0 %20486, %v13576_v27   ;;  %1206 = vperm.xlu1 %20487, %v13575_v28  }
  0x23   :  { %17 = vsyncpa [#allocation6], 0  ;;  %18481 = vmatprep.subr.bf16.mxu0 %v20538_v11  ;;  %v1819_v37 = vld [vmem:[%s25084_s4] sm:$0xff]  ;;  %v1820_v38 = vld [vmem:[%s25084_s4 + $0x8] sm:$0xff]  ;;  %18589 = vmatprep.subr.bf16.mxu1 %v20538_v11  ;;  %v1837_v41 = vrot.slane %v20786_v36, 1  ;;  %v1991_v20 = vrot.slane %v20786_v36, 2 }
  0x24   :  { %v117_v39 = vld [vmem:[%s25080_s0 + $0x10] sm:$0xff]  ;;  %18483 = vmatpush3.bf16.msra.mxu0 %v18482_v35  ;;  %v20803_v42 = vpack.c.bf16 %v1820_v38, %v1819_v37  ;;  %18591 = vmatpush3.bf16.msra.mxu1 %v18482_v35  ;;  %v1822_v44 = vld [vmem:[%s25084_s4 + $0x18] sm:$0xff]  ;;  %v1823_v48 = vld [vmem:[%s25084_s4 + $0x20] sm:$0xff]  ;;  %vm1414_vm4 = vcmask 518144   ;;  %vm1425_vm5 = vcmask 520194   ;;  %vm1434_vm6 = vcmask 522244  }
  0x25   :  { %v13458_v40 = vld [vmem:[%s25080_s0 + $0x90] sm:$0xff]  ;;  %18484 = vmatprep.subr.bf16.mxu0 %v20538_v11  ;;  %18592 = vmatprep.subr.bf16.mxu1 %v20538_v11  ;;  %v13476_v45 = vld [vmem:[%s25080_s0 + $0x118] sm:$0xff]  ;;  %v1824_v49 = vld [vmem:[%s25084_s4 + $0x28] sm:$0xff]  ;;  %vm1443_vm7 = vcmask 523270   ;;  %vm1423_vm8 = vcmask 516096   ;;  %vm2581_vm9 = vcmask 519168  }
  0x26   :  { %149 = vperm.xlu0 %20486, %v118_v33   ;;  %283 = vperm.xlu1 %20487, %v13459_v34   ;;  %v1821_v43 = vld [vmem:[%s25084_s4 + $0x10] sm:$0xff]  ;;  %v13493_v50 = vld [vmem:[%s25080_s0 + $0x198] sm:$0xff]  ;;  %v20839_v52 = vpack.c.bf16 %v1824_v49, %v1823_v48  ;;  %v13604_v58 = vld [vmem:[%s25084_s4 + $0x80] sm:$0xff]  ;;  %vm10630_vm10 = vcmask 73728  }
  0x27   :  { %v13475_v46 = vld [vmem:[%s25080_s0 + $0x110] sm:$0xff]  ;;  %15715 = vmatmul.mubr.msk.f32.vlgmr.msra.gmra.mrb[0].mxu0 %vm42_vm2, %v1837_v41  ;;  %v20821_v47 = vpack.c.bf16 %v1822_v44, %v1821_v43  ;;  %v1826_v54 = vld [vmem:[%s25084_s4 + $0x38] sm:$0xff]  ;;  %v13605_v59 = vld [vmem:[%s25084_s4 + $0x88] sm:$0xff] }
  0x28   :  { %18486 = vmatpush3.bf16.msra.mxu0 %v20803_v42  ;;  %15733 = vmatprep.mubr.msk.f32.mxu0 %vm20540_vm1, %v20539_v14  ;;  %v13492_v51 = vld [vmem:[%s25080_s0 + $0x190] sm:$0xff]  ;;  %v13510_v55 = vld [vmem:[%s25080_s0 + $0x218] sm:$0xff]  ;;  %v20871_v62 = vpack.c.bf16 %v13605_v59, %v13604_v58  ;;  %v13608_v4 = vld [vmem:[%s25084_s4 + $0xa0] sm:$0xff] }
  0x29   :  { %18487 = vmatprep.subr.bf16.mxu0 %v20538_v11  ;;  %v1825_v53 = vld [vmem:[%s25084_s4 + $0x30] sm:$0xff]  ;;  %v13527_v60 = vld [vmem:[%s25080_s0 + $0x298] sm:$0xff]  ;;  %v13609_v5 = vld [vmem:[%s25084_s4 + $0xa8] sm:$0xff] }
  0x2a   :  { %144 = vperm.xlu0 %20486, %v117_v39   ;;  %278 = vperm.xlu1 %20487, %v13458_v40   ;;  %v13509_v56 = vld [vmem:[%s25080_s0 + $0x210] sm:$0xff]  ;;  %v20855_v57 = vpack.c.bf16 %v1826_v54, %v1825_v53  ;;  %v13607_v0 = vld [vmem:[%s25084_s4 + $0x98] sm:$0xff]  ;;  %v20907_v8 = vpack.c.bf16 %v13609_v5, %v13608_v4  ;;  %v13613_v16 = vld [vmem:[%s25084_s4 + $0xc0] sm:$0xff] }
  0x2b   :  { %v13526_v61 = vld [vmem:[%s25080_s0 + $0x290] sm:$0xff]  ;;  %v13544_v1 = vld [vmem:[%s25080_s0 + $0x318] sm:$0xff]  ;;  %v13614_v17 = vld [vmem:[%s25084_s4 + $0xc8] sm:$0xff] }
  0x2c   :  { %18489 = vmatpush3.bf16.msra.mxu0 %v20821_v47  ;;  %v13606_v63 = vld [vmem:[%s25084_s4 + $0x90] sm:$0xff]  ;;  %v13561_v6 = vld [vmem:[%s25080_s0 + $0x398] sm:$0xff]  ;;  %v120_v18 = vld [vmem:[%s25080_s0 + $0x28] sm:$0xff]  ;;  %v20940_v21 = vpack.c.bf16 %v13614_v17, %v13613_v16 }
  0x2d   :  { %18490 = vmatprep.subr.bf16.mxu0 %v20538_v11  ;;  %v13543_v2 = vld [vmem:[%s25080_s0 + $0x310] sm:$0xff]  ;;  %v20889_v3 = vpack.c.bf16 %v13607_v0, %v13606_v63  ;;  %v13611_v10 = vld [vmem:[%s25084_s4 + $0xb8] sm:$0xff]  ;;  %v13461_v19 = vld [vmem:[%s25080_s0 + $0xa8] sm:$0xff] }
  0x2e   :  { %417 = vperm.xlu0 %20486, %v13476_v45   ;;  %412 = vperm.xlu1 %20487, %v13475_v46   ;;  %v13560_v7 = vld [vmem:[%s25080_s0 + $0x390] sm:$0xff]  ;;  %v13578_v12 = vld [vmem:[%s25080_s0 + $0x418] sm:$0xff]  ;;  %v119_v24 = vld [vmem:[%s25080_s0 + $0x20] sm:$0xff] }
  0x2f   :  { %v13610_v9 = vld [vmem:[%s25084_s4 + $0xb0] sm:$0xff]  ;;  %v13616_v23 = vld [vmem:[%s25084_s4 + $0xd8] sm:$0xff]  ;;  %v13460_v25 = vld [vmem:[%s25080_s0 + $0xa0] sm:$0xff] }
  0x30   :  { %18492 = vmatpush3.bf16.msra.mxu0 %v20839_v52  ;;  %v13577_v13 = vld [vmem:[%s25080_s0 + $0x410] sm:$0xff]  ;;  %v20923_v15 = vpack.c.bf16 %v13611_v10, %v13610_v9  ;;  %v13617_v27 = vld [vmem:[%s25084_s4 + $0xe0] sm:$0xff]  ;;  %v13618_v28 = vld [vmem:[%s25084_s4 + $0xe8] sm:$0xff] }
  0x31   :  { %18493 = vmatprep.subr.bf16.mxu0 %v20538_v11  ;;  %v13615_v22 = vld [vmem:[%s25084_s4 + $0xd0] sm:$0xff]  ;;  %v13478_v29 = vld [vmem:[%s25080_s0 + $0x128] sm:$0xff]  ;;  %v13477_v30 = vld [vmem:[%s25080_s0 + $0x120] sm:$0xff]  ;;  %v20975_v31 = vpack.c.bf16 %v13618_v28, %v13617_v27 }
  0x32   :  { %551 = vperm.xlu0 %20486, %v13493_v50   ;;  %546 = vperm.xlu1 %20487, %v13492_v51   ;;  %v20957_v26 = vpack.c.bf16 %v13616_v23, %v13615_v22  ;;  %v13619_v32 = vld [vmem:[%s25084_s4 + $0xf0] sm:$0xff]  ;;  %v13620_v33 = vld [vmem:[%s25084_s4 + $0xf8] sm:$0xff]  ;;  %v13495_v34 = vld [vmem:[%s25080_s0 + $0x1a8] sm:$0xff] }
  0x33   :  { %v13494_v35 = vld [vmem:[%s25080_s0 + $0x1a0] sm:$0xff]  ;;  %v13512_v37 = vld [vmem:[%s25080_s0 + $0x228] sm:$0xff]  ;;  %v122_v49 = vld [vmem:[%s25080_s0 + $0x38] sm:$0xff] }
  0x34   :  { %18495 = vmatpush3.bf16.msra.mxu0 %v20855_v57  ;;  %v13511_v38 = vld [vmem:[%s25080_s0 + $0x220] sm:$0xff]  ;;  %v13529_v39 = vld [vmem:[%s25080_s0 + $0x2a8] sm:$0xff]  ;;  %v13463_v50 = vld [vmem:[%s25080_s0 + $0xb8] sm:$0xff] }
  0x35   :  { %18496 = vmatprep.subr.bf16.mxu0 %v20538_v11  ;;  %v13528_v40 = vld [vmem:[%s25080_s0 + $0x2a0] sm:$0xff]  ;;  %v13546_v41 = vld [vmem:[%s25080_s0 + $0x328] sm:$0xff]  ;;  %v121_v51 = vld [vmem:[%s25080_s0 + $0x30] sm:$0xff] }
  0x36   :  { %685 = vperm.xlu0 %20486, %v13510_v55   ;;  %680 = vperm.xlu1 %20487, %v13509_v56   ;;  %v13545_v43 = vld [vmem:[%s25080_s0 + $0x320] sm:$0xff]  ;;  %v13563_v44 = vld [vmem:[%s25080_s0 + $0x3a8] sm:$0xff]  ;;  %v13462_v53 = vld [vmem:[%s25080_s0 + $0xb0] sm:$0xff] }
  0x37   :  { %15734 = vmatmul.mubr.msk.f32.vlgmr.msra.gmra.mrb[0].mxu0 %vm42_vm2, %v20786_v36  ;;  %v20991_v36 = vpack.c.bf16 %v13620_v33, %v13619_v32  ;;  %v13562_v45 = vld [vmem:[%s25080_s0 + $0x3a0] sm:$0xff]  ;;  %v13580_v46 = vld [vmem:[%s25080_s0 + $0x428] sm:$0xff]  ;;  %v13480_v54 = vld [vmem:[%s25080_s0 + $0x138] sm:$0xff] }
  0x38   :  { %18498 = vmatpush3.bf16.msra.mxu0 %v20871_v62  ;;  %15752 = vmatprep.mubr.msk.f32.mxu0 %vm20540_vm1, %v20539_v14  ;;  %v13579_v48 = vld [vmem:[%s25080_s0 + $0x420] sm:$0xff]  ;;  %v13479_v55 = vld [vmem:[%s25080_s0 + $0x130] sm:$0xff]  ;;  %v13497_v56 = vld [vmem:[%s25080_s0 + $0x1b8] sm:$0xff] }
  0x39   :  { %18499 = vmatprep.subr.bf16.mxu0 %v20538_v11  ;;  %v13496_v58 = vld [vmem:[%s25080_s0 + $0x1b0] sm:$0xff]  ;;  %v13514_v59 = vld [vmem:[%s25080_s0 + $0x238] sm:$0xff]  ;;  %v13465_v22 = vld [vmem:[%s25080_s0 + $0xc8] sm:$0xff] }
  0x3a   :  { %819 = vperm.xlu0 %20486, %v13527_v60   ;;  %814 = vperm.xlu1 %20487, %v13526_v61   ;;  %v13513_v60 = vld [vmem:[%s25080_s0 + $0x230] sm:$0xff]  ;;  %v13531_v61 = vld [vmem:[%s25080_s0 + $0x2b8] sm:$0xff]  ;;  %v21094_v23 = vld [vmem:[%s25081_s1] ss:$0 sm:$0xff] }
  0x3b   :  { %v13530_v63 = vld [vmem:[%s25080_s0 + $0x2b0] sm:$0xff] }
  0x3c   :  { %18501 = vmatpush3.bf16.msra.mxu0 %v20889_v3  ;;  %v13547_v4 = vld [vmem:[%s25080_s0 + $0x330] sm:$0xff] }
  0x3d   :  { %18502 = vmatprep.subr.bf16.mxu0 %v20538_v11  ;;  %v13564_v9 = vld [vmem:[%s25080_s0 + $0x3b0] sm:$0xff] }
  0x3e   :  { %953 = vperm.xlu0 %20486, %v13544_v1   ;;  %948 = vperm.xlu1 %20487, %v13543_v2   ;;  %v13548_v2 = vld [vmem:[%s25080_s0 + $0x338] sm:$0xff]  ;;  %v13581_v16 = vld [vmem:[%s25080_s0 + $0x430] sm:$0xff] }
  0x40   :  { %18504 = vmatpush3.bf16.msra.mxu0 %v20907_v8 }
  0x41   :  { %18505 = vmatprep.subr.bf16.mxu0 %v20538_v11 }
  0x42   :  { %1087 = vperm.xlu0 %20486, %v13561_v6   ;;  %1082 = vperm.xlu1 %20487, %v13560_v7   ;;  %v13565_v7 = vld [vmem:[%s25080_s0 + $0x3b8] sm:$0xff] }
  0x44   :  { %18507 = vmatpush3.bf16.msra.mxu0 %v20923_v15 }
  0x45   :  { %18508 = vmatprep.subr.bf16.mxu0 %v20538_v11 }
  0x46   :  { %1221 = vperm.xlu0 %20486, %v13578_v12   ;;  %1216 = vperm.xlu1 %20487, %v13577_v13   ;;  %v13582_v13 = vld [vmem:[%s25080_s0 + $0x438] sm:$0xff] }
  0x47   :  { %15753 = vmatmul.mubr.msk.f32.vlgmr.msra.gmra.mrb[0].mxu0 %vm42_vm2, %v1991_v20  ;;  %v124_v20 = vld [vmem:[%s25080_s0 + $0x48] sm:$0xff] }
  0x48   :  { %18510 = vmatpush3.bf16.msra.mxu0 %v20940_v21  ;;  %15771 = vmatprep.mubr.msk.f32.mxu0 %vm20540_vm1, %v20539_v14 }
  0x49   :  { %18511 = vmatprep.subr.bf16.mxu0 %v20538_v11 }
  0x4a   :  { %159 = vperm.xlu0 %20486, %v120_v18   ;;  %293 = vperm.xlu1 %20487, %v13461_v19   ;;  %v21083_v19 = vld [vmem:[%s25081_s1 + $0x1] ss:$0 sm:$0xff] }
  0x4c   :  { %18513 = vmatpush3.bf16.msra.mxu0 %v20957_v26 }
  0x4d   :  { %18514 = vmatprep.subr.bf16.mxu0 %v20538_v11 }
  0x4e   :  { %154 = vperm.xlu0 %20486, %v119_v24   ;;  %288 = vperm.xlu1 %20487, %v13460_v25   ;;  %v21099_v24 = vld [vmem:[%s25081_s1 + $0x2] ss:$0 sm:$0xff] }
  0x50   :  { %18516 = vmatpush3.bf16.msra.mxu0 %v20975_v31 }
  0x51   :  { %18517 = vmatprep.subr.bf16.mxu0 %v20538_v11 }
  0x52   :  { %427 = vperm.xlu0 %20486, %v13478_v29   ;;  %422 = vperm.xlu1 %20487, %v13477_v30   ;;  %v21106_v30 = vld [vmem:[%s25081_s1 + $0x3] ss:$0 sm:$0xff] }
  0x54   :  { %18519 = vmatpush3.bf16.msra.mxu0 %v20991_v36 }
  0x55   :  { %18520 = vmatprep.subr.bf16.mxu0 %v20538_v11 }
  0x56   :  { %561 = vperm.xlu0 %20486, %v13495_v34   ;;  %556 = vperm.xlu1 %20487, %v13494_v35   ;;  %v123_v34 = vld [vmem:[%s25080_s0 + $0x40] sm:$0xff] }
  0x57   :  { %v13464_v35 = vld [vmem:[%s25080_s0 + $0xc0] sm:$0xff] }
  0x5a   :  { %695 = vperm.xlu0 %20486, %v13512_v37   ;;  %690 = vperm.xlu1 %20487, %v13511_v38  }
  0x5e   :  { %829 = vperm.xlu0 %20486, %v13529_v39   ;;  %824 = vperm.xlu1 %20487, %v13528_v40   ;;  %v21121_v39 = vld [vmem:[%s25081_s1 + $0x4] ss:$0 sm:$0xff] }
  0x62   :  { %963 = vperm.xlu0 %20486, %v13546_v41   ;;  %958 = vperm.xlu1 %20487, %v13545_v43  }
  0x66   :  { %1097 = vperm.xlu0 %20486, %v13563_v44   ;;  %1092 = vperm.xlu1 %20487, %v13562_v45  }
  0x6a   :  { %1231 = vperm.xlu0 %20486, %v13580_v46   ;;  %1226 = vperm.xlu1 %20487, %v13579_v48   ;;  %v21128_v48 = vld [vmem:[%s25081_s1 + $0x5] ss:$0 sm:$0xff] }
  0x6e   :  { %169 = vperm.xlu0 %20486, %v122_v49   ;;  %303 = vperm.xlu1 %20487, %v13463_v50  }
  0x72   :  { %164 = vperm.xlu0 %20486, %v121_v51   ;;  %298 = vperm.xlu1 %20487, %v13462_v53   ;;  %v13482_v51 = vld [vmem:[%s25080_s0 + $0x148] sm:$0xff]  ;;  %v13481_v53 = vld [vmem:[%s25080_s0 + $0x140] sm:$0xff] }
  0x76   :  { %437 = vperm.xlu0 %20486, %v13480_v54   ;;  %432 = vperm.xlu1 %20487, %v13479_v55  }
  0x7a   :  { %571 = vperm.xlu0 %20486, %v13497_v56   ;;  %566 = vperm.xlu1 %20487, %v13496_v58   ;;  %v21141_v56 = vld [vmem:[%s25081_s1 + $0x6] ss:$0 sm:$0xff] }
  0x7e   :  { %705 = vperm.xlu0 %20486, %v13514_v59   ;;  %700 = vperm.xlu1 %20487, %v13513_v60  }
  0x81   :  { %v140_v0 = vpop.permute.xlu0 %139  ;;  %v135_v1 = vpop.permute.xlu1 %134 }
  0x82   :  { %839 = vperm.xlu0 %20486, %v13531_v61   ;;  %834 = vperm.xlu1 %20487, %v13530_v63   ;;  %v217_v32 = vmul.f32 %v21094_v23, %v140_v0  ;;  %v216_v37 = vmul.f32 %v21094_v23, %v135_v1 }
  0x85   :  { %v274_v5 = vpop.permute.xlu0 %273  ;;  %v269_v6 = vpop.permute.xlu1 %268 }
  0x86   :  { %973 = vperm.xlu0 %20486, %v13548_v2   ;;  %968 = vperm.xlu1 %20487, %v13547_v4   ;;  %v351_v25 = vmul.f32 %v21083_v19, %v274_v5  ;;  %v350_v29 = vmul.f32 %v21083_v19, %v269_v6  ;;  %v21149_v4 = vld [vmem:[%s25081_s1 + $0x7] ss:$0 sm:$0xff]  ;;  %v13499_v5 = vld [vmem:[%s25080_s0 + $0x1c8] sm:$0xff] }
  0x87   :  { %v13498_v6 = vld [vmem:[%s25080_s0 + $0x1c0] sm:$0xff] }
  0x88   :  { %v367_v40 = vadd.f32 %v351_v25, %v217_v32  ;;  %v366_v45 = vadd.f32 %v350_v29, %v216_v37  ;;  %v13516_v25 = vld [vmem:[%s25080_s0 + $0x248] sm:$0xff] }
  0x89   :  { %v408_v10 = vpop.permute.xlu0 %407  ;;  %v403_v12 = vpop.permute.xlu1 %402 }
  0x8a   :  { %1107 = vperm.xlu0 %20486, %v13565_v7   ;;  %1102 = vperm.xlu1 %20487, %v13564_v9   ;;  %v485_v33 = vmul.f32 %v21099_v24, %v408_v10  ;;  %v484_v38 = vmul.f32 %v21099_v24, %v403_v12 }
  0x8c   :  { %v501_v49 = vadd.f32 %v485_v33, %v367_v40  ;;  %v500_v54 = vadd.f32 %v484_v38, %v366_v45  ;;  %v21176_v38 = vld [vmem:[%s25082_s2] ss:$0 sm:$0xff]  ;;  %v13533_v40 = vld [vmem:[%s25080_s0 + $0x2c8] sm:$0xff] }
  0x8d   :  { %v542_v17 = vpop.permute.xlu0 %541  ;;  %v537_v18 = vpop.permute.xlu1 %536  ;;  %v21187_v45 = vld [vmem:[%s25083_s3] ss:$0 sm:$0xff] }
  0x8e   :  { %1241 = vperm.xlu0 %20486, %v13582_v13   ;;  %1236 = vperm.xlu1 %20487, %v13581_v16   ;;  %v619_v41 = vmul.f32 %v21106_v30, %v542_v17  ;;  %v618_v46 = vmul.f32 %v21106_v30, %v537_v18 }
  0x90   :  { %v635_v58 = vadd.f32 %v619_v41, %v501_v49  ;;  %v634_v63 = vadd.f32 %v618_v46, %v500_v54 }
  0x91   :  { %v676_v27 = vpop.permute.xlu0 %675  ;;  %v671_v28 = vpop.permute.xlu1 %670 }
  0x92   :  { %179 = vperm.xlu0 %20486, %v124_v20   ;;  %313 = vperm.xlu1 %20487, %v13465_v22   ;;  %v753_v50 = vmul.f32 %v21121_v39, %v676_v27  ;;  %v752_v55 = vmul.f32 %v21121_v39, %v671_v28  ;;  %v21163_v22 = vld [vmem:[%s25081_s1 + $0x8] ss:$0 sm:$0xff]  ;;  %v13515_v27 = vld [vmem:[%s25080_s0 + $0x240] sm:$0xff] }
  0x94   :  { %v769_v1 = vadd.f32 %v753_v50, %v635_v58  ;;  %v768_v7 = vadd.f32 %v752_v55, %v634_v63  ;;  %v13549_v58 = vld [vmem:[%s25080_s0 + $0x340] sm:$0xff] }
  0x95   :  { %v810_v43 = vpop.permute.xlu0 %809  ;;  %v805_v44 = vpop.permute.xlu1 %804 }
  0x96   :  { %174 = vperm.xlu0 %20486, %v123_v34   ;;  %308 = vperm.xlu1 %20487, %v13464_v35   ;;  %v887_v59 = vmul.f32 %v21128_v48, %v810_v43  ;;  %v886_v0 = vmul.f32 %v21128_v48, %v805_v44  ;;  %v13532_v44 = vld [vmem:[%s25080_s0 + $0x2c0] sm:$0xff] }
  0x98   :  { %v903_v10 = vadd.f32 %v887_v59, %v769_v1  ;;  %v902_v16 = vadd.f32 %v886_v0, %v768_v7  ;;  %v13567_v0 = vld [vmem:[%s25080_s0 + $0x3c8] sm:$0xff]  ;;  %v13566_v1 = vld [vmem:[%s25080_s0 + $0x3c0] sm:$0xff] }
  0x99   :  { %v944_v60 = vpop.permute.xlu0 %943  ;;  %v939_v61 = vpop.permute.xlu1 %938  ;;  %v1399_v7 = vld [vmem:[#allocation2 + $0x8] sm:$0x3] }
  0x9a   :  { %447 = vperm.xlu0 %20486, %v13482_v51   ;;  %442 = vperm.xlu1 %20487, %v13481_v53   ;;  %v1021_v2 = vmul.f32 %v21141_v56, %v944_v60  ;;  %v1020_v9 = vmul.f32 %v21141_v56, %v939_v61  ;;  %v13550_v53 = vld [vmem:[%s25080_s0 + $0x348] sm:$0xff] }
  0x9c   :  { %v1037_v20 = vadd.f32 %v1021_v2, %v903_v10  ;;  %v1036_v28 = vadd.f32 %v1020_v9, %v902_v16  ;;  %v13584_v9 = vld [vmem:[%s25080_s0 + $0x448] sm:$0xff]  ;;  %v13583_v10 = vld [vmem:[%s25080_s0 + $0x440] sm:$0xff] }
  0x9d   :  { %v1078_v12 = vpop.permute.xlu0 %1077  ;;  %v1073_v13 = vpop.permute.xlu1 %1072 }
  0x9e   :  { %v1155_v17 = vmul.f32 %v21149_v4, %v1078_v12  ;;  %v1154_v18 = vmul.f32 %v21149_v4, %v1073_v13  ;;  %581 = vperm.xlu0 %20486, %v13499_v5   ;;  %576 = vperm.xlu1 %20487, %v13498_v6   ;;  %v1398_v6 = vld [vmem:[#allocation2] sm:$0xff] }
  0x9f   :  { %v1404_v16 = vsel %vm42_vm2, %v1398_v6, -inf }
  0xa0   :  { %v1171_v29 = vadd.f32 %v1155_v17, %v1037_v20  ;;  %v1170_v34 = vadd.f32 %v1154_v18, %v1036_v28  ;;  %v1409_v17 = vsel %vm44_vm3, %v1399_v7, -inf  ;;  %v126_v28 = vld [vmem:[%s25080_s0 + $0x58] sm:$0xff] }
  0xa1   :  { %v1212_v32 = vpop.permute.xlu0 %1211  ;;  %v1207_v33 = vpop.permute.xlu1 %1206 }
  0xa2   :  { %v1289_v35 = vmul.f32 %v21163_v22, %v1212_v32  ;;  %v1288_v37 = vmul.f32 %v21163_v22, %v1207_v33  ;;  %715 = vperm.xlu0 %20486, %v13516_v25   ;;  %710 = vperm.xlu1 %20487, %v13515_v27  }
  0xa4   :  { %v1305_v41 = vadd.f32 %v1289_v35, %v1171_v29  ;;  %v1304_v43 = vadd.f32 %v1288_v37, %v1170_v34 }
  0xa5   :  { %v150_v46 = vpop.permute.xlu0 %149  ;;  %v284_v49 = vpop.permute.xlu1 %283 }
  0xa6   :  { %v1327_v50 = vmul.f32 %v21176_v38, %v1305_v41  ;;  %v1326_v51 = vmul.f32 %v21176_v38, %v1304_v43  ;;  %849 = vperm.xlu0 %20486, %v13533_v40   ;;  %844 = vperm.xlu1 %20487, %v13532_v44   ;;  %v219_v25 = vmul.f32 %v21094_v23, %v150_v46  ;;  %v13467_v40 = vld [vmem:[%s25080_s0 + $0xd8] sm:$0xff] }
  0xa7   :  { %v353_v27 = vmul.f32 %v21083_v19, %v284_v49 }
  0xa8   :  { %v1349_v54 = vadd.f32 %v21187_v45, %v1327_v50  ;;  %v1348_v55 = vadd.f32 %v21187_v45, %v1326_v51 }
  0xa9   :  { %v145_v59 = vpop.permute.xlu0 %144  ;;  %v279_v60 = vpop.permute.xlu1 %278 }
  0xaa   :  { %v1365_v61 = vmax.f32 %v1349_v54, 0.0  ;;  %v1364_v63 = vmax.f32 %v1348_v55, 0.0  ;;  %983 = vperm.xlu0 %20486, %v13550_v53   ;;  %978 = vperm.xlu1 %20487, %v13549_v58   ;;  %v218_v35 = vmul.f32 %v21094_v23, %v145_v59  ;;  %v352_v37 = vmul.f32 %v21083_v19, %v279_v60  ;;  %v125_v59 = vld [vmem:[%s25080_s0 + $0x50] sm:$0xff] }
  0xab   :  { %v369_v58 = vadd.f32 %v353_v27, %v219_v25 }
  0xac   :  { %1382 = vst.msk [vmem:[#allocation2 + $0x21] sm:$0xff] %vm42_vm2, %v1365_v61  ;;  %1381 = vst.msk [vmem:[#allocation2 + $0x11] sm:$0xff] %vm42_vm2, %v1364_v63  ;;  %v368_v60 = vadd.f32 %v352_v37, %v218_v35 }
  0xad   :  { %v418_v2 = vpop.permute.xlu0 %417  ;;  %v413_v5 = vpop.permute.xlu1 %412 }
  0xae   :  { %1117 = vperm.xlu0 %20486, %v13567_v0   ;;  %1112 = vperm.xlu1 %20487, %v13566_v1   ;;  %v487_v44 = vmul.f32 %v21099_v24, %v418_v2  ;;  %v486_v53 = vmul.f32 %v21099_v24, %v413_v5  ;;  %v13466_v0 = vld [vmem:[%s25080_s0 + $0xd0] sm:$0xff] }
  0xb0   :  { %v503_v1 = vadd.f32 %v487_v44, %v369_v58 }
  0xb1   :  { %v552_v12 = vpop.permute.xlu0 %551  ;;  %v547_v13 = vpop.permute.xlu1 %546 }
  0xb2   :  { %1251 = vperm.xlu0 %20486, %v13584_v9   ;;  %1246 = vperm.xlu1 %20487, %v13583_v10   ;;  %v621_v61 = vmul.f32 %v21106_v30, %v552_v12  ;;  %v620_v63 = vmul.f32 %v21106_v30, %v547_v13  ;;  %v502_v10 = vadd.f32 %v486_v53, %v368_v60 }
  0xb3   :  { %v1402_v18 = vld [vmem:[#allocation2 + $0x20] sm:$0xff]  ;;  %v1403_v20 = vld [vmem:[#allocation2 + $0x28] sm:$0x3]  ;;  %v1400_v33 = vld [vmem:[#allocation2 + $0x10] sm:$0xff] }
  0xb4   :  { %v21221_v29 = vsel %vm42_vm2, %v1402_v18, -inf  ;;  %v1411_v32 = vsel %vm44_vm3, %v1403_v20, -inf  ;;  %v1401_v34 = vld [vmem:[#allocation2 + $0x18] sm:$0x3]  ;;  %v1405_v50 = vsel %vm42_vm2, %v1400_v33, -inf  ;;  %v13483_v33 = vld [vmem:[%s25080_s0 + $0x150] sm:$0xff] }
  0xb5   :  { %v1407_v41 = vmax.f32 %v1404_v16, %v21221_v29  ;;  %v1412_v43 = vmax.f32 %v1409_v17, %v1411_v32  ;;  %v686_v46 = vpop.permute.xlu0 %685  ;;  %v681_v49 = vpop.permute.xlu1 %680  ;;  %v1410_v51 = vsel %vm44_vm3, %v1401_v34, -inf  ;;  %v13484_v20 = vld [vmem:[%s25080_s0 + $0x158] sm:$0xff]  ;;  %v636_v32 = vadd.f32 %v620_v63, %v502_v10 }
  0xb6   :  { %189 = vperm.xlu0 %20486, %v126_v28   ;;  %323 = vperm.xlu1 %20487, %v13467_v40   ;;  %v755_v17 = vmul.f32 %v21121_v39, %v686_v46  ;;  %v754_v18 = vmul.f32 %v21121_v39, %v681_v49  ;;  %v637_v28 = vadd.f32 %v621_v61, %v503_v1  ;;  %v13500_v61 = vld [vmem:[%s25080_s0 + $0x1d0] sm:$0xff] }
  0xb7   :  { %v1408_v54 = vmax.f32 %v1407_v41, %v1405_v50  ;;  %v1413_v55 = vmax.f32 %v1412_v43, %v1410_v51 }
  0xb8   :  { %v771_v51 = vadd.f32 %v755_v17, %v637_v28  ;;  %v770_v53 = vadd.f32 %v754_v18, %v636_v32  ;;  %v13518_v17 = vld [vmem:[%s25080_s0 + $0x258] sm:$0xff]  ;;  %v13517_v28 = vld [vmem:[%s25080_s0 + $0x250] sm:$0xff] }
  0xb9   :  { %v820_v2 = vpop.permute.xlu0 %819  ;;  %v815_v5 = vpop.permute.xlu1 %814  ;;  %v1415_v6 = vsel %vm1414_vm4, %v1408_v54, -inf  ;;  %v1426_v7 = vsel %vm1425_vm5, %v1408_v54, -inf  ;;  %v1435_v9 = vsel %vm1434_vm6, %v1408_v54, -inf  ;;  %v1444_v13 = vsel %vm1443_vm7, %v1408_v54, -inf  ;;  %v13501_v54 = vld [vmem:[%s25080_s0 + $0x1d8] sm:$0xff] }
  0xba   :  { %184 = vperm.xlu0 %20486, %v125_v59   ;;  %v1416_v16 = vrot.slane %v1415_v6, 4  ;;  %v1427_v12 = vrot.slane %v1426_v7, 4  ;;  %318 = vperm.xlu1 %20487, %v13466_v0   ;;  %v1436_v25 = vrot.slane %v1435_v9, 4  ;;  %v1445_v27 = vsel %vm1423_vm8, %v1413_v55, -inf }
  0xbb   :  { %v889_v37 = vmul.f32 %v21128_v48, %v820_v2  ;;  %v888_v40 = vmul.f32 %v21128_v48, %v815_v5  ;;  %v1446_v46 = vmax.f32 %v1444_v13, %v1445_v27 }
  0xbc   :  { %v1417_v34 = vmax.f32 %v1415_v6, %v1416_v16  ;;  %v1428_v35 = vmax.f32 %v1426_v7, %v1427_v12  ;;  %v1437_v44 = vmax.f32 %v1435_v9, %v1436_v25 }
  0xbd   :  { %v954_v41 = vpop.permute.xlu0 %953  ;;  %v949_v43 = vpop.permute.xlu1 %948  ;;  %v1447_v58 = vrot.slane %v1446_v46, 4  ;;  %v905_v1 = vadd.f32 %v889_v37, %v771_v51  ;;  %v904_v2 = vadd.f32 %v888_v40, %v770_v53 }
  0xbe   :  { %457 = vperm.xlu0 %20486, %v13484_v20   ;;  %v1418_v49 = vrot.slane %v1417_v34, 2  ;;  %v1429_v50 = vrot.slane %v1428_v35, 2  ;;  %452 = vperm.xlu1 %20487, %v13483_v33   ;;  %v1438_v55 = vrot.slane %v1437_v44, 2  ;;  %v1023_v59 = vmul.f32 %v21141_v56, %v954_v41 }
  0xbf   :  { %v1022_v60 = vmul.f32 %v21141_v56, %v949_v43  ;;  %v1448_v9 = vmax.f32 %v1446_v46, %v1447_v58 }
  0xc0   :  { %v1419_v63 = vmax.f32 %v1417_v34, %v1418_v49  ;;  %v1430_v0 = vmax.f32 %v1428_v35, %v1429_v50  ;;  %v1439_v7 = vmax.f32 %v1437_v44, %v1438_v55  ;;  %v1039_v25 = vadd.f32 %v1023_v59, %v905_v1  ;;  %v13535_v49 = vld [vmem:[%s25080_s0 + $0x2d8] sm:$0xff] }
  0xc1   :  { %v1088_v5 = vpop.permute.xlu0 %1087  ;;  %v1083_v6 = vpop.permute.xlu1 %1082  ;;  %v1449_v20 = vrot.slane %v1448_v9, 2  ;;  %v1038_v27 = vadd.f32 %v1022_v60, %v904_v2  ;;  %v13551_v2 = vld [vmem:[%s25080_s0 + $0x350] sm:$0xff] }
  0xc2   :  { %v1157_v10 = vmul.f32 %v21149_v4, %v1088_v5  ;;  %v1156_v16 = vmul.f32 %v21149_v4, %v1083_v6  ;;  %591 = vperm.xlu0 %20486, %v13501_v54   ;;  %v1420_v12 = vrot.slane %v1419_v63, 1  ;;  %v1431_v13 = vrot.slane %v1430_v0, 1  ;;  %586 = vperm.xlu1 %20487, %v13500_v61   ;;  %v13534_v54 = vld [vmem:[%s25080_s0 + $0x2d0] sm:$0xff] }
  0xc3   :  { %v1440_v18 = vrot.slane %v1439_v7, 1  ;;  %v1450_v40 = vmax.f32 %v1448_v9, %v1449_v20  ;;  %v13623_v9 = vld [vmem:[%s25084_s4 + $0x108] sm:$0xff] }
  0xc4   :  { %v1421_v32 = vmax.f32 %v1419_v63, %v1420_v12  ;;  %v1432_v33 = vmax.f32 %v1430_v0, %v1431_v13  ;;  %v1173_v41 = vadd.f32 %v1157_v10, %v1039_v25  ;;  %v1172_v43 = vadd.f32 %v1156_v16, %v1038_v27  ;;  %v13552_v63 = vld [vmem:[%s25080_s0 + $0x358] sm:$0xff]  ;;  %v13624_v25 = vld [vmem:[%s25084_s4 + $0x110] sm:$0xff] }
  0xc5   :  { %v1222_v34 = vpop.permute.xlu0 %1221  ;;  %v1217_v35 = vpop.permute.xlu1 %1216  ;;  %v1441_v37 = vmax.f32 %v1439_v7, %v1440_v18  ;;  %v1451_v50 = vrot.slane %v1450_v40, 1  ;;  %v13622_v7 = vld [vmem:[%s25084_s4 + $0x100] sm:$0xff]  ;;  %v13569_v12 = vld [vmem:[%s25080_s0 + $0x3d8] sm:$0xff] }
  0xc6   :  { %v1291_v44 = vmul.f32 %v21163_v22, %v1222_v34  ;;  %v1290_v46 = vmul.f32 %v21163_v22, %v1217_v35  ;;  %725 = vperm.xlu0 %20486, %v13518_v17   ;;  %1424 = vst.msk [vmem:[#allocation3 + $0x9] sm:$0x1] %vm1423_vm8, %v1421_v32  ;;  %1433 = vst.msk [vmem:[#allocation3 + $0xa] sm:$0x1] %vm1423_vm8, %v1432_v33  ;;  %720 = vperm.xlu1 %20487, %v13517_v28   ;;  %v13568_v17 = vld [vmem:[%s25080_s0 + $0x3d0] sm:$0xff]  ;;  %v13625_v27 = vld [vmem:[%s25084_s4 + $0x118] sm:$0xff] }
  0xc7   :  { %1442 = vst.msk [vmem:[#allocation3 + $0xb] sm:$0x1] %vm1423_vm8, %v1441_v37  ;;  %v1452_v59 = vmax.f32 %v1450_v40, %v1451_v50  ;;  %v21306_v13 = vpack.c.bf16 %v13623_v9, %v13622_v7  ;;  %v13586_v34 = vld [vmem:[%s25080_s0 + $0x458] sm:$0xff]  ;;  %v13585_v35 = vld [vmem:[%s25080_s0 + $0x450] sm:$0xff]  ;;  %v1456_v37 = vld [vmem:[#allocation2 + $0x28] sm:$0x3]  ;;  %v21331_v40 = vpack.c.bf16 %v13625_v27, %v13624_v25 }
  0xc8   :  { %v1307_v51 = vadd.f32 %v1291_v44, %v1173_v41  ;;  %v1306_v53 = vadd.f32 %v1290_v46, %v1172_v43  ;;  %v13626_v41 = vld [vmem:[%s25084_s4 + $0x120] sm:$0xff]  ;;  %v13627_v43 = vld [vmem:[%s25084_s4 + $0x128] sm:$0xff] }
  0xc9   :  { %v160_v55 = vpop.permute.xlu0 %159  ;;  %v294_v58 = vpop.permute.xlu1 %293  ;;  %1453 = vst.msk [vmem:[#allocation3 + $0xc] sm:$0x1] %vm1423_vm8, %v1452_v59  ;;  %v1466_v59 = vsel %vm44_vm3, %v1456_v37, -inf  ;;  %v13469_v7 = vld [vmem:[%s25080_s0 + $0xe8] sm:$0xff] }
  0xca   :  { %v1329_v60 = vmul.f32 %v21176_v38, %v1307_v51  ;;  %v1328_v61 = vmul.f32 %v21176_v38, %v1306_v53  ;;  %859 = vperm.xlu0 %20486, %v13535_v49   ;;  %854 = vperm.xlu1 %20487, %v13534_v54   ;;  %v221_v44 = vmul.f32 %v21094_v23, %v160_v55  ;;  %v13628_v54 = vld [vmem:[%s25084_s4 + $0x130] sm:$0xff]  ;;  %v13629_v55 = vld [vmem:[%s25084_s4 + $0x138] sm:$0xff] }
  0xcb   :  { %v355_v50 = vmul.f32 %v21083_v19, %v294_v58  ;;  %v21356_v58 = vpack.c.bf16 %v13627_v43, %v13626_v41  ;;  %v127_v41 = vld [vmem:[%s25080_s0 + $0x60] sm:$0xff] }
  0xcc   :  { %v1351_v0 = vadd.f32 %v21187_v45, %v1329_v60  ;;  %v1350_v1 = vadd.f32 %v21187_v45, %v1328_v61 }
  0xcd   :  { %v155_v5 = vpop.permute.xlu0 %154  ;;  %v289_v6 = vpop.permute.xlu1 %288 }
  0xce   :  { %v1367_v10 = vmax.f32 %v1351_v0, 0.0  ;;  %v1366_v16 = vmax.f32 %v1350_v1, 0.0  ;;  %993 = vperm.xlu0 %20486, %v13552_v63   ;;  %988 = vperm.xlu1 %20487, %v13551_v2   ;;  %v220_v51 = vmul.f32 %v21094_v23, %v155_v5  ;;  %v354_v53 = vmul.f32 %v21083_v19, %v289_v6 }
  0xd0   :  { %1384 = vst.msk [vmem:[#allocation2 + $0x41] sm:$0xff] %vm42_vm2, %v1367_v10  ;;  %1383 = vst.msk [vmem:[#allocation2 + $0x31] sm:$0xff] %vm42_vm2, %v1366_v16  ;;  %v21317_v28 = vld [vmem:[#allocation3 + $0x8] sm:$0x3f] }
  0xd1   :  { %v428_v18 = vpop.permute.xlu0 %427  ;;  %v423_v20 = vpop.permute.xlu1 %422  ;;  %v21319_v32 = vld [vmem:[#allocation3 + $0x8] sm:$0x3f]  ;;  %15772 = vmatmul.mubr.msk.f32.vlgmr.msra.gmra.mrb[0].mxu0 %vm42_vm2, %v21317_v28 }
  0xd2   :  { %1127 = vperm.xlu0 %20486, %v13569_v12   ;;  %1122 = vperm.xlu1 %20487, %v13568_v17   ;;  %v2601_v33 = vrot.slane %v21319_v32, 1  ;;  %v489_v5 = vmul.f32 %v21099_v24, %v428_v18  ;;  %v488_v6 = vmul.f32 %v21099_v24, %v423_v20  ;;  %v21376_v17 = vpack.c.bf16 %v13629_v55, %v13628_v54  ;;  %v13631_v18 = vld [vmem:[%s25084_s4 + $0x140] sm:$0xff]  ;;  %v13632_v20 = vld [vmem:[%s25084_s4 + $0x148] sm:$0xff] }
  0xd3   :  { %18522 = vmatpush3.bf16.msra.mxu0 %v21306_v13  ;;  %15790 = vmatprep.mubr.msk.f32.mxu0 %vm20540_vm1, %v20539_v14 }
  0xd4   :  { %15886 = vmatmul.mubr.msk.f32.vlgmr.msra.gmra.mrb[0].mxu1 %vm42_vm2, %v2601_v33  ;;  %18523 = vmatprep.subr.bf16.mxu0 %v20538_v11  ;;  %v370_v33 = vadd.f32 %v354_v53, %v220_v51 }
  0xd5   :  { %v562_v46 = vpop.permute.xlu0 %561  ;;  %v557_v49 = vpop.permute.xlu1 %556  ;;  %18594 = vmatpush3.bf16.msra.mxu1 %v20803_v42  ;;  %v128_v42 = vld [vmem:[%s25080_s0 + $0x68] sm:$0xff]  ;;  %15904 = vmatprep.mubr.msk.f32.mxu1 %vm20540_vm1, %v20539_v14 }
  0xd6   :  { %1261 = vperm.xlu0 %20486, %v13586_v34   ;;  %18595 = vmatprep.subr.bf16.mxu1 %v20538_v11  ;;  %v623_v37 = vmul.f32 %v21106_v30, %v562_v46  ;;  %v504_v54 = vadd.f32 %v488_v6, %v370_v33  ;;  %v622_v55 = vmul.f32 %v21106_v30, %v557_v49 }
  0xd7   :  { %v1459_v60 = vld [vmem:[#allocation2 + $0x40] sm:$0xff]  ;;  %v1460_v61 = vld [vmem:[#allocation2 + $0x48] sm:$0x3]  ;;  %1256 = vperm.xlu1 %20487, %v13585_v35   ;;  %v1457_v1 = vld [vmem:[#allocation2 + $0x30] sm:$0xff]  ;;  %18525 = vmatpush3.bf16.msra.mxu0 %v21331_v40 }
  0xd8   :  { %v21362_v63 = vsel %vm42_vm2, %v1459_v60, -inf  ;;  %v1468_v0 = vsel %vm44_vm3, %v1460_v61, -inf  ;;  %v1458_v2 = vld [vmem:[#allocation2 + $0x38] sm:$0x3]  ;;  %18526 = vmatprep.subr.bf16.mxu0 %v20538_v11  ;;  %v1462_v25 = vsel %vm42_vm2, %v1457_v1, -inf }
  0xd9   :  { %v1464_v9 = vmax.f32 %v21221_v29, %v21362_v63  ;;  %v1469_v10 = vmax.f32 %v1466_v59, %v1468_v0  ;;  %v696_v16 = vpop.permute.xlu0 %695  ;;  %v691_v12 = vpop.permute.xlu1 %690  ;;  %v1467_v27 = vsel %vm44_vm3, %v1458_v2, -inf  ;;  %v371_v29 = vadd.f32 %v355_v50, %v221_v44  ;;  %18597 = vmatpush3.bf16.msra.mxu1 %v20821_v47  ;;  %v13468_v47 = vld [vmem:[%s25080_s0 + $0xe0] sm:$0xff] }
  0xda   :  { %199 = vperm.xlu0 %20486, %v128_v42   ;;  %18598 = vmatprep.subr.bf16.mxu1 %v20538_v11  ;;  %v21397_v44 = vpack.c.bf16 %v13632_v20, %v13631_v18  ;;  %v757_v46 = vmul.f32 %v21121_v39, %v696_v16  ;;  %v756_v60 = vmul.f32 %v21121_v39, %v691_v12  ;;  %v2158_v18 = vrot.slane %v21317_v28, 1 }
  0xdb   :  { %v1465_v34 = vmax.f32 %v1464_v9, %v1462_v25  ;;  %v1470_v35 = vmax.f32 %v1469_v10, %v1467_v27  ;;  %333 = vperm.xlu1 %20487, %v13469_v7   ;;  %v505_v43 = vadd.f32 %v489_v5, %v371_v29  ;;  %18528 = vmatpush3.bf16.msra.mxu0 %v21356_v58  ;;  %v13486_v5 = vld [vmem:[%s25080_s0 + $0x168] sm:$0xff]  ;;  %v13633_v9 = vld [vmem:[%s25084_s4 + $0x150] sm:$0xff]  ;;  %v13634_v10 = vld [vmem:[%s25084_s4 + $0x158] sm:$0xff] }
  0xdc   :  { %18529 = vmatprep.subr.bf16.mxu0 %v20538_v11  ;;  %v638_v7 = vadd.f32 %v622_v55, %v504_v54  ;;  %v21430_v54 = vpack.c.bf16 %v13634_v10, %v13633_v9  ;;  %v13503_v55 = vld [vmem:[%s25080_s0 + $0x1e8] sm:$0xff] }
  0xdd   :  { %v830_v50 = vpop.permute.xlu0 %829  ;;  %v825_v51 = vpop.permute.xlu1 %824  ;;  %v1471_v53 = vsel %vm1414_vm4, %v1465_v34, -inf  ;;  %v1480_v59 = vsel %vm1425_vm5, %v1465_v34, -inf  ;;  %v1488_v49 = vsel %vm1434_vm6, %v1465_v34, -inf  ;;  %18600 = vmatpush3.bf16.msra.mxu1 %v20839_v52  ;;  %v1496_v0 = vsel %vm1443_vm7, %v1465_v34, -inf }
  0xde   :  { %194 = vperm.xlu0 %20486, %v127_v41   ;;  %v1472_v61 = vrot.slane %v1471_v53, 4  ;;  %v1481_v42 = vrot.slane %v1480_v59, 4  ;;  %v639_v1 = vadd.f32 %v623_v37, %v505_v43  ;;  %v891_v2 = vmul.f32 %v21128_v48, %v830_v50  ;;  %18601 = vmatprep.subr.bf16.mxu1 %v20538_v11 }
  0xdf   :  { %328 = vperm.xlu1 %20487, %v13468_v47   ;;  %v1489_v6 = vrot.slane %v1488_v49, 4  ;;  %v1497_v39 = vsel %vm1423_vm8, %v1470_v35, -inf  ;;  %18531 = vmatpush3.bf16.msra.mxu0 %v21376_v17  ;;  %v890_v52 = vmul.f32 %v21128_v48, %v825_v51  ;;  %v13485_v48 = vld [vmem:[%s25080_s0 + $0x160] sm:$0xff]  ;;  %v772_v34 = vadd.f32 %v756_v60, %v638_v7  ;;  %v13520_v7 = vld [vmem:[%s25080_s0 + $0x268] sm:$0xff] }
  0xe0   :  { %v1473_v16 = vmax.f32 %v1471_v53, %v1472_v61  ;;  %v1482_v12 = vmax.f32 %v1480_v59, %v1481_v42  ;;  %v773_v20 = vadd.f32 %v757_v46, %v639_v1  ;;  %18532 = vmatprep.subr.bf16.mxu0 %v20538_v11  ;;  %v1498_v33 = vmax.f32 %v1496_v0, %v1497_v39  ;;  %v13635_v51 = vld [vmem:[%s25084_s4 + $0x160] sm:$0xff]  ;;  %v13636_v53 = vld [vmem:[%s25084_s4 + $0x168] sm:$0xff] }
  0xe1   :  { %v964_v25 = vpop.permute.xlu0 %963  ;;  %v959_v27 = vpop.permute.xlu1 %958  ;;  %v1490_v29 = vmax.f32 %v1488_v49, %v1489_v6  ;;  %18603 = vmatpush3.bf16.msra.mxu1 %v20855_v57  ;;  %v906_v50 = vadd.f32 %v890_v52, %v772_v34  ;;  %v21453_v39 = vpack.c.bf16 %v13636_v53, %v13635_v51  ;;  %v13641_v51 = vld [vmem:[%s25084_s4 + $0x188] sm:$0xff] }
  0xe2   :  { %v1025_v35 = vmul.f32 %v21141_v56, %v964_v25  ;;  %467 = vperm.xlu0 %20486, %v13486_v5   ;;  %v1474_v37 = vrot.slane %v1473_v16, 2  ;;  %v1483_v41 = vrot.slane %v1482_v12, 2  ;;  %v907_v43 = vadd.f32 %v891_v2, %v773_v20  ;;  %15791 = vmatmul.mubr.msk.f32.vlgmr.msra.gmra.mrb[0].mxu0 %vm42_vm2, %v2158_v18  ;;  %v13519_v20 = vld [vmem:[%s25080_s0 + $0x260] sm:$0xff]  ;;  %v13637_v25 = vld [vmem:[%s25084_s4 + $0x170] sm:$0xff] }
  0xe3   :  { %18604 = vmatprep.subr.bf16.mxu1 %v20538_v11  ;;  %v1491_v47 = vrot.slane %v1490_v29, 2  ;;  %v1499_v46 = vrot.slane %v1498_v33, 4  ;;  %18534 = vmatpush3.bf16.msra.mxu0 %v21397_v44  ;;  %v1024_v57 = vmul.f32 %v21141_v56, %v959_v27  ;;  %v13502_v56 = vld [vmem:[%s25080_s0 + $0x1e0] sm:$0xff]  ;;  %v13638_v27 = vld [vmem:[%s25084_s4 + $0x178] sm:$0xff] }
  0xe4   :  { %462 = vperm.xlu1 %20487, %v13485_v48   ;;  %v1475_v59 = vmax.f32 %v1473_v16, %v1474_v37  ;;  %15905 = vmatmul.mubr.msk.f32.vlgmr.msra.gmra.mrb[0].mxu1 %vm42_vm2, %v21319_v32  ;;  %v1484_v61 = vmax.f32 %v1482_v12, %v1483_v41  ;;  %v1041_v1 = vadd.f32 %v1025_v35, %v907_v43 }
  0xe5   :  { %18535 = vmatprep.subr.bf16.mxu0 %v20538_v11  ;;  %v1098_v49 = vpop.permute.xlu0 %1097  ;;  %v1093_v60 = vpop.permute.xlu1 %1092  ;;  %v1492_v42 = vmax.f32 %v1490_v29, %v1491_v47  ;;  %v1500_v0 = vmax.f32 %v1498_v33, %v1499_v46  ;;  %18606 = vmatpush3.bf16.msra.mxu1 %v20871_v62  ;;  %v1040_v10 = vadd.f32 %v1024_v57, %v906_v50  ;;  %v13536_v50 = vld [vmem:[%s25080_s0 + $0x2e0] sm:$0xff] }
  0xe6   :  { %v1159_v2 = vmul.f32 %v21149_v4, %v1098_v49  ;;  %v1158_v5 = vmul.f32 %v21149_v4, %v1093_v60  ;;  %601 = vperm.xlu0 %20486, %v13503_v55   ;;  %v1476_v6 = vrot.slane %v1475_v59, 1  ;;  %18607 = vmatprep.subr.bf16.mxu1 %v20538_v11  ;;  %v1485_v52 = vrot.slane %v1484_v61, 1  ;;  %v13640_v57 = vld [vmem:[%s25084_s4 + $0x180] sm:$0xff] }
  0xe7   :  { %15809 = vmatprep.mubr.msk.f32.mxu0 %vm20540_vm1, %v20539_v14  ;;  %v1493_v9 = vrot.slane %v1492_v42, 1  ;;  %v1501_v62 = vrot.slane %v1500_v0, 2  ;;  %18537 = vmatpush3.bf16.msra.mxu0 %v21430_v54 }
  0xe8   :  { %v1175_v4 = vadd.f32 %v1159_v2, %v1041_v1  ;;  %596 = vperm.xlu1 %20487, %v13502_v56   ;;  %v1477_v16 = vmax.f32 %v1475_v59, %v1476_v6  ;;  %18538 = vmatprep.subr.bf16.mxu0 %v20538_v11  ;;  %v1486_v48 = vmax.f32 %v1484_v61, %v1485_v52  ;;  %v13642_v1 = vld [vmem:[%s25084_s4 + $0x190] sm:$0xff]  ;;  %v2754_v6 = vrot.slane %v21319_v32, 2  ;;  %v13571_v32 = vld [vmem:[%s25080_s0 + $0x3e8] sm:$0xff] }
  0xe9   :  { %v1232_v12 = vpop.permute.xlu0 %1231  ;;  %v1227_v18 = vpop.permute.xlu1 %1226  ;;  %15923 = vmatprep.mubr.msk.f32.mxu1 %vm20540_vm1, %v20539_v14  ;;  %v1494_v29 = vmax.f32 %v1492_v42, %v1493_v9  ;;  %v1502_v33 = vmax.f32 %v1500_v0, %v1501_v62  ;;  %v1174_v34 = vadd.f32 %v1158_v5, %v1040_v10  ;;  %18609 = vmatpush3.bf16.msra.mxu1 %v20889_v3  ;;  %v2241_v42 = vrot.slane %v21317_v28, 2  ;;  %v13554_v0 = vld [vmem:[%s25080_s0 + $0x368] sm:$0xff]  ;;  %v13553_v28 = vld [vmem:[%s25080_s0 + $0x360] sm:$0xff] }
  0xea   :  { %v1293_v35 = vmul.f32 %v21163_v22, %v1232_v12  ;;  %v1292_v37 = vmul.f32 %v21163_v22, %v1227_v18  ;;  %735 = vperm.xlu0 %20486, %v13520_v7   ;;  %1479 = vst.msk [vmem:[#allocation3 + $0x11] sm:$0x1] %vm1423_vm8, %v1477_v16  ;;  %18610 = vmatprep.subr.bf16.mxu1 %v20538_v11  ;;  %1487 = vst.msk [vmem:[#allocation3 + $0x12] sm:$0x1] %vm1423_vm8, %v1486_v48  ;;  %v13537_v22 = vld [vmem:[%s25080_s0 + $0x2e8] sm:$0xff]  ;;  %v13644_v9 = vld [vmem:[%s25084_s4 + $0x1a0] sm:$0xff] }
  0xeb   :  { %1495 = vst.msk [vmem:[#allocation3 + $0x13] sm:$0x1] %vm1423_vm8, %v1494_v29  ;;  %v1503_v41 = vrot.slane %v1502_v33, 1  ;;  %18540 = vmatpush3.bf16.msra.mxu0 %v21453_v39  ;;  %v21481_v3 = vpack.c.bf16 %v13638_v27, %v13637_v25  ;;  %v21504_v61 = vpack.c.bf16 %v13641_v51, %v13640_v57  ;;  %v13645_v62 = vld [vmem:[%s25084_s4 + $0x1a8] sm:$0xff]  ;;  %v13570_v10 = vld [vmem:[%s25080_s0 + $0x3e0] sm:$0xff]  ;;  %v13646_v18 = vld [vmem:[%s25084_s4 + $0x1b0] sm:$0xff] }
  0xec   :  { %v1309_v43 = vadd.f32 %v1293_v35, %v1175_v4  ;;  %v1308_v55 = vadd.f32 %v1292_v37, %v1174_v34  ;;  %730 = vperm.xlu1 %20487, %v13519_v20   ;;  %18541 = vmatprep.subr.bf16.mxu0 %v20538_v11  ;;  %v1508_v4 = vld [vmem:[#allocation2 + $0x48] sm:$0x3]  ;;  %v13647_v20 = vld [vmem:[%s25084_s4 + $0x1b8] sm:$0xff]  ;;  %v13587_v34 = vld [vmem:[%s25080_s0 + $0x460] sm:$0xff] }
  0xed   :  { %v170_v47 = vpop.permute.xlu0 %169  ;;  %v304_v46 = vpop.permute.xlu1 %303  ;;  %v1504_v53 = vmax.f32 %v1502_v33, %v1503_v41  ;;  %18612 = vmatpush3.bf16.msra.mxu1 %v20907_v8  ;;  %v13588_v48 = vld [vmem:[%s25080_s0 + $0x468] sm:$0xff]  ;;  %v1518_v35 = vsel %vm44_vm3, %v1508_v4, -inf }
  0xee   :  { %v1331_v59 = vmul.f32 %v21176_v38, %v1309_v43  ;;  %v1330_v49 = vmul.f32 %v21176_v38, %v1308_v55  ;;  %18613 = vmatprep.subr.bf16.mxu1 %v20538_v11  ;;  %869 = vperm.xlu0 %20486, %v13537_v22   ;;  %v223_v16 = vmul.f32 %v21094_v23, %v170_v47  ;;  %v13650_v57 = vld [vmem:[%s25084_s4 + $0x1c8] sm:$0xff] }
  0xef   :  { %1505 = vst.msk [vmem:[#allocation3 + $0x14] sm:$0x1] %vm1423_vm8, %v1504_v53  ;;  %18543 = vmatpush3.bf16.msra.mxu0 %v21481_v3  ;;  %v357_v12 = vmul.f32 %v21083_v19, %v304_v46 }
  0xf0   :  { %v1353_v60 = vadd.f32 %v21187_v45, %v1331_v59  ;;  %v1352_v56 = vadd.f32 %v21187_v45, %v1330_v49  ;;  %864 = vperm.xlu1 %20487, %v13536_v50   ;;  %18544 = vmatprep.subr.bf16.mxu0 %v20538_v11  ;;  %v13643_v45 = vld [vmem:[%s25084_s4 + $0x198] sm:$0xff] }
  0xf1   :  { %v165_v38 = vpop.permute.xlu0 %164  ;;  %v299_v8 = vpop.permute.xlu1 %298  ;;  %18615 = vmatpush3.bf16.msra.mxu1 %v20923_v15  ;;  %v21527_v7 = vpack.c.bf16 %v13643_v45, %v13642_v1  ;;  %v373_v46 = vadd.f32 %v357_v12, %v223_v16 }
  0xf2   :  { %v1369_v2 = vmax.f32 %v1353_v60, 0.0  ;;  %v1368_v5 = vmax.f32 %v1352_v56, 0.0  ;;  %15810 = vmatmul.mubr.msk.f32.vlgmr.msra.gmra.mrb[0].mxu0 %vm42_vm2, %v2241_v42  ;;  %18616 = vmatprep.subr.bf16.mxu1 %v20538_v11  ;;  %v222_v29 = vmul.f32 %v21094_v23, %v165_v38  ;;  %v356_v33 = vmul.f32 %v21083_v19, %v299_v8 }
  0xf3   :  { %18546 = vmatpush3.bf16.msra.mxu0 %v21504_v61  ;;  %1003 = vperm.xlu0 %20486, %v13554_v0   ;;  %v21573_v23 = vpack.c.bf16 %v13647_v20, %v13646_v18  ;;  %v13470_v20 = vld [vmem:[%s25080_s0 + $0xf0] sm:$0xff] }
  0xf4   :  { %1386 = vst.msk [vmem:[#allocation2 + $0x61] sm:$0xff] %vm42_vm2, %v1369_v2  ;;  %1385 = vst.msk [vmem:[#allocation2 + $0x51] sm:$0xff] %vm42_vm2, %v1368_v5  ;;  %15924 = vmatmul.mubr.msk.f32.vlgmr.msra.gmra.mrb[0].mxu1 %vm42_vm2, %v2754_v6  ;;  %998 = vperm.xlu1 %20487, %v13553_v28   ;;  %v372_v38 = vadd.f32 %v356_v33, %v222_v29  ;;  %v21606_v2 = vld [vmem:[%s25081_s1 + $0x3] ss:$0 sm:$0xff]  ;;  %v13651_v6 = vld [vmem:[%s25084_s4 + $0x1d0] sm:$0xff] }
  0xf5   :  { %v438_v15 = vpop.permute.xlu0 %437  ;;  %v433_v52 = vpop.permute.xlu1 %432  ;;  %18618 = vmatpush3.bf16.msra.mxu1 %v20940_v21  ;;  %18547 = vmatprep.subr.bf16.mxu0 %v20538_v11  ;;  %v21550_v21 = vpack.c.bf16 %v13645_v62, %v13644_v9  ;;  %v129_v62 = vld [vmem:[%s25080_s0 + $0x70] sm:$0xff]  ;;  %v21642_v29 = vld [vmem:[%s25081_s1 + $0x5] ss:$0 sm:$0xff] }
  0xf6   :  { %18619 = vmatprep.subr.bf16.mxu1 %v20538_v11  ;;  %15828 = vmatprep.mubr.msk.f32.mxu0 %vm20540_vm1, %v20539_v14  ;;  %v491_v43 = vmul.f32 %v21099_v24, %v438_v15  ;;  %v490_v50 = vmul.f32 %v21099_v24, %v433_v52  ;;  %v130_v24 = vld [vmem:[%s25080_s0 + $0x78] sm:$0xff]  ;;  %v21631_v18 = vld [vmem:[#allocation3 + $0x10] sm:$0x3f] }
  0xf7   :  { %18549 = vmatpush3.bf16.msra.mxu0 %v21527_v7  ;;  %1137 = vperm.xlu0 %20486, %v13571_v32   ;;  %v13652_v15 = vld [vmem:[%s25084_s4 + $0x1d8] sm:$0xff] }
  0xf8   :  { %1132 = vperm.xlu1 %20487, %v13570_v10   ;;  %18550 = vmatprep.subr.bf16.mxu0 %v20538_v11  ;;  %v507_v0 = vadd.f32 %v491_v43, %v373_v46  ;;  %v506_v45 = vadd.f32 %v490_v50, %v372_v38  ;;  %v21646_v33 = vpack.c.bf16 %v13652_v15, %v13651_v6  ;;  %v13488_v50 = vld [vmem:[%s25080_s0 + $0x178] sm:$0xff] }
  0xf9   :  { %v572_v25 = vpop.permute.xlu0 %571  ;;  %v567_v27 = vpop.permute.xlu1 %566  ;;  %18621 = vmatpush3.bf16.msra.mxu1 %v20957_v26  ;;  %15942 = vmatprep.mubr.msk.f32.mxu1 %vm20540_vm1, %v20539_v14  ;;  %v13649_v26 = vld [vmem:[%s25084_s4 + $0x1c0] sm:$0xff] }
  0xfa   :  { %18622 = vmatprep.subr.bf16.mxu1 %v20538_v11  ;;  %v625_v59 = vmul.f32 %v21106_v30, %v572_v25  ;;  %v13471_v30 = vld [vmem:[%s25080_s0 + $0xf8] sm:$0xff]  ;;  %v21601_v1 = vpack.c.bf16 %v13650_v57, %v13649_v26  ;;  %v624_v5 = vmul.f32 %v21606_v2, %v567_v27 }
  0xfb   :  { %v1511_v37 = vld [vmem:[#allocation2 + $0x60] sm:$0xff]  ;;  %v1512_v41 = vld [vmem:[#allocation2 + $0x68] sm:$0x3]  ;;  %v1509_v22 = vld [vmem:[#allocation2 + $0x50] sm:$0xff]  ;;  %18552 = vmatpush3.bf16.msra.mxu0 %v21550_v21  ;;  %1271 = vperm.xlu0 %20486, %v13588_v48  }
  0xfc   :  { %v21579_v19 = vsel %vm42_vm2, %v1511_v37, -inf  ;;  %v1520_v55 = vsel %vm44_vm3, %v1512_v41, -inf  ;;  %v1510_v47 = vld [vmem:[#allocation2 + $0x58] sm:$0x3]  ;;  %1266 = vperm.xlu1 %20487, %v13587_v34   ;;  %18553 = vmatprep.subr.bf16.mxu0 %v20538_v11  ;;  %v1514_v56 = vsel %vm42_vm2, %v1509_v22, -inf  ;;  %v641_v52 = vadd.f32 %v625_v59, %v507_v0  ;;  %v13653_v34 = vld [vmem:[%s25084_s4 + $0x1e0] sm:$0xff] }
  0xfd   :  { %v1516_v51 = vmax.f32 %v21362_v63, %v21579_v19  ;;  %v1521_v53 = vmax.f32 %v1518_v35, %v1520_v55  ;;  %v706_v49 = vpop.permute.xlu0 %705  ;;  %v701_v60 = vpop.permute.xlu1 %700  ;;  %v1519_v42 = vsel %vm44_vm3, %v1510_v47, -inf  ;;  %18624 = vmatpush3.bf16.msra.mxu1 %v20975_v31  ;;  %v21613_v31 = vld [vmem:[%s25081_s1 + $0x4] ss:$0 sm:$0xff]  ;;  %v13654_v35 = vld [vmem:[%s25084_s4 + $0x1e8] sm:$0xff]  ;;  %v640_v43 = vadd.f32 %v624_v5, %v506_v45  ;;  %v21656_v55 = vld [vmem:[#allocation3 + $0x10] sm:$0x3f] }
  0xfe   :  { %18625 = vmatprep.subr.bf16.mxu1 %v20538_v11  ;;  %v759_v28 = vmul.f32 %v21613_v31, %v706_v49  ;;  %v758_v12 = vmul.f32 %v21613_v31, %v701_v60  ;;  %v13487_v60 = vld [vmem:[%s25080_s0 + $0x170] sm:$0xff]  ;;  %v13656_v5 = vld [vmem:[%s25084_s4 + $0x1f8] sm:$0xff] }
  0xff   :  { %v1517_v63 = vmax.f32 %v1516_v51, %v1514_v56  ;;  %v1522_v8 = vmax.f32 %v1521_v53, %v1519_v42  ;;  %18555 = vmatpush3.bf16.msra.mxu0 %v21573_v23  ;;  %209 = vperm.xlu0 %20486, %v130_v24   ;;  %v21669_v24 = vpack.c.bf16 %v13654_v35, %v13653_v34  ;;  %v13655_v45 = vld [vmem:[%s25084_s4 + $0x1f0] sm:$0xff] }
 0x100   :  { %343 = vperm.xlu1 %20487, %v13471_v30   ;;  %18556 = vmatprep.subr.bf16.mxu0 %v20538_v11  ;;  %v775_v26 = vadd.f32 %v759_v28, %v641_v52  ;;  %v774_v59 = vadd.f32 %v758_v12, %v640_v43  ;;  %v13505_v52 = vld [vmem:[%s25080_s0 + $0x1f8] sm:$0xff] }
 0x101   :  { %v840_v32 = vpop.permute.xlu0 %839  ;;  %v835_v9 = vpop.permute.xlu1 %834  ;;  %v1523_v10 = vsel %vm1414_vm4, %v1517_v63, -inf  ;;  %v1532_v4 = vsel %vm1425_vm5, %v1517_v63, -inf  ;;  %v1540_v16 = vsel %vm1434_vm6, %v1517_v63, -inf  ;;  %18627 = vmatpush3.bf16.msra.mxu1 %v20991_v36  ;;  %v1548_v48 = vsel %vm1443_vm7, %v1517_v63, -inf }
 0x102   :  { %v1524_v25 = vrot.slane %v1523_v10, 4  ;;  %v1533_v27 = vrot.slane %v1532_v4, 4  ;;  %15829 = vmatmul.mubr.msk.f32.vlgmr.msra.gmra.mrb[0].mxu0 %vm42_vm2, %v21631_v18  ;;  %v893_v36 = vmul.f32 %v21642_v29, %v840_v32  ;;  %18628 = vmatprep.subr.bf16.mxu1 %v20538_v11  ;;  %v1541_v37 = vrot.slane %v1540_v16, 4 }
 0x103   :  { %v1549_v41 = vsel %vm1423_vm8, %v1522_v8, -inf  ;;  %18558 = vmatpush3.bf16.msra.mxu0 %v21601_v1  ;;  %204 = vperm.xlu0 %20486, %v129_v62   ;;  %v892_v49 = vmul.f32 %v21642_v29, %v835_v9 }
 0x104   :  { %v1525_v22 = vmax.f32 %v1523_v10, %v1524_v25  ;;  %15943 = vmatmul.mubr.msk.f32.vlgmr.msra.gmra.mrb[0].mxu1 %vm42_vm2, %v21656_v55  ;;  %338 = vperm.xlu1 %20487, %v13470_v20   ;;  %v1534_v57 = vmax.f32 %v1532_v4, %v1533_v27  ;;  %v1542_v51 = vmax.f32 %v1540_v16, %v1541_v37  ;;  %v21696_v4 = vld [vmem:[%s25081_s1 + $0x7] ss:$0 sm:$0xff]  ;;  %v13504_v20 = vld [vmem:[%s25080_s0 + $0x1f0] sm:$0xff] }
 0x105   :  { %v974_v47 = vpop.permute.xlu0 %973  ;;  %v969_v46 = vpop.permute.xlu1 %968  ;;  %v1550_v53 = vmax.f32 %v1548_v48, %v1549_v41  ;;  %18630 = vmatpush3.bf16.msra.mxu1 %v21306_v13  ;;  %18559 = vmatprep.subr.bf16.mxu0 %v20538_v11  ;;  %v909_v42 = vadd.f32 %v893_v36, %v775_v26  ;;  %v21678_v13 = vld [vmem:[%s25081_s1 + $0x6] ss:$0 sm:$0xff]  ;;  %v908_v10 = vadd.f32 %v892_v49, %v774_v59  ;;  %v13522_v26 = vld [vmem:[%s25080_s0 + $0x278] sm:$0xff]  ;;  %v21723_v59 = vld [vmem:[%s25081_s1 + $0x8] ss:$0 sm:$0xff] }
 0x106   :  { %v1526_v56 = vrot.slane %v1525_v22, 2  ;;  %18631 = vmatprep.subr.bf16.mxu1 %v20538_v11  ;;  %15847 = vmatprep.mubr.msk.f32.mxu0 %vm20540_vm1, %v20539_v14  ;;  %v1535_v38 = vrot.slane %v1534_v57, 2  ;;  %v1543_v30 = vrot.slane %v1542_v51, 2  ;;  %v1027_v8 = vmul.f32 %v21678_v13, %v974_v47  ;;  %v13659_v47 = vld [vmem:[%s25084_s4 + $0x208] sm:$0xff] }
 0x107   :  { %v1551_v63 = vrot.slane %v1550_v53, 4  ;;  %18561 = vmatpush3.bf16.msra.mxu0 %v21646_v33  ;;  %v1026_v0 = vmul.f32 %v21678_v13, %v969_v46  ;;  %477 = vperm.xlu0 %20486, %v13488_v50  }
 0x108   :  { %v1527_v28 = vmax.f32 %v1525_v22, %v1526_v56  ;;  %472 = vperm.xlu1 %20487, %v13487_v60   ;;  %18562 = vmatprep.subr.bf16.mxu0 %v20538_v11  ;;  %v1536_v32 = vmax.f32 %v1534_v57, %v1535_v38  ;;  %v1544_v9 = vmax.f32 %v1542_v51, %v1543_v30  ;;  %v13658_v22 = vld [vmem:[%s25084_s4 + $0x200] sm:$0xff]  ;;  %v13521_v56 = vld [vmem:[%s25080_s0 + $0x270] sm:$0xff] }
 0x109   :  { %v1108_v6 = vpop.permute.xlu0 %1107  ;;  %v1103_v15 = vpop.permute.xlu1 %1102  ;;  %v1552_v62 = vmax.f32 %v1550_v53, %v1551_v63  ;;  %18633 = vmatpush3.bf16.msra.mxu1 %v21331_v40  ;;  %15961 = vmatprep.mubr.msk.f32.mxu1 %vm20540_vm1, %v20539_v14  ;;  %v21706_v40 = vpack.c.bf16 %v13656_v5, %v13655_v45  ;;  %v1043_v34 = vadd.f32 %v1027_v8, %v909_v42  ;;  %v2408_v63 = vrot.slane %v21631_v18, 1  ;;  %v13539_v45 = vld [vmem:[%s25080_s0 + $0x2f8] sm:$0xff]  ;;  %v13660_v5 = vld [vmem:[%s25084_s4 + $0x210] sm:$0xff] }
 0x10a   :  { %v1161_v16 = vmul.f32 %v21696_v4, %v1108_v6  ;;  %v1160_v12 = vmul.f32 %v21696_v4, %v1103_v15  ;;  %v1528_v25 = vrot.slane %v1527_v28, 1  ;;  %18634 = vmatprep.subr.bf16.mxu1 %v20538_v11  ;;  %v1537_v27 = vrot.slane %v1536_v32, 1  ;;  %v21755_v15 = vld [vmem:[%s25082_s2] ss:$0 sm:$0xff] }
 0x10b   :  { %v1545_v48 = vrot.slane %v1544_v9, 1  ;;  %v1553_v36 = vrot.slane %v1552_v62, 2  ;;  %v1042_v35 = vadd.f32 %v1026_v0, %v908_v10  ;;  %18564 = vmatpush3.bf16.msra.mxu0 %v21669_v24  ;;  %611 = vperm.xlu0 %20486, %v13505_v52   ;;  %v21735_v30 = vpack.c.bf16 %v13659_v47, %v13658_v22  ;;  %v21770_v10 = vld [vmem:[%s25083_s3] ss:$0 sm:$0xff]  ;;  %v13664_v22 = vld [vmem:[%s25084_s4 + $0x230] sm:$0xff]  ;;  %v13665_v47 = vld [vmem:[%s25084_s4 + $0x238] sm:$0xff] }
 0x10c   :  { %v1529_v37 = vmax.f32 %v1527_v28, %v1528_v25  ;;  %606 = vperm.xlu1 %20487, %v13504_v20   ;;  %18565 = vmatprep.subr.bf16.mxu0 %v20538_v11  ;;  %v1538_v46 = vmax.f32 %v1536_v32, %v1537_v27  ;;  %v1177_v51 = vadd.f32 %v1161_v16, %v1043_v34  ;;  %v13661_v28 = vld [vmem:[%s25084_s4 + $0x218] sm:$0xff] }
 0x10d   :  { %v1242_v41 = vpop.permute.xlu0 %1241  ;;  %v1237_v43 = vpop.permute.xlu1 %1236  ;;  %v1546_v50 = vmax.f32 %v1544_v9, %v1545_v48  ;;  %v1554_v57 = vmax.f32 %v1552_v62, %v1553_v36  ;;  %v1176_v53 = vadd.f32 %v1160_v12, %v1042_v35  ;;  %18636 = vmatpush3.bf16.msra.mxu1 %v21356_v58  ;;  %v13538_v9 = vld [vmem:[%s25080_s0 + $0x2f0] sm:$0xff]  ;;  %v2919_v62 = vrot.slane %v21656_v55, 1  ;;  %v13556_v27 = vld [vmem:[%s25080_s0 + $0x378] sm:$0xff]  ;;  %v13662_v48 = vld [vmem:[%s25084_s4 + $0x220] sm:$0xff] }
 0x10e   :  { %v1295_v49 = vmul.f32 %v21723_v59, %v1242_v41  ;;  %v1294_v60 = vmul.f32 %v21723_v59, %v1237_v43  ;;  %1531 = vst.msk [vmem:[#allocation3 + $0x19] sm:$0x1] %vm1423_vm8, %v1529_v37  ;;  %18637 = vmatprep.subr.bf16.mxu1 %v20538_v11  ;;  %1539 = vst.msk [vmem:[#allocation3 + $0x1a] sm:$0x1] %vm1423_vm8, %v1538_v46  ;;  %v21775_v12 = vpack.c.bf16 %v13661_v28, %v13660_v5  ;;  %v13663_v36 = vld [vmem:[%s25084_s4 + $0x228] sm:$0xff]  ;;  %v13555_v37 = vld [vmem:[%s25080_s0 + $0x370] sm:$0xff] }
 0x10f   :  { %1547 = vst.msk [vmem:[#allocation3 + $0x1b] sm:$0x1] %vm1423_vm8, %v1546_v50  ;;  %v1555_v58 = vrot.slane %v1554_v57, 1  ;;  %18567 = vmatpush3.bf16.msra.mxu0 %v21706_v40  ;;  %745 = vperm.xlu0 %20486, %v13522_v26   ;;  %v21798_v41 = vpack.c.bf16 %v13663_v36, %v13662_v48  ;;  %v13573_v26 = vld [vmem:[%s25080_s0 + $0x3f8] sm:$0xff]  ;;  %v13572_v46 = vld [vmem:[%s25080_s0 + $0x3f0] sm:$0xff]  ;;  %v2491_v36 = vrot.slane %v21631_v18, 2 }
 0x110   :  { %v1311_v42 = vadd.f32 %v1295_v49, %v1177_v51  ;;  %v1310_v38 = vadd.f32 %v1294_v60, %v1176_v53  ;;  %740 = vperm.xlu1 %20487, %v13521_v56   ;;  %18568 = vmatprep.subr.bf16.mxu0 %v20538_v11  ;;  %v1560_v50 = vld [vmem:[#allocation2 + $0x68] sm:$0x3]  ;;  %v13742_v51 = vld [vmem:[%s25084_s4 + $0x40] sm:$0xff]  ;;  %v13590_v60 = vld [vmem:[%s25080_s0 + $0x478] sm:$0xff]  ;;  %v3001_v18 = vrot.slane %v21656_v55, 2 }
 0x111   :  { %v21739_v8 = vpop.permute.xlu0 %179  ;;  %v21741_v0 = vpop.permute.xlu1 %313  ;;  %v1556_v6 = vmax.f32 %v1554_v57, %v1555_v58  ;;  %18639 = vmatpush3.bf16.msra.mxu1 %v21376_v17  ;;  %v21820_v57 = vpack.c.bf16 %v13665_v47, %v13664_v22  ;;  %v13589_v56 = vld [vmem:[%s25080_s0 + $0x470] sm:$0xff] }
 0x112   :  { %v1333_v52 = vmul.f32 %v21755_v15, %v1311_v42  ;;  %v1332_v32 = vmul.f32 %v21755_v15, %v1310_v38  ;;  %15848 = vmatmul.mubr.msk.f32.vlgmr.msra.gmra.mrb[0].mxu0 %vm42_vm2, %v2408_v63  ;;  %18640 = vmatprep.subr.bf16.mxu1 %v20538_v11  ;;  %v13744_v58 = vld [vmem:[%s25084_s4 + $0x50] sm:$0xff]  ;;  %v13745_v42 = vld [vmem:[%s25084_s4 + $0x58] sm:$0xff]  ;;  %v13746_v38 = vld [vmem:[%s25084_s4 + $0x60] sm:$0xff] }
 0x113   :  { %1557 = vst.msk [vmem:[#allocation3 + $0x1c] sm:$0x1] %vm1423_vm8, %v1556_v6  ;;  %18570 = vmatpush3.bf16.msra.mxu0 %v21735_v30  ;;  %879 = vperm.xlu0 %20486, %v13539_v45   ;;  %v13747_v63 = vld [vmem:[%s25084_s4 + $0x68] sm:$0xff]  ;;  %v1570_v45 = vsel %vm44_vm3, %v1560_v50, -inf }
 0x114   :  { %v1355_v16 = vadd.f32 %v21770_v10, %v1333_v52  ;;  %v1354_v17 = vadd.f32 %v21770_v10, %v1332_v32  ;;  %15962 = vmatmul.mubr.msk.f32.vlgmr.msra.gmra.mrb[0].mxu1 %vm42_vm2, %v2919_v62  ;;  %874 = vperm.xlu1 %20487, %v13538_v9   ;;  %v21861_v32 = vld [vmem:[%s25081_s1 + $0x1] ss:$0 sm:$0xff] }
 0x115   :  { %v175_v20 = vpop.permute.xlu0 %174  ;;  %v309_v25 = vpop.permute.xlu1 %308  ;;  %18642 = vmatpush3.bf16.msra.mxu1 %v21397_v44  ;;  %18571 = vmatprep.subr.bf16.mxu0 %v20538_v11  ;;  %v359_v9 = vmul.f32 %v21861_v32, %v21741_v0 }
 0x116   :  { %v1371_v34 = vmax.f32 %v1355_v16, 0.0  ;;  %v1370_v35 = vmax.f32 %v1354_v17, 0.0  ;;  %18643 = vmatprep.subr.bf16.mxu1 %v20538_v11  ;;  %15866 = vmatprep.mubr.msk.f32.mxu0 %vm20540_vm1, %v20539_v14 }
 0x117   :  { %18573 = vmatpush3.bf16.msra.mxu0 %v21775_v12  ;;  %1013 = vperm.xlu0 %20486, %v13556_v27  }
 0x118   :  { %1388 = vst.msk [vmem:[#allocation2 + $0x81] sm:$0xff] %vm42_vm2, %v1371_v34  ;;  %1387 = vst.msk [vmem:[#allocation2 + $0x71] sm:$0xff] %vm42_vm2, %v1370_v35  ;;  %1008 = vperm.xlu1 %20487, %v13555_v37   ;;  %18574 = vmatprep.subr.bf16.mxu0 %v20538_v11 }
 0x119   :  { %v448_v44 = vpop.permute.xlu0 %447  ;;  %v21801_v43 = vpop.permute.xlu1 %442  ;;  %18645 = vmatpush3.bf16.msra.mxu1 %v21430_v54  ;;  %15980 = vmatprep.mubr.msk.f32.mxu1 %vm20540_vm1, %v20539_v14  ;;  %v13743_v54 = vld [vmem:[%s25084_s4 + $0x48] sm:$0xff] }
 0x11a   :  { %18646 = vmatprep.subr.bf16.mxu1 %v20538_v11  ;;  %v21866_v62 = vpack.c.bf16 %v13743_v54, %v13742_v51 }
 0x11b   :  { %18576 = vmatpush3.bf16.msra.mxu0 %v21798_v41  ;;  %1147 = vperm.xlu0 %20486, %v13573_v26  }
 0x11c   :  { %1142 = vperm.xlu1 %20487, %v13572_v46   ;;  %18577 = vmatprep.subr.bf16.mxu0 %v20538_v11  ;;  %v21887_v46 = vld [vmem:[%s25081_s1 + $0x2] ss:$0 sm:$0xff] }
 0x11d   :  { %v582_v53 = vpop.permute.xlu0 %581  ;;  %v21829_v49 = vpop.permute.xlu1 %576  ;;  %18648 = vmatpush3.bf16.msra.mxu1 %v21453_v39  ;;  %v21854_v39 = vld [vmem:[%s25081_s1] ss:$0 sm:$0xff]  ;;  %v493_v50 = vmul.f32 %v21887_v46, %v448_v44  ;;  %v492_v54 = vmul.f32 %v21887_v46, %v21801_v43 }
 0x11e   :  { %v225_v52 = vmul.f32 %v21854_v39, %v21739_v8  ;;  %18649 = vmatprep.subr.bf16.mxu1 %v20538_v11  ;;  %v224_v48 = vmul.f32 %v21854_v39, %v175_v20  ;;  %v358_v8 = vmul.f32 %v21861_v32, %v309_v25  ;;  %v21879_v20 = vpack.c.bf16 %v13745_v42, %v13744_v58 }
 0x11f   :  { %v1563_v5 = vld [vmem:[#allocation2 + $0x80] sm:$0xff]  ;;  %v1564_v28 = vld [vmem:[#allocation2 + $0x88] sm:$0x3]  ;;  %v1561_v6 = vld [vmem:[#allocation2 + $0x70] sm:$0xff]  ;;  %18579 = vmatpush3.bf16.msra.mxu0 %v21820_v57  ;;  %1281 = vperm.xlu0 %20486, %v13590_v60   ;;  %v21881_v25 = vpack.c.bf16 %v13747_v63, %v13746_v38  ;;  %v627_v55 = vmul.f32 %v21606_v2, %v582_v53 }
 0x120   :  { %v1567_v16 = vsel %vm42_vm2, %v1563_v5, -inf  ;;  %v1572_v17 = vsel %vm44_vm3, %v1564_v28, -inf  ;;  %v1562_v27 = vld [vmem:[#allocation2 + $0x78] sm:$0x3]  ;;  %1276 = vperm.xlu1 %20487, %v13589_v56   ;;  %18688 = vmatprep.subr.bf16.mxu0 %v20538_v11  ;;  %v1566_v26 = vsel %vm42_vm2, %v1561_v6, -inf  ;;  %v374_v51 = vadd.f32 %v358_v8, %v224_v48 }
 0x121   :  { %v1568_v0 = vmax.f32 %v21579_v19, %v1567_v16  ;;  %v1573_v34 = vmax.f32 %v1570_v45, %v1572_v17  ;;  %v716_v35 = vpop.permute.xlu0 %715  ;;  %v711_v37 = vpop.permute.xlu1 %710  ;;  %v1571_v22 = vsel %vm44_vm3, %v1562_v27, -inf  ;;  %18651 = vmatpush3.bf16.msra.mxu1 %v21481_v3  ;;  %v375_v3 = vadd.f32 %v359_v9, %v225_v52  ;;  %v13749_v6 = vld [vmem:[%s25084_s4 + $0x78] sm:$0xff] }
 0x122   :  { %15867 = vmatmul.mubr.msk.f32.vlgmr.msra.gmra.mrb[0].mxu0 %vm42_vm2, %v2491_v36  ;;  %18652 = vmatprep.subr.bf16.mxu1 %v20538_v11  ;;  %v626_v5 = vmul.f32 %v21606_v2, %v21829_v49  ;;  %v761_v28 = vmul.f32 %v21613_v31, %v716_v35  ;;  %v508_v9 = vadd.f32 %v492_v54, %v374_v51  ;;  %v3329_v51 = vld [vmem:[%s25084_s4 + $0x8] sm:$0xff] }
 0x123   :  { %v1569_v47 = vmax.f32 %v1568_v0, %v1566_v26  ;;  %v1574_v19 = vmax.f32 %v1573_v34, %v1571_v22  ;;  %18690 = vmatpush3.bf16.msra.mxu0 %v21866_v62  ;;  %16056 = vmatprep.mubr.msk.f32.mxu0 %vm20540_vm1, %v20539_v14  ;;  %v509_v45 = vadd.f32 %v493_v50, %v375_v3 }
 0x124   :  { %15981 = vmatmul.mubr.msk.f32.vlgmr.msra.gmra.mrb[0].mxu1 %vm42_vm2, %v3001_v18  ;;  %18691 = vmatprep.subr.bf16.mxu0 %v20538_v11  ;;  %v760_v48 = vmul.f32 %v21613_v31, %v711_v37 }
 0x125   :  { %v850_v44 = vpop.permute.xlu0 %849  ;;  %v1575_v60 = vsel %vm1414_vm4, %v1569_v47, -inf  ;;  %v1584_v56 = vsel %vm1425_vm5, %v1569_v47, -inf  ;;  %v1592_v58 = vsel %vm1434_vm6, %v1569_v47, -inf  ;;  %18654 = vmatpush3.bf16.msra.mxu1 %v21504_v61  ;;  %v845_v43 = vpop.permute.xlu1 %844  ;;  %15999 = vmatprep.mubr.msk.f32.mxu1 %vm20540_vm1, %v20539_v14  ;;  %v1600_v63 = vsel %vm1443_vm7, %v1569_v47, -inf  ;;  %v13748_v61 = vld [vmem:[%s25084_s4 + $0x70] sm:$0xff] }
 0x126   :  { %v1576_v42 = vrot.slane %v1575_v60, 4  ;;  %v1585_v38 = vrot.slane %v1584_v56, 4  ;;  %v1593_v53 = vrot.slane %v1592_v58, 4  ;;  %18655 = vmatprep.subr.bf16.mxu1 %v20538_v11  ;;  %v1601_v52 = vsel %vm1423_vm8, %v1574_v19, -inf }
 0x127   :  { %18693 = vmatpush3.bf16.msra.mxu0 %v21879_v20  ;;  %v643_v27 = vadd.f32 %v627_v55, %v509_v45  ;;  %v895_v8 = vmul.f32 %v21642_v29, %v850_v44  ;;  %v1602_v0 = vmax.f32 %v1600_v63, %v1601_v52  ;;  %v21923_v35 = vpack.c.bf16 %v13749_v6, %v13748_v61  ;;  %v21939_v63 = vld [vmem:[#allocation3 + $0x10] sm:$0x3f] }
 0x128   :  { %v1577_v16 = vmax.f32 %v1575_v60, %v1576_v42  ;;  %v1586_v17 = vmax.f32 %v1584_v56, %v1585_v38  ;;  %v1594_v49 = vmax.f32 %v1592_v58, %v1593_v53  ;;  %18694 = vmatprep.subr.bf16.mxu0 %v20538_v11  ;;  %v642_v47 = vadd.f32 %v626_v5, %v508_v9 }
 0x129   :  { %v984_v36 = vpop.permute.xlu0 %983  ;;  %18657 = vmatpush3.bf16.msra.mxu1 %v21527_v7  ;;  %v979_v34 = vpop.permute.xlu1 %978  ;;  %v777_v19 = vadd.f32 %v761_v28, %v643_v27  ;;  %v894_v50 = vmul.f32 %v21642_v29, %v845_v43  ;;  %v1603_v37 = vrot.slane %v1602_v0, 4  ;;  %v3328_v7 = vld [vmem:[%s25084_s4] sm:$0xff] }
 0x12a   :  { %v1578_v26 = vrot.slane %v1577_v16, 2  ;;  %v1587_v22 = vrot.slane %v1586_v17, 2  ;;  %v1595_v18 = vrot.slane %v1594_v49, 2  ;;  %18658 = vmatprep.subr.bf16.mxu1 %v20538_v11  ;;  %v1029_v3 = vmul.f32 %v21678_v13, %v984_v36  ;;  %v3330_v36 = vld [vmem:[%s25084_s4 + $0x10] sm:$0xff] }
 0x12b   :  { %18696 = vmatpush3.bf16.msra.mxu0 %v21881_v25  ;;  %v776_v60 = vadd.f32 %v760_v48, %v642_v47  ;;  %v911_v56 = vadd.f32 %v895_v8, %v777_v19  ;;  %v1028_v58 = vmul.f32 %v21678_v13, %v979_v34  ;;  %v1604_v42 = vmax.f32 %v1602_v0, %v1603_v37  ;;  %v3331_v0 = vld [vmem:[%s25084_s4 + $0x18] sm:$0xff] }
 0x12c   :  { %v1579_v54 = vmax.f32 %v1577_v16, %v1578_v26  ;;  %v1588_v55 = vmax.f32 %v1586_v17, %v1587_v22  ;;  %v1596_v44 = vmax.f32 %v1594_v49, %v1595_v18  ;;  %18697 = vmatprep.subr.bf16.mxu0 %v20538_v11  ;;  %v21943_v52 = vpack.c.bf16 %v3329_v51, %v3328_v7  ;;  %v21963_v37 = vld [vmem:[#allocation3 + $0x18] sm:$0x3f] }
 0x12d   :  { %v1118_v43 = vpop.permute.xlu0 %1117  ;;  %18660 = vmatpush3.bf16.msra.mxu1 %v21550_v21  ;;  %v1113_v53 = vpop.permute.xlu1 %1112  ;;  %v910_v61 = vadd.f32 %v894_v50, %v776_v60  ;;  %v1605_v9 = vrot.slane %v1604_v42, 2  ;;  %v1045_v16 = vadd.f32 %v1029_v3, %v911_v56  ;;  %v3345_v48 = vrot.slane %v21939_v63, 1 }
 0x12e   :  { %v1163_v38 = vmul.f32 %v21696_v4, %v1118_v43  ;;  %v1580_v45 = vrot.slane %v1579_v54, 1  ;;  %v1589_v5 = vrot.slane %v1588_v55, 1  ;;  %v1597_v28 = vrot.slane %v1596_v44, 1  ;;  %18661 = vmatprep.subr.bf16.mxu1 %v20538_v11 }
 0x12f   :  { %v1162_v6 = vmul.f32 %v21696_v4, %v1113_v53  ;;  %18699 = vmatpush3.bf16.msra.mxu0 %v21923_v35  ;;  %v1044_v27 = vadd.f32 %v1028_v58, %v910_v61  ;;  %v1606_v34 = vmax.f32 %v1604_v42, %v1605_v9  ;;  %v21965_v3 = vpack.c.bf16 %v3331_v0, %v3330_v36  ;;  %v3334_v53 = vld [vmem:[%s25084_s4 + $0x30] sm:$0xff]  ;;  %v13756_v36 = vld [vmem:[%s25084_s4 + $0xa0] sm:$0xff] }
 0x130   :  { %v1581_v21 = vmax.f32 %v1579_v54, %v1580_v45  ;;  %v1590_v17 = vmax.f32 %v1588_v55, %v1589_v5  ;;  %v1598_v49 = vmax.f32 %v1596_v44, %v1597_v28  ;;  %18700 = vmatprep.subr.bf16.mxu0 %v20538_v11  ;;  %v1179_v26 = vadd.f32 %v1163_v38, %v1045_v16  ;;  %v3332_v54 = vld [vmem:[%s25084_s4 + $0x20] sm:$0xff]  ;;  %v3333_v55 = vld [vmem:[%s25084_s4 + $0x28] sm:$0xff]  ;;  %v3335_v45 = vld [vmem:[%s25084_s4 + $0x38] sm:$0xff] }
 0x131   :  { %v1252_v8 = vpop.permute.xlu0 %1251  ;;  %18663 = vmatpush3.bf16.msra.mxu1 %v21573_v23  ;;  %v1247_v18 = vpop.permute.xlu1 %1246  ;;  %v1178_v47 = vadd.f32 %v1162_v6, %v1044_v27  ;;  %v1607_v50 = vrot.slane %v1606_v34, 1  ;;  %v21987_v42 = vpack.c.bf16 %v3333_v55, %v3332_v54  ;;  %v22001_v6 = vpack.c.bf16 %v3335_v45, %v3334_v53  ;;  %v13752_v16 = vld [vmem:[%s25084_s4 + $0x80] sm:$0xff] }
 0x132   :  { %v1297_v22 = vmul.f32 %v21723_v59, %v1252_v8  ;;  %1583 = vst.msk [vmem:[#allocation3 + $0x21] sm:$0x1] %vm1423_vm8, %v1581_v21  ;;  %1591 = vst.msk [vmem:[#allocation3 + $0x22] sm:$0x1] %vm1423_vm8, %v1590_v17  ;;  %16057 = vmatmul.mubr.msk.f32.vlgmr.msra.gmra.mrb[2].mxu0 %vm42_vm2, %v3345_v48  ;;  %v1296_v19 = vmul.f32 %v21723_v59, %v1247_v18  ;;  %18664 = vmatprep.subr.bf16.mxu1 %v20538_v11  ;;  %v1611_v17 = vld [vmem:[#allocation2 + $0xa0] sm:$0xff]  ;;  %v13754_v48 = vld [vmem:[%s25084_s4 + $0x90] sm:$0xff] }
 0x133   :  { %1599 = vst.msk [vmem:[#allocation3 + $0x23] sm:$0x1] %vm1423_vm8, %v1598_v49  ;;  %18702 = vmatpush3.bf16.msra.mxu0 %v21943_v52  ;;  %16075 = vmatprep.mubr.msk.f32.mxu0 %vm20540_vm1, %v20539_v14  ;;  %v1608_v44 = vmax.f32 %v1606_v34, %v1607_v50  ;;  %v1612_v49 = vld [vmem:[#allocation2 + $0xa8] sm:$0x3]  ;;  %v13755_v8 = vld [vmem:[%s25084_s4 + $0x98] sm:$0xff]  ;;  %v1617_v0 = vsel %vm42_vm2, %v1611_v17, -inf }
 0x134   :  { %v1313_v23 = vadd.f32 %v1297_v22, %v1179_v26  ;;  %v1312_v7 = vadd.f32 %v1296_v19, %v1178_v47  ;;  %16000 = vmatmul.mubr.msk.f32.vlgmr.msra.gmra.mrb[0].mxu1 %vm42_vm2, %v21963_v37  ;;  %18703 = vmatprep.subr.bf16.mxu0 %v20538_v11  ;;  %v1622_v34 = vsel %vm44_vm3, %v1612_v49, -inf  ;;  %v13757_v22 = vld [vmem:[%s25084_s4 + $0xa8] sm:$0xff]  ;;  %v13758_v18 = vld [vmem:[%s25084_s4 + $0xb0] sm:$0xff]  ;;  %v13759_v47 = vld [vmem:[%s25084_s4 + $0xb8] sm:$0xff]  ;;  %v22044_v54 = vpack.c.bf16 %v13755_v8, %v13754_v48 }
 0x135   :  { %v190_v51 = vpop.permute.xlu0 %189  ;;  %18666 = vmatpush3.bf16.msra.mxu1 %v21601_v1  ;;  %v324_v56 = vpop.permute.xlu1 %323  ;;  %16018 = vmatprep.mubr.msk.f32.mxu1 %vm20540_vm1, %v20539_v14  ;;  %1609 = vst.msk [vmem:[#allocation3 + $0x24] sm:$0x1] %vm1423_vm8, %v1608_v44  ;;  %v13761_v55 = vld [vmem:[%s25084_s4 + $0xc0] sm:$0xff]  ;;  %v22074_v49 = vpack.c.bf16 %v13757_v22, %v13756_v36 }
 0x136   :  { %v1335_v60 = vmul.f32 %v21755_v15, %v1313_v23  ;;  %v1334_v58 = vmul.f32 %v21755_v15, %v1312_v7  ;;  %18667 = vmatprep.subr.bf16.mxu1 %v20538_v11  ;;  %v3166_v23 = vrot.slane %v21963_v37, 1  ;;  %v227_v7 = vmul.f32 %v21854_v39, %v190_v51 }
 0x137   :  { %18705 = vmatpush3.bf16.msra.mxu0 %v21965_v3 }
 0x138   :  { %v1357_v43 = vadd.f32 %v21770_v10, %v1335_v60  ;;  %v1356_v38 = vadd.f32 %v21770_v10, %v1334_v58  ;;  %18706 = vmatprep.subr.bf16.mxu0 %v20538_v11 }
 0x139   :  { %v185_v1 = vpop.permute.xlu0 %184  ;;  %18669 = vmatpush3.bf16.msra.mxu1 %v21646_v33  ;;  %v319_v28 = vpop.permute.xlu1 %318  ;;  %v13753_v33 = vld [vmem:[%s25084_s4 + $0x88] sm:$0xff] }
 0x13a   :  { %v1373_v5 = vmax.f32 %v1357_v43, 0.0  ;;  %v1372_v61 = vmax.f32 %v1356_v38, 0.0  ;;  %18670 = vmatprep.subr.bf16.mxu1 %v20538_v11  ;;  %v22014_v27 = vpack.c.bf16 %v13753_v33, %v13752_v16  ;;  %v360_v43 = vmul.f32 %v21861_v32, %v319_v28  ;;  %v13762_v38 = vld [vmem:[%s25084_s4 + $0xc8] sm:$0xff]  ;;  %v13764_v28 = vld [vmem:[%s25084_s4 + $0xd8] sm:$0xff] }
 0x13b   :  { %18708 = vmatpush3.bf16.msra.mxu0 %v21987_v42 }
 0x13c   :  { %1391 = vst.msk [vmem:[#allocation2 + $0xc1] sm:$0xff] %vm42_vm2, %v1373_v5  ;;  %1390 = vst.msk [vmem:[#allocation2 + $0xb1] sm:$0xff] %vm42_vm2, %v1372_v61  ;;  %18709 = vmatprep.subr.bf16.mxu0 %v20538_v11 }
 0x13d   :  { %v458_v9 = vpop.permute.xlu0 %457  ;;  %18672 = vmatpush3.bf16.msra.mxu1 %v21669_v24  ;;  %v453_v21 = vpop.permute.xlu1 %452 }
 0x13e   :  { %18673 = vmatprep.subr.bf16.mxu1 %v20538_v11  ;;  %v495_v33 = vmul.f32 %v21887_v46, %v458_v9  ;;  %v494_v36 = vmul.f32 %v21887_v46, %v453_v21 }
 0x13f   :  { %18711 = vmatpush3.bf16.msra.mxu0 %v22001_v6 }
 0x140   :  { %18712 = vmatprep.subr.bf16.mxu0 %v20538_v11 }
 0x141   :  { %v592_v24 = vpop.permute.xlu0 %591  ;;  %18675 = vmatpush3.bf16.msra.mxu1 %v21706_v40  ;;  %v587_v26 = vpop.permute.xlu1 %586  ;;  %v361_v40 = vmul.f32 %v21861_v32, %v324_v56  ;;  %v226_v56 = vmul.f32 %v21854_v39, %v185_v1  ;;  %v13763_v1 = vld [vmem:[%s25084_s4 + $0xd0] sm:$0xff] }
 0x142   :  { %16076 = vmatmul.mubr.msk.f32.vlgmr.msra.gmra.mrb[2].mxu0 %vm42_vm2, %v21939_v63  ;;  %18676 = vmatprep.subr.bf16.mxu1 %v20538_v11  ;;  %v22085_v9 = vpack.c.bf16 %v13764_v28, %v13763_v1 }
 0x143   :  { %v1615_v19 = vld [vmem:[#allocation2 + $0xc0] sm:$0xff]  ;;  %v1616_v50 = vld [vmem:[#allocation2 + $0xc8] sm:$0x3]  ;;  %v1613_v58 = vld [vmem:[#allocation2 + $0xb0] sm:$0xff]  ;;  %18714 = vmatpush3.bf16.msra.mxu0 %v22014_v27  ;;  %16094 = vmatprep.mubr.msk.f32.mxu0 %vm20540_vm1, %v20539_v14 }
 0x144   :  { %v22050_v44 = vsel %vm42_vm2, %v1615_v19, -inf  ;;  %v1624_v60 = vsel %vm44_vm3, %v1616_v50, -inf  ;;  %v1614_v51 = vld [vmem:[#allocation2 + $0xb8] sm:$0x3]  ;;  %16019 = vmatmul.mubr.msk.f32.vlgmr.msra.gmra.mrb[0].mxu1 %vm42_vm2, %v3166_v23  ;;  %18715 = vmatprep.subr.bf16.mxu0 %v20538_v11  ;;  %v1618_v61 = vsel %vm42_vm2, %v1613_v58, -inf  ;;  %v377_v19 = vadd.f32 %v361_v40, %v227_v7 }
 0x145   :  { %v1620_v53 = vmax.f32 %v1617_v0, %v22050_v44  ;;  %v1625_v45 = vmax.f32 %v1622_v34, %v1624_v60  ;;  %v726_v5 = vpop.permute.xlu0 %725  ;;  %v1623_v16 = vsel %vm44_vm3, %v1614_v51, -inf  ;;  %18678 = vmatpush3.bf16.msra.mxu1 %v21735_v30  ;;  %v721_v17 = vpop.permute.xlu1 %720  ;;  %16037 = vmatprep.mubr.msk.f32.mxu1 %vm20540_vm1, %v20539_v14  ;;  %v22079_v0 = vpack.c.bf16 %v13759_v47, %v13758_v18 }
 0x146   :  { %18679 = vmatprep.subr.bf16.mxu1 %v20538_v11  ;;  %v22081_v34 = vpack.c.bf16 %v13762_v38, %v13761_v55  ;;  %v376_v50 = vadd.f32 %v360_v43, %v226_v56  ;;  %v3498_v30 = vrot.slane %v21939_v63, 2  ;;  %v511_v55 = vadd.f32 %v495_v33, %v377_v19 }
 0x147   :  { %v1621_v48 = vmax.f32 %v1620_v53, %v1618_v61  ;;  %v1626_v8 = vmax.f32 %v1625_v45, %v1623_v16  ;;  %18717 = vmatpush3.bf16.msra.mxu0 %v22044_v54  ;;  %v629_v7 = vmul.f32 %v21606_v2, %v592_v24  ;;  %v628_v58 = vmul.f32 %v21606_v2, %v587_v26 }
 0x148   :  { %18718 = vmatprep.subr.bf16.mxu0 %v20538_v11  ;;  %v763_v43 = vmul.f32 %v21613_v31, %v726_v5  ;;  %v510_v45 = vadd.f32 %v494_v36, %v376_v50  ;;  %v762_v1 = vmul.f32 %v21613_v31, %v721_v17 }
 0x149   :  { %v860_v22 = vpop.permute.xlu0 %859  ;;  %v1627_v23 = vsel %vm1414_vm4, %v1621_v48, -inf  ;;  %v1636_v18 = vsel %vm1425_vm5, %v1621_v48, -inf  ;;  %v1644_v47 = vsel %vm1434_vm6, %v1621_v48, -inf  ;;  %18681 = vmatpush3.bf16.msra.mxu1 %v21775_v12  ;;  %v855_v40 = vpop.permute.xlu1 %854  ;;  %v1652_v51 = vsel %vm1443_vm7, %v1621_v48, -inf }
 0x14a   :  { %v1628_v63 = vrot.slane %v1627_v23, 4  ;;  %v1637_v60 = vrot.slane %v1636_v18, 4  ;;  %18682 = vmatprep.subr.bf16.mxu1 %v20538_v11  ;;  %v1645_v21 = vrot.slane %v1644_v47, 4  ;;  %v1653_v56 = vsel %vm1423_vm8, %v1626_v8, -inf }
 0x14b   :  { %18720 = vmatpush3.bf16.msra.mxu0 %v22074_v49  ;;  %v1654_v53 = vmax.f32 %v1652_v51, %v1653_v56  ;;  %v3248_v12 = vrot.slane %v21963_v37, 2  ;;  %v645_v28 = vadd.f32 %v629_v7, %v511_v55  ;;  %v897_v61 = vmul.f32 %v21642_v29, %v860_v22 }
 0x14c   :  { %v1629_v38 = vmax.f32 %v1627_v23, %v1628_v63  ;;  %v1638_v24 = vmax.f32 %v1636_v18, %v1637_v60  ;;  %18721 = vmatprep.subr.bf16.mxu0 %v20538_v11  ;;  %v1646_v26 = vmax.f32 %v1644_v47, %v1645_v21  ;;  %v644_v48 = vadd.f32 %v628_v58, %v510_v45 }
 0x14d   :  { %v994_v2 = vpop.permute.xlu0 %993  ;;  %18684 = vmatpush3.bf16.msra.mxu1 %v21798_v41  ;;  %v989_v5 = vpop.permute.xlu1 %988  ;;  %v896_v8 = vmul.f32 %v21642_v29, %v855_v40  ;;  %v1655_v19 = vrot.slane %v1654_v53, 4  ;;  %v779_v31 = vadd.f32 %v763_v43, %v645_v28 }
 0x14e   :  { %v1630_v16 = vrot.slane %v1629_v38, 2  ;;  %v1639_v33 = vrot.slane %v1638_v24, 2  ;;  %18685 = vmatprep.subr.bf16.mxu1 %v20538_v11  ;;  %v1647_v37 = vrot.slane %v1646_v26, 2  ;;  %v1031_v17 = vmul.f32 %v21678_v13, %v994_v2 }
 0x14f   :  { %18723 = vmatpush3.bf16.msra.mxu0 %v22079_v0  ;;  %v778_v22 = vadd.f32 %v762_v1, %v644_v48  ;;  %v1030_v41 = vmul.f32 %v21678_v13, %v989_v5  ;;  %v1656_v47 = vmax.f32 %v1654_v53, %v1655_v19  ;;  %v913_v29 = vadd.f32 %v897_v61, %v779_v31 }
 0x150   :  { %v1631_v50 = vmax.f32 %v1629_v38, %v1630_v16  ;;  %v1640_v36 = vmax.f32 %v1638_v24, %v1639_v33  ;;  %18724 = vmatprep.subr.bf16.mxu0 %v20538_v11  ;;  %v1648_v18 = vmax.f32 %v1646_v26, %v1647_v37  ;;  %v13766_v38 = vld [vmem:[%s25084_s4 + $0xe8] sm:$0xff]  ;;  %v13767_v33 = vld [vmem:[%s25084_s4 + $0xf0] sm:$0xff] }
 0x151   :  { %v1128_v23 = vpop.permute.xlu0 %1127  ;;  %18687 = vmatpush3.bf16.msra.mxu1 %v21820_v57  ;;  %v1123_v7 = vpop.permute.xlu1 %1122  ;;  %v912_v60 = vadd.f32 %v896_v8, %v778_v22  ;;  %v1657_v21 = vrot.slane %v1656_v47, 2  ;;  %v1047_v51 = vadd.f32 %v1031_v17, %v913_v29  ;;  %v13773_v29 = vld [vmem:[%s25084_s4 + $0x118] sm:$0xff] }
 0x152   :  { %v1165_v55 = vmul.f32 %v21696_v4, %v1128_v23  ;;  %v1632_v40 = vrot.slane %v1631_v50, 1  ;;  %v1641_v63 = vrot.slane %v1640_v36, 1  ;;  %16095 = vmatmul.mubr.msk.f32.vlgmr.msra.gmra.mrb[2].mxu0 %vm42_vm2, %v3498_v30  ;;  %v1164_v58 = vmul.f32 %v21696_v4, %v1123_v7  ;;  %18796 = vmatprep.subr.bf16.mxu1 %v20538_v11  ;;  %v13765_v4 = vld [vmem:[%s25084_s4 + $0xe0] sm:$0xff] }
 0x153   :  { %v1649_v13 = vrot.slane %v1648_v18, 1  ;;  %18726 = vmatpush3.bf16.msra.mxu0 %v22081_v34  ;;  %16113 = vmatprep.mubr.msk.f32.mxu0 %vm20540_vm1, %v20539_v14  ;;  %v1046_v43 = vadd.f32 %v1030_v41, %v912_v60  ;;  %v1658_v53 = vmax.f32 %v1656_v47, %v1657_v21  ;;  %v22137_v61 = vpack.c.bf16 %v13766_v38, %v13765_v4  ;;  %v1664_v60 = vld [vmem:[#allocation2 + $0xc8] sm:$0x3]  ;;  %v13776_v21 = vld [vmem:[%s25084_s4 + $0x130] sm:$0xff] }
 0x154   :  { %v1633_v57 = vmax.f32 %v1631_v50, %v1632_v40  ;;  %v1642_v56 = vmax.f32 %v1640_v36, %v1641_v63  ;;  %16038 = vmatmul.mubr.msk.f32.vlgmr.msra.gmra.mrb[0].mxu1 %vm42_vm2, %v3248_v12  ;;  %18727 = vmatprep.subr.bf16.mxu0 %v20538_v11  ;;  %v1181_v45 = vadd.f32 %v1165_v55, %v1047_v51  ;;  %v22186_v55 = vld [vmem:[#allocation3 + $0x18] sm:$0x3f] }
 0x155   :  { %v1262_v30 = vpop.permute.xlu0 %1261  ;;  %v1650_v24 = vmax.f32 %v1648_v18, %v1649_v13  ;;  %18798 = vmatpush3.bf16.msra.mxu1 %v21866_v62  ;;  %16227 = vmatprep.mubr.msk.f32.mxu1 %vm20540_vm1, %v20539_v14  ;;  %v1180_v12 = vadd.f32 %v1164_v58, %v1046_v43  ;;  %v1659_v28 = vrot.slane %v1658_v53, 1  ;;  %v22175_v18 = vld [vmem:[#allocation3 + $0x18] sm:$0x3f]  ;;  %v13774_v58 = vld [vmem:[%s25084_s4 + $0x120] sm:$0xff]  ;;  %v13775_v13 = vld [vmem:[%s25084_s4 + $0x128] sm:$0xff] }
 0x156   :  { %v1299_v1 = vmul.f32 %v21723_v59, %v1262_v30  ;;  %v1257_v2 = vpop.permute.xlu1 %1256  ;;  %1635 = vst.msk [vmem:[#allocation3 + $0x39] sm:$0x1] %vm1423_vm8, %v1633_v57  ;;  %1643 = vst.msk [vmem:[#allocation3 + $0x3a] sm:$0x1] %vm1423_vm8, %v1642_v56  ;;  %18799 = vmatprep.subr.bf16.mxu1 %v20538_v11  ;;  %v4089_v40 = vrot.slane %v22175_v18, 1  ;;  %v13777_v51 = vld [vmem:[%s25084_s4 + $0x138] sm:$0xff] }
 0x157   :  { %v1298_v26 = vmul.f32 %v21723_v59, %v1257_v2  ;;  %1651 = vst.msk [vmem:[#allocation3 + $0x3b] sm:$0x1] %vm1423_vm8, %v1650_v24  ;;  %18729 = vmatpush3.bf16.msra.mxu0 %v22085_v9  ;;  %v13768_v59 = vld [vmem:[%s25084_s4 + $0xf8] sm:$0xff]  ;;  %v1660_v48 = vmax.f32 %v1658_v53, %v1659_v28  ;;  %v1674_v30 = vsel %vm44_vm3, %v1664_v60, -inf  ;;  %v13780_v28 = vld [vmem:[%s25084_s4 + $0x148] sm:$0xff] }
 0x158   :  { %v1315_v62 = vadd.f32 %v1299_v1, %v1181_v45  ;;  %18730 = vmatprep.subr.bf16.mxu0 %v20538_v11  ;;  %v22157_v17 = vpack.c.bf16 %v13768_v59, %v13767_v33  ;;  %v22224_v45 = vpack.c.bf16 %v13775_v13, %v13774_v58 }
 0x159   :  { %v1314_v5 = vadd.f32 %v1298_v26, %v1180_v12  ;;  %v22140_v16 = vpop.permute.xlu0 %199  ;;  %18801 = vmatpush3.bf16.msra.mxu1 %v21879_v20  ;;  %1661 = vst.msk [vmem:[#allocation3 + $0x3c] sm:$0x1] %vm1423_vm8, %v1660_v48  ;;  %v13771_v20 = vld [vmem:[%s25084_s4 + $0x108] sm:$0xff]  ;;  %v22229_v26 = vpack.c.bf16 %v13777_v51, %v13776_v21 }
 0x15a   :  { %v1337_v8 = vmul.f32 %v21755_v15, %v1315_v62  ;;  %v22150_v37 = vpop.permute.xlu1 %333  ;;  %18802 = vmatprep.subr.bf16.mxu1 %v20538_v11  ;;  %v13781_v62 = vld [vmem:[%s25084_s4 + $0x150] sm:$0xff]  ;;  %v229_v59 = vmul.f32 %v21854_v39, %v22140_v16 }
 0x15b   :  { %v1336_v19 = vmul.f32 %v21755_v15, %v1314_v5  ;;  %18732 = vmatpush3.bf16.msra.mxu0 %v22137_v61  ;;  %v13770_v15 = vld [vmem:[%s25084_s4 + $0x100] sm:$0xff]  ;;  %v13782_v5 = vld [vmem:[%s25084_s4 + $0x158] sm:$0xff]  ;;  %v363_v48 = vmul.f32 %v21861_v32, %v22150_v37 }
 0x15c   :  { %v1359_v31 = vadd.f32 %v21770_v10, %v1337_v8  ;;  %18733 = vmatprep.subr.bf16.mxu0 %v20538_v11  ;;  %v22256_v37 = vpack.c.bf16 %v13782_v5, %v13781_v62 }
 0x15d   :  { %v1358_v50 = vadd.f32 %v21770_v10, %v1336_v19  ;;  %v22161_v36 = vpop.permute.xlu0 %194  ;;  %18804 = vmatpush3.bf16.msra.mxu1 %v21881_v25  ;;  %v22173_v10 = vpack.c.bf16 %v13771_v20, %v13770_v15  ;;  %v13772_v25 = vld [vmem:[%s25084_s4 + $0x110] sm:$0xff] }
 0x15e   :  { %v1375_v22 = vmax.f32 %v1359_v31, 0.0  ;;  %v329_v41 = vpop.permute.xlu1 %328  ;;  %18805 = vmatprep.subr.bf16.mxu1 %v20538_v11  ;;  %v22193_v63 = vpack.c.bf16 %v13773_v29, %v13772_v25  ;;  %v228_v31 = vmul.f32 %v21854_v39, %v22161_v36  ;;  %v13783_v25 = vld [vmem:[%s25084_s4 + $0x160] sm:$0xff]  ;;  %v13784_v29 = vld [vmem:[%s25084_s4 + $0x168] sm:$0xff] }
 0x15f   :  { %v1374_v23 = vmax.f32 %v1358_v50, 0.0  ;;  %18735 = vmatpush3.bf16.msra.mxu0 %v22157_v17  ;;  %v362_v50 = vmul.f32 %v21861_v32, %v329_v41  ;;  %v379_v41 = vadd.f32 %v363_v48, %v229_v59  ;;  %v22297_v48 = vld [vmem:[%s25081_s1 + $0x5] ss:$0 sm:$0xff] }
 0x160   :  { %1393 = vst.msk [vmem:[#allocation2 + $0xe1] sm:$0xff] %vm42_vm2, %v1375_v22  ;;  %18736 = vmatprep.subr.bf16.mxu0 %v20538_v11 }
 0x161   :  { %1392 = vst.msk [vmem:[#allocation2 + $0xd1] sm:$0xff] %vm42_vm2, %v1374_v23  ;;  %v468_v47 = vpop.permute.xlu0 %467  ;;  %18807 = vmatpush3.bf16.msra.mxu1 %v21923_v35  ;;  %v378_v60 = vadd.f32 %v362_v50, %v228_v31 }
 0x162   :  { %16114 = vmatmul.mubr.msk.f32.vlgmr.msra.gmra.mrb[2].mxu0 %vm42_vm2, %v22186_v55  ;;  %18808 = vmatprep.subr.bf16.mxu1 %v20538_v11  ;;  %v497_v20 = vmul.f32 %v21887_v46, %v468_v47 }
 0x163   :  { %v463_v7 = vpop.permute.xlu1 %462  ;;  %18738 = vmatpush3.bf16.msra.mxu0 %v22173_v10  ;;  %16132 = vmatprep.mubr.msk.f32.mxu0 %vm20540_vm1, %v20539_v14 }
 0x164   :  { %16228 = vmatmul.mubr.msk.f32.vlgmr.msra.gmra.mrb[2].mxu1 %vm42_vm2, %v4089_v40  ;;  %18739 = vmatprep.subr.bf16.mxu0 %v20538_v11  ;;  %v496_v22 = vmul.f32 %v21887_v46, %v463_v7  ;;  %v22266_v46 = vld [vmem:[%s25081_s1 + $0x3] ss:$0 sm:$0xff]  ;;  %v513_v21 = vadd.f32 %v497_v20, %v379_v41 }
 0x165   :  { %v602_v35 = vpop.permute.xlu0 %601  ;;  %18810 = vmatpush3.bf16.msra.mxu1 %v21943_v52  ;;  %16246 = vmatprep.mubr.msk.f32.mxu1 %vm20540_vm1, %v20539_v14  ;;  %v13779_v52 = vld [vmem:[%s25084_s4 + $0x140] sm:$0xff] }
 0x166   :  { %18811 = vmatprep.subr.bf16.mxu1 %v20538_v11  ;;  %v22254_v16 = vpack.c.bf16 %v13780_v28, %v13779_v52  ;;  %v631_v23 = vmul.f32 %v22266_v46, %v602_v35  ;;  %v3663_v52 = vrot.slane %v22186_v55, 1 }
 0x167   :  { %v1667_v57 = vld [vmem:[#allocation2 + $0xe0] sm:$0xff]  ;;  %v1668_v56 = vld [vmem:[#allocation2 + $0xe8] sm:$0x3]  ;;  %v597_v43 = vpop.permute.xlu1 %596  ;;  %18741 = vmatpush3.bf16.msra.mxu0 %v22193_v63 }
 0x168   :  { %v22220_v4 = vsel %vm42_vm2, %v1667_v57, -inf  ;;  %v1676_v38 = vsel %vm44_vm3, %v1668_v56, -inf  ;;  %v1665_v24 = vld [vmem:[#allocation2 + $0xd0] sm:$0xff]  ;;  %v1666_v53 = vld [vmem:[#allocation2 + $0xd8] sm:$0x3]  ;;  %18742 = vmatprep.subr.bf16.mxu0 %v20538_v11  ;;  %v630_v58 = vmul.f32 %v22266_v46, %v597_v43 }
 0x169   :  { %v1672_v1 = vmax.f32 %v22050_v44, %v22220_v4  ;;  %v1677_v2 = vmax.f32 %v1674_v30, %v1676_v38  ;;  %v736_v12 = vpop.permute.xlu0 %735  ;;  %v1670_v44 = vsel %vm42_vm2, %v1665_v24, -inf  ;;  %v1675_v33 = vsel %vm44_vm3, %v1666_v53, -inf  ;;  %18813 = vmatpush3.bf16.msra.mxu1 %v21965_v3  ;;  %v22287_v53 = vld [vmem:[%s25081_s1 + $0x4] ss:$0 sm:$0xff] }
 0x16a   :  { %18814 = vmatprep.subr.bf16.mxu1 %v20538_v11  ;;  %v512_v30 = vadd.f32 %v496_v22, %v378_v60  ;;  %v22282_v38 = vpack.c.bf16 %v13784_v29, %v13783_v25  ;;  %v647_v24 = vadd.f32 %v631_v23, %v513_v21  ;;  %v22310_v22 = vld [vmem:[%s25081_s1 + $0x6] ss:$0 sm:$0xff]  ;;  %v13786_v21 = vld [vmem:[%s25084_s4 + $0x178] sm:$0xff] }
 0x16b   :  { %v1673_v8 = vmax.f32 %v1672_v1, %v1670_v44  ;;  %v1678_v19 = vmax.f32 %v1677_v2, %v1675_v33  ;;  %v731_v15 = vpop.permute.xlu1 %730  ;;  %18744 = vmatpush3.bf16.msra.mxu0 %v22224_v45  ;;  %v765_v1 = vmul.f32 %v22287_v53, %v736_v12 }
 0x16c   :  { %18745 = vmatprep.subr.bf16.mxu0 %v20538_v11  ;;  %v646_v62 = vadd.f32 %v630_v58, %v512_v30  ;;  %v764_v5 = vmul.f32 %v22287_v53, %v731_v15 }
 0x16d   :  { %v1679_v3 = vsel %vm1414_vm4, %v1673_v8, -inf  ;;  %v1688_v39 = vsel %vm1425_vm5, %v1673_v8, -inf  ;;  %v1696_v32 = vsel %vm1434_vm6, %v1673_v8, -inf  ;;  %v1704_v36 = vsel %vm1443_vm7, %v1673_v8, -inf  ;;  %18816 = vmatpush3.bf16.msra.mxu1 %v21987_v42  ;;  %v870_v47 = vpop.permute.xlu0 %869 }
 0x16e   :  { %v1680_v7 = vrot.slane %v1679_v3, 4  ;;  %v1689_v40 = vrot.slane %v1688_v39, 4  ;;  %18817 = vmatprep.subr.bf16.mxu1 %v20538_v11  ;;  %v1697_v35 = vrot.slane %v1696_v32, 4  ;;  %v1705_v42 = vsel %vm1423_vm8, %v1678_v19, -inf }
 0x16f   :  { %v865_v13 = vpop.permute.xlu1 %864  ;;  %18747 = vmatpush3.bf16.msra.mxu0 %v22229_v26  ;;  %v1706_v56 = vmax.f32 %v1704_v36, %v1705_v42  ;;  %v899_v12 = vmul.f32 %v22297_v48, %v870_v47  ;;  %v781_v20 = vadd.f32 %v765_v1, %v647_v24  ;;  %v780_v36 = vadd.f32 %v764_v5, %v646_v62  ;;  %v13785_v42 = vld [vmem:[%s25084_s4 + $0x170] sm:$0xff]  ;;  %v22342_v1 = vld [vmem:[%s25081_s1 + $0x8] ss:$0 sm:$0xff] }
 0x170   :  { %v1681_v51 = vmax.f32 %v1679_v3, %v1680_v7  ;;  %v1690_v57 = vmax.f32 %v1688_v39, %v1689_v40  ;;  %18748 = vmatprep.subr.bf16.mxu0 %v20538_v11  ;;  %v1698_v43 = vmax.f32 %v1696_v32, %v1697_v35  ;;  %v898_v31 = vmul.f32 %v22297_v48, %v865_v13 }
 0x171   :  { %18819 = vmatpush3.bf16.msra.mxu1 %v22001_v6  ;;  %v1707_v59 = vrot.slane %v1706_v56, 4  ;;  %v915_v29 = vadd.f32 %v899_v12, %v781_v20 }
 0x172   :  { %v1682_v2 = vrot.slane %v1681_v51, 2  ;;  %v1691_v28 = vrot.slane %v1690_v57, 2  ;;  %16133 = vmatmul.mubr.msk.f32.vlgmr.msra.gmra.mrb[2].mxu0 %vm42_vm2, %v3663_v52  ;;  %v1004_v44 = vpop.permute.xlu0 %1003  ;;  %18820 = vmatprep.subr.bf16.mxu1 %v20538_v11  ;;  %v1699_v33 = vrot.slane %v1698_v43, 2  ;;  %v914_v13 = vadd.f32 %v898_v31, %v780_v36 }
 0x173   :  { %18750 = vmatpush3.bf16.msra.mxu0 %v22254_v16  ;;  %v999_v6 = vpop.permute.xlu1 %998  ;;  %16151 = vmatprep.mubr.msk.f32.mxu0 %vm20540_vm1, %v20539_v14  ;;  %v1708_v15 = vmax.f32 %v1706_v56, %v1707_v59  ;;  %v1033_v3 = vmul.f32 %v22310_v22, %v1004_v44  ;;  %v13788_v44 = vld [vmem:[%s25084_s4 + $0x180] sm:$0xff] }
 0x174   :  { %v1683_v8 = vmax.f32 %v1681_v51, %v1682_v2  ;;  %v1692_v19 = vmax.f32 %v1690_v57, %v1691_v28  ;;  %16247 = vmatmul.mubr.msk.f32.vlgmr.msra.gmra.mrb[2].mxu1 %vm42_vm2, %v22175_v18  ;;  %18751 = vmatprep.subr.bf16.mxu0 %v20538_v11  ;;  %v1700_v50 = vmax.f32 %v1698_v43, %v1699_v33  ;;  %v13789_v33 = vld [vmem:[%s25084_s4 + $0x188] sm:$0xff] }
 0x175   :  { %18822 = vmatpush3.bf16.msra.mxu1 %v22014_v27  ;;  %16265 = vmatprep.mubr.msk.f32.mxu1 %vm20540_vm1, %v20539_v14  ;;  %v1032_v41 = vmul.f32 %v22310_v22, %v999_v6  ;;  %v1709_v25 = vrot.slane %v1708_v15, 2  ;;  %v22322_v27 = vld [vmem:[%s25081_s1 + $0x7] ss:$0 sm:$0xff]  ;;  %v1049_v56 = vadd.f32 %v1033_v3, %v915_v29  ;;  %v22345_v28 = vpack.c.bf16 %v13786_v21, %v13785_v42  ;;  %v13790_v3 = vld [vmem:[%s25084_s4 + $0x190] sm:$0xff] }
 0x176   :  { %v1684_v39 = vrot.slane %v1683_v8, 1  ;;  %v1693_v32 = vrot.slane %v1692_v19, 1  ;;  %v1138_v23 = vpop.permute.xlu0 %1137  ;;  %18823 = vmatprep.subr.bf16.mxu1 %v20538_v11  ;;  %v1701_v47 = vrot.slane %v1700_v50, 1 }
 0x177   :  { %18753 = vmatpush3.bf16.msra.mxu0 %v22256_v37  ;;  %v1167_v7 = vmul.f32 %v22322_v27, %v1138_v23  ;;  %v1133_v40 = vpop.permute.xlu1 %1132  ;;  %v1710_v57 = vmax.f32 %v1708_v15, %v1709_v25  ;;  %v1048_v52 = vadd.f32 %v1032_v41, %v914_v13  ;;  %v22365_v15 = vpack.c.bf16 %v13789_v33, %v13788_v44  ;;  %v13794_v13 = vld [vmem:[%s25084_s4 + $0x1b0] sm:$0xff] }
 0x178   :  { %v1685_v60 = vmax.f32 %v1683_v8, %v1684_v39  ;;  %v1694_v58 = vmax.f32 %v1692_v19, %v1693_v32  ;;  %v1166_v35 = vmul.f32 %v22322_v27, %v1133_v40  ;;  %18754 = vmatprep.subr.bf16.mxu0 %v20538_v11  ;;  %v1702_v51 = vmax.f32 %v1700_v50, %v1701_v47  ;;  %v22361_v19 = vld [vmem:[%s25082_s2] ss:$0 sm:$0xff]  ;;  %v13791_v39 = vld [vmem:[%s25084_s4 + $0x198] sm:$0xff] }
 0x179   :  { %18825 = vmatpush3.bf16.msra.mxu1 %v22044_v54  ;;  %v1711_v43 = vrot.slane %v1710_v57, 1  ;;  %v1183_v24 = vadd.f32 %v1167_v7, %v1049_v56  ;;  %v22379_v32 = vld [vmem:[%s25083_s3] ss:$0 sm:$0xff]  ;;  %v4242_v23 = vrot.slane %v22175_v18, 2  ;;  %v22388_v29 = vpack.c.bf16 %v13791_v39, %v13790_v3  ;;  %v13793_v18 = vld [vmem:[%s25084_s4 + $0x1a8] sm:$0xff] }
 0x17a   :  { %1687 = vst.msk [vmem:[#allocation3 + $0x41] sm:$0x1] %vm1423_vm8, %v1685_v60  ;;  %1695 = vst.msk [vmem:[#allocation3 + $0x42] sm:$0x1] %vm1423_vm8, %v1694_v58  ;;  %v1272_v30 = vpop.permute.xlu0 %1271  ;;  %18826 = vmatprep.subr.bf16.mxu1 %v20538_v11  ;;  %v1182_v62 = vadd.f32 %v1166_v35, %v1048_v52  ;;  %v1716_v35 = vld [vmem:[#allocation2 + $0xe8] sm:$0x3] }
 0x17b   :  { %1703 = vst.msk [vmem:[#allocation3 + $0x43] sm:$0x1] %vm1423_vm8, %v1702_v51  ;;  %18756 = vmatpush3.bf16.msra.mxu0 %v22282_v38  ;;  %v1301_v54 = vmul.f32 %v22342_v1, %v1272_v30  ;;  %v1267_v2 = vpop.permute.xlu1 %1266  ;;  %v1712_v59 = vmax.f32 %v1710_v57, %v1711_v43  ;;  %v13797_v57 = vld [vmem:[%s25084_s4 + $0x1c0] sm:$0xff]  ;;  %v1726_v56 = vsel %vm44_vm3, %v1716_v35, -inf }
 0x17c   :  { %v1300_v5 = vmul.f32 %v22342_v1, %v1267_v2  ;;  %18757 = vmatprep.subr.bf16.mxu0 %v20538_v11  ;;  %v13798_v2 = vld [vmem:[%s25084_s4 + $0x1c8] sm:$0xff] }
 0x17d   :  { %v1317_v12 = vadd.f32 %v1301_v54, %v1183_v24  ;;  %18828 = vmatpush3.bf16.msra.mxu1 %v22074_v49  ;;  %1713 = vst.msk [vmem:[#allocation3 + $0x44] sm:$0x1] %vm1423_vm8, %v1712_v59  ;;  %v3745_v49 = vrot.slane %v22186_v55, 2  ;;  %v20508_v24 = vld [vmem:[%s25081_s1 + $0x1] ss:$0 sm:$0xff] }
 0x17e   :  { %v1316_v6 = vadd.f32 %v1300_v5, %v1182_v62  ;;  %v210_v8 = vpop.permute.xlu0 %209  ;;  %18829 = vmatprep.subr.bf16.mxu1 %v20538_v11 }
 0x17f   :  { %v1339_v31 = vmul.f32 %v22361_v19, %v1317_v12  ;;  %18759 = vmatpush3.bf16.msra.mxu0 %v22345_v28  ;;  %v344_v50 = vpop.permute.xlu1 %343 }
 0x180   :  { %v1338_v20 = vmul.f32 %v22361_v19, %v1316_v6  ;;  %18760 = vmatprep.subr.bf16.mxu0 %v20538_v11  ;;  %v365_v54 = vmul.f32 %v20508_v24, %v344_v50  ;;  %v13799_v6 = vld [vmem:[%s25084_s4 + $0x1d0] sm:$0xff] }
 0x181   :  { %v1361_v36 = vadd.f32 %v22379_v32, %v1339_v31  ;;  %18831 = vmatpush3.bf16.msra.mxu1 %v22079_v0  ;;  %v13792_v0 = vld [vmem:[%s25084_s4 + $0x1a0] sm:$0xff] }
 0x182   :  { %v1360_v55 = vadd.f32 %v22379_v32, %v1338_v20  ;;  %16152 = vmatmul.mubr.msk.f32.vlgmr.msra.gmra.mrb[2].mxu0 %vm42_vm2, %v3745_v49  ;;  %v205_v41 = vpop.permute.xlu0 %204  ;;  %18832 = vmatprep.subr.bf16.mxu1 %v20538_v11  ;;  %v22407_v58 = vpack.c.bf16 %v13793_v18, %v13792_v0  ;;  %v13800_v49 = vld [vmem:[%s25084_s4 + $0x1d8] sm:$0xff]  ;;  %v13801_v20 = vld [vmem:[%s25084_s4 + $0x1e0] sm:$0xff] }
 0x183   :  { %v1377_v47 = vmax.f32 %v1361_v36, 0.0  ;;  %18762 = vmatpush3.bf16.msra.mxu0 %v22365_v15  ;;  %v339_v25 = vpop.permute.xlu1 %338  ;;  %16170 = vmatprep.mubr.msk.f32.mxu0 %vm20540_vm1, %v20539_v14  ;;  %v22458_v36 = vpack.c.bf16 %v13798_v2, %v13797_v57  ;;  %v22465_v18 = vld [vmem:[#allocation3 + $0x20] sm:$0x3f] }
 0x184   :  { %v1376_v7 = vmax.f32 %v1360_v55, 0.0  ;;  %16266 = vmatmul.mubr.msk.f32.vlgmr.msra.gmra.mrb[2].mxu1 %vm42_vm2, %v4242_v23  ;;  %18763 = vmatprep.subr.bf16.mxu0 %v20538_v11  ;;  %v364_v12 = vmul.f32 %v20508_v24, %v339_v25  ;;  %v20509_v23 = vld [vmem:[%s25081_s1 + $0x2] ss:$0 sm:$0xff] }
 0x185   :  { %1395 = vst.msk [vmem:[#allocation2 + $0x101] sm:$0xff] %vm42_vm2, %v1377_v47  ;;  %18834 = vmatpush3.bf16.msra.mxu1 %v22081_v34  ;;  %16284 = vmatprep.mubr.msk.f32.mxu1 %vm20540_vm1, %v20539_v14  ;;  %v13795_v34 = vld [vmem:[%s25084_s4 + $0x1b8] sm:$0xff] }
 0x186   :  { %1394 = vst.msk [vmem:[#allocation2 + $0xf1] sm:$0xff] %vm42_vm2, %v1376_v7  ;;  %v478_v40 = vpop.permute.xlu0 %477  ;;  %18835 = vmatprep.subr.bf16.mxu1 %v20538_v11  ;;  %v22419_v51 = vpack.c.bf16 %v13795_v34, %v13794_v13  ;;  %v22467_v13 = vpack.c.bf16 %v13800_v49, %v13799_v6 }
 0x187   :  { %18765 = vmatpush3.bf16.msra.mxu0 %v22388_v29  ;;  %v473_v60 = vpop.permute.xlu1 %472  ;;  %v499_v47 = vmul.f32 %v20509_v23, %v478_v40 }
 0x188   :  { %18766 = vmatprep.subr.bf16.mxu0 %v20538_v11  ;;  %v498_v25 = vmul.f32 %v20509_v23, %v473_v60 }
 0x189   :  { %18837 = vmatpush3.bf16.msra.mxu1 %v22085_v9  ;;  %v20507_v9 = vld [vmem:[%s25081_s1] ss:$0 sm:$0xff] }
 0x18a   :  { %v612_v42 = vpop.permute.xlu0 %611  ;;  %18838 = vmatprep.subr.bf16.mxu1 %v20538_v11  ;;  %v231_v43 = vmul.f32 %v20507_v9, %v210_v8  ;;  %v230_v59 = vmul.f32 %v20507_v9, %v205_v41 }
 0x18b   :  { %18768 = vmatpush3.bf16.msra.mxu0 %v22407_v58  ;;  %v607_v21 = vpop.permute.xlu1 %606  ;;  %v633_v35 = vmul.f32 %v22266_v46, %v612_v42 }
 0x18c   :  { %v1719_v52 = vld [vmem:[#allocation2 + $0x100] sm:$0xff]  ;;  %v1720_v30 = vld [vmem:[#allocation2 + $0x108] sm:$0x3]  ;;  %18769 = vmatprep.subr.bf16.mxu0 %v20538_v11  ;;  %v381_v7 = vadd.f32 %v365_v54, %v231_v43  ;;  %v380_v0 = vadd.f32 %v364_v12, %v230_v59 }
 0x18d   :  { %v22436_v62 = vsel %vm42_vm2, %v1719_v52, -inf  ;;  %v1728_v5 = vsel %vm44_vm3, %v1720_v30, -inf  ;;  %v1717_v44 = vld [vmem:[#allocation2 + $0xf0] sm:$0xff]  ;;  %v1718_v33 = vld [vmem:[#allocation2 + $0xf8] sm:$0x3]  ;;  %18840 = vmatpush3.bf16.msra.mxu1 %v22137_v61  ;;  %v13802_v61 = vld [vmem:[%s25084_s4 + $0x1e8] sm:$0xff] }
 0x18e   :  { %v1724_v8 = vmax.f32 %v22220_v4, %v22436_v62  ;;  %v1729_v31 = vmax.f32 %v1726_v56, %v1728_v5  ;;  %v746_v50 = vpop.permute.xlu0 %745  ;;  %18841 = vmatprep.subr.bf16.mxu1 %v20538_v11  ;;  %v1722_v3 = vsel %vm42_vm2, %v1717_v44, -inf  ;;  %v1727_v4 = vsel %vm44_vm3, %v1718_v33, -inf  ;;  %v22480_v30 = vld [vmem:[#allocation3 + $0x20] sm:$0x3f]  ;;  %v13803_v44 = vld [vmem:[%s25084_s4 + $0x1f0] sm:$0xff]  ;;  %v13804_v33 = vld [vmem:[%s25084_s4 + $0x1f8] sm:$0xff] }
 0x18f   :  { %18771 = vmatpush3.bf16.msra.mxu0 %v22419_v51  ;;  %v741_v39 = vpop.permute.xlu1 %740  ;;  %v22469_v34 = vpack.c.bf16 %v13802_v61, %v13801_v20  ;;  %v632_v56 = vmul.f32 %v22266_v46, %v607_v21  ;;  %v515_v24 = vadd.f32 %v499_v47, %v381_v7  ;;  %v514_v54 = vadd.f32 %v498_v25, %v380_v0 }
 0x190   :  { %v1725_v55 = vmax.f32 %v1724_v8, %v1722_v3  ;;  %v1730_v41 = vmax.f32 %v1729_v31, %v1727_v4  ;;  %18772 = vmatprep.subr.bf16.mxu0 %v20538_v11  ;;  %v767_v2 = vmul.f32 %v22287_v53, %v746_v50  ;;  %v766_v5 = vmul.f32 %v22287_v53, %v741_v39 }
 0x191   :  { %18843 = vmatpush3.bf16.msra.mxu1 %v22157_v17  ;;  %v649_v12 = vadd.f32 %v633_v35, %v515_v24  ;;  %v22505_v3 = vpack.c.bf16 %v13804_v33, %v13803_v44 }
 0x192   :  { %16171 = vmatmul.mubr.msk.f32.vlgmr.msra.gmra.mrb[2].mxu0 %vm42_vm2, %v22465_v18  ;;  %v880_v57 = vpop.permute.xlu0 %879  ;;  %18844 = vmatprep.subr.bf16.mxu1 %v20538_v11  ;;  %v1731_v40 = vsel %vm1414_vm4, %v1725_v55, -inf  ;;  %v1740_v60 = vsel %vm1425_vm5, %v1725_v55, -inf  ;;  %v1748_v17 = vsel %vm1434_vm6, %v1725_v55, -inf  ;;  %v1756_v46 = vsel %vm1443_vm7, %v1725_v55, -inf }
 0x193   :  { %18774 = vmatpush3.bf16.msra.mxu0 %v22458_v36  ;;  %v875_v52 = vpop.permute.xlu1 %874  ;;  %16189 = vmatprep.mubr.msk.f32.mxu0 %vm20540_vm1, %v20539_v14  ;;  %v1732_v42 = vrot.slane %v1731_v40, 4  ;;  %v1741_v9 = vrot.slane %v1740_v60, 4  ;;  %v1749_v43 = vrot.slane %v1748_v17, 4  ;;  %v1757_v21 = vsel %vm1423_vm8, %v1730_v41, -inf }
 0x194   :  { %16285 = vmatmul.mubr.msk.f32.vlgmr.msra.gmra.mrb[2].mxu1 %vm42_vm2, %v22480_v30  ;;  %18775 = vmatprep.subr.bf16.mxu0 %v20538_v11  ;;  %v1758_v31 = vmax.f32 %v1756_v46, %v1757_v21  ;;  %v901_v50 = vmul.f32 %v22297_v48, %v880_v57  ;;  %v900_v49 = vmul.f32 %v22297_v48, %v875_v52 }
 0x195   :  { %18846 = vmatpush3.bf16.msra.mxu1 %v22173_v10  ;;  %16303 = vmatprep.mubr.msk.f32.mxu1 %vm20540_vm1, %v20539_v14  ;;  %v1733_v59 = vmax.f32 %v1731_v40, %v1732_v42  ;;  %v1742_v8 = vmax.f32 %v1740_v60, %v1741_v9  ;;  %v1750_v53 = vmax.f32 %v1748_v17, %v1749_v43 }
 0x196   :  { %v1014_v6 = vpop.permute.xlu0 %1013  ;;  %18847 = vmatprep.subr.bf16.mxu1 %v20538_v11  ;;  %v648_v10 = vadd.f32 %v632_v56, %v514_v54  ;;  %v1759_v55 = vrot.slane %v1758_v31, 4  ;;  %v783_v41 = vadd.f32 %v767_v2, %v649_v12 }
 0x197   :  { %18777 = vmatpush3.bf16.msra.mxu0 %v22467_v13  ;;  %v1009_v20 = vpop.permute.xlu1 %1008  ;;  %v1734_v61 = vrot.slane %v1733_v59, 2  ;;  %v1743_v4 = vrot.slane %v1742_v8, 2  ;;  %v1751_v39 = vrot.slane %v1750_v53, 2  ;;  %v1035_v47 = vmul.f32 %v22310_v22, %v1014_v6 }
 0x198   :  { %18778 = vmatprep.subr.bf16.mxu0 %v20538_v11  ;;  %v782_v23 = vadd.f32 %v766_v5, %v648_v10  ;;  %v1034_v48 = vmul.f32 %v22310_v22, %v1009_v20  ;;  %v1760_v57 = vmax.f32 %v1758_v31, %v1759_v55  ;;  %v917_v40 = vadd.f32 %v901_v50, %v783_v41  ;;  %v13807_v22 = vld [vmem:[%s25084_s4 + $0x208] sm:$0xff]  ;;  %v13808_v31 = vld [vmem:[%s25084_s4 + $0x210] sm:$0xff]  ;;  %v13809_v10 = vld [vmem:[%s25084_s4 + $0x218] sm:$0xff] }
 0x199   :  { %18849 = vmatpush3.bf16.msra.mxu1 %v22193_v63  ;;  %v1735_v25 = vmax.f32 %v1733_v59, %v1734_v61  ;;  %v1744_v0 = vmax.f32 %v1742_v8, %v1743_v4  ;;  %v1752_v35 = vmax.f32 %v1750_v53, %v1751_v39  ;;  %v13806_v63 = vld [vmem:[%s25084_s4 + $0x200] sm:$0xff]  ;;  %v22545_v39 = vpack.c.bf16 %v13809_v10, %v13808_v31  ;;  %v13811_v41 = vld [vmem:[%s25084_s4 + $0x228] sm:$0xff]  ;;  %v13895_v31 = vld [vmem:[%s25084_s4 + $0x78] sm:$0xff] }
 0x19a   :  { %v1148_v7 = vpop.permute.xlu0 %1147  ;;  %18850 = vmatprep.subr.bf16.mxu1 %v20538_v11  ;;  %v916_v60 = vadd.f32 %v900_v49, %v782_v23  ;;  %v1761_v24 = vrot.slane %v1760_v57, 2  ;;  %v1051_v54 = vadd.f32 %v1035_v47, %v917_v40  ;;  %v22525_v6 = vpack.c.bf16 %v13807_v22, %v13806_v63  ;;  %v13890_v40 = vld [vmem:[%s25084_s4 + $0x50] sm:$0xff] }
 0x19b   :  { %18780 = vmatpush3.bf16.msra.mxu0 %v22469_v34  ;;  %v1169_v17 = vmul.f32 %v22322_v27, %v1148_v7  ;;  %v1143_v56 = vpop.permute.xlu1 %1142  ;;  %v1736_v52 = vrot.slane %v1735_v25, 1  ;;  %v1745_v9 = vrot.slane %v1744_v0, 1  ;;  %v1753_v43 = vrot.slane %v1752_v35, 1  ;;  %v13812_v7 = vld [vmem:[%s25084_s4 + $0x230] sm:$0xff] }
 0x19c   :  { %v1168_v42 = vmul.f32 %v22322_v27, %v1143_v56  ;;  %18781 = vmatprep.subr.bf16.mxu0 %v20538_v11  ;;  %v1050_v21 = vadd.f32 %v1034_v48, %v916_v60  ;;  %v1762_v44 = vmax.f32 %v1760_v57, %v1761_v24  ;;  %v3992_v60 = vrot.slane %v22465_v18, 2 }
 0x19d   :  { %18852 = vmatpush3.bf16.msra.mxu1 %v22224_v45  ;;  %v1737_v46 = vmax.f32 %v1735_v25, %v1736_v52  ;;  %v1746_v27 = vmax.f32 %v1744_v0, %v1745_v9  ;;  %v1754_v5 = vmax.f32 %v1752_v35, %v1753_v43  ;;  %v1185_v33 = vadd.f32 %v1169_v17, %v1051_v54  ;;  %v13888_v0 = vld [vmem:[%s25084_s4 + $0x40] sm:$0xff]  ;;  %v13889_v35 = vld [vmem:[%s25084_s4 + $0x48] sm:$0xff] }
 0x19e   :  { %v1282_v2 = vpop.permute.xlu0 %1281  ;;  %18853 = vmatprep.subr.bf16.mxu1 %v20538_v11  ;;  %v3910_v45 = vrot.slane %v22465_v18, 1  ;;  %v1184_v8 = vadd.f32 %v1168_v42, %v1050_v21  ;;  %v1763_v50 = vrot.slane %v1762_v44, 1  ;;  %v22592_v57 = vpack.c.bf16 %v13889_v35, %v13888_v0  ;;  %v13892_v54 = vld [vmem:[%s25084_s4 + $0x60] sm:$0xff] }
 0x19f   :  { %18783 = vmatpush3.bf16.msra.mxu0 %v22505_v3  ;;  %v1303_v59 = vmul.f32 %v22342_v1, %v1282_v2  ;;  %v1277_v12 = vpop.permute.xlu1 %1276  ;;  %1739 = vst.msk [vmem:[#allocation3 + $0x49] sm:$0x1] %vm1423_vm8, %v1737_v46  ;;  %1747 = vst.msk [vmem:[#allocation3 + $0x4a] sm:$0x1] %vm1423_vm8, %v1746_v27  ;;  %v4489_v18 = vrot.slane %v22480_v30, 2  ;;  %v13893_v46 = vld [vmem:[%s25084_s4 + $0x68] sm:$0xff] }
 0x1a0   :  { %v1302_v53 = vmul.f32 %v22342_v1, %v1277_v12  ;;  %18784 = vmatprep.subr.bf16.mxu0 %v20538_v11  ;;  %1755 = vst.msk [vmem:[#allocation3 + $0x4b] sm:$0x1] %vm1423_vm8, %v1754_v5  ;;  %v4407_v1 = vrot.slane %v22480_v30, 1  ;;  %v1764_v61 = vmax.f32 %v1762_v44, %v1763_v50  ;;  %v22626_v27 = vpack.c.bf16 %v13893_v46, %v13892_v54  ;;  %v4824_v54 = vld [vmem:[%s25084_s4 + $0x30] sm:$0xff] }
 0x1a1   :  { %v1319_v49 = vadd.f32 %v1303_v59, %v1185_v33  ;;  %18855 = vmatpush3.bf16.msra.mxu1 %v22229_v26  ;;  %v13810_v26 = vld [vmem:[%s25084_s4 + $0x220] sm:$0xff] }
 0x1a2   :  { %v1318_v20 = vadd.f32 %v1302_v53, %v1184_v8  ;;  %16190 = vmatmul.mubr.msk.f32.vlgmr.msra.gmra.mrb[2].mxu0 %vm42_vm2, %v3910_v45  ;;  %18856 = vmatprep.subr.bf16.mxu1 %v20538_v11  ;;  %1765 = vst.msk [vmem:[#allocation3 + $0x4c] sm:$0x1] %vm1423_vm8, %v1764_v61  ;;  %v22566_v25 = vpack.c.bf16 %v13811_v41, %v13810_v26  ;;  %v13894_v53 = vld [vmem:[%s25084_s4 + $0x70] sm:$0xff] }
 0x1a3   :  { %v1341_v4 = vmul.f32 %v22361_v19, %v1319_v49  ;;  %18786 = vmatpush3.bf16.msra.mxu0 %v22525_v6  ;;  %16208 = vmatprep.mubr.msk.f32.mxu0 %vm20540_vm1, %v20539_v14  ;;  %v22647_v61 = vpack.c.bf16 %v13895_v31, %v13894_v53 }
 0x1a4   :  { %v1340_v55 = vmul.f32 %v22361_v19, %v1318_v20  ;;  %16304 = vmatmul.mubr.msk.f32.vlgmr.msra.gmra.mrb[2].mxu1 %vm42_vm2, %v4407_v1  ;;  %18787 = vmatprep.subr.bf16.mxu0 %v20538_v11 }
 0x1a5   :  { %v1363_v23 = vadd.f32 %v22379_v32, %v1341_v4  ;;  %18858 = vmatpush3.bf16.msra.mxu1 %v22254_v16  ;;  %16322 = vmatprep.mubr.msk.f32.mxu1 %vm20540_vm1, %v20539_v14  ;;  %v13813_v16 = vld [vmem:[%s25084_s4 + $0x238] sm:$0xff]  ;;  %v22649_v4 = vld [vmem:[#allocation3 + $0x30] sm:$0x3f] }
 0x1a6   :  { %v1362_v19 = vadd.f32 %v22379_v32, %v1340_v55  ;;  %18859 = vmatprep.subr.bf16.mxu1 %v20538_v11  ;;  %v22580_v32 = vpack.c.bf16 %v13813_v16, %v13812_v7  ;;  %v4835_v16 = vrot.slane %v22649_v4, 1  ;;  %v4988_v53 = vrot.slane %v22649_v4, 2 }
 0x1a7   :  { %v1379_v47 = vmax.f32 %v1363_v23, 0.0  ;;  %18789 = vmatpush3.bf16.msra.mxu0 %v22545_v39  ;;  %v4819_v23 = vld [vmem:[%s25084_s4 + $0x8] sm:$0xff] }
 0x1a8   :  { %v1378_v48 = vmax.f32 %v1362_v19, 0.0  ;;  %18790 = vmatprep.subr.bf16.mxu0 %v20538_v11 }
 0x1a9   :  { %1397 = vst.msk [vmem:[#allocation2 + $0x121] sm:$0xff] %vm42_vm2, %v1379_v47  ;;  %18861 = vmatpush3.bf16.msra.mxu1 %v22256_v37  ;;  %v1768_v37 = vld [vmem:[#allocation2 + $0x108] sm:$0x3] }
 0x1aa   :  { %1396 = vst.msk [vmem:[#allocation2 + $0x111] sm:$0xff] %vm42_vm2, %v1378_v48  ;;  %18862 = vmatprep.subr.bf16.mxu1 %v20538_v11  ;;  %v1778_v52 = vsel %vm44_vm3, %v1768_v37, -inf }
 0x1ab   :  { %18792 = vmatpush3.bf16.msra.mxu0 %v22566_v25 }
 0x1ac   :  { %18793 = vmatprep.subr.bf16.mxu0 %v20538_v11 }
 0x1ad   :  { %18864 = vmatpush3.bf16.msra.mxu1 %v22282_v38  ;;  %v13891_v38 = vld [vmem:[%s25084_s4 + $0x58] sm:$0xff] }
 0x1ae   :  { %18865 = vmatprep.subr.bf16.mxu1 %v20538_v11 }
 0x1af   :  { %18795 = vmatpush3.bf16.msra.mxu0 %v22580_v32 }
 0x1b0   :  { %v1771_v17 = vld [vmem:[#allocation2 + $0x120] sm:$0xff]  ;;  %v1772_v56 = vld [vmem:[#allocation2 + $0x128] sm:$0x3]  ;;  %18904 = vmatprep.subr.bf16.mxu0 %v20538_v11 }
 0x1b1   :  { %v1775_v42 = vsel %vm42_vm2, %v1771_v17, -inf  ;;  %v1780_v63 = vsel %vm44_vm3, %v1772_v56, -inf  ;;  %v1769_v22 = vld [vmem:[#allocation2 + $0x110] sm:$0xff]  ;;  %v1770_v9 = vld [vmem:[#allocation2 + $0x118] sm:$0x3]  ;;  %18867 = vmatpush3.bf16.msra.mxu1 %v22345_v28 }
 0x1b2   :  { %v1776_v43 = vmax.f32 %v22436_v62, %v1775_v42  ;;  %v1781_v24 = vmax.f32 %v1778_v52, %v1780_v63  ;;  %16209 = vmatmul.mubr.msk.f32.vlgmr.msra.gmra.mrb[2].mxu0 %vm42_vm2, %v3992_v60  ;;  %18868 = vmatprep.subr.bf16.mxu1 %v20538_v11  ;;  %v1774_v21 = vsel %vm42_vm2, %v1769_v22, -inf  ;;  %v1779_v28 = vsel %vm44_vm3, %v1770_v9, -inf  ;;  %v4821_v17 = vld [vmem:[%s25084_s4 + $0x18] sm:$0xff] }
 0x1b3   :  { %18906 = vmatpush3.bf16.msra.mxu0 %v22592_v57  ;;  %v22619_v62 = vpack.c.bf16 %v13891_v38, %v13890_v40  ;;  %16398 = vmatprep.mubr.msk.f32.mxu0 %vm20540_vm1, %v20539_v14  ;;  %v22672_v38 = vld [vmem:[#allocation3 + $0x28] sm:$0x3f] }
 0x1b4   :  { %v1777_v30 = vmax.f32 %v1776_v43, %v1774_v21  ;;  %v1782_v2 = vmax.f32 %v1781_v24, %v1779_v28  ;;  %16323 = vmatmul.mubr.msk.f32.vlgmr.msra.gmra.mrb[2].mxu1 %vm42_vm2, %v4489_v18  ;;  %18907 = vmatprep.subr.bf16.mxu0 %v20538_v11  ;;  %v4823_v18 = vld [vmem:[%s25084_s4 + $0x28] sm:$0xff]  ;;  %v13898_v21 = vld [vmem:[%s25084_s4 + $0x80] sm:$0xff] }
 0x1b5   :  { %18870 = vmatpush3.bf16.msra.mxu1 %v22365_v15  ;;  %16341 = vmatprep.mubr.msk.f32.mxu1 %vm20540_vm1, %v20539_v14  ;;  %v13899_v28 = vld [vmem:[%s25084_s4 + $0x88] sm:$0xff] }
 0x1b6   :  { %18871 = vmatprep.subr.bf16.mxu1 %v20538_v11  ;;  %v1783_v5 = vsel %vm1414_vm4, %v1777_v30, -inf  ;;  %v1792_v44 = vsel %vm1425_vm5, %v1777_v30, -inf  ;;  %v1800_v33 = vsel %vm1434_vm6, %v1777_v30, -inf  ;;  %v1808_v59 = vsel %vm1443_vm7, %v1777_v30, -inf }
 0x1b7   :  { %18909 = vmatpush3.bf16.msra.mxu0 %v22619_v62  ;;  %v1784_v12 = vrot.slane %v1783_v5, 4  ;;  %v1793_v45 = vrot.slane %v1792_v44, 4  ;;  %v1801_v15 = vrot.slane %v1800_v33, 4  ;;  %v1809_v8 = vsel %vm1423_vm8, %v1782_v2, -inf  ;;  %v13900_v2 = vld [vmem:[%s25084_s4 + $0x90] sm:$0xff] }
 0x1b8   :  { %18910 = vmatprep.subr.bf16.mxu0 %v20538_v11  ;;  %v1810_v10 = vmax.f32 %v1808_v59, %v1809_v8  ;;  %v4655_v30 = vrot.slane %v22672_v38, 1  ;;  %v13904_v59 = vld [vmem:[%s25084_s4 + $0xb0] sm:$0xff]  ;;  %v13908_v8 = vld [vmem:[%s25084_s4 + $0xc8] sm:$0xff] }
 0x1b9   :  { %18873 = vmatpush3.bf16.msra.mxu1 %v22388_v29  ;;  %v1785_v50 = vmax.f32 %v1783_v5, %v1784_v12  ;;  %v1794_v49 = vmax.f32 %v1792_v44, %v1793_v45  ;;  %v1802_v1 = vmax.f32 %v1800_v33, %v1801_v15  ;;  %v4818_v29 = vld [vmem:[%s25084_s4] sm:$0xff]  ;;  %v13901_v5 = vld [vmem:[%s25084_s4 + $0x98] sm:$0xff]  ;;  %v13903_v44 = vld [vmem:[%s25084_s4 + $0xa8] sm:$0xff] }
 0x1ba   :  { %18874 = vmatprep.subr.bf16.mxu1 %v20538_v11  ;;  %v1811_v20 = vrot.slane %v1810_v10, 4  ;;  %v22662_v35 = vpack.c.bf16 %v4819_v23, %v4818_v29  ;;  %v13905_v12 = vld [vmem:[%s25084_s4 + $0xb8] sm:$0xff]  ;;  %v13907_v15 = vld [vmem:[%s25084_s4 + $0xc0] sm:$0xff] }
 0x1bb   :  { %18912 = vmatpush3.bf16.msra.mxu0 %v22626_v27  ;;  %v1786_v55 = vrot.slane %v1785_v50, 2  ;;  %v1795_v26 = vrot.slane %v1794_v49, 2  ;;  %v1803_v41 = vrot.slane %v1802_v1, 2  ;;  %v22767_v45 = vpack.c.bf16 %v13905_v12, %v13904_v59  ;;  %v13916_v23 = vld [vmem:[%s25084_s4 + $0x100] sm:$0xff]  ;;  %v13932_v59 = vld [vmem:[%s25084_s4 + $0x178] sm:$0xff] }
 0x1bc   :  { %18913 = vmatprep.subr.bf16.mxu0 %v20538_v11  ;;  %v1812_v19 = vmax.f32 %v1810_v10, %v1811_v20  ;;  %v22780_v31 = vpack.c.bf16 %v13908_v8, %v13907_v15  ;;  %v4737_v10 = vrot.slane %v22672_v38, 2  ;;  %v13911_v20 = vld [vmem:[%s25084_s4 + $0xe0] sm:$0xff]  ;;  %v13935_v15 = vld [vmem:[%s25084_s4 + $0x188] sm:$0xff] }
 0x1bd   :  { %18876 = vmatpush3.bf16.msra.mxu1 %v22407_v58  ;;  %v1787_v47 = vmax.f32 %v1785_v50, %v1786_v55  ;;  %v1796_v48 = vmax.f32 %v1794_v49, %v1795_v26  ;;  %v1804_v7 = vmax.f32 %v1802_v1, %v1803_v41  ;;  %v4820_v58 = vld [vmem:[%s25084_s4 + $0x10] sm:$0xff]  ;;  %v13910_v49 = vld [vmem:[%s25084_s4 + $0xd8] sm:$0xff]  ;;  %v13934_v12 = vld [vmem:[%s25084_s4 + $0x180] sm:$0xff] }
 0x1be   :  { %18877 = vmatprep.subr.bf16.mxu1 %v20538_v11  ;;  %v1813_v0 = vrot.slane %v1812_v19, 2  ;;  %v22677_v9 = vpack.c.bf16 %v4821_v17, %v4820_v58  ;;  %v13909_v50 = vld [vmem:[%s25084_s4 + $0xd0] sm:$0xff]  ;;  %v13914_v41 = vld [vmem:[%s25084_s4 + $0xf8] sm:$0xff]  ;;  %v13920_v58 = vld [vmem:[%s25084_s4 + $0x120] sm:$0xff] }
 0x1bf   :  { %18915 = vmatpush3.bf16.msra.mxu0 %v22647_v61  ;;  %v1788_v37 = vrot.slane %v1787_v47, 1  ;;  %v1797_v40 = vrot.slane %v1796_v48, 1  ;;  %v1805_v60 = vrot.slane %v1804_v7, 1  ;;  %v22794_v1 = vpack.c.bf16 %v13910_v49, %v13909_v50  ;;  %v13913_v26 = vld [vmem:[%s25084_s4 + $0xf0] sm:$0xff]  ;;  %v13921_v17 = vld [vmem:[%s25084_s4 + $0x128] sm:$0xff] }
 0x1c0   :  { %18916 = vmatprep.subr.bf16.mxu0 %v20538_v11  ;;  %v1814_v56 = vmax.f32 %v1812_v19, %v1813_v0  ;;  %v22823_v29 = vpack.c.bf16 %v13914_v41, %v13913_v26  ;;  %v13917_v19 = vld [vmem:[%s25084_s4 + $0x108] sm:$0xff]  ;;  %v22847_v0 = vld [vmem:[#allocation3 + $0x38] sm:$0x3f]  ;;  %v13943_v41 = vld [vmem:[%s25084_s4 + $0x1c0] sm:$0xff] }
 0x1c1   :  { %18879 = vmatpush3.bf16.msra.mxu1 %v22419_v51  ;;  %v1789_v52 = vmax.f32 %v1787_v47, %v1788_v37  ;;  %v1798_v42 = vmax.f32 %v1796_v48, %v1797_v40  ;;  %v1806_v63 = vmax.f32 %v1804_v7, %v1805_v60  ;;  %v4822_v51 = vld [vmem:[%s25084_s4 + $0x20] sm:$0xff]  ;;  %v22835_v47 = vpack.c.bf16 %v13917_v19, %v13916_v23  ;;  %v22837_v48 = vld [vmem:[#allocation3 + $0x38] sm:$0x3f]  ;;  %v13918_v7 = vld [vmem:[%s25084_s4 + $0x110] sm:$0xff] }
 0x1c2   :  { %16399 = vmatmul.mubr.msk.f32.vlgmr.msra.gmra.mrb[4].mxu0 %vm42_vm2, %v4835_v16  ;;  %18880 = vmatprep.subr.bf16.mxu1 %v20538_v11  ;;  %v1815_v22 = vrot.slane %v1814_v56, 1  ;;  %v22699_v24 = vpack.c.bf16 %v4823_v18, %v4822_v51  ;;  %v13919_v16 = vld [vmem:[%s25084_s4 + $0x118] sm:$0xff]  ;;  %v5579_v37 = vrot.slane %v22837_v48, 1  ;;  %v22857_v40 = vld [vmem:[%s25085_s5] ss:$0 sm:$0xff]  ;;  %v13922_v51 = vld [vmem:[%s25084_s4 + $0x130] sm:$0xff] }
 0x1c3   :  { %18918 = vmatpush3.bf16.msra.mxu0 %v22662_v35  ;;  %16417 = vmatprep.mubr.msk.f32.mxu0 %vm20540_vm1, %v20539_v14  ;;  %1791 = vst.msk [vmem:[#allocation3 + $0x51] sm:$0x1] %vm1423_vm8, %v1789_v52  ;;  %1799 = vst.msk [vmem:[#allocation3 + $0x52] sm:$0x1] %vm1423_vm8, %v1798_v42  ;;  %v22859_v60 = vpack.c.bf16 %v13919_v16, %v13918_v7  ;;  %v13923_v18 = vld [vmem:[%s25084_s4 + $0x138] sm:$0xff]  ;;  %v5235_v8 = vrot.slane %v22847_v0, 2 }
 0x1c4   :  { %1807 = vst.msk [vmem:[#allocation3 + $0x53] sm:$0x1] %vm1423_vm8, %v1806_v63  ;;  %16342 = vmatmul.mubr.msk.f32.vlgmr.msra.gmra.mrb[2].mxu1 %vm42_vm2, %v22672_v38  ;;  %18919 = vmatprep.subr.bf16.mxu0 %v20538_v11  ;;  %v1816_v43 = vmax.f32 %v1814_v56, %v1815_v22  ;;  %v22874_v56 = vld [vmem:[%s25086_s6] ss:$0 sm:$0xff]  ;;  %v22882_v63 = vpack.c.bf16 %v13921_v17, %v13920_v58  ;;  %v13939_v49 = vld [vmem:[%s25084_s4 + $0x1a8] sm:$0xff]  ;;  %v13941_v26 = vld [vmem:[%s25084_s4 + $0x1b8] sm:$0xff] }
 0x1c5   :  { %18882 = vmatpush3.bf16.msra.mxu1 %v22458_v36  ;;  %16360 = vmatprep.mubr.msk.f32.mxu1 %vm20540_vm1, %v20539_v14  ;;  %v4825_v36 = vld [vmem:[%s25084_s4 + $0x38] sm:$0xff]  ;;  %v13944_v23 = vld [vmem:[%s25084_s4 + $0x1c8] sm:$0xff]  ;;  %v13945_v19 = vld [vmem:[%s25084_s4 + $0x1d0] sm:$0xff] }
 0x1c6   :  { %18883 = vmatprep.subr.bf16.mxu1 %v20538_v11  ;;  %1817 = vst.msk [vmem:[#allocation3 + $0x54] sm:$0x1] %vm1423_vm8, %v1816_v43  ;;  %v22711_v46 = vpack.c.bf16 %v4825_v36, %v4824_v54  ;;  %v22895_v54 = vpack.c.bf16 %v13923_v18, %v13922_v51  ;;  %v13925_v36 = vld [vmem:[%s25084_s4 + $0x140] sm:$0xff] }
 0x1c7   :  { %18921 = vmatpush3.bf16.msra.mxu0 %v22677_v9  ;;  %v5309_v7 = vld [vmem:[#allocation3 + $0x40] sm:$0x3f] }
 0x1c8   :  { %18922 = vmatprep.subr.bf16.mxu0 %v20538_v11 }
 0x1c9   :  { %18885 = vmatpush3.bf16.msra.mxu1 %v22467_v13  ;;  %v22723_v13 = vpack.c.bf16 %v13899_v28, %v13898_v21  ;;  %v13926_v21 = vld [vmem:[%s25084_s4 + $0x148] sm:$0xff]  ;;  %v5153_v28 = vrot.slane %v22847_v0, 1 }
 0x1ca   :  { %18886 = vmatprep.subr.bf16.mxu1 %v20538_v11 }
 0x1cb   :  { %18924 = vmatpush3.bf16.msra.mxu0 %v22699_v24 }
 0x1cc   :  { %18925 = vmatprep.subr.bf16.mxu0 %v20538_v11 }
 0x1cd   :  { %18888 = vmatpush3.bf16.msra.mxu1 %v22469_v34  ;;  %v22738_v34 = vpack.c.bf16 %v13901_v5, %v13900_v2  ;;  %v13928_v2 = vld [vmem:[%s25084_s4 + $0x158] sm:$0xff]  ;;  %v13930_v5 = vld [vmem:[%s25084_s4 + $0x168] sm:$0xff] }
 0x1ce   :  { %18889 = vmatprep.subr.bf16.mxu1 %v20538_v11 }
 0x1cf   :  { %18927 = vmatpush3.bf16.msra.mxu0 %v22711_v46 }
 0x1d0   :  { %18928 = vmatprep.subr.bf16.mxu0 %v20538_v11 }
 0x1d1   :  { %18891 = vmatpush3.bf16.msra.mxu1 %v22505_v3  ;;  %v13902_v3 = vld [vmem:[%s25084_s4 + $0xa0] sm:$0xff] }
 0x1d2   :  { %16418 = vmatmul.mubr.msk.f32.vlgmr.msra.gmra.mrb[4].mxu0 %vm42_vm2, %v22649_v4  ;;  %18892 = vmatprep.subr.bf16.mxu1 %v20538_v11  ;;  %v22755_v33 = vpack.c.bf16 %v13903_v44, %v13902_v3  ;;  %v13912_v4 = vld [vmem:[%s25084_s4 + $0xe8] sm:$0xff]  ;;  %v13931_v44 = vld [vmem:[%s25084_s4 + $0x170] sm:$0xff] }
 0x1d3   :  { %18930 = vmatpush3.bf16.msra.mxu0 %v22723_v13  ;;  %16436 = vmatprep.mubr.msk.f32.mxu0 %vm20540_vm1, %v20539_v14  ;;  %v22811_v55 = vpack.c.bf16 %v13912_v4, %v13911_v20  ;;  %v13940_v4 = vld [vmem:[%s25084_s4 + $0x1b0] sm:$0xff] }
 0x1d4   :  { %16361 = vmatmul.mubr.msk.f32.vlgmr.msra.gmra.mrb[2].mxu1 %vm42_vm2, %v4655_v30  ;;  %18931 = vmatprep.subr.bf16.mxu0 %v20538_v11  ;;  %v13927_v30 = vld [vmem:[%s25084_s4 + $0x150] sm:$0xff] }
 0x1d5   :  { %18894 = vmatpush3.bf16.msra.mxu1 %v22525_v6  ;;  %16379 = vmatprep.mubr.msk.f32.mxu1 %vm20540_vm1, %v20539_v14 }
 0x1d6   :  { %18895 = vmatprep.subr.bf16.mxu1 %v20538_v11 }
 0x1d7   :  { %18933 = vmatpush3.bf16.msra.mxu0 %v22738_v34 }
 0x1d8   :  { %18934 = vmatprep.subr.bf16.mxu0 %v20538_v11 }
 0x1d9   :  { %18897 = vmatpush3.bf16.msra.mxu1 %v22545_v39 }
 0x1da   :  { %18898 = vmatprep.subr.bf16.mxu1 %v20538_v11 }
 0x1db   :  { %18936 = vmatpush3.bf16.msra.mxu0 %v22755_v33 }
 0x1dc   :  { %18937 = vmatprep.subr.bf16.mxu0 %v20538_v11 }
 0x1dd   :  { %18900 = vmatpush3.bf16.msra.mxu1 %v22566_v25 }
 0x1de   :  { %18901 = vmatprep.subr.bf16.mxu1 %v20538_v11 }
 0x1df   :  { %18939 = vmatpush3.bf16.msra.mxu0 %v22767_v45 }
 0x1e0   :  { %18940 = vmatprep.subr.bf16.mxu0 %v20538_v11 }
 0x1e1   :  { %18903 = vmatpush3.bf16.msra.mxu1 %v22580_v32 }
 0x1e2   :  { %16437 = vmatmul.mubr.msk.f32.vlgmr.msra.gmra.mrb[4].mxu0 %vm42_vm2, %v4988_v53  ;;  %19012 = vmatprep.subr.bf16.mxu1 %v20538_v11  ;;  %v13936_v53 = vld [vmem:[%s25084_s4 + $0x190] sm:$0xff] }
 0x1e3   :  { %18942 = vmatpush3.bf16.msra.mxu0 %v22780_v31  ;;  %16455 = vmatprep.mubr.msk.f32.mxu0 %vm20540_vm1, %v20539_v14 }
 0x1e4   :  { %16380 = vmatmul.mubr.msk.f32.vlgmr.msra.gmra.mrb[2].mxu1 %vm42_vm2, %v4737_v10  ;;  %18943 = vmatprep.subr.bf16.mxu0 %v20538_v11  ;;  %v13937_v10 = vld [vmem:[%s25084_s4 + $0x198] sm:$0xff] }
 0x1e5   :  { %19014 = vmatpush3.bf16.msra.mxu1 %v22592_v57  ;;  %16569 = vmatprep.mubr.msk.f32.mxu1 %vm20540_vm1, %v20539_v14  ;;  %v22979_v50 = vpack.c.bf16 %v13937_v10, %v13936_v53  ;;  %v14047_v53 = vld [vmem:[%s25084_s4 + $0x98] sm:$0xff] }
 0x1e6   :  { %19015 = vmatprep.subr.bf16.mxu1 %v20538_v11 }
 0x1e7   :  { %18945 = vmatpush3.bf16.msra.mxu0 %v22794_v1 }
 0x1e8   :  { %18946 = vmatprep.subr.bf16.mxu0 %v20538_v11 }
 0x1e9   :  { %19017 = vmatpush3.bf16.msra.mxu1 %v22619_v62 }
 0x1ea   :  { %19018 = vmatprep.subr.bf16.mxu1 %v20538_v11 }
 0x1eb   :  { %18948 = vmatpush3.bf16.msra.mxu0 %v22811_v55 }
 0x1ec   :  { %18949 = vmatprep.subr.bf16.mxu0 %v20538_v11 }
 0x1ed   :  { %19020 = vmatpush3.bf16.msra.mxu1 %v22626_v27 }
 0x1ee   :  { %19021 = vmatprep.subr.bf16.mxu1 %v20538_v11 }
 0x1ef   :  { %18951 = vmatpush3.bf16.msra.mxu0 %v22823_v29 }
 0x1f0   :  { %18952 = vmatprep.subr.bf16.mxu0 %v20538_v11 }
 0x1f1   :  { %19023 = vmatpush3.bf16.msra.mxu1 %v22647_v61 }
 0x1f2   :  { %16456 = vmatmul.mubr.msk.f32.vlgmr.msra.gmra.mrb[4].mxu0 %vm42_vm2, %v22847_v0  ;;  %19024 = vmatprep.subr.bf16.mxu1 %v20538_v11  ;;  %v13948_v0 = vld [vmem:[%s25084_s4 + $0x1e8] sm:$0xff] }
 0x1f3   :  { %18954 = vmatpush3.bf16.msra.mxu0 %v22835_v47  ;;  %16474 = vmatprep.mubr.msk.f32.mxu0 %vm20540_vm1, %v20539_v14 }
 0x1f4   :  { %16570 = vmatmul.mubr.msk.f32.vlgmr.msra.gmra.mrb[4].mxu1 %vm42_vm2, %v5579_v37  ;;  %18955 = vmatprep.subr.bf16.mxu0 %v20538_v11 }
 0x1f5   :  { %v2560_v38 = vpop.f32.mrb[0].mxu0  ;;  %19026 = vmatpush3.bf16.msra.mxu1 %v22662_v35  ;;  %16588 = vmatprep.mubr.msk.f32.mxu1 %vm20540_vm1, %v20539_v14 }
 0x1f6   :  { %v2571_v52 = vmul.f32 %v22857_v40, %v2560_v38  ;;  %v15868_v42 = vpop.f32.mrb[1].mxu0  ;;  %19027 = vmatprep.subr.bf16.mxu1 %v20538_v11 }
 0x1f7   :  { %18957 = vmatpush3.bf16.msra.mxu0 %v22859_v60  ;;  %v13950_v42 = vld [vmem:[%s25084_s4 + $0x1f8] sm:$0xff] }
 0x1f8   :  { %v2578_v22 = vadd.f32 %v22874_v56, %v2571_v52  ;;  %18958 = vmatprep.subr.bf16.mxu0 %v20538_v11  ;;  %v13949_v52 = vld [vmem:[%s25084_s4 + $0x1f0] sm:$0xff] }
 0x1f9   :  { %19029 = vmatpush3.bf16.msra.mxu1 %v22677_v9  ;;  %v22908_v9 = vpack.c.bf16 %v13926_v21, %v13925_v36  ;;  %v23064_v51 = vpack.c.bf16 %v13950_v42, %v13949_v52  ;;  %v6310_v21 = vld [vmem:[%s25084_s4 + $0x20] sm:$0xff]  ;;  %v14054_v42 = vld [vmem:[%s25084_s4 + $0xc8] sm:$0xff] }
 0x1fa   :  { %v2579_v43 = vmax.f32 %v2578_v22, 0.0  ;;  %19030 = vmatprep.subr.bf16.mxu1 %v20538_v11  ;;  %v14053_v52 = vld [vmem:[%s25084_s4 + $0xc0] sm:$0xff] }
 0x1fb   :  { %18960 = vmatpush3.bf16.msra.mxu0 %v22882_v63 }
 0x1fc   :  { %2582 = vst.msk [vmem:[#allocation4 + $0x9] sm:$0xf] %vm2581_vm9, %v2579_v43  ;;  %18961 = vmatprep.subr.bf16.mxu0 %v20538_v11  ;;  %v5400_v43 = vrot.slane %v5309_v7, 1 }
 0x1fd   :  { %19032 = vmatpush3.bf16.msra.mxu1 %v22699_v24  ;;  %v22922_v24 = vpack.c.bf16 %v13928_v2, %v13927_v30  ;;  %v6312_v30 = vld [vmem:[%s25084_s4 + $0x30] sm:$0xff]  ;;  %v6313_v2 = vld [vmem:[%s25084_s4 + $0x38] sm:$0xff] }
 0x1fe   :  { %19033 = vmatprep.subr.bf16.mxu1 %v20538_v11 }
 0x1ff   :  { %18963 = vmatpush3.bf16.msra.mxu0 %v22895_v54 }
 0x200   :  { %18964 = vmatprep.subr.bf16.mxu0 %v20538_v11 }
 0x201   :  { %19035 = vmatpush3.bf16.msra.mxu1 %v22711_v46  ;;  %v13929_v46 = vld [vmem:[%s25084_s4 + $0x160] sm:$0xff] }
 0x202   :  { %16475 = vmatmul.mubr.msk.f32.vlgmr.msra.gmra.mrb[4].mxu0 %vm42_vm2, %v5153_v28  ;;  %19036 = vmatprep.subr.bf16.mxu1 %v20538_v11  ;;  %v22940_v3 = vpack.c.bf16 %v13930_v5, %v13929_v46  ;;  %v23161_v46 = vpack.c.bf16 %v6313_v2, %v6312_v30  ;;  %v14044_v5 = vld [vmem:[%s25084_s4 + $0x80] sm:$0xff]  ;;  %v14058_v30 = vld [vmem:[%s25084_s4 + $0xe8] sm:$0xff] }
 0x203   :  { %18966 = vmatpush3.bf16.msra.mxu0 %v22908_v9  ;;  %16493 = vmatprep.mubr.msk.f32.mxu0 %vm20540_vm1, %v20539_v14 }
 0x204   :  { %16589 = vmatmul.mubr.msk.f32.vlgmr.msra.gmra.mrb[4].mxu1 %vm42_vm2, %v22837_v48  ;;  %18967 = vmatprep.subr.bf16.mxu0 %v20538_v11 }
 0x205   :  { %19038 = vmatpush3.bf16.msra.mxu1 %v22723_v13  ;;  %16607 = vmatprep.mubr.msk.f32.mxu1 %vm20540_vm1, %v20539_v14  ;;  %v22952_v13 = vpack.c.bf16 %v13932_v59, %v13931_v44  ;;  %v14045_v44 = vld [vmem:[%s25084_s4 + $0x88] sm:$0xff]  ;;  %v14025_v59 = vld [vmem:[%s25084_s4 + $0x200] sm:$0xff] }
 0x206   :  { %19039 = vmatprep.subr.bf16.mxu1 %v20538_v11 }
 0x207   :  { %18969 = vmatpush3.bf16.msra.mxu0 %v22922_v24 }
 0x208   :  { %18970 = vmatprep.subr.bf16.mxu0 %v20538_v11 }
 0x209   :  { %19041 = vmatpush3.bf16.msra.mxu1 %v22738_v34  ;;  %v22964_v34 = vpack.c.bf16 %v13935_v15, %v13934_v12  ;;  %v14026_v12 = vld [vmem:[%s25084_s4 + $0x208] sm:$0xff]  ;;  %v23179_v15 = vpack.c.bf16 %v14045_v44, %v14044_v5  ;;  %v14111_v5 = vld [vmem:[%s25084_s4 + $0x60] sm:$0xff] }
 0x20a   :  { %19042 = vmatprep.subr.bf16.mxu1 %v20538_v11  ;;  %v23189_v10 = vpack.c.bf16 %v14026_v12, %v14025_v59  ;;  %v14112_v44 = vld [vmem:[%s25084_s4 + $0x68] sm:$0xff]  ;;  %v14059_v12 = vld [vmem:[%s25084_s4 + $0xf0] sm:$0xff] }
 0x20b   :  { %18972 = vmatpush3.bf16.msra.mxu0 %v22940_v3 }
 0x20c   :  { %18973 = vmatprep.subr.bf16.mxu0 %v20538_v11 }
 0x20d   :  { %19044 = vmatpush3.bf16.msra.mxu1 %v22755_v33  ;;  %v5732_v33 = vrot.slane %v22837_v48, 2  ;;  %v13946_v48 = vld [vmem:[%s25084_s4 + $0x1d8] sm:$0xff] }
 0x20e   :  { %19045 = vmatprep.subr.bf16.mxu1 %v20538_v11  ;;  %v23033_v16 = vpack.c.bf16 %v13946_v48, %v13945_v19  ;;  %v14029_v19 = vld [vmem:[%s25084_s4 + $0x220] sm:$0xff]  ;;  %v14030_v48 = vld [vmem:[%s25084_s4 + $0x228] sm:$0xff] }
 0x20f   :  { %18975 = vmatpush3.bf16.msra.mxu0 %v22952_v13 }
 0x210   :  { %18976 = vmatprep.subr.bf16.mxu0 %v20538_v11 }
 0x211   :  { %19047 = vmatpush3.bf16.msra.mxu1 %v22767_v45  ;;  %v13938_v45 = vld [vmem:[%s25084_s4 + $0x1a0] sm:$0xff] }
 0x212   :  { %16494 = vmatmul.mubr.msk.f32.vlgmr.msra.gmra.mrb[4].mxu0 %vm42_vm2, %v5235_v8  ;;  %19048 = vmatprep.subr.bf16.mxu1 %v20538_v11  ;;  %v22996_v20 = vpack.c.bf16 %v13939_v49, %v13938_v45  ;;  %v14046_v8 = vld [vmem:[%s25084_s4 + $0x90] sm:$0xff]  ;;  %v14028_v49 = vld [vmem:[%s25084_s4 + $0x218] sm:$0xff] }
 0x213   :  { %18978 = vmatpush3.bf16.msra.mxu0 %v22964_v34  ;;  %16512 = vmatprep.mubr.msk.f32.mxu0 %vm20540_vm1, %v20539_v14  ;;  %v14027_v45 = vld [vmem:[%s25084_s4 + $0x210] sm:$0xff] }
 0x214   :  { %16608 = vmatmul.mubr.msk.f32.vlgmr.msra.gmra.mrb[4].mxu1 %vm42_vm2, %v5732_v33  ;;  %18979 = vmatprep.subr.bf16.mxu0 %v20538_v11 }
 0x215   :  { %19050 = vmatpush3.bf16.msra.mxu1 %v22780_v31  ;;  %16626 = vmatprep.mubr.msk.f32.mxu1 %vm20540_vm1, %v20539_v14  ;;  %v23008_v31 = vpack.c.bf16 %v13941_v26, %v13940_v4  ;;  %v23202_v4 = vpack.c.bf16 %v14047_v53, %v14046_v8  ;;  %v14048_v26 = vld [vmem:[%s25084_s4 + $0xa0] sm:$0xff]  ;;  %v14060_v8 = vld [vmem:[%s25084_s4 + $0xf8] sm:$0xff]  ;;  %v19235_v53 = vpack.c.bf16 %v14112_v44, %v14111_v5 }
 0x216   :  { %19051 = vmatprep.subr.bf16.mxu1 %v20538_v11  ;;  %v14153_v44 = vld [vmem:[%s25084_s4 + $0x180] sm:$0xff] }
 0x217   :  { %18981 = vmatpush3.bf16.msra.mxu0 %v22979_v50 }
 0x218   :  { %18982 = vmatprep.subr.bf16.mxu0 %v20538_v11 }
 0x219   :  { %19053 = vmatpush3.bf16.msra.mxu1 %v22794_v1  ;;  %v23020_v1 = vpack.c.bf16 %v13944_v23, %v13943_v41  ;;  %v14049_v41 = vld [vmem:[%s25084_s4 + $0xa8] sm:$0xff]  ;;  %v23215_v23 = vpack.c.bf16 %v14028_v49, %v14027_v45  ;;  %v14114_v45 = vld [vmem:[%s25084_s4 + $0x78] sm:$0xff]  ;;  %v23327_v49 = vpack.c.bf16 %v14060_v8, %v14059_v12 }
 0x21a   :  { %19054 = vmatprep.subr.bf16.mxu1 %v20538_v11 }
 0x21b   :  { %18984 = vmatpush3.bf16.msra.mxu0 %v22996_v20 }
 0x21c   :  { %18985 = vmatprep.subr.bf16.mxu0 %v20538_v11 }
 0x21d   :  { %19056 = vmatpush3.bf16.msra.mxu1 %v22811_v55  ;;  %v5806_v55 = vld [vmem:[#allocation3 + $0x40] sm:$0x3f] }
 0x21e   :  { %19057 = vmatprep.subr.bf16.mxu1 %v20538_v11  ;;  %v5897_v36 = vrot.slane %v5806_v55, 1 }
 0x21f   :  { %18987 = vmatpush3.bf16.msra.mxu0 %v23008_v31 }
 0x220   :  { %18988 = vmatprep.subr.bf16.mxu0 %v20538_v11 }
 0x221   :  { %19059 = vmatpush3.bf16.msra.mxu1 %v22823_v29  ;;  %v13947_v29 = vld [vmem:[%s25084_s4 + $0x1e0] sm:$0xff] }
 0x222   :  { %16513 = vmatmul.mubr.msk.f32.vlgmr.msra.gmra.mrb[4].mxu0 %vm42_vm2, %v5309_v7  ;;  %19060 = vmatprep.subr.bf16.mxu1 %v20538_v11  ;;  %v23050_v58 = vpack.c.bf16 %v13948_v0, %v13947_v29  ;;  %v14051_v29 = vld [vmem:[%s25084_s4 + $0xb8] sm:$0xff]  ;;  %v23237_v0 = vpack.c.bf16 %v14030_v48, %v14029_v19  ;;  %v7051_v19 = vld [vmem:[%s25084_s4 + $0x8] sm:$0xff] }
 0x223   :  { %18990 = vmatpush3.bf16.msra.mxu0 %v23020_v1  ;;  %16531 = vmatprep.mubr.msk.f32.mxu0 %vm20540_vm1, %v20539_v14  ;;  %v7049_v48 = vld [vmem:[#allocation3 + $0x48] sm:$0x3f] }
 0x224   :  { %16627 = vmatmul.mubr.msk.f32.vlgmr.msra.gmra.mrb[4].mxu1 %vm42_vm2, %v5806_v55  ;;  %18991 = vmatprep.subr.bf16.mxu0 %v20538_v11 }
 0x225   :  { %19062 = vmatpush3.bf16.msra.mxu1 %v22835_v47  ;;  %16645 = vmatprep.mubr.msk.f32.mxu1 %vm20540_vm1, %v20539_v14 }
 0x226   :  { %19063 = vmatprep.subr.bf16.mxu1 %v20538_v11 }
 0x227   :  { %v3317_v37 = vpop.f32.mrb[0].mxu1  ;;  %18993 = vmatpush3.bf16.msra.mxu0 %v23033_v16 }
 0x228   :  { %v3322_v17 = vmul.f32 %v22857_v40, %v3317_v37  ;;  %v16039_v38 = vpop.f32.mrb[1].mxu1  ;;  %18994 = vmatprep.subr.bf16.mxu0 %v20538_v11  ;;  %v14031_v37 = vld [vmem:[%s25084_s4 + $0x230] sm:$0xff] }
 0x229   :  { %19065 = vmatpush3.bf16.msra.mxu1 %v22859_v60 }
 0x22a   :  { %v3323_v22 = vadd.f32 %v22874_v56, %v3322_v17  ;;  %19066 = vmatprep.subr.bf16.mxu1 %v20538_v11  ;;  %v14032_v17 = vld [vmem:[%s25084_s4 + $0x238] sm:$0xff] }
 0x22b   :  { %18996 = vmatpush3.bf16.msra.mxu0 %v23050_v58 }
 0x22c   :  { %v3324_v18 = vmax.f32 %v3323_v22, 0.0  ;;  %18997 = vmatprep.subr.bf16.mxu0 %v20538_v11  ;;  %v23257_v22 = vpack.c.bf16 %v14032_v17, %v14031_v37  ;;  %v7067_v37 = vrot.slane %v7049_v48, 1 }
 0x22d   :  { %19068 = vmatpush3.bf16.msra.mxu1 %v22882_v63 }
 0x22e   :  { %3326 = vst.msk [vmem:[#allocation4 + $0x11] sm:$0xf] %vm2581_vm9, %v3324_v18  ;;  %19069 = vmatprep.subr.bf16.mxu1 %v20538_v11  ;;  %v14107_v18 = vld [vmem:[%s25084_s4 + $0x40] sm:$0xff] }
 0x22f   :  { %18999 = vmatpush3.bf16.msra.mxu0 %v23064_v51 }
 0x230   :  { %19000 = vmatprep.subr.bf16.mxu0 %v20538_v11 }
 0x231   :  { %19071 = vmatpush3.bf16.msra.mxu1 %v22895_v54 }
 0x232   :  { %16532 = vmatmul.mubr.msk.f32.vlgmr.msra.gmra.mrb[4].mxu0 %vm42_vm2, %v5400_v43  ;;  %19072 = vmatprep.subr.bf16.mxu1 %v20538_v11  ;;  %v14108_v43 = vld [vmem:[%s25084_s4 + $0x48] sm:$0xff] }
 0x233   :  { %19002 = vmatpush3.bf16.msra.mxu0 %v22525_v6  ;;  %16550 = vmatprep.mubr.msk.f32.mxu0 %vm20540_vm1, %v20539_v14  ;;  %v5482_v6 = vrot.slane %v5309_v7, 2  ;;  %v23227_v7 = vpack.c.bf16 %v14049_v41, %v14048_v26  ;;  %v7050_v41 = vld [vmem:[%s25084_s4] sm:$0xff] }
 0x234   :  { %16646 = vmatmul.mubr.msk.f32.vlgmr.msra.gmra.mrb[4].mxu1 %vm42_vm2, %v5897_v36  ;;  %19003 = vmatprep.subr.bf16.mxu0 %v20538_v11  ;;  %v23267_v36 = vpack.c.bf16 %v14054_v42, %v14053_v52 }
 0x235   :  { %19074 = vmatpush3.bf16.msra.mxu1 %v22908_v9  ;;  %16664 = vmatprep.mubr.msk.f32.mxu1 %vm20540_vm1, %v20539_v14 }
 0x236   :  { %19075 = vmatprep.subr.bf16.mxu1 %v20538_v11 }
 0x237   :  { %19005 = vmatpush3.bf16.msra.mxu0 %v22545_v39  ;;  %v5979_v39 = vrot.slane %v5806_v55, 2  ;;  %v14050_v55 = vld [vmem:[%s25084_s4 + $0xb0] sm:$0xff] }
 0x238   :  { %19006 = vmatprep.subr.bf16.mxu0 %v20538_v11  ;;  %v23247_v38 = vpack.c.bf16 %v14051_v29, %v14050_v55  ;;  %v6550_v55 = vld [vmem:[#allocation3 + $0x48] sm:$0x3f]  ;;  %v19241_v29 = vpack.c.bf16 %v7051_v19, %v7050_v41  ;;  %v14156_v41 = vld [vmem:[%s25084_s4 + $0x198] sm:$0xff] }
 0x239   :  { %19077 = vmatpush3.bf16.msra.mxu1 %v22922_v24 }
 0x23a   :  { %19078 = vmatprep.subr.bf16.mxu1 %v20538_v11 }
 0x23b   :  { %19008 = vmatpush3.bf16.msra.mxu0 %v22566_v25  ;;  %v23113_v25 = vld [vmem:[#allocation3 + $0x40] sm:$0x3f] }
 0x23c   :  { %19009 = vmatprep.subr.bf16.mxu0 %v20538_v11 }
 0x23d   :  { %19080 = vmatpush3.bf16.msra.mxu1 %v22940_v3 }
 0x23e   :  { %19081 = vmatprep.subr.bf16.mxu1 %v20538_v11 }
 0x23f   :  { %19011 = vmatpush3.bf16.msra.mxu0 %v22580_v32  ;;  %v6323_v32 = vrot.slane %v23113_v25, 1 }
 0x240   :  { %19120 = vmatprep.subr.bf16.mxu0 %v20538_v11 }
 0x241   :  { %19083 = vmatpush3.bf16.msra.mxu1 %v22952_v13 }
 0x242   :  { %16551 = vmatmul.mubr.msk.f32.vlgmr.msra.gmra.mrb[4].mxu0 %vm42_vm2, %v5482_v6  ;;  %19084 = vmatprep.subr.bf16.mxu1 %v20538_v11  ;;  %v6476_v6 = vrot.slane %v23113_v25, 2 }
 0x243   :  { %19122 = vmatpush3.bf16.msra.mxu0 %v22592_v57  ;;  %16740 = vmatprep.mubr.msk.f32.mxu0 %vm20540_vm1, %v20539_v14  ;;  %v6308_v57 = vld [vmem:[%s25084_s4 + $0x10] sm:$0xff] }
 0x244   :  { %16665 = vmatmul.mubr.msk.f32.vlgmr.msra.gmra.mrb[4].mxu1 %vm42_vm2, %v5979_v39  ;;  %19123 = vmatprep.subr.bf16.mxu0 %v20538_v11  ;;  %v14055_v39 = vld [vmem:[%s25084_s4 + $0xd0] sm:$0xff] }
 0x245   :  { %19086 = vmatpush3.bf16.msra.mxu1 %v22964_v34  ;;  %16683 = vmatprep.mubr.msk.f32.mxu1 %vm20540_vm1, %v20539_v14 }
 0x246   :  { %19087 = vmatprep.subr.bf16.mxu1 %v20538_v11 }
 0x247   :  { %19125 = vmatpush3.bf16.msra.mxu0 %v22619_v62  ;;  %v6309_v62 = vld [vmem:[%s25084_s4 + $0x18] sm:$0xff] }
 0x248   :  { %19126 = vmatprep.subr.bf16.mxu0 %v20538_v11 }
 0x249   :  { %19089 = vmatpush3.bf16.msra.mxu1 %v22979_v50 }
 0x24a   :  { %19090 = vmatprep.subr.bf16.mxu1 %v20538_v11 }
 0x24b   :  { %19128 = vmatpush3.bf16.msra.mxu0 %v22626_v27  ;;  %v23129_v27 = vld [vmem:[#allocation3 + $0x48] sm:$0x3f] }
 0x24c   :  { %19129 = vmatprep.subr.bf16.mxu0 %v20538_v11  ;;  %v6144_v33 = vrot.slane %v23129_v27, 1 }
 0x24d   :  { %19092 = vmatpush3.bf16.msra.mxu1 %v22996_v20 }
 0x24e   :  { %19093 = vmatprep.subr.bf16.mxu1 %v20538_v11 }
 0x24f   :  { %19131 = vmatpush3.bf16.msra.mxu0 %v22647_v61  ;;  %v23131_v61 = vpack.c.bf16 %v6309_v62, %v6308_v57  ;;  %v19229_v57 = vpack.c.bf16 %v14108_v43, %v14107_v18  ;;  %v6226_v62 = vrot.slane %v23129_v27, 2  ;;  %v14142_v43 = vld [vmem:[%s25084_s4 + $0x138] sm:$0xff] }
 0x250   :  { %19132 = vmatprep.subr.bf16.mxu0 %v20538_v11 }
 0x251   :  { %19095 = vmatpush3.bf16.msra.mxu1 %v23008_v31 }
 0x252   :  { %16741 = vmatmul.mubr.msk.f32.vlgmr.msra.gmra.mrb[6].mxu0 %vm42_vm2, %v6323_v32  ;;  %19096 = vmatprep.subr.bf16.mxu1 %v20538_v11  ;;  %v14056_v32 = vld [vmem:[%s25084_s4 + $0xd8] sm:$0xff] }
 0x253   :  { %19134 = vmatpush3.bf16.msra.mxu0 %v22662_v35  ;;  %16759 = vmatprep.mubr.msk.f32.mxu0 %vm20540_vm1, %v20539_v14  ;;  %v6311_v35 = vld [vmem:[%s25084_s4 + $0x28] sm:$0xff] }
 0x254   :  { %16684 = vmatmul.mubr.msk.f32.vlgmr.msra.gmra.mrb[4].mxu1 %vm42_vm2, %v23129_v27  ;;  %19135 = vmatprep.subr.bf16.mxu0 %v20538_v11  ;;  %v23149_v28 = vpack.c.bf16 %v6311_v35, %v6310_v21  ;;  %v14110_v21 = vld [vmem:[%s25084_s4 + $0x58] sm:$0xff]  ;;  %v23288_v35 = vpack.c.bf16 %v14056_v32, %v14055_v39  ;;  %v14057_v27 = vld [vmem:[%s25084_s4 + $0xe0] sm:$0xff]  ;;  %v14146_v32 = vld [vmem:[%s25084_s4 + $0x150] sm:$0xff] }
 0x255   :  { %19098 = vmatpush3.bf16.msra.mxu1 %v23020_v1  ;;  %16702 = vmatprep.mubr.msk.f32.mxu1 %vm20540_vm1, %v20539_v14  ;;  %v23310_v59 = vpack.c.bf16 %v14058_v30, %v14057_v27  ;;  %v14151_v27 = vld [vmem:[%s25084_s4 + $0x178] sm:$0xff]  ;;  %v14180_v30 = vld [vmem:[%s25087_s7 + $0x40] sm:$0xff] }
 0x256   :  { %19099 = vmatprep.subr.bf16.mxu1 %v20538_v11 }
 0x257   :  { %19137 = vmatpush3.bf16.msra.mxu0 %v23131_v61 }
 0x258   :  { %19138 = vmatprep.subr.bf16.mxu0 %v20538_v11 }
 0x259   :  { %19101 = vmatpush3.bf16.msra.mxu1 %v23033_v16 }
 0x25a   :  { %19102 = vmatprep.subr.bf16.mxu1 %v20538_v11 }
 0x25b   :  { %19140 = vmatpush3.bf16.msra.mxu0 %v23149_v28 }
 0x25c   :  { %19141 = vmatprep.subr.bf16.mxu0 %v20538_v11 }
 0x25d   :  { %19104 = vmatpush3.bf16.msra.mxu1 %v23050_v58 }
 0x25e   :  { %19105 = vmatprep.subr.bf16.mxu1 %v20538_v11 }
 0x25f   :  { %19143 = vmatpush3.bf16.msra.mxu0 %v23161_v46 }
 0x260   :  { %19144 = vmatprep.subr.bf16.mxu0 %v20538_v11 }
 0x261   :  { %19107 = vmatpush3.bf16.msra.mxu1 %v23064_v51 }
 0x262   :  { %16760 = vmatmul.mubr.msk.f32.vlgmr.msra.gmra.mrb[6].mxu0 %vm42_vm2, %v23113_v25  ;;  %19108 = vmatprep.subr.bf16.mxu1 %v20538_v11  ;;  %v14109_v25 = vld [vmem:[%s25084_s4 + $0x50] sm:$0xff] }
 0x263   :  { %19146 = vmatpush3.bf16.msra.mxu0 %v23179_v15  ;;  %16778 = vmatprep.mubr.msk.f32.mxu0 %vm20540_vm1, %v20539_v14  ;;  %v19232_v2 = vpack.c.bf16 %v14110_v21, %v14109_v25  ;;  %v14149_v25 = vld [vmem:[%s25084_s4 + $0x168] sm:$0xff] }
 0x264   :  { %16703 = vmatmul.mubr.msk.f32.vlgmr.msra.gmra.mrb[4].mxu1 %vm42_vm2, %v6144_v33  ;;  %19147 = vmatprep.subr.bf16.mxu0 %v20538_v11  ;;  %v14113_v33 = vld [vmem:[%s25084_s4 + $0x70] sm:$0xff] }
 0x265   :  { %19110 = vmatpush3.bf16.msra.mxu1 %v23189_v10  ;;  %16721 = vmatprep.mubr.msk.f32.mxu1 %vm20540_vm1, %v20539_v14  ;;  %v19238_v26 = vpack.c.bf16 %v14114_v45, %v14113_v33  ;;  %v14183_v33 = vld [vmem:[%s25087_s7 + $0x58] sm:$0xff] }
 0x266   :  { %19111 = vmatprep.subr.bf16.mxu1 %v20538_v11 }
 0x267   :  { %19149 = vmatpush3.bf16.msra.mxu0 %v23202_v4 }
 0x268   :  { %19150 = vmatprep.subr.bf16.mxu0 %v20538_v11 }
 0x269   :  { %19113 = vmatpush3.bf16.msra.mxu1 %v23215_v23 }
 0x26a   :  { %19114 = vmatprep.subr.bf16.mxu1 %v20538_v11 }
 0x26b   :  { %19152 = vmatpush3.bf16.msra.mxu0 %v23227_v7 }
 0x26c   :  { %19153 = vmatprep.subr.bf16.mxu0 %v20538_v11 }
 0x26d   :  { %19116 = vmatpush3.bf16.msra.mxu1 %v23237_v0 }
 0x26e   :  { %19117 = vmatprep.subr.bf16.mxu1 %v20538_v11 }
 0x26f   :  { %19155 = vmatpush3.bf16.msra.mxu0 %v23247_v38 }
 0x270   :  { %19156 = vmatprep.subr.bf16.mxu0 %v20538_v11 }
 0x271   :  { %19119 = vmatpush3.bf16.msra.mxu1 %v23257_v22 }
 0x272   :  { %16779 = vmatmul.mubr.msk.f32.vlgmr.msra.gmra.mrb[6].mxu0 %vm42_vm2, %v6476_v6  ;;  %19228 = vmatprep.subr.bf16.mxu1 %v20538_v11 }
 0x273   :  { %19158 = vmatpush3.bf16.msra.mxu0 %v23267_v36  ;;  %16797 = vmatprep.mubr.msk.f32.mxu0 %vm20540_vm1, %v20539_v14 }
 0x274   :  { %16722 = vmatmul.mubr.msk.f32.vlgmr.msra.gmra.mrb[4].mxu1 %vm42_vm2, %v6226_v62  ;;  %19159 = vmatprep.subr.bf16.mxu0 %v20538_v11  ;;  %v14148_v62 = vld [vmem:[%s25084_s4 + $0x160] sm:$0xff] }
 0x275   :  { %19230 = vmatpush3.bf16.msra.mxu1 %v19229_v57  ;;  %16911 = vmatprep.mubr.msk.f32.mxu1 %vm20540_vm1, %v20539_v14  ;;  %v19295_v21 = vpack.c.bf16 %v14149_v25, %v14148_v62  ;;  %v14190_v62 = vld [vmem:[%s25087_s7 + $0x80] sm:$0xff]  ;;  %v14191_v25 = vld [vmem:[%s25087_s7 + $0x88] sm:$0xff] }
 0x276   :  { %19231 = vmatprep.subr.bf16.mxu1 %v20538_v11 }
 0x277   :  { %19161 = vmatpush3.bf16.msra.mxu0 %v23288_v35 }
 0x278   :  { %19162 = vmatprep.subr.bf16.mxu0 %v20538_v11 }
 0x279   :  { %19233 = vmatpush3.bf16.msra.mxu1 %v19232_v2  ;;  %v14181_v2 = vld [vmem:[%s25087_s7 + $0x48] sm:$0xff] }
 0x27a   :  { %19234 = vmatprep.subr.bf16.mxu1 %v20538_v11  ;;  %v23513_v12 = vpack.c.bf16 %v14181_v2, %v14180_v30  ;;  %v14192_v30 = vld [vmem:[%s25087_s7 + $0x90] sm:$0xff]  ;;  %v14193_v2 = vld [vmem:[%s25087_s7 + $0x98] sm:$0xff] }
 0x27b   :  { %19164 = vmatpush3.bf16.msra.mxu0 %v23310_v59 }
 0x27c   :  { %19165 = vmatprep.subr.bf16.mxu0 %v20538_v11 }
 0x27d   :  { %19236 = vmatpush3.bf16.msra.mxu1 %v19235_v53  ;;  %v14182_v53 = vld [vmem:[%s25087_s7 + $0x50] sm:$0xff] }
 0x27e   :  { %19237 = vmatprep.subr.bf16.mxu1 %v20538_v11  ;;  %v23533_v19 = vpack.c.bf16 %v14183_v33, %v14182_v53  ;;  %v14196_v53 = vld [vmem:[%s25087_s7 + $0xb0] sm:$0xff]  ;;  %v14197_v33 = vld [vmem:[%s25087_s7 + $0xb8] sm:$0xff] }
 0x27f   :  { %19167 = vmatpush3.bf16.msra.mxu0 %v23327_v49 }
 0x280   :  { %19168 = vmatprep.subr.bf16.mxu0 %v20538_v11 }
 0x281   :  { %19239 = vmatpush3.bf16.msra.mxu1 %v19238_v26  ;;  %v14155_v26 = vld [vmem:[%s25084_s4 + $0x190] sm:$0xff] }
 0x282   :  { %16798 = vmatmul.mubr.msk.f32.vlgmr.msra.gmra.mrb[6].mxu0 %vm42_vm2, %v6550_v55  ;;  %19240 = vmatprep.subr.bf16.mxu1 %v20538_v11 }
 0x283   :  { %19170 = vmatpush3.bf16.msra.mxu0 %v22835_v47  ;;  %16816 = vmatprep.mubr.msk.f32.mxu0 %vm20540_vm1, %v20539_v14 }
 0x284   :  { %16912 = vmatmul.mubr.msk.f32.vlgmr.msra.gmra.mrb[6].mxu1 %vm42_vm2, %v7067_v37  ;;  %19171 = vmatprep.subr.bf16.mxu0 %v20538_v11  ;;  %v14157_v37 = vld [vmem:[%s25084_s4 + $0x1a0] sm:$0xff] }
 0x285   :  { %v4061_v17 = vpop.f32.mrb[2].mxu0  ;;  %19242 = vmatpush3.bf16.msra.mxu1 %v19241_v29  ;;  %16930 = vmatprep.mubr.msk.f32.mxu1 %vm20540_vm1, %v20539_v14  ;;  %v19304_v29 = vpack.c.bf16 %v14156_v41, %v14155_v26 }
 0x286   :  { %v4066_v52 = vmul.f32 %v22857_v40, %v4061_v17  ;;  %v16210_v42 = vpop.f32.mrb[3].mxu0  ;;  %19243 = vmatprep.subr.bf16.mxu1 %v20538_v11  ;;  %v14158_v17 = vld [vmem:[%s25084_s4 + $0x1a8] sm:$0xff] }
 0x287   :  { %19173 = vmatpush3.bf16.msra.mxu0 %v22859_v60  ;;  %v6641_v60 = vrot.slane %v6550_v55, 1  ;;  %v14186_v42 = vld [vmem:[%s25087_s7 + $0x70] sm:$0xff] }
 0x288   :  { %v4067_v47 = vadd.f32 %v22874_v56, %v4066_v52  ;;  %19174 = vmatprep.subr.bf16.mxu0 %v20538_v11 }
 0x289   :  { %19245 = vmatpush3.bf16.msra.mxu1 %v23131_v61  ;;  %v14140_v61 = vld [vmem:[%s25084_s4 + $0x128] sm:$0xff] }
 0x28a   :  { %v4068_v18 = vmax.f32 %v4067_v47, 0.0  ;;  %19246 = vmatprep.subr.bf16.mxu1 %v20538_v11  ;;  %v14187_v47 = vld [vmem:[%s25087_s7 + $0x78] sm:$0xff] }
 0x28b   :  { %19176 = vmatpush3.bf16.msra.mxu0 %v22882_v63  ;;  %v6723_v63 = vrot.slane %v6550_v55, 2  ;;  %v14185_v55 = vld [vmem:[%s25087_s7 + $0x68] sm:$0xff] }
 0x28c   :  { %4070 = vst.msk [vmem:[#allocation4 + $0x19] sm:$0xf] %vm2581_vm9, %v4068_v18  ;;  %19177 = vmatprep.subr.bf16.mxu0 %v20538_v11  ;;  %v19307_v18 = vpack.c.bf16 %v14158_v17, %v14157_v37  ;;  %v14205_v17 = vld [vmem:[%s25087_s7 + $0xf0] sm:$0xff] }
 0x28d   :  { %19248 = vmatpush3.bf16.msra.mxu1 %v23149_v28 }
 0x28e   :  { %19249 = vmatprep.subr.bf16.mxu1 %v20538_v11 }
 0x28f   :  { %19179 = vmatpush3.bf16.msra.mxu0 %v22895_v54  ;;  %v7220_v54 = vrot.slane %v7049_v48, 2 }
 0x290   :  { %19180 = vmatprep.subr.bf16.mxu0 %v20538_v11 }
 0x291   :  { %19251 = vmatpush3.bf16.msra.mxu1 %v23161_v46 }
 0x292   :  { %16817 = vmatmul.mubr.msk.f32.vlgmr.msra.gmra.mrb[6].mxu0 %vm42_vm2, %v6641_v60  ;;  %19252 = vmatprep.subr.bf16.mxu1 %v20538_v11  ;;  %v14159_v60 = vld [vmem:[%s25084_s4 + $0x1b0] sm:$0xff] }
 0x293   :  { %19182 = vmatpush3.bf16.msra.mxu0 %v22908_v9  ;;  %16835 = vmatprep.mubr.msk.f32.mxu0 %vm20540_vm1, %v20539_v14  ;;  %v14135_v9 = vld [vmem:[%s25084_s4 + $0x100] sm:$0xff] }
 0x294   :  { %16931 = vmatmul.mubr.msk.f32.vlgmr.msra.gmra.mrb[6].mxu1 %vm42_vm2, %v7049_v48  ;;  %19183 = vmatprep.subr.bf16.mxu0 %v20538_v11  ;;  %v14184_v48 = vld [vmem:[%s25087_s7 + $0x60] sm:$0xff] }
 0x295   :  { %19254 = vmatpush3.bf16.msra.mxu1 %v23179_v15  ;;  %16949 = vmatprep.mubr.msk.f32.mxu1 %vm20540_vm1, %v20539_v14  ;;  %v23555_v52 = vpack.c.bf16 %v14185_v55, %v14184_v48  ;;  %v14201_v48 = vld [vmem:[%s25087_s7 + $0xd0] sm:$0xff] }
 0x296   :  { %19255 = vmatprep.subr.bf16.mxu1 %v20538_v11 }
 0x297   :  { %19185 = vmatpush3.bf16.msra.mxu0 %v22922_v24  ;;  %v14136_v24 = vld [vmem:[%s25084_s4 + $0x108] sm:$0xff] }
 0x298   :  { %19186 = vmatprep.subr.bf16.mxu0 %v20538_v11 }
 0x299   :  { %19257 = vmatpush3.bf16.msra.mxu1 %v23202_v4 }
 0x29a   :  { %19258 = vmatprep.subr.bf16.mxu1 %v20538_v11 }
 0x29b   :  { %19188 = vmatpush3.bf16.msra.mxu0 %v22940_v3  ;;  %v23413_v3 = vld [vmem:[#allocation3 + $0x50] sm:$0x3f] }
 0x29c   :  { %19189 = vmatprep.subr.bf16.mxu0 %v20538_v11  ;;  %v6970_v8 = vrot.slane %v23413_v3, 2 }
 0x29d   :  { %19260 = vmatpush3.bf16.msra.mxu1 %v23227_v7 }
 0x29e   :  { %19261 = vmatprep.subr.bf16.mxu1 %v20538_v11 }
 0x29f   :  { %19191 = vmatpush3.bf16.msra.mxu0 %v22952_v13  ;;  %v19277_v13 = vpack.c.bf16 %v14136_v24, %v14135_v9  ;;  %v23574_v9 = vld [vmem:[#allocation4] sm:$0x3f] }
 0x2a0   :  { %19192 = vmatprep.subr.bf16.mxu0 %v20538_v11  ;;  %v7804_v24 = vld [vmem:[%s25087_s7] sm:$0xff] }
 0x2a1   :  { %19263 = vmatpush3.bf16.msra.mxu1 %v23247_v38  ;;  %v14141_v38 = vld [vmem:[%s25084_s4 + $0x130] sm:$0xff] }
 0x2a2   :  { %16836 = vmatmul.mubr.msk.f32.vlgmr.msra.gmra.mrb[6].mxu0 %vm42_vm2, %v6723_v63  ;;  %19264 = vmatprep.subr.bf16.mxu1 %v20538_v11  ;;  %v14160_v63 = vld [vmem:[%s25084_s4 + $0x1b8] sm:$0xff] }
 0x2a3   :  { %19194 = vmatpush3.bf16.msra.mxu0 %v22964_v34  ;;  %16854 = vmatprep.mubr.msk.f32.mxu0 %vm20540_vm1, %v20539_v14  ;;  %v14137_v34 = vld [vmem:[%s25084_s4 + $0x110] sm:$0xff] }
 0x2a4   :  { %16950 = vmatmul.mubr.msk.f32.vlgmr.msra.gmra.mrb[6].mxu1 %vm42_vm2, %v7220_v54  ;;  %19195 = vmatprep.subr.bf16.mxu0 %v20538_v11  ;;  %v23572_v54 = vpack.c.bf16 %v14187_v47, %v14186_v42  ;;  %v14206_v42 = vld [vmem:[%s25087_s7 + $0xf8] sm:$0xff] }
 0x2a5   :  { %19266 = vmatpush3.bf16.msra.mxu1 %v23267_v36  ;;  %16968 = vmatprep.mubr.msk.f32.mxu1 %vm20540_vm1, %v20539_v14  ;;  %v14145_v36 = vld [vmem:[%s25084_s4 + $0x148] sm:$0xff]  ;;  %v23762_v47 = vpack.c.bf16 %v14206_v42, %v14205_v17  ;;  %v14233_v17 = vld [vmem:[%s25087_s7 + $0x1b8] sm:$0xff] }
 0x2a6   :  { %19267 = vmatprep.subr.bf16.mxu1 %v20538_v11 }
 0x2a7   :  { %19197 = vmatpush3.bf16.msra.mxu0 %v22979_v50  ;;  %v14138_v50 = vld [vmem:[%s25084_s4 + $0x118] sm:$0xff] }
 0x2a8   :  { %19198 = vmatprep.subr.bf16.mxu0 %v20538_v11 }
 0x2a9   :  { %19269 = vmatpush3.bf16.msra.mxu1 %v23288_v35  ;;  %v14150_v35 = vld [vmem:[%s25084_s4 + $0x170] sm:$0xff] }
 0x2aa   :  { %19270 = vmatprep.subr.bf16.mxu1 %v20538_v11  ;;  %v19298_v5 = vpack.c.bf16 %v14151_v27, %v14150_v35  ;;  %v23663_v35 = vpack.c.bf16 %v14191_v25, %v14190_v62  ;;  %v14221_v25 = vld [vmem:[%s25087_s7 + $0x160] sm:$0xff] }
 0x2ab   :  { %19200 = vmatpush3.bf16.msra.mxu0 %v22996_v20  ;;  %v23425_v20 = vld [vmem:[#allocation3 + $0x50] sm:$0x3f] }
 0x2ac   :  { %19201 = vmatprep.subr.bf16.mxu0 %v20538_v11  ;;  %v7385_v39 = vrot.slane %v23425_v20, 1 }
 0x2ad   :  { %19272 = vmatpush3.bf16.msra.mxu1 %v23310_v59  ;;  %v14154_v59 = vld [vmem:[%s25084_s4 + $0x188] sm:$0xff] }
 0x2ae   :  { %19273 = vmatprep.subr.bf16.mxu1 %v20538_v11  ;;  %v19301_v45 = vpack.c.bf16 %v14154_v59, %v14153_v44  ;;  %v14194_v44 = vld [vmem:[%s25087_s7 + $0xa0] sm:$0xff]  ;;  %v14195_v59 = vld [vmem:[%s25087_s7 + $0xa8] sm:$0xff] }
 0x2af   :  { %19203 = vmatpush3.bf16.msra.mxu0 %v23008_v31  ;;  %v19280_v31 = vpack.c.bf16 %v14138_v50, %v14137_v34  ;;  %v7822_v34 = vrot.slane %v23574_v9, 1  ;;  %v14162_v50 = vld [vmem:[%s25084_s4 + $0x1c0] sm:$0xff] }
 0x2b0   :  { %19204 = vmatprep.subr.bf16.mxu0 %v20538_v11 }
 0x2b1   :  { %19275 = vmatpush3.bf16.msra.mxu1 %v23327_v49  ;;  %v7467_v49 = vrot.slane %v23425_v20, 2 }
 0x2b2   :  { %16855 = vmatmul.mubr.msk.f32.vlgmr.msra.gmra.mrb[6].mxu0 %vm42_vm2, %v23413_v3  ;;  %19276 = vmatprep.subr.bf16.mxu1 %v20538_v11 }
 0x2b3   :  { %19206 = vmatpush3.bf16.msra.mxu0 %v23020_v1  ;;  %16873 = vmatprep.mubr.msk.f32.mxu0 %vm20540_vm1, %v20539_v14  ;;  %v14139_v1 = vld [vmem:[%s25084_s4 + $0x120] sm:$0xff] }
 0x2b4   :  { %16969 = vmatmul.mubr.msk.f32.vlgmr.msra.gmra.mrb[6].mxu1 %vm42_vm2, %v23425_v20  ;;  %19207 = vmatprep.subr.bf16.mxu0 %v20538_v11  ;;  %v19283_v4 = vpack.c.bf16 %v14140_v61, %v14139_v1  ;;  %v14163_v20 = vld [vmem:[%s25084_s4 + $0x1c8] sm:$0xff]  ;;  %v7806_v1 = vld [vmem:[%s25087_s7 + $0x10] sm:$0xff]  ;;  %v7807_v61 = vld [vmem:[%s25087_s7 + $0x18] sm:$0xff] }
 0x2b5   :  { %19278 = vmatpush3.bf16.msra.mxu1 %v19277_v13  ;;  %16987 = vmatprep.mubr.msk.f32.mxu1 %vm20540_vm1, %v20539_v14  ;;  %v19310_v13 = vpack.c.bf16 %v14160_v63, %v14159_v60  ;;  %v14209_v60 = vld [vmem:[%s25087_s7 + $0x108] sm:$0xff] }
 0x2b6   :  { %19279 = vmatprep.subr.bf16.mxu1 %v20538_v11  ;;  %v23774_v63 = vld [vmem:[#allocation4 + $0x8] sm:$0x3f] }
 0x2b7   :  { %v4806_v28 = vpop.f32.mrb[2].mxu1  ;;  %19209 = vmatpush3.bf16.msra.mxu0 %v23033_v16  ;;  %v19286_v16 = vpack.c.bf16 %v14142_v43, %v14141_v38  ;;  %v7808_v38 = vld [vmem:[%s25087_s7 + $0x20] sm:$0xff]  ;;  %v7809_v43 = vld [vmem:[%s25087_s7 + $0x28] sm:$0xff] }
 0x2b8   :  { %v4811_v46 = vmul.f32 %v22857_v40, %v4806_v28  ;;  %v16381_v15 = vpop.f32.mrb[3].mxu1  ;;  %19210 = vmatprep.subr.bf16.mxu0 %v20538_v11  ;;  %v23601_v28 = vld [vmem:[#allocation3 + $0x58] sm:$0x3f] }
 0x2b9   :  { %19281 = vmatpush3.bf16.msra.mxu1 %v19280_v31  ;;  %v14164_v15 = vld [vmem:[%s25084_s4 + $0x1d0] sm:$0xff]  ;;  %v7633_v27 = vrot.slane %v23601_v28, 1  ;;  %v7715_v41 = vrot.slane %v23601_v28, 2 }
 0x2ba   :  { %v4812_v7 = vadd.f32 %v22874_v56, %v4811_v46  ;;  %19282 = vmatprep.subr.bf16.mxu1 %v20538_v11  ;;  %v14144_v56 = vld [vmem:[%s25084_s4 + $0x140] sm:$0xff]  ;;  %v19313_v46 = vpack.c.bf16 %v14163_v20, %v14162_v50  ;;  %v14213_v20 = vld [vmem:[%s25087_s7 + $0x128] sm:$0xff] }
 0x2bb   :  { %19212 = vmatpush3.bf16.msra.mxu0 %v23050_v58  ;;  %v6888_v58 = vrot.slane %v23413_v3, 1  ;;  %v19289_v6 = vpack.c.bf16 %v14145_v36, %v14144_v56  ;;  %v7805_v3 = vld [vmem:[%s25087_s7 + $0x8] sm:$0xff]  ;;  %v23635_v36 = vpack.c.bf16 %v7809_v43, %v7808_v38  ;;  %v14212_v50 = vld [vmem:[%s25087_s7 + $0x120] sm:$0xff]  ;;  %v14214_v43 = vld [vmem:[%s25087_s7 + $0x130] sm:$0xff] }
 0x2bc   :  { %v4813_v40 = vmax.f32 %v4812_v7, 0.0  ;;  %19213 = vmatprep.subr.bf16.mxu0 %v20538_v11  ;;  %v23592_v31 = vpack.c.bf16 %v7805_v3, %v7804_v24  ;;  %v23612_v7 = vpack.c.bf16 %v7807_v61, %v7806_v1  ;;  %v14167_v56 = vld [vmem:[%s25084_s4 + $0x1e8] sm:$0xff]  ;;  %v14210_v24 = vld [vmem:[%s25087_s7 + $0x110] sm:$0xff]  ;;  %v14211_v3 = vld [vmem:[%s25087_s7 + $0x118] sm:$0xff] }
 0x2bd   :  { %19284 = vmatpush3.bf16.msra.mxu1 %v19283_v4  ;;  %v14165_v4 = vld [vmem:[%s25084_s4 + $0x1d8] sm:$0xff]  ;;  %v23809_v61 = vld [vmem:[%s25085_s5] ss:$0 sm:$0xff] }
 0x2be   :  { %4815 = vst.msk [vmem:[#allocation4 + $0x21] sm:$0xf] %vm2581_vm9, %v4813_v40  ;;  %19285 = vmatprep.subr.bf16.mxu1 %v20538_v11  ;;  %v19316_v40 = vpack.c.bf16 %v14165_v4, %v14164_v15  ;;  %v23814_v15 = vpack.c.bf16 %v14213_v20, %v14212_v50  ;;  %v23819_v4 = vld [vmem:[%s25086_s6] ss:$0 sm:$0xff] }
 0x2bf   :  { %19215 = vmatpush3.bf16.msra.mxu0 %v23064_v51  ;;  %v14147_v51 = vld [vmem:[%s25084_s4 + $0x158] sm:$0xff]  ;;  %v14239_v20 = vld [vmem:[%s25087_s7 + $0x1e0] sm:$0xff] }
 0x2c0   :  { %19216 = vmatprep.subr.bf16.mxu0 %v20538_v11  ;;  %v19292_v57 = vpack.c.bf16 %v14147_v51, %v14146_v32  ;;  %v14168_v32 = vld [vmem:[%s25084_s4 + $0x1f0] sm:$0xff]  ;;  %v14169_v51 = vld [vmem:[%s25084_s4 + $0x1f8] sm:$0xff] }
 0x2c1   :  { %19287 = vmatpush3.bf16.msra.mxu1 %v19286_v16  ;;  %v14166_v16 = vld [vmem:[%s25084_s4 + $0x1e0] sm:$0xff] }
 0x2c2   :  { %16874 = vmatmul.mubr.msk.f32.vlgmr.msra.gmra.mrb[6].mxu0 %vm42_vm2, %v6888_v58  ;;  %19288 = vmatprep.subr.bf16.mxu1 %v20538_v11  ;;  %v7810_v58 = vld [vmem:[%s25087_s7 + $0x30] sm:$0xff] }
 0x2c3   :  { %19218 = vmatpush3.bf16.msra.mxu0 %v23189_v10  ;;  %16892 = vmatprep.mubr.msk.f32.mxu0 %vm20540_vm1, %v20539_v14 }
 0x2c4   :  { %16988 = vmatmul.mubr.msk.f32.vlgmr.msra.gmra.mrb[6].mxu1 %vm42_vm2, %v7385_v39  ;;  %19219 = vmatprep.subr.bf16.mxu0 %v20538_v11  ;;  %v19319_v39 = vpack.c.bf16 %v14167_v56, %v14166_v16 }
 0x2c5   :  { %19290 = vmatpush3.bf16.msra.mxu1 %v19289_v6  ;;  %17006 = vmatprep.mubr.msk.f32.mxu1 %vm20540_vm1, %v20539_v14  ;;  %v7811_v6 = vld [vmem:[%s25087_s7 + $0x38] sm:$0xff] }
 0x2c6   :  { %19291 = vmatprep.subr.bf16.mxu1 %v20538_v11 }
 0x2c7   :  { %19221 = vmatpush3.bf16.msra.mxu0 %v23215_v23 }
 0x2c8   :  { %19222 = vmatprep.subr.bf16.mxu0 %v20538_v11 }
 0x2c9   :  { %19293 = vmatpush3.bf16.msra.mxu1 %v19292_v57  ;;  %v23652_v57 = vpack.c.bf16 %v7811_v6, %v7810_v58  ;;  %v14217_v58 = vld [vmem:[%s25087_s7 + $0x140] sm:$0xff]  ;;  %v14218_v6 = vld [vmem:[%s25087_s7 + $0x148] sm:$0xff] }
 0x2ca   :  { %19294 = vmatprep.subr.bf16.mxu1 %v20538_v11 }
 0x2cb   :  { %19224 = vmatpush3.bf16.msra.mxu0 %v23237_v0 }
 0x2cc   :  { %19225 = vmatprep.subr.bf16.mxu0 %v20538_v11 }
 0x2cd   :  { %19296 = vmatpush3.bf16.msra.mxu1 %v19295_v21  ;;  %v19322_v21 = vpack.c.bf16 %v14169_v51, %v14168_v32  ;;  %v14219_v32 = vld [vmem:[%s25087_s7 + $0x150] sm:$0xff]  ;;  %v14220_v51 = vld [vmem:[%s25087_s7 + $0x158] sm:$0xff] }
 0x2ce   :  { %19297 = vmatprep.subr.bf16.mxu1 %v20538_v11  ;;  %v23858_v62 = vpack.c.bf16 %v14220_v51, %v14219_v32  ;;  %v14244_v51 = vld [vmem:[%s25087_s7 + $0x200] sm:$0xff] }
 0x2cf   :  { %19227 = vmatpush3.bf16.msra.mxu0 %v23257_v22 }
 0x2d0   :  { %19336 = vmatprep.subr.bf16.mxu0 %v20538_v11 }
 0x2d1   :  { %19299 = vmatpush3.bf16.msra.mxu1 %v19298_v5  ;;  %v23677_v5 = vpack.c.bf16 %v14193_v2, %v14192_v30  ;;  %v14223_v30 = vld [vmem:[%s25087_s7 + $0x170] sm:$0xff]  ;;  %v14224_v2 = vld [vmem:[%s25087_s7 + $0x178] sm:$0xff] }
 0x2d2   :  { %16893 = vmatmul.mubr.msk.f32.vlgmr.msra.gmra.mrb[6].mxu0 %vm42_vm2, %v6970_v8  ;;  %19300 = vmatprep.subr.bf16.mxu1 %v20538_v11  ;;  %v23694_v8 = vpack.c.bf16 %v14195_v59, %v14194_v44  ;;  %v23888_v44 = vpack.c.bf16 %v14224_v2, %v14223_v30  ;;  %v14226_v59 = vld [vmem:[%s25087_s7 + $0x180] sm:$0xff]  ;;  %v14246_v2 = vld [vmem:[%s25087_s7 + $0x210] sm:$0xff] }
 0x2d3   :  { %19338 = vmatpush3.bf16.msra.mxu0 %v23513_v12  ;;  %17082 = vmatprep.mubr.msk.f32.mxu0 %vm20540_vm1, %v20539_v14 }
 0x2d4   :  { %17007 = vmatmul.mubr.msk.f32.vlgmr.msra.gmra.mrb[6].mxu1 %vm42_vm2, %v7467_v49  ;;  %19339 = vmatprep.subr.bf16.mxu0 %v20538_v11  ;;  %v14200_v49 = vld [vmem:[%s25087_s7 + $0xc8] sm:$0xff] }
 0x2d5   :  { %19302 = vmatpush3.bf16.msra.mxu1 %v19301_v45  ;;  %17025 = vmatprep.mubr.msk.f32.mxu1 %vm20540_vm1, %v20539_v14  ;;  %v14199_v45 = vld [vmem:[%s25087_s7 + $0xc0] sm:$0xff] }
 0x2d6   :  { %19303 = vmatprep.subr.bf16.mxu1 %v20538_v11  ;;  %v23719_v26 = vpack.c.bf16 %v14200_v49, %v14199_v45  ;;  %v8226_v45 = vrot.slane %v23774_v63, 2  ;;  %v14228_v49 = vld [vmem:[%s25087_s7 + $0x190] sm:$0xff] }
 0x2d7   :  { %19341 = vmatpush3.bf16.msra.mxu0 %v23533_v19 }
 0x2d8   :  { %19342 = vmatprep.subr.bf16.mxu0 %v20538_v11 }
 0x2d9   :  { %19305 = vmatpush3.bf16.msra.mxu1 %v19304_v29  ;;  %v14203_v29 = vld [vmem:[%s25087_s7 + $0xe0] sm:$0xff] }
 0x2da   :  { %19306 = vmatprep.subr.bf16.mxu1 %v20538_v11 }
 0x2db   :  { %19344 = vmatpush3.bf16.msra.mxu0 %v23555_v52 }
 0x2dc   :  { %19345 = vmatprep.subr.bf16.mxu0 %v20538_v11 }
 0x2dd   :  { %19308 = vmatpush3.bf16.msra.mxu1 %v19307_v18  ;;  %v14208_v18 = vld [vmem:[%s25087_s7 + $0x100] sm:$0xff] }
 0x2de   :  { %19309 = vmatprep.subr.bf16.mxu1 %v20538_v11 }
 0x2df   :  { %19347 = vmatpush3.bf16.msra.mxu0 %v23572_v54 }
 0x2e0   :  { %19348 = vmatprep.subr.bf16.mxu0 %v20538_v11 }
 0x2e1   :  { %19311 = vmatpush3.bf16.msra.mxu1 %v19310_v13  ;;  %v8143_v13 = vrot.slane %v23774_v63, 1 }
 0x2e2   :  { %17083 = vmatmul.mubr.msk.f32.vlgmr.msra.gmra.mrb[8].mxu0 %vm42_vm2, %v7822_v34  ;;  %19312 = vmatprep.subr.bf16.mxu1 %v20538_v11  ;;  %v23791_v34 = vpack.c.bf16 %v14211_v3, %v14210_v24  ;;  %v14237_v24 = vld [vmem:[%s25087_s7 + $0x1d0] sm:$0xff]  ;;  %v14238_v3 = vld [vmem:[%s25087_s7 + $0x1d8] sm:$0xff] }
 0x2e3   :  { %19350 = vmatpush3.bf16.msra.mxu0 %v23592_v31  ;;  %17101 = vmatprep.mubr.msk.f32.mxu0 %vm20540_vm1, %v20539_v14  ;;  %v23971_v50 = vpack.c.bf16 %v14238_v3, %v14237_v24 }
 0x2e4   :  { %17026 = vmatmul.mubr.msk.f32.vlgmr.msra.gmra.mrb[6].mxu1 %vm42_vm2, %v23601_v28  ;;  %19351 = vmatprep.subr.bf16.mxu0 %v20538_v11 }
 0x2e5   :  { %19314 = vmatpush3.bf16.msra.mxu1 %v19313_v46  ;;  %17044 = vmatprep.mubr.msk.f32.mxu1 %vm20540_vm1, %v20539_v14 }
 0x2e6   :  { %19315 = vmatprep.subr.bf16.mxu1 %v20538_v11 }
 0x2e7   :  { %19353 = vmatpush3.bf16.msra.mxu0 %v23612_v7 }
 0x2e8   :  { %19354 = vmatprep.subr.bf16.mxu0 %v20538_v11 }
 0x2e9   :  { %19317 = vmatpush3.bf16.msra.mxu1 %v19316_v40  ;;  %v14215_v40 = vld [vmem:[%s25087_s7 + $0x138] sm:$0xff] }
 0x2ea   :  { %19318 = vmatprep.subr.bf16.mxu1 %v20538_v11  ;;  %v23832_v56 = vpack.c.bf16 %v14215_v40, %v14214_v43  ;;  %v14241_v40 = vld [vmem:[%s25087_s7 + $0x1f0] sm:$0xff] }
 0x2eb   :  { %19356 = vmatpush3.bf16.msra.mxu0 %v23635_v36 }
 0x2ec   :  { %19357 = vmatprep.subr.bf16.mxu0 %v20538_v11 }
 0x2ed   :  { %19320 = vmatpush3.bf16.msra.mxu1 %v19319_v39  ;;  %v23845_v39 = vpack.c.bf16 %v14218_v6, %v14217_v58 }
 0x2ee   :  { %19321 = vmatprep.subr.bf16.mxu1 %v20538_v11 }
 0x2ef   :  { %19359 = vmatpush3.bf16.msra.mxu0 %v23652_v57 }
 0x2f0   :  { %19360 = vmatprep.subr.bf16.mxu0 %v20538_v11 }
 0x2f1   :  { %19323 = vmatpush3.bf16.msra.mxu1 %v19322_v21  ;;  %v14222_v21 = vld [vmem:[%s25087_s7 + $0x168] sm:$0xff] }
 0x2f2   :  { %17102 = vmatmul.mubr.msk.f32.vlgmr.msra.gmra.mrb[8].mxu0 %vm42_vm2, %v23574_v9  ;;  %19324 = vmatprep.subr.bf16.mxu1 %v20538_v11 }
 0x2f3   :  { %19362 = vmatpush3.bf16.msra.mxu0 %v23663_v35  ;;  %17120 = vmatprep.mubr.msk.f32.mxu0 %vm20540_vm1, %v20539_v14 }
 0x2f4   :  { %17045 = vmatmul.mubr.msk.f32.vlgmr.msra.gmra.mrb[6].mxu1 %vm42_vm2, %v7633_v27  ;;  %19363 = vmatprep.subr.bf16.mxu0 %v20538_v11  ;;  %v23876_v27 = vpack.c.bf16 %v14222_v21, %v14221_v25  ;;  %v14245_v25 = vld [vmem:[%s25087_s7 + $0x208] sm:$0xff] }
 0x2f5   :  { %19326 = vmatpush3.bf16.msra.mxu1 %v23189_v10  ;;  %17063 = vmatprep.mubr.msk.f32.mxu1 %vm20540_vm1, %v20539_v14  ;;  %v23706_v10 = vpack.c.bf16 %v14197_v33, %v14196_v53  ;;  %v14227_v53 = vld [vmem:[%s25087_s7 + $0x188] sm:$0xff]  ;;  %v24016_v21 = vpack.c.bf16 %v14245_v25, %v14244_v51 }
 0x2f6   :  { %19327 = vmatprep.subr.bf16.mxu1 %v20538_v11  ;;  %v23900_v33 = vpack.c.bf16 %v14227_v53, %v14226_v59  ;;  %v14247_v59 = vld [vmem:[%s25087_s7 + $0x218] sm:$0xff] }
 0x2f7   :  { %19365 = vmatpush3.bf16.msra.mxu0 %v23677_v5  ;;  %v24030_v53 = vpack.c.bf16 %v14247_v59, %v14246_v2  ;;  %v10638_v2 = vld [vmem:[%s25087_s7 + $0x20] sm:$0xff]  ;;  %v10639_v59 = vld [vmem:[%s25087_s7 + $0x28] sm:$0xff] }
 0x2f8   :  { %19366 = vmatprep.subr.bf16.mxu0 %v20538_v11 }
 0x2f9   :  { %19329 = vmatpush3.bf16.msra.mxu1 %v23215_v23  ;;  %v7976_v23 = vrot.slane %v23574_v9, 2  ;;  %v23776_v9 = vpack.c.bf16 %v14209_v60, %v14208_v18  ;;  %v14235_v18 = vld [vmem:[%s25087_s7 + $0x1c0] sm:$0xff]  ;;  %v14236_v60 = vld [vmem:[%s25087_s7 + $0x1c8] sm:$0xff] }
 0x2fa   :  { %19330 = vmatprep.subr.bf16.mxu1 %v20538_v11 }
 0x2fb   :  { %19368 = vmatpush3.bf16.msra.mxu0 %v23694_v8 }
 0x2fc   :  { %19369 = vmatprep.subr.bf16.mxu0 %v20538_v11 }
 0x2fd   :  { %19332 = vmatpush3.bf16.msra.mxu1 %v23237_v0  ;;  %v14202_v0 = vld [vmem:[%s25087_s7 + $0xd8] sm:$0xff] }
 0x2fe   :  { %19333 = vmatprep.subr.bf16.mxu1 %v20538_v11  ;;  %v23733_v55 = vpack.c.bf16 %v14202_v0, %v14201_v48  ;;  %v14230_v48 = vld [vmem:[%s25087_s7 + $0x1a0] sm:$0xff]  ;;  %v14231_v0 = vld [vmem:[%s25087_s7 + $0x1a8] sm:$0xff] }
 0x2ff   :  { %19371 = vmatpush3.bf16.msra.mxu0 %v23706_v10 }
 0x300   :  { %19372 = vmatprep.subr.bf16.mxu0 %v20538_v11 }
 0x301   :  { %19335 = vmatpush3.bf16.msra.mxu1 %v23257_v22  ;;  %v14204_v22 = vld [vmem:[%s25087_s7 + $0xe8] sm:$0xff] }
 0x302   :  { %17121 = vmatmul.mubr.msk.f32.vlgmr.msra.gmra.mrb[8].mxu0 %vm42_vm2, %v7976_v23  ;;  %19444 = vmatprep.subr.bf16.mxu1 %v20538_v11  ;;  %v23750_v37 = vpack.c.bf16 %v14204_v22, %v14203_v29  ;;  %v14229_v23 = vld [vmem:[%s25087_s7 + $0x198] sm:$0xff]  ;;  %v23931_v29 = vpack.c.bf16 %v14231_v0, %v14230_v48  ;;  %v14232_v22 = vld [vmem:[%s25087_s7 + $0x1b0] sm:$0xff] }
 0x303   :  { %19374 = vmatpush3.bf16.msra.mxu0 %v23719_v26  ;;  %17139 = vmatprep.mubr.msk.f32.mxu0 %vm20540_vm1, %v20539_v14  ;;  %v23943_v42 = vpack.c.bf16 %v14233_v17, %v14232_v22  ;;  %v14250_v48 = vld [vmem:[%s25087_s7 + $0x230] sm:$0xff]  ;;  %v14251_v0 = vld [vmem:[%s25087_s7 + $0x238] sm:$0xff] }
 0x304   :  { %17064 = vmatmul.mubr.msk.f32.vlgmr.msra.gmra.mrb[6].mxu1 %vm42_vm2, %v7715_v41  ;;  %19375 = vmatprep.subr.bf16.mxu0 %v20538_v11  ;;  %v23914_v41 = vpack.c.bf16 %v14229_v23, %v14228_v49  ;;  %v14249_v49 = vld [vmem:[%s25087_s7 + $0x228] sm:$0xff]  ;;  %v24059_v22 = vpack.c.bf16 %v14251_v0, %v14250_v48  ;;  %v10641_v48 = vld [vmem:[%s25087_s7 + $0x38] sm:$0xff] }
 0x305   :  { %19446 = vmatpush3.bf16.msra.mxu1 %v23513_v12  ;;  %17253 = vmatprep.mubr.msk.f32.mxu1 %vm20540_vm1, %v20539_v14 }
 0x306   :  { %19447 = vmatprep.subr.bf16.mxu1 %v20538_v11 }
 0x307   :  { %19377 = vmatpush3.bf16.msra.mxu0 %v23733_v55 }
 0x308   :  { %19378 = vmatprep.subr.bf16.mxu0 %v20538_v11 }
 0x309   :  { %19449 = vmatpush3.bf16.msra.mxu1 %v23533_v19 }
 0x30a   :  { %19450 = vmatprep.subr.bf16.mxu1 %v20538_v11 }
 0x30b   :  { %19380 = vmatpush3.bf16.msra.mxu0 %v23750_v37 }
 0x30c   :  { %19381 = vmatprep.subr.bf16.mxu0 %v20538_v11 }
 0x30d   :  { %19452 = vmatpush3.bf16.msra.mxu1 %v23555_v52 }
 0x30e   :  { %19453 = vmatprep.subr.bf16.mxu1 %v20538_v11 }
 0x30f   :  { %19383 = vmatpush3.bf16.msra.mxu0 %v23762_v47 }
 0x310   :  { %19384 = vmatprep.subr.bf16.mxu0 %v20538_v11 }
 0x311   :  { %19455 = vmatpush3.bf16.msra.mxu1 %v23572_v54 }
 0x312   :  { %17140 = vmatmul.mubr.msk.f32.vlgmr.msra.gmra.mrb[8].mxu0 %vm42_vm2, %v23774_v63  ;;  %19456 = vmatprep.subr.bf16.mxu1 %v20538_v11 }
 0x313   :  { %19386 = vmatpush3.bf16.msra.mxu0 %v23776_v9  ;;  %17158 = vmatprep.mubr.msk.f32.mxu0 %vm20540_vm1, %v20539_v14 }
 0x314   :  { %17254 = vmatmul.mubr.msk.f32.vlgmr.msra.gmra.mrb[8].mxu1 %vm42_vm2, %v8143_v13  ;;  %19387 = vmatprep.subr.bf16.mxu0 %v20538_v11 }
 0x315   :  { %v5551_v1 = vpop.f32.mrb[4].mxu0  ;;  %19458 = vmatpush3.bf16.msra.mxu1 %v23592_v31  ;;  %17272 = vmatprep.mubr.msk.f32.mxu1 %vm20540_vm1, %v20539_v14 }
 0x316   :  { %v5556_v28 = vmul.f32 %v23809_v61, %v5551_v1  ;;  %v16552_v46 = vpop.f32.mrb[5].mxu0  ;;  %19459 = vmatprep.subr.bf16.mxu1 %v20538_v11  ;;  %v14240_v1 = vld [vmem:[%s25087_s7 + $0x1e8] sm:$0xff] }
 0x317   :  { %19389 = vmatpush3.bf16.msra.mxu0 %v23791_v34  ;;  %v23989_v46 = vpack.c.bf16 %v14240_v1, %v14239_v20  ;;  %v14290_v20 = vld [vmem:[%s25087_s7 + $0x78] sm:$0xff] }
 0x318   :  { %v5557_v38 = vadd.f32 %v23819_v4, %v5556_v28  ;;  %19390 = vmatprep.subr.bf16.mxu0 %v20538_v11 }
 0x319   :  { %19461 = vmatpush3.bf16.msra.mxu1 %v23612_v7 }
 0x31a   :  { %v5558_v16 = vmax.f32 %v5557_v38, 0.0  ;;  %19462 = vmatprep.subr.bf16.mxu1 %v20538_v11 }
 0x31b   :  { %19392 = vmatpush3.bf16.msra.mxu0 %v23814_v15 }
 0x31c   :  { %5560 = vst.msk [vmem:[#allocation4 + $0x39] sm:$0xf] %vm2581_vm9, %v5558_v16  ;;  %19393 = vmatprep.subr.bf16.mxu0 %v20538_v11  ;;  %v14242_v16 = vld [vmem:[%s25087_s7 + $0x1f8] sm:$0xff] }
 0x31d   :  { %19464 = vmatpush3.bf16.msra.mxu1 %v23635_v36  ;;  %v24003_v6 = vpack.c.bf16 %v14242_v16, %v14241_v40 }
 0x31e   :  { %19465 = vmatprep.subr.bf16.mxu1 %v20538_v11 }
 0x31f   :  { %19395 = vmatpush3.bf16.msra.mxu0 %v23832_v56 }
 0x320   :  { %19396 = vmatprep.subr.bf16.mxu0 %v20538_v11 }
 0x321   :  { %19467 = vmatpush3.bf16.msra.mxu1 %v23652_v57 }
 0x322   :  { %17159 = vmatmul.mubr.msk.f32.vlgmr.msra.gmra.mrb[8].mxu0 %vm42_vm2, %v8143_v13  ;;  %19468 = vmatprep.subr.bf16.mxu1 %v20538_v11  ;;  %v23965_v13 = vld [vmem:[#allocation4 + $0x10] sm:$0x3f] }
 0x323   :  { %19398 = vmatpush3.bf16.msra.mxu0 %v23845_v39  ;;  %17177 = vmatprep.mubr.msk.f32.mxu0 %vm20540_vm1, %v20539_v14  ;;  %v8393_v30 = vrot.slane %v23965_v13, 1  ;;  %v24066_v17 = vrot.slane %v23965_v13, 2 }
 0x324   :  { %17273 = vmatmul.mubr.msk.f32.vlgmr.msra.gmra.mrb[8].mxu1 %vm42_vm2, %v23774_v63  ;;  %19399 = vmatprep.subr.bf16.mxu0 %v20538_v11  ;;  %v23955_v63 = vpack.c.bf16 %v14236_v60, %v14235_v18  ;;  %v24097_v18 = vld [vmem:[#allocation4 + $0x18] sm:$0x3f] }
 0x325   :  { %19470 = vmatpush3.bf16.msra.mxu1 %v23663_v35  ;;  %17291 = vmatprep.mubr.msk.f32.mxu1 %vm20540_vm1, %v20539_v14  ;;  %v24122_v60 = vrot.slane %v24097_v18, 1  ;;  %v24149_v24 = vrot.slane %v24097_v18, 2 }
 0x326   :  { %19471 = vmatprep.subr.bf16.mxu1 %v20538_v11 }
 0x327   :  { %19401 = vmatpush3.bf16.msra.mxu0 %v23858_v62 }
 0x328   :  { %19402 = vmatprep.subr.bf16.mxu0 %v20538_v11 }
 0x329   :  { %19473 = vmatpush3.bf16.msra.mxu1 %v23677_v5 }
 0x32a   :  { %19474 = vmatprep.subr.bf16.mxu1 %v20538_v11 }
 0x32b   :  { %19404 = vmatpush3.bf16.msra.mxu0 %v23876_v27 }
 0x32c   :  { %19405 = vmatprep.subr.bf16.mxu0 %v20538_v11 }
 0x32d   :  { %19476 = vmatpush3.bf16.msra.mxu1 %v23694_v8 }
 0x32e   :  { %19477 = vmatprep.subr.bf16.mxu1 %v20538_v11 }
 0x32f   :  { %19407 = vmatpush3.bf16.msra.mxu0 %v23888_v44 }
 0x330   :  { %19408 = vmatprep.subr.bf16.mxu0 %v20538_v11 }
 0x331   :  { %19479 = vmatpush3.bf16.msra.mxu1 %v23706_v10 }
 0x332   :  { %17178 = vmatmul.mubr.msk.f32.vlgmr.msra.gmra.mrb[8].mxu0 %vm42_vm2, %v8226_v45  ;;  %19480 = vmatprep.subr.bf16.mxu1 %v20538_v11 }
 0x333   :  { %19410 = vmatpush3.bf16.msra.mxu0 %v23900_v33  ;;  %17196 = vmatprep.mubr.msk.f32.mxu0 %vm20540_vm1, %v20539_v14 }
 0x334   :  { %17292 = vmatmul.mubr.msk.f32.vlgmr.msra.gmra.mrb[8].mxu1 %vm42_vm2, %v8226_v45  ;;  %19411 = vmatprep.subr.bf16.mxu0 %v20538_v11  ;;  %v14248_v45 = vld [vmem:[%s25087_s7 + $0x220] sm:$0xff] }
 0x335   :  { %19482 = vmatpush3.bf16.msra.mxu1 %v23719_v26  ;;  %17310 = vmatprep.mubr.msk.f32.mxu1 %vm20540_vm1, %v20539_v14  ;;  %v24047_v23 = vpack.c.bf16 %v14249_v49, %v14248_v45  ;;  %v24403_v45 = vpack.c.bf16 %v10639_v59, %v10638_v2  ;;  %v10640_v49 = vld [vmem:[%s25087_s7 + $0x30] sm:$0xff]  ;;  %v14314_v2 = vld [vmem:[%s25087_s7 + $0x118] sm:$0xff] }
 0x336   :  { %19483 = vmatprep.subr.bf16.mxu1 %v20538_v11  ;;  %v24413_v0 = vpack.c.bf16 %v10641_v48, %v10640_v49  ;;  %v24530_v59 = vld [vmem:[#allocation4 + $0x38] sm:$0x3f] }
 0x337   :  { %19413 = vmatpush3.bf16.msra.mxu0 %v23914_v41 }
 0x338   :  { %19414 = vmatprep.subr.bf16.mxu0 %v20538_v11 }
 0x339   :  { %19485 = vmatpush3.bf16.msra.mxu1 %v23733_v55 }
 0x33a   :  { %19486 = vmatprep.subr.bf16.mxu1 %v20538_v11 }
 0x33b   :  { %19416 = vmatpush3.bf16.msra.mxu0 %v23931_v29 }
 0x33c   :  { %19417 = vmatprep.subr.bf16.mxu0 %v20538_v11 }
 0x33d   :  { %19488 = vmatpush3.bf16.msra.mxu1 %v23750_v37 }
 0x33e   :  { %19489 = vmatprep.subr.bf16.mxu1 %v20538_v11 }
 0x33f   :  { %19419 = vmatpush3.bf16.msra.mxu0 %v23943_v42 }
 0x340   :  { %19420 = vmatprep.subr.bf16.mxu0 %v20538_v11 }
 0x341   :  { %19491 = vmatpush3.bf16.msra.mxu1 %v23762_v47 }
 0x342   :  { %17197 = vmatmul.mubr.msk.f32.vlgmr.msra.gmra.mrb[8].mxu0 %vm42_vm2, %v23965_v13  ;;  %19492 = vmatprep.subr.bf16.mxu1 %v20538_v11 }
 0x343   :  { %19422 = vmatpush3.bf16.msra.mxu0 %v23955_v63  ;;  %17215 = vmatprep.mubr.msk.f32.mxu0 %vm20540_vm1, %v20539_v14 }
 0x344   :  { %17311 = vmatmul.mubr.msk.f32.vlgmr.msra.gmra.mrb[8].mxu1 %vm42_vm2, %v23965_v13  ;;  %19423 = vmatprep.subr.bf16.mxu0 %v20538_v11 }
 0x345   :  { %19494 = vmatpush3.bf16.msra.mxu1 %v23776_v9  ;;  %17329 = vmatprep.mubr.msk.f32.mxu1 %vm20540_vm1, %v20539_v14 }
 0x346   :  { %19495 = vmatprep.subr.bf16.mxu1 %v20538_v11 }
 0x347   :  { %v6295_v28 = vpop.f32.mrb[4].mxu1  ;;  %19425 = vmatpush3.bf16.msra.mxu0 %v23971_v50 }
 0x348   :  { %v6300_v38 = vmul.f32 %v23809_v61, %v6295_v28  ;;  %v16723_v43 = vpop.f32.mrb[5].mxu1  ;;  %19426 = vmatprep.subr.bf16.mxu0 %v20538_v11  ;;  %v10633_v28 = vld [vmem:[#allocation4 + $0x30] sm:$0x3f] }
 0x349   :  { %19497 = vmatpush3.bf16.msra.mxu1 %v23791_v34  ;;  %v10635_v43 = vld [vmem:[%s25087_s7 + $0x8] sm:$0xff]  ;;  %v10651_v40 = vrot.slane %v10633_v28, 1 }
 0x34a   :  { %v6301_v58 = vadd.f32 %v23819_v4, %v6300_v38  ;;  %19498 = vmatprep.subr.bf16.mxu1 %v20538_v11  ;;  %v10634_v38 = vld [vmem:[%s25087_s7] sm:$0xff] }
 0x34b   :  { %19428 = vmatpush3.bf16.msra.mxu0 %v23989_v46  ;;  %v24380_v16 = vpack.c.bf16 %v10635_v43, %v10634_v38 }
 0x34c   :  { %v6302_v32 = vmax.f32 %v6301_v58, 0.0  ;;  %19429 = vmatprep.subr.bf16.mxu0 %v20538_v11  ;;  %v10636_v58 = vld [vmem:[%s25087_s7 + $0x10] sm:$0xff] }
 0x34d   :  { %19500 = vmatpush3.bf16.msra.mxu1 %v23814_v15 }
 0x34e   :  { %6304 = vst.msk [vmem:[#allocation4 + $0x41] sm:$0xf] %vm2581_vm9, %v6302_v32  ;;  %19501 = vmatprep.subr.bf16.mxu1 %v20538_v11  ;;  %v10637_v32 = vld [vmem:[%s25087_s7 + $0x18] sm:$0xff] }
 0x34f   :  { %19431 = vmatpush3.bf16.msra.mxu0 %v24003_v6  ;;  %v24391_v25 = vpack.c.bf16 %v10637_v32, %v10636_v58  ;;  %v14312_v58 = vld [vmem:[%s25087_s7 + $0x108] sm:$0xff] }
 0x350   :  { %19432 = vmatprep.subr.bf16.mxu0 %v20538_v11 }
 0x351   :  { %19503 = vmatpush3.bf16.msra.mxu1 %v23832_v56 }
 0x352   :  { %17216 = vmatmul.mubr.msk.f32.vlgmr.msra.gmra.mrb[8].mxu0 %vm42_vm2, %v8393_v30  ;;  %19504 = vmatprep.subr.bf16.mxu1 %v20538_v11 }
 0x353   :  { %19434 = vmatpush3.bf16.msra.mxu0 %v24016_v21  ;;  %17234 = vmatprep.mubr.msk.f32.mxu0 %vm20540_vm1, %v20539_v14 }
 0x354   :  { %17330 = vmatmul.mubr.msk.f32.vlgmr.msra.gmra.mrb[8].mxu1 %vm42_vm2, %v8393_v30  ;;  %19435 = vmatprep.subr.bf16.mxu0 %v20538_v11 }
 0x355   :  { %19506 = vmatpush3.bf16.msra.mxu1 %v23845_v39  ;;  %17348 = vmatprep.mubr.msk.f32.mxu1 %vm20540_vm1, %v20539_v14 }
 0x356   :  { %19507 = vmatprep.subr.bf16.mxu1 %v20538_v11 }
 0x357   :  { %19437 = vmatpush3.bf16.msra.mxu0 %v24030_v53 }
 0x358   :  { %19438 = vmatprep.subr.bf16.mxu0 %v20538_v11 }
 0x359   :  { %19509 = vmatpush3.bf16.msra.mxu1 %v23858_v62 }
 0x35a   :  { %19510 = vmatprep.subr.bf16.mxu1 %v20538_v11 }
 0x35b   :  { %19440 = vmatpush3.bf16.msra.mxu0 %v24047_v23 }
 0x35c   :  { %19441 = vmatprep.subr.bf16.mxu0 %v20538_v11 }
 0x35d   :  { %19512 = vmatpush3.bf16.msra.mxu1 %v23876_v27 }
 0x35e   :  { %19513 = vmatprep.subr.bf16.mxu1 %v20538_v11 }
 0x35f   :  { %19443 = vmatpush3.bf16.msra.mxu0 %v24059_v22 }
 0x360   :  { %19552 = vmatprep.subr.bf16.mxu0 %v20538_v11 }
 0x361   :  { %19515 = vmatpush3.bf16.msra.mxu1 %v23888_v44 }
 0x362   :  { %17235 = vmatmul.mubr.msk.f32.vlgmr.msra.gmra.mrb[8].mxu0 %vm42_vm2, %v24066_v17  ;;  %19516 = vmatprep.subr.bf16.mxu1 %v20538_v11 }
 0x363   :  { %19554 = vmatpush3.bf16.msra.mxu0 %v23513_v12  ;;  %17424 = vmatprep.mubr.msk.f32.mxu0 %vm20540_vm1, %v20539_v14 }
 0x364   :  { %17349 = vmatmul.mubr.msk.f32.vlgmr.msra.gmra.mrb[8].mxu1 %vm42_vm2, %v24066_v17  ;;  %19555 = vmatprep.subr.bf16.mxu0 %v20538_v11 }
 0x365   :  { %19518 = vmatpush3.bf16.msra.mxu1 %v23900_v33  ;;  %17367 = vmatprep.mubr.msk.f32.mxu1 %vm20540_vm1, %v20539_v14 }
 0x366   :  { %19519 = vmatprep.subr.bf16.mxu1 %v20538_v11 }
 0x367   :  { %19557 = vmatpush3.bf16.msra.mxu0 %v23533_v19 }
 0x368   :  { %19558 = vmatprep.subr.bf16.mxu0 %v20538_v11 }
 0x369   :  { %19521 = vmatpush3.bf16.msra.mxu1 %v23914_v41 }
 0x36a   :  { %19522 = vmatprep.subr.bf16.mxu1 %v20538_v11 }
 0x36b   :  { %19560 = vmatpush3.bf16.msra.mxu0 %v23555_v52 }
 0x36c   :  { %19561 = vmatprep.subr.bf16.mxu0 %v20538_v11 }
 0x36d   :  { %19524 = vmatpush3.bf16.msra.mxu1 %v23931_v29 }
 0x36e   :  { %19525 = vmatprep.subr.bf16.mxu1 %v20538_v11 }
 0x36f   :  { %19563 = vmatpush3.bf16.msra.mxu0 %v23572_v54 }
 0x370   :  { %19564 = vmatprep.subr.bf16.mxu0 %v20538_v11 }
 0x371   :  { %19527 = vmatpush3.bf16.msra.mxu1 %v23943_v42 }
 0x372   :  { %17425 = vmatmul.mubr.msk.f32.vlgmr.msra.gmra.mrb[10].mxu0 %vm42_vm2, %v8393_v30  ;;  %19528 = vmatprep.subr.bf16.mxu1 %v20538_v11 }
 0x373   :  { %19566 = vmatpush3.bf16.msra.mxu0 %v23592_v31  ;;  %17443 = vmatprep.mubr.msk.f32.mxu0 %vm20540_vm1, %v20539_v14 }
 0x374   :  { %17368 = vmatmul.mubr.msk.f32.vlgmr.msra.gmra.mrb[8].mxu1 %vm42_vm2, %v24097_v18  ;;  %19567 = vmatprep.subr.bf16.mxu0 %v20538_v11 }
 0x375   :  { %19530 = vmatpush3.bf16.msra.mxu1 %v23955_v63  ;;  %17386 = vmatprep.mubr.msk.f32.mxu1 %vm20540_vm1, %v20539_v14 }
 0x376   :  { %19531 = vmatprep.subr.bf16.mxu1 %v20538_v11 }
 0x377   :  { %19569 = vmatpush3.bf16.msra.mxu0 %v23612_v7 }
 0x378   :  { %19570 = vmatprep.subr.bf16.mxu0 %v20538_v11 }
 0x379   :  { %19533 = vmatpush3.bf16.msra.mxu1 %v23971_v50 }
 0x37a   :  { %19534 = vmatprep.subr.bf16.mxu1 %v20538_v11 }
 0x37b   :  { %19572 = vmatpush3.bf16.msra.mxu0 %v23635_v36 }
 0x37c   :  { %19573 = vmatprep.subr.bf16.mxu0 %v20538_v11 }
 0x37d   :  { %19536 = vmatpush3.bf16.msra.mxu1 %v23989_v46 }
 0x37e   :  { %19537 = vmatprep.subr.bf16.mxu1 %v20538_v11 }
 0x37f   :  { %19575 = vmatpush3.bf16.msra.mxu0 %v23652_v57 }
 0x380   :  { %19576 = vmatprep.subr.bf16.mxu0 %v20538_v11 }
 0x381   :  { %19539 = vmatpush3.bf16.msra.mxu1 %v24003_v6 }
 0x382   :  { %17444 = vmatmul.mubr.msk.f32.vlgmr.msra.gmra.mrb[10].mxu0 %vm42_vm2, %v23965_v13  ;;  %19540 = vmatprep.subr.bf16.mxu1 %v20538_v11  ;;  %v14289_v13 = vld [vmem:[%s25087_s7 + $0x70] sm:$0xff] }
 0x383   :  { %19578 = vmatpush3.bf16.msra.mxu0 %v23663_v35  ;;  %17462 = vmatprep.mubr.msk.f32.mxu0 %vm20540_vm1, %v20539_v14  ;;  %v24370_v1 = vpack.c.bf16 %v14290_v20, %v14289_v13  ;;  %v14308_v13 = vld [vmem:[%s25087_s7 + $0xf0] sm:$0xff]  ;;  %v14309_v20 = vld [vmem:[%s25087_s7 + $0xf8] sm:$0xff] }
 0x384   :  { %17387 = vmatmul.mubr.msk.f32.vlgmr.msra.gmra.mrb[8].mxu1 %vm42_vm2, %v24122_v60  ;;  %19579 = vmatprep.subr.bf16.mxu0 %v20538_v11  ;;  %v24511_v43 = vpack.c.bf16 %v14309_v20, %v14308_v13 }
 0x385   :  { %19542 = vmatpush3.bf16.msra.mxu1 %v24016_v21  ;;  %17405 = vmatprep.mubr.msk.f32.mxu1 %vm20540_vm1, %v20539_v14 }
 0x386   :  { %19543 = vmatprep.subr.bf16.mxu1 %v20538_v11 }
 0x387   :  { %19581 = vmatpush3.bf16.msra.mxu0 %v23677_v5 }
 0x388   :  { %19582 = vmatprep.subr.bf16.mxu0 %v20538_v11 }
 0x389   :  { %19545 = vmatpush3.bf16.msra.mxu1 %v24030_v53 }
 0x38a   :  { %19546 = vmatprep.subr.bf16.mxu1 %v20538_v11 }
 0x38b   :  { %19584 = vmatpush3.bf16.msra.mxu0 %v23694_v8 }
 0x38c   :  { %19585 = vmatprep.subr.bf16.mxu0 %v20538_v11 }
 0x38d   :  { %19548 = vmatpush3.bf16.msra.mxu1 %v24047_v23 }
 0x38e   :  { %19549 = vmatprep.subr.bf16.mxu1 %v20538_v11 }
 0x38f   :  { %19587 = vmatpush3.bf16.msra.mxu0 %v23706_v10 }
 0x390   :  { %19588 = vmatprep.subr.bf16.mxu0 %v20538_v11 }
 0x391   :  { %19551 = vmatpush3.bf16.msra.mxu1 %v24059_v22 }
 0x392   :  { %17463 = vmatmul.mubr.msk.f32.vlgmr.msra.gmra.mrb[10].mxu0 %vm42_vm2, %v24066_v17  ;;  %19660 = vmatprep.subr.bf16.mxu1 %v20538_v11  ;;  %v14293_v17 = vld [vmem:[%s25087_s7 + $0x80] sm:$0xff] }
 0x393   :  { %19590 = vmatpush3.bf16.msra.mxu0 %v23719_v26  ;;  %17481 = vmatprep.mubr.msk.f32.mxu0 %vm20540_vm1, %v20539_v14 }
 0x394   :  { %17406 = vmatmul.mubr.msk.f32.vlgmr.msra.gmra.mrb[8].mxu1 %vm42_vm2, %v24149_v24  ;;  %19591 = vmatprep.subr.bf16.mxu0 %v20538_v11 }
 0x395   :  { %19662 = vmatpush3.bf16.msra.mxu1 %v23513_v12  ;;  %17595 = vmatprep.mubr.msk.f32.mxu1 %vm20540_vm1, %v20539_v14 }
 0x396   :  { %19663 = vmatprep.subr.bf16.mxu1 %v20538_v11 }
 0x397   :  { %19593 = vmatpush3.bf16.msra.mxu0 %v23733_v55 }
 0x398   :  { %19594 = vmatprep.subr.bf16.mxu0 %v20538_v11 }
 0x399   :  { %19665 = vmatpush3.bf16.msra.mxu1 %v23533_v19 }
 0x39a   :  { %19666 = vmatprep.subr.bf16.mxu1 %v20538_v11 }
 0x39b   :  { %19596 = vmatpush3.bf16.msra.mxu0 %v23750_v37 }
 0x39c   :  { %19597 = vmatprep.subr.bf16.mxu0 %v20538_v11 }
 0x39d   :  { %19668 = vmatpush3.bf16.msra.mxu1 %v23555_v52 }
 0x39e   :  { %19669 = vmatprep.subr.bf16.mxu1 %v20538_v11 }
 0x39f   :  { %19599 = vmatpush3.bf16.msra.mxu0 %v23762_v47 }
 0x3a0   :  { %19600 = vmatprep.subr.bf16.mxu0 %v20538_v11 }
 0x3a1   :  { %19671 = vmatpush3.bf16.msra.mxu1 %v23572_v54 }
 0x3a2   :  { %17482 = vmatmul.mubr.msk.f32.vlgmr.msra.gmra.mrb[10].mxu0 %vm42_vm2, %v24097_v18  ;;  %19672 = vmatprep.subr.bf16.mxu1 %v20538_v11 }
 0x3a3   :  { %19602 = vmatpush3.bf16.msra.mxu0 %v23776_v9  ;;  %17500 = vmatprep.mubr.msk.f32.mxu0 %vm20540_vm1, %v20539_v14 }
 0x3a4   :  { %17596 = vmatmul.mubr.msk.f32.vlgmr.msra.gmra.mrb[10].mxu1 %vm42_vm2, %v24122_v60  ;;  %19603 = vmatprep.subr.bf16.mxu0 %v20538_v11 }
 0x3a5   :  { %v7039_v12 = vpop.f32.mrb[6].mxu0  ;;  %19674 = vmatpush3.bf16.msra.mxu1 %v23592_v31  ;;  %17614 = vmatprep.mubr.msk.f32.mxu1 %vm20540_vm1, %v20539_v14  ;;  %v9659_v31 = vld [vmem:[#allocation4 + $0x20] sm:$0x3f] }
 0x3a6   :  { %v7044_v19 = vmul.f32 %v23809_v61, %v7039_v12  ;;  %v16894_v52 = vpop.f32.mrb[7].mxu0  ;;  %19675 = vmatprep.subr.bf16.mxu1 %v20538_v11  ;;  %v14296_v12 = vld [vmem:[%s25087_s7 + $0x98] sm:$0xff] }
 0x3a7   :  { %19605 = vmatpush3.bf16.msra.mxu0 %v23791_v34  ;;  %v14297_v52 = vld [vmem:[%s25087_s7 + $0xa0] sm:$0xff] }
 0x3a8   :  { %v7045_v54 = vadd.f32 %v23819_v4, %v7044_v19  ;;  %19606 = vmatprep.subr.bf16.mxu0 %v20538_v11 }
 0x3a9   :  { %19677 = vmatpush3.bf16.msra.mxu1 %v23612_v7 }
 0x3aa   :  { %v7046_v3 = vmax.f32 %v7045_v54, 0.0  ;;  %19678 = vmatprep.subr.bf16.mxu1 %v20538_v11  ;;  %v14298_v54 = vld [vmem:[%s25087_s7 + $0xa8] sm:$0xff] }
 0x3ab   :  { %19608 = vmatpush3.bf16.msra.mxu0 %v23814_v15 }
 0x3ac   :  { %7048 = vst.msk [vmem:[#allocation4 + $0x49] sm:$0xf] %vm2581_vm9, %v7046_v3  ;;  %19609 = vmatprep.subr.bf16.mxu0 %v20538_v11  ;;  %v24446_v3 = vpack.c.bf16 %v14298_v54, %v14297_v52 }
 0x3ad   :  { %19680 = vmatpush3.bf16.msra.mxu1 %v23635_v36 }
 0x3ae   :  { %19681 = vmatprep.subr.bf16.mxu1 %v20538_v11 }
 0x3af   :  { %19611 = vmatpush3.bf16.msra.mxu0 %v23832_v56 }
 0x3b0   :  { %19612 = vmatprep.subr.bf16.mxu0 %v20538_v11 }
 0x3b1   :  { %19683 = vmatpush3.bf16.msra.mxu1 %v23652_v57 }
 0x3b2   :  { %17501 = vmatmul.mubr.msk.f32.vlgmr.msra.gmra.mrb[10].mxu0 %vm42_vm2, %v24122_v60  ;;  %19684 = vmatprep.subr.bf16.mxu1 %v20538_v11 }
 0x3b3   :  { %19614 = vmatpush3.bf16.msra.mxu0 %v23845_v39  ;;  %17519 = vmatprep.mubr.msk.f32.mxu0 %vm20540_vm1, %v20539_v14 }
 0x3b4   :  { %17615 = vmatmul.mubr.msk.f32.vlgmr.msra.gmra.mrb[10].mxu1 %vm42_vm2, %v24097_v18  ;;  %19615 = vmatprep.subr.bf16.mxu0 %v20538_v11  ;;  %v14294_v18 = vld [vmem:[%s25087_s7 + $0x88] sm:$0xff] }
 0x3b5   :  { %19686 = vmatpush3.bf16.msra.mxu1 %v23663_v35  ;;  %17633 = vmatprep.mubr.msk.f32.mxu1 %vm20540_vm1, %v20539_v14  ;;  %v24423_v60 = vpack.c.bf16 %v14294_v18, %v14293_v17  ;;  %v14315_v17 = vld [vmem:[%s25087_s7 + $0x120] sm:$0xff]  ;;  %v14316_v18 = vld [vmem:[%s25087_s7 + $0x128] sm:$0xff] }
 0x3b6   :  { %19687 = vmatprep.subr.bf16.mxu1 %v20538_v11 }
 0x3b7   :  { %19617 = vmatpush3.bf16.msra.mxu0 %v23858_v62 }
 0x3b8   :  { %19618 = vmatprep.subr.bf16.mxu0 %v20538_v11 }
 0x3b9   :  { %19689 = vmatpush3.bf16.msra.mxu1 %v23677_v5 }
 0x3ba   :  { %19690 = vmatprep.subr.bf16.mxu1 %v20538_v11 }
 0x3bb   :  { %19620 = vmatpush3.bf16.msra.mxu0 %v23876_v27 }
 0x3bc   :  { %19621 = vmatprep.subr.bf16.mxu0 %v20538_v11 }
 0x3bd   :  { %19692 = vmatpush3.bf16.msra.mxu1 %v23694_v8  ;;  %v9734_v8 = vrot.slane %v9659_v31, 1 }
 0x3be   :  { %19693 = vmatprep.subr.bf16.mxu1 %v20538_v11 }
 0x3bf   :  { %19623 = vmatpush3.bf16.msra.mxu0 %v23888_v44 }
 0x3c0   :  { %19624 = vmatprep.subr.bf16.mxu0 %v20538_v11 }
 0x3c1   :  { %19695 = vmatpush3.bf16.msra.mxu1 %v23706_v10  ;;  %v9808_v10 = vrot.slane %v9659_v31, 2 }
 0x3c2   :  { %17520 = vmatmul.mubr.msk.f32.vlgmr.msra.gmra.mrb[10].mxu0 %vm42_vm2, %v24149_v24  ;;  %19696 = vmatprep.subr.bf16.mxu1 %v20538_v11 }
 0x3c3   :  { %19626 = vmatpush3.bf16.msra.mxu0 %v23900_v33  ;;  %17538 = vmatprep.mubr.msk.f32.mxu0 %vm20540_vm1, %v20539_v14 }
 0x3c4   :  { %17634 = vmatmul.mubr.msk.f32.vlgmr.msra.gmra.mrb[10].mxu1 %vm42_vm2, %v24149_v24  ;;  %19627 = vmatprep.subr.bf16.mxu0 %v20538_v11  ;;  %v14295_v24 = vld [vmem:[%s25087_s7 + $0x90] sm:$0xff] }
 0x3c5   :  { %19698 = vmatpush3.bf16.msra.mxu1 %v23719_v26  ;;  %17652 = vmatprep.mubr.msk.f32.mxu1 %vm20540_vm1, %v20539_v14  ;;  %v10320_v26 = vld [vmem:[#allocation4 + $0x28] sm:$0x3f]  ;;  %v24434_v19 = vpack.c.bf16 %v14296_v12, %v14295_v24 }
 0x3c6   :  { %19699 = vmatprep.subr.bf16.mxu1 %v20538_v11 }
 0x3c7   :  { %19629 = vmatpush3.bf16.msra.mxu0 %v23914_v41 }
 0x3c8   :  { %19630 = vmatprep.subr.bf16.mxu0 %v20538_v11 }
 0x3c9   :  { %19701 = vmatpush3.bf16.msra.mxu1 %v23733_v55  ;;  %v10395_v55 = vrot.slane %v10320_v26, 1 }
 0x3ca   :  { %19702 = vmatprep.subr.bf16.mxu1 %v20538_v11 }
 0x3cb   :  { %19632 = vmatpush3.bf16.msra.mxu0 %v23931_v29 }
 0x3cc   :  { %19633 = vmatprep.subr.bf16.mxu0 %v20538_v11 }
 0x3cd   :  { %19704 = vmatpush3.bf16.msra.mxu1 %v23750_v37  ;;  %v14283_v37 = vld [vmem:[%s25087_s7 + $0x40] sm:$0xff] }
 0x3ce   :  { %19705 = vmatprep.subr.bf16.mxu1 %v20538_v11 }
 0x3cf   :  { %19635 = vmatpush3.bf16.msra.mxu0 %v23943_v42 }
 0x3d0   :  { %19636 = vmatprep.subr.bf16.mxu0 %v20538_v11 }
 0x3d1   :  { %19707 = vmatpush3.bf16.msra.mxu1 %v23762_v47  ;;  %v14284_v47 = vld [vmem:[%s25087_s7 + $0x48] sm:$0xff] }
 0x3d2   :  { %17539 = vmatmul.mubr.msk.f32.vlgmr.msra.gmra.mrb[10].mxu0 %vm42_vm2, %v9659_v31  ;;  %19708 = vmatprep.subr.bf16.mxu1 %v20538_v11 }
 0x3d3   :  { %19638 = vmatpush3.bf16.msra.mxu0 %v23955_v63  ;;  %17557 = vmatprep.mubr.msk.f32.mxu0 %vm20540_vm1, %v20539_v14 }
 0x3d4   :  { %17653 = vmatmul.mubr.msk.f32.vlgmr.msra.gmra.mrb[10].mxu1 %vm42_vm2, %v9659_v31  ;;  %19639 = vmatprep.subr.bf16.mxu0 %v20538_v11  ;;  %v14299_v31 = vld [vmem:[%s25087_s7 + $0xb0] sm:$0xff] }
 0x3d5   :  { %19710 = vmatpush3.bf16.msra.mxu1 %v23776_v9  ;;  %17671 = vmatprep.mubr.msk.f32.mxu1 %vm20540_vm1, %v20539_v14  ;;  %v10469_v9 = vrot.slane %v10320_v26, 2 }
 0x3d6   :  { %19711 = vmatprep.subr.bf16.mxu1 %v20538_v11 }
 0x3d7   :  { %v7784_v7 = vpop.f32.mrb[6].mxu1  ;;  %19641 = vmatpush3.bf16.msra.mxu0 %v23971_v50 }
 0x3d8   :  { %v7789_v36 = vmul.f32 %v23809_v61, %v7784_v7  ;;  %v17065_v57 = vpop.f32.mrb[7].mxu1  ;;  %19642 = vmatprep.subr.bf16.mxu0 %v20538_v11  ;;  %v14285_v61 = vld [vmem:[%s25087_s7 + $0x50] sm:$0xff]  ;;  %v14300_v7 = vld [vmem:[%s25087_s7 + $0xb8] sm:$0xff] }
 0x3d9   :  { %19713 = vmatpush3.bf16.msra.mxu1 %v23791_v34  ;;  %v24337_v34 = vpack.c.bf16 %v14284_v47, %v14283_v37  ;;  %v14302_v57 = vld [vmem:[%s25087_s7 + $0xc0] sm:$0xff] }
 0x3da   :  { %v7790_v35 = vadd.f32 %v23819_v4, %v7789_v36  ;;  %19714 = vmatprep.subr.bf16.mxu1 %v20538_v11  ;;  %v24456_v36 = vpack.c.bf16 %v14300_v7, %v14299_v31  ;;  %v24485_v47 = vld [vmem:[%s25089_s9] ss:$0 sm:$0xff]  ;;  %v24549_v31 = vpack.c.bf16 %v14316_v18, %v14315_v17 }
 0x3db   :  { %19644 = vmatpush3.bf16.msra.mxu0 %v23989_v46 }
 0x3dc   :  { %v7791_v5 = vmax.f32 %v7790_v35, 0.0  ;;  %19645 = vmatprep.subr.bf16.mxu0 %v20538_v11  ;;  %v14303_v35 = vld [vmem:[%s25087_s7 + $0xc8] sm:$0xff] }
 0x3dd   :  { %19716 = vmatpush3.bf16.msra.mxu1 %v23814_v15  ;;  %v14286_v15 = vld [vmem:[%s25087_s7 + $0x58] sm:$0xff] }
 0x3de   :  { %7793 = vst.msk [vmem:[#allocation4 + $0x51] sm:$0xf] %vm2581_vm9, %v7791_v5  ;;  %19717 = vmatprep.subr.bf16.mxu1 %v20538_v11  ;;  %v24348_v4 = vpack.c.bf16 %v14286_v15, %v14285_v61  ;;  %v10804_v5 = vrot.slane %v10633_v28, 2  ;;  %v14306_v61 = vld [vmem:[%s25087_s7 + $0xe0] sm:$0xff]  ;;  %v14307_v15 = vld [vmem:[%s25087_s7 + $0xe8] sm:$0xff] }
 0x3df   :  { %19647 = vmatpush3.bf16.msra.mxu0 %v24003_v6 }
 0x3e0   :  { %19648 = vmatprep.subr.bf16.mxu0 %v20538_v11 }
 0x3e1   :  { %19719 = vmatpush3.bf16.msra.mxu1 %v23832_v56  ;;  %v14287_v56 = vld [vmem:[%s25087_s7 + $0x60] sm:$0xff] }
 0x3e2   :  { %17558 = vmatmul.mubr.msk.f32.vlgmr.msra.gmra.mrb[10].mxu0 %vm42_vm2, %v9734_v8  ;;  %19720 = vmatprep.subr.bf16.mxu1 %v20538_v11 }
 0x3e3   :  { %19650 = vmatpush3.bf16.msra.mxu0 %v24016_v21  ;;  %17576 = vmatprep.mubr.msk.f32.mxu0 %vm20540_vm1, %v20539_v14 }
 0x3e4   :  { %17672 = vmatmul.mubr.msk.f32.vlgmr.msra.gmra.mrb[10].mxu1 %vm42_vm2, %v9734_v8  ;;  %19651 = vmatprep.subr.bf16.mxu0 %v20538_v11  ;;  %v24468_v8 = vld [vmem:[%s25088_s8] ss:$0 sm:$0xff] }
 0x3e5   :  { %19722 = vmatpush3.bf16.msra.mxu1 %v23845_v39  ;;  %17690 = vmatprep.mubr.msk.f32.mxu1 %vm20540_vm1, %v20539_v14  ;;  %v14288_v39 = vld [vmem:[%s25087_s7 + $0x68] sm:$0xff] }
 0x3e6   :  { %19723 = vmatprep.subr.bf16.mxu1 %v20538_v11 }
 0x3e7   :  { %19653 = vmatpush3.bf16.msra.mxu0 %v24030_v53 }
 0x3e8   :  { %19654 = vmatprep.subr.bf16.mxu0 %v20538_v11 }
 0x3e9   :  { %19725 = vmatpush3.bf16.msra.mxu1 %v23858_v62  ;;  %v24360_v62 = vpack.c.bf16 %v14288_v39, %v14287_v56  ;;  %v24501_v39 = vpack.c.bf16 %v14307_v15, %v14306_v61  ;;  %v14320_v15 = vld [vmem:[%s25087_s7 + $0x140] sm:$0xff] }
 0x3ea   :  { %19726 = vmatprep.subr.bf16.mxu1 %v20538_v11 }
 0x3eb   :  { %19656 = vmatpush3.bf16.msra.mxu0 %v24047_v23 }
 0x3ec   :  { %19657 = vmatprep.subr.bf16.mxu0 %v20538_v11 }
 0x3ed   :  { %19728 = vmatpush3.bf16.msra.mxu1 %v23876_v27 }
 0x3ee   :  { %19729 = vmatprep.subr.bf16.mxu1 %v20538_v11 }
 0x3ef   :  { %19659 = vmatpush3.bf16.msra.mxu0 %v24059_v22 }
 0x3f0   :  { %19768 = vmatprep.subr.bf16.mxu0 %v20538_v11 }
 0x3f1   :  { %19731 = vmatpush3.bf16.msra.mxu1 %v23888_v44 }
 0x3f2   :  { %17577 = vmatmul.mubr.msk.f32.vlgmr.msra.gmra.mrb[10].mxu0 %vm42_vm2, %v9808_v10  ;;  %19732 = vmatprep.subr.bf16.mxu1 %v20538_v11 }
 0x3f3   :  { %17766 = vmatprep.mubr.msk.f32.mxu0 %vm20540_vm1, %v20539_v14 }
 0x3f4   :  { %17691 = vmatmul.mubr.msk.f32.vlgmr.msra.gmra.mrb[10].mxu1 %vm42_vm2, %v9808_v10  ;;  %v24471_v10 = vpack.c.bf16 %v14303_v35, %v14302_v57  ;;  %v14317_v57 = vld [vmem:[%s25087_s7 + $0x130] sm:$0xff]  ;;  %v14318_v35 = vld [vmem:[%s25087_s7 + $0x138] sm:$0xff] }
 0x3f5   :  { %19734 = vmatpush3.bf16.msra.mxu1 %v23900_v33  ;;  %17709 = vmatprep.mubr.msk.f32.mxu1 %vm20540_vm1, %v20539_v14 }
 0x3f6   :  { %19735 = vmatprep.subr.bf16.mxu1 %v20538_v11 }
 0x3f9   :  { %19737 = vmatpush3.bf16.msra.mxu1 %v23914_v41 }
 0x3fa   :  { %19738 = vmatprep.subr.bf16.mxu1 %v20538_v11 }
 0x3fd   :  { %19740 = vmatpush3.bf16.msra.mxu1 %v23931_v29 }
 0x3fe   :  { %19741 = vmatprep.subr.bf16.mxu1 %v20538_v11 }
 0x401   :  { %19743 = vmatpush3.bf16.msra.mxu1 %v23943_v42 }
 0x402   :  { %19744 = vmatprep.subr.bf16.mxu1 %v20538_v11 }
 0x404   :  { %17710 = vmatmul.mubr.msk.f32.vlgmr.msra.gmra.mrb[10].mxu1 %vm42_vm2, %v10320_v26  ;;  %v14304_v26 = vld [vmem:[%s25087_s7 + $0xd0] sm:$0xff] }
 0x405   :  { %19746 = vmatpush3.bf16.msra.mxu1 %v23955_v63  ;;  %17728 = vmatprep.mubr.msk.f32.mxu1 %vm20540_vm1, %v20539_v14 }
 0x406   :  { %19747 = vmatprep.subr.bf16.mxu1 %v20538_v11 }
 0x409   :  { %19749 = vmatpush3.bf16.msra.mxu1 %v23971_v50 }
 0x40a   :  { %19750 = vmatprep.subr.bf16.mxu1 %v20538_v11 }
 0x40d   :  { %19752 = vmatpush3.bf16.msra.mxu1 %v23989_v46 }
 0x40e   :  { %19753 = vmatprep.subr.bf16.mxu1 %v20538_v11 }
 0x411   :  { %19755 = vmatpush3.bf16.msra.mxu1 %v24003_v6 }
 0x412   :  { %19756 = vmatprep.subr.bf16.mxu1 %v20538_v11 }
 0x414   :  { %17729 = vmatmul.mubr.msk.f32.vlgmr.msra.gmra.mrb[10].mxu1 %vm42_vm2, %v10395_v55  ;;  %v14305_v55 = vld [vmem:[%s25087_s7 + $0xd8] sm:$0xff] }
 0x415   :  { %19758 = vmatpush3.bf16.msra.mxu1 %v24016_v21  ;;  %17747 = vmatprep.mubr.msk.f32.mxu1 %vm20540_vm1, %v20539_v14 }
 0x416   :  { %19759 = vmatprep.subr.bf16.mxu1 %v20538_v11 }
 0x419   :  { %19761 = vmatpush3.bf16.msra.mxu1 %v24030_v53 }
 0x41a   :  { %19762 = vmatprep.subr.bf16.mxu1 %v20538_v11 }
 0x41d   :  { %19764 = vmatpush3.bf16.msra.mxu1 %v24047_v23 }
 0x41e   :  { %19765 = vmatprep.subr.bf16.mxu1 %v20538_v11 }
 0x421   :  { %19767 = vmatpush3.bf16.msra.mxu1 %v24059_v22 }
 0x422   :  { %19780 = vmatprep.subr.bf16.mxu1 %v20538_v11 }
 0x424   :  { %17748 = vmatmul.mubr.msk.f32.vlgmr.msra.gmra.mrb[10].mxu1 %vm42_vm2, %v10469_v9  ;;  %v24488_v9 = vpack.c.bf16 %v14305_v55, %v14304_v26  ;;  %v9222_v26 = vld [vmem:[#allocation3 + $0x11] sm:$0xf] }
 0x425   :  { %19782 = vmatpush3.bf16.msra.mxu1 %v24337_v34  ;;  %17785 = vmatprep.mubr.msk.f32.mxu1 %vm20540_vm1, %v20539_v14 }
 0x426   :  { %19783 = vmatprep.subr.bf16.mxu1 %v20538_v11 }
 0x429   :  { %19785 = vmatpush3.bf16.msra.mxu1 %v24348_v4 }
 0x42a   :  { %19786 = vmatprep.subr.bf16.mxu1 %v20538_v11 }
 0x42d   :  { %19788 = vmatpush3.bf16.msra.mxu1 %v24360_v62 }
 0x42e   :  { %19789 = vmatprep.subr.bf16.mxu1 %v20538_v11 }
 0x431   :  { %19791 = vmatpush3.bf16.msra.mxu1 %v24370_v1 }
 0x432   :  { %19792 = vmatprep.subr.bf16.mxu1 %v20538_v11 }
 0x434   :  { %17786 = vmatmul.mubr.msk.f32.vlgmr.msra.gmra.mrb[12].mxu1 %vm42_vm2, %v10651_v40  ;;  %v14311_v40 = vld [vmem:[%s25087_s7 + $0x100] sm:$0xff] }
 0x435   :  { %v8545_v51 = vpop.f32.mrb[8].mxu0  ;;  %19794 = vmatpush3.bf16.msra.mxu1 %v24380_v16  ;;  %17804 = vmatprep.mubr.msk.f32.mxu1 %vm20540_vm1, %v20539_v14 }
 0x436   :  { %v17236_v30 = vpop.f32.mrb[9].mxu0  ;;  %19795 = vmatprep.subr.bf16.mxu1 %v20538_v11  ;;  %v8557_v37 = vmul.f32 %v24468_v8, %v8545_v51  ;;  %v24521_v51 = vpack.c.bf16 %v14312_v58, %v14311_v40  ;;  %v10969_v40 = vrot.slane %v24530_v59, 1  ;;  %v14322_v58 = vld [vmem:[%s25087_s7 + $0x150] sm:$0xff] }
 0x437   :  { %v14313_v30 = vld [vmem:[%s25087_s7 + $0x110] sm:$0xff] }
 0x438   :  { %v8564_v56 = vadd.f32 %v24485_v47, %v8557_v37  ;;  %v24536_v48 = vpack.c.bf16 %v14314_v2, %v14313_v30  ;;  %v24560_v37 = vpack.c.bf16 %v14318_v35, %v14317_v57  ;;  %v7794_v57 = vld [vmem:[%s25090_s10] sm:$0xff]  ;;  %v7795_v35 = vld [vmem:[%s25090_s10 + $0x8] sm:$0xff] }
 0x439   :  { %19797 = vmatpush3.bf16.msra.mxu1 %v24391_v25 }
 0x43a   :  { %19798 = vmatprep.subr.bf16.mxu1 %v20538_v11 }
 0x43d   :  { %19800 = vmatpush3.bf16.msra.mxu1 %v24403_v45 }
 0x43e   :  { %19801 = vmatprep.subr.bf16.mxu1 %v20538_v11 }
 0x441   :  { %19803 = vmatpush3.bf16.msra.mxu1 %v24413_v0 }
 0x442   :  { %19804 = vmatprep.subr.bf16.mxu1 %v20538_v11 }
 0x444   :  { %17805 = vmatmul.mubr.msk.f32.vlgmr.msra.gmra.mrb[12].mxu1 %vm42_vm2, %v10633_v28  ;;  %v8550_v28 = vld [vmem:[#allocation3 + $0x9] sm:$0xf] }
 0x445   :  { %19806 = vmatpush3.bf16.msra.mxu1 %v24423_v60  ;;  %17823 = vmatprep.mubr.msk.f32.mxu1 %vm20540_vm1, %v20539_v14  ;;  %v8565_v38 = vadd.f32 %v8564_v56, %v8550_v28  ;;  %v14321_v56 = vld [vmem:[%s25087_s7 + $0x148] sm:$0xff] }
 0x446   :  { %19807 = vmatprep.subr.bf16.mxu1 %v20538_v11 }
 0x447   :  { %v8566_v32 = vmax.f32 %v8565_v38, 0.0  ;;  %v24571_v38 = vpack.c.bf16 %v14321_v56, %v14320_v15  ;;  %v7798_v56 = vld [vmem:[%s25090_s10 + $0x20] sm:$0xff] }
 0x449   :  { %19809 = vmatpush3.bf16.msra.mxu1 %v24434_v19  ;;  %v8567_v49 = vsel %vm2581_vm9, %v8566_v32, 0.0  ;;  %v14323_v32 = vld [vmem:[%s25087_s7 + $0x158] sm:$0xff] }
 0x44a   :  { %19810 = vmatprep.subr.bf16.mxu1 %v20538_v11  ;;  %v8568_v24 = vrot.slane %v8567_v49, 4  ;;  %v24585_v17 = vpack.c.bf16 %v14323_v32, %v14322_v58  ;;  %v7801_v58 = vld [vmem:[%s25090_s10 + $0x38] sm:$0xff] }
 0x44d   :  { %19812 = vmatpush3.bf16.msra.mxu1 %v24446_v3 }
 0x44e   :  { %19813 = vmatprep.subr.bf16.mxu1 %v20538_v11 }
 0x451   :  { %19815 = vmatpush3.bf16.msra.mxu1 %v24456_v36 }
 0x452   :  { %19816 = vmatprep.subr.bf16.mxu1 %v20538_v11 }
 0x454   :  { %17824 = vmatmul.mubr.msk.f32.vlgmr.msra.gmra.mrb[12].mxu1 %vm42_vm2, %v10804_v5  ;;  %v8569_v5 = vadd.f32 %v8568_v24, %v8567_v49 }
 0x455   :  { %19818 = vmatpush3.bf16.msra.mxu1 %v24471_v10  ;;  %17842 = vmatprep.mubr.msk.f32.mxu1 %vm20540_vm1, %v20539_v14 }
 0x456   :  { %19819 = vmatprep.subr.bf16.mxu1 %v20538_v11  ;;  %v8570_v13 = vrot.slane %v8569_v5, 2 }
 0x458   :  { %v8571_v30 = vadd.f32 %v8570_v13, %v8569_v5  ;;  %v24603_v5 = vpack.c.bf16 %v7795_v35, %v7794_v57  ;;  %v7799_v13 = vld [vmem:[%s25090_s10 + $0x28] sm:$0xff] }
 0x459   :  { %19821 = vmatpush3.bf16.msra.mxu1 %v24488_v9 }
 0x45a   :  { %19822 = vmatprep.subr.bf16.mxu1 %v20538_v11  ;;  %v8572_v18 = vrot.slane %v8571_v30, 1  ;;  %19770 = vmatpush3.bf16.msra.mxu0 %v24603_v5 }
 0x45b   :  { %19771 = vmatprep.subr.bf16.mxu0 %v20538_v11 }
 0x45d   :  { %19824 = vmatpush3.bf16.msra.mxu1 %v24501_v39 }
 0x45e   :  { %19825 = vmatprep.subr.bf16.mxu1 %v20538_v11 }
 0x461   :  { %19827 = vmatpush3.bf16.msra.mxu1 %v24511_v43 }
 0x462   :  { %19828 = vmatprep.subr.bf16.mxu1 %v20538_v11 }
 0x464   :  { %17843 = vmatmul.mubr.msk.f32.vlgmr.msra.gmra.mrb[12].mxu1 %vm42_vm2, %v24530_v59 }
 0x465   :  { %19830 = vmatpush3.bf16.msra.mxu1 %v24521_v51  ;;  %17861 = vmatprep.mubr.msk.f32.mxu1 %vm20540_vm1, %v20539_v14 }
 0x466   :  { %19831 = vmatprep.subr.bf16.mxu1 %v20538_v11 }
 0x467   :  { %v9217_v12 = vpop.f32.mrb[8].mxu1 }
 0x468   :  { %v9223_v52 = vmul.f32 %v24468_v8, %v9217_v12  ;;  %v17407_v54 = vpop.f32.mrb[9].mxu1 }
 0x469   :  { %19833 = vmatpush3.bf16.msra.mxu1 %v24536_v48 }
 0x46a   :  { %v9224_v7 = vadd.f32 %v24485_v47, %v9223_v52  ;;  %19834 = vmatprep.subr.bf16.mxu1 %v20538_v11  ;;  %v8573_v52 = vadd.f32 %v8572_v18, %v8571_v30  ;;  %v24652_v30 = vld [vmem:[#allocation4 + $0x40] sm:$0x3f] }
 0x46c   :  { %v9225_v55 = vadd.f32 %v9224_v7, %v9222_v26  ;;  %v11051_v26 = vrot.slane %v24530_v59, 2 }
 0x46d   :  { %19836 = vmatpush3.bf16.msra.mxu1 %v24549_v31 }
 0x46e   :  { %v9226_v61 = vmax.f32 %v9225_v55, 0.0  ;;  %19837 = vmatprep.subr.bf16.mxu1 %v20538_v11  ;;  %v7796_v55 = vld [vmem:[%s25090_s10 + $0x10] sm:$0xff] }
 0x470   :  { %v9227_v20 = vsel %vm2581_vm9, %v9226_v61, 0.0  ;;  %v7797_v61 = vld [vmem:[%s25090_s10 + $0x18] sm:$0xff] }
 0x471   :  { %v9228_v28 = vrot.slane %v9227_v20, 4  ;;  %19839 = vmatpush3.bf16.msra.mxu1 %v24560_v37  ;;  %v24621_v15 = vpack.c.bf16 %v7797_v61, %v7796_v55 }
 0x472   :  { %19840 = vmatprep.subr.bf16.mxu1 %v20538_v11 }
 0x473   :  { %v9229_v2 = vadd.f32 %v9228_v28, %v9227_v20  ;;  %19773 = vmatpush3.bf16.msra.mxu0 %v24621_v15  ;;  %v24633_v20 = vpack.c.bf16 %v7799_v13, %v7798_v56  ;;  %v7800_v28 = vld [vmem:[%s25090_s10 + $0x30] sm:$0xff] }
 0x474   :  { %17862 = vmatmul.mubr.msk.f32.vlgmr.msra.gmra.mrb[12].mxu1 %vm42_vm2, %v10969_v40  ;;  %19774 = vmatprep.subr.bf16.mxu0 %v20538_v11  ;;  %v24644_v32 = vpack.c.bf16 %v7801_v58, %v7800_v28 }
 0x475   :  { %v9230_v49 = vrot.slane %v9229_v2, 2  ;;  %19842 = vmatpush3.bf16.msra.mxu1 %v24571_v38  ;;  %17880 = vmatprep.mubr.msk.f32.mxu1 %vm20540_vm1, %v20539_v14 }
 0x476   :  { %19843 = vmatprep.subr.bf16.mxu1 %v20538_v11 }
 0x477   :  { %v9231_v24 = vadd.f32 %v9230_v49, %v9229_v2  ;;  %19776 = vmatpush3.bf16.msra.mxu0 %v24633_v20  ;;  %v24666_v2 = vrot.slane %v24652_v30, 1  ;;  %v24681_v49 = vrot.slane %v24652_v30, 2 }
 0x478   :  { %19777 = vmatprep.subr.bf16.mxu0 %v20538_v11 }
 0x479   :  { %v9232_v12 = vrot.slane %v9231_v24, 1  ;;  %19845 = vmatpush3.bf16.msra.mxu1 %v24585_v17 }
 0x47a   :  { %19846 = vmatprep.subr.bf16.mxu1 %v20538_v11 }
 0x47b   :  { %v9233_v54 = vadd.f32 %v9232_v12, %v9231_v24  ;;  %19779 = vmatpush3.bf16.msra.mxu0 %v24644_v32 }
 0x47c   :  { %19888 = vmatprep.subr.bf16.mxu0 %v20538_v11 }
 0x47d   :  { %v24592_v7 = vadd.f32 %v9233_v54, %v8573_v52  ;;  %19848 = vmatpush3.bf16.msra.mxu1 %v23876_v27  ;;  %v9882_v54 = vld [vmem:[#allocation3 + $0x19] sm:$0xf] }
 0x47e   :  { %19849 = vmatprep.subr.bf16.mxu1 %v20538_v11 }
 0x481   :  { %19851 = vmatpush3.bf16.msra.mxu1 %v23888_v44 }
 0x482   :  { %19852 = vmatprep.subr.bf16.mxu1 %v20538_v11 }
 0x484   :  { %17881 = vmatmul.mubr.msk.f32.vlgmr.msra.gmra.mrb[12].mxu1 %vm42_vm2, %v11051_v26 }
 0x485   :  { %19854 = vmatpush3.bf16.msra.mxu1 %v23900_v33  ;;  %17899 = vmatprep.mubr.msk.f32.mxu1 %vm20540_vm1, %v20539_v14 }
 0x486   :  { %19855 = vmatprep.subr.bf16.mxu1 %v20538_v11 }
 0x489   :  { %19857 = vmatpush3.bf16.msra.mxu1 %v23914_v41 }
 0x48a   :  { %19858 = vmatprep.subr.bf16.mxu1 %v20538_v11 }
 0x48d   :  { %19860 = vmatpush3.bf16.msra.mxu1 %v23931_v29 }
 0x48e   :  { %19861 = vmatprep.subr.bf16.mxu1 %v20538_v11 }
 0x491   :  { %19863 = vmatpush3.bf16.msra.mxu1 %v23943_v42 }
 0x492   :  { %19864 = vmatprep.subr.bf16.mxu1 %v20538_v11 }
 0x494   :  { %17900 = vmatmul.mubr.msk.f32.vlgmr.msra.gmra.mrb[12].mxu1 %vm42_vm2, %v24652_v30 }
 0x495   :  { %19866 = vmatpush3.bf16.msra.mxu1 %v23955_v63  ;;  %17918 = vmatprep.mubr.msk.f32.mxu1 %vm20540_vm1, %v20539_v14 }
 0x496   :  { %19867 = vmatprep.subr.bf16.mxu1 %v20538_v11 }
 0x499   :  { %19869 = vmatpush3.bf16.msra.mxu1 %v23971_v50 }
 0x49a   :  { %19870 = vmatprep.subr.bf16.mxu1 %v20538_v11 }
 0x49d   :  { %19872 = vmatpush3.bf16.msra.mxu1 %v23989_v46 }
 0x49e   :  { %19873 = vmatprep.subr.bf16.mxu1 %v20538_v11 }
 0x4a1   :  { %19875 = vmatpush3.bf16.msra.mxu1 %v24003_v6 }
 0x4a2   :  { %19876 = vmatprep.subr.bf16.mxu1 %v20538_v11 }
 0x4a4   :  { %17919 = vmatmul.mubr.msk.f32.vlgmr.msra.gmra.mrb[12].mxu1 %vm42_vm2, %v24666_v2 }
 0x4a5   :  { %19878 = vmatpush3.bf16.msra.mxu1 %v24016_v21  ;;  %17937 = vmatprep.mubr.msk.f32.mxu1 %vm20540_vm1, %v20539_v14 }
 0x4a6   :  { %19879 = vmatprep.subr.bf16.mxu1 %v20538_v11 }
 0x4a9   :  { %19881 = vmatpush3.bf16.msra.mxu1 %v24030_v53 }
 0x4aa   :  { %19882 = vmatprep.subr.bf16.mxu1 %v20538_v11 }
 0x4ad   :  { %19884 = vmatpush3.bf16.msra.mxu1 %v24047_v23 }
 0x4ae   :  { %19885 = vmatprep.subr.bf16.mxu1 %v20538_v11 }
 0x4b1   :  { %19887 = vmatpush3.bf16.msra.mxu1 %v24059_v22 }
 0x4b2   :  { %19996 = vmatprep.subr.bf16.mxu1 %v20538_v11 }
 0x4b4   :  { %17938 = vmatmul.mubr.msk.f32.vlgmr.msra.gmra.mrb[12].mxu1 %vm42_vm2, %v24681_v49 }
 0x4b5   :  { %19998 = vmatpush3.bf16.msra.mxu1 %v24337_v34  ;;  %18127 = vmatprep.mubr.msk.f32.mxu1 %vm20540_vm1, %v20539_v14 }
 0x4b6   :  { %19999 = vmatprep.subr.bf16.mxu1 %v20538_v11 }
 0x4b9   :  { %20001 = vmatpush3.bf16.msra.mxu1 %v24348_v4 }
 0x4ba   :  { %20002 = vmatprep.subr.bf16.mxu1 %v20538_v11 }
 0x4bd   :  { %20004 = vmatpush3.bf16.msra.mxu1 %v24360_v62 }
 0x4be   :  { %20005 = vmatprep.subr.bf16.mxu1 %v20538_v11 }
 0x4c1   :  { %20007 = vmatpush3.bf16.msra.mxu1 %v24370_v1 }
 0x4c2   :  { %20008 = vmatprep.subr.bf16.mxu1 %v20538_v11 }
 0x4c4   :  { %18128 = vmatmul.mubr.msk.f32.vlgmr.msra.gmra.mrb[14].mxu1 %vm42_vm2, %v24666_v2 }
 0x4c5   :  { %v9877_v18 = vpop.f32.mrb[10].mxu0  ;;  %20010 = vmatpush3.bf16.msra.mxu1 %v24380_v16  ;;  %18146 = vmatprep.mubr.msk.f32.mxu1 %vm20540_vm1, %v20539_v14 }
 0x4c6   :  { %v9883_v24 = vmul.f32 %v24468_v8, %v9877_v18  ;;  %v17578_v12 = vpop.f32.mrb[11].mxu0  ;;  %20011 = vmatprep.subr.bf16.mxu1 %v20538_v11 }
 0x4c8   :  { %v9884_v52 = vadd.f32 %v24485_v47, %v9883_v24 }
 0x4c9   :  { %20013 = vmatpush3.bf16.msra.mxu1 %v24391_v25 }
 0x4ca   :  { %v9885_v57 = vadd.f32 %v9884_v52, %v9882_v54  ;;  %20014 = vmatprep.subr.bf16.mxu1 %v20538_v11 }
 0x4cc   :  { %v9886_v35 = vmax.f32 %v9885_v57, 0.0 }
 0x4cd   :  { %20016 = vmatpush3.bf16.msra.mxu1 %v24403_v45 }
 0x4ce   :  { %v9887_v55 = vsel %vm2581_vm9, %v9886_v35, 0.0  ;;  %20017 = vmatprep.subr.bf16.mxu1 %v20538_v11  ;;  %v10543_v35 = vld [vmem:[#allocation3 + $0x21] sm:$0xf] }
 0x4cf   :  { %v9888_v61 = vrot.slane %v9887_v55, 4 }
 0x4d1   :  { %v9889_v56 = vadd.f32 %v9888_v61, %v9887_v55  ;;  %20019 = vmatpush3.bf16.msra.mxu1 %v24413_v0 }
 0x4d2   :  { %20020 = vmatprep.subr.bf16.mxu1 %v20538_v11 }
 0x4d3   :  { %v9890_v13 = vrot.slane %v9889_v56, 2 }
 0x4d4   :  { %18147 = vmatmul.mubr.msk.f32.vlgmr.msra.gmra.mrb[14].mxu1 %vm42_vm2, %v24652_v30 }
 0x4d5   :  { %v9891_v28 = vadd.f32 %v9890_v13, %v9889_v56  ;;  %20022 = vmatpush3.bf16.msra.mxu1 %v24423_v60  ;;  %18165 = vmatprep.mubr.msk.f32.mxu1 %vm20540_vm1, %v20539_v14 }
 0x4d6   :  { %20023 = vmatprep.subr.bf16.mxu1 %v20538_v11 }
 0x4d7   :  { %v9892_v58 = vrot.slane %v9891_v28, 1 }
 0x4d9   :  { %v9893_v18 = vadd.f32 %v9892_v58, %v9891_v28  ;;  %20025 = vmatpush3.bf16.msra.mxu1 %v24434_v19 }
 0x4da   :  { %20026 = vmatprep.subr.bf16.mxu1 %v20538_v11 }
 0x4db   :  { %v9894_v24 = vadd.f32 %v9893_v18, %v24592_v7  ;;  %v24736_v7 = vld [vmem:[#allocation4 + $0x48] sm:$0x3f] }
 0x4dc   :  { %v24753_v28 = vrot.slane %v24736_v7, 1 }
 0x4dd   :  { %20028 = vmatpush3.bf16.msra.mxu1 %v24446_v3 }
 0x4de   :  { %20029 = vmatprep.subr.bf16.mxu1 %v20538_v11 }
 0x4e1   :  { %20031 = vmatpush3.bf16.msra.mxu1 %v24456_v36 }
 0x4e2   :  { %20032 = vmatprep.subr.bf16.mxu1 %v20538_v11 }
 0x4e4   :  { %18166 = vmatmul.mubr.msk.f32.vlgmr.msra.gmra.mrb[14].mxu1 %vm42_vm2, %v24681_v49 }
 0x4e5   :  { %20034 = vmatpush3.bf16.msra.mxu1 %v24471_v10  ;;  %18184 = vmatprep.mubr.msk.f32.mxu1 %vm20540_vm1, %v20539_v14 }
 0x4e6   :  { %20035 = vmatprep.subr.bf16.mxu1 %v20538_v11 }
 0x4e9   :  { %20037 = vmatpush3.bf16.msra.mxu1 %v24488_v9 }
 0x4ea   :  { %20038 = vmatprep.subr.bf16.mxu1 %v20538_v11 }
 0x4ed   :  { %20040 = vmatpush3.bf16.msra.mxu1 %v24501_v39 }
 0x4ee   :  { %20041 = vmatprep.subr.bf16.mxu1 %v20538_v11 }
 0x4f1   :  { %20043 = vmatpush3.bf16.msra.mxu1 %v24511_v43 }
 0x4f2   :  { %20044 = vmatprep.subr.bf16.mxu1 %v20538_v11 }
 0x4f4   :  { %18185 = vmatmul.mubr.msk.f32.vlgmr.msra.gmra.mrb[14].mxu1 %vm42_vm2, %v24736_v7 }
 0x4f5   :  { %20046 = vmatpush3.bf16.msra.mxu1 %v24521_v51  ;;  %18203 = vmatprep.mubr.msk.f32.mxu1 %vm20540_vm1, %v20539_v14 }
 0x4f6   :  { %20047 = vmatprep.subr.bf16.mxu1 %v20538_v11 }
 0x4f7   :  { %v10538_v12 = vpop.f32.mrb[10].mxu1 }
 0x4f8   :  { %v10544_v52 = vmul.f32 %v24468_v8, %v10538_v12  ;;  %v17749_v54 = vpop.f32.mrb[11].mxu1 }
 0x4f9   :  { %20049 = vmatpush3.bf16.msra.mxu1 %v24536_v48 }
 0x4fa   :  { %v10545_v57 = vadd.f32 %v24485_v47, %v10544_v52  ;;  %20050 = vmatprep.subr.bf16.mxu1 %v20538_v11 }
 0x4fc   :  { %v10546_v55 = vadd.f32 %v10545_v57, %v10543_v35 }
 0x4fd   :  { %20052 = vmatpush3.bf16.msra.mxu1 %v24549_v31 }
 0x4fe   :  { %v10547_v61 = vmax.f32 %v10546_v55, 0.0  ;;  %20053 = vmatprep.subr.bf16.mxu1 %v20538_v11  ;;  %v24770_v55 = vrot.slane %v24736_v7, 2 }
 0x500   :  { %v10548_v56 = vsel %vm2581_vm9, %v10547_v61, 0.0 }
 0x501   :  { %v10549_v13 = vrot.slane %v10548_v56, 4  ;;  %20055 = vmatpush3.bf16.msra.mxu1 %v24560_v37 }
 0x502   :  { %20056 = vmatprep.subr.bf16.mxu1 %v20538_v11 }
 0x503   :  { %v10550_v58 = vadd.f32 %v10549_v13, %v10548_v56 }
 0x504   :  { %18204 = vmatmul.mubr.msk.f32.vlgmr.msra.gmra.mrb[14].mxu1 %vm42_vm2, %v24753_v28 }
 0x505   :  { %v10551_v18 = vrot.slane %v10550_v58, 2  ;;  %20058 = vmatpush3.bf16.msra.mxu1 %v24571_v38  ;;  %18222 = vmatprep.mubr.msk.f32.mxu1 %vm20540_vm1, %v20539_v14 }
 0x506   :  { %20059 = vmatprep.subr.bf16.mxu1 %v20538_v11 }
 0x507   :  { %v10552_v12 = vadd.f32 %v10551_v18, %v10550_v58  ;;  %v20512_v58 = vld [vmem:[%s25088_s8] ss:$0 sm:$0xff]  ;;  %s20542_s8 = smov [#allocation5]  }
 0x508   :  { %s13447_s5 = sshll.u32 %s20542_s8, 4  ;;  %s13448_s5 = int_to_ptr.vmem [resolvable:$true] %s13447_s5 }
 0x509   :  { %v10553_v52 = vrot.slane %v10552_v12, 1  ;;  %20061 = vmatpush3.bf16.msra.mxu1 %v24585_v17  ;;  %s20513_s1 = scalar_lea.vmem %s13448_s5, 32  ;;  %p20518_p1 = scmp.lt.s32.totalorder %s13448_s5, %s13448_s5 }
 0x50a   :  { %20062 = vmatprep.subr.bf16.mxu1 %v20538_v11  ;;  %p20514_p0 = scmp.ne.s32.totalorder %s13448_s5, %s20513_s1  ;;  %p20519_p2 = scmp.lt.s32.totalorder %s20513_s1, %s20513_s1 }
 0x50b   :  { %v10554_v54 = vadd.f32 %v10553_v52, %v10552_v12 }
 0x50c   :  { %p20520_p3 = por %p20519_p2, %p20518_p1 }
 0x50d   :  { %20064 = vmatpush3.bf16.msra.mxu1 %v23876_v27  ;;  %v10555_v57 = vadd.f32 %v10554_v54, %v9894_v24  ;;  %v24799_v24 = vld [vmem:[#allocation4 + $0x50] sm:$0x3f] }
 0x50e   :  { %20065 = vmatprep.subr.bf16.mxu1 %v20538_v11  ;;  %v12618_v61 = vrot.slane %v24799_v24, 2  ;;  %v13353_v54 = vld [vmem:[#allocation3 + $0x51] sm:$0xf]  ;;  %p20521_p4 = pnand %p20520_p3, %p20514_p0 }
 0x50f   :  { %v10556_v35 = vmul.f32 0.0625, %v10555_v57 }
 0x511   :  { %17767 = vmatmul.mubr.msk.f32.vlgmr.msra.gmra.mrb[12].mxu0 %vm42_vm2, %v10556_v35  ;;  %20067 = vmatpush3.bf16.msra.mxu1 %v23888_v44 }
 0x512   :  { %19890 = vmatpush3.bf16.msra.mxu0 %v24337_v34  ;;  %20068 = vmatprep.subr.bf16.mxu1 %v20538_v11 }
 0x513   :  { %19891 = vmatprep.subr.bf16.mxu0 %v20538_v11  ;;  %17956 = vmatprep.mubr.msk.f32.mxu0 %vm20540_vm1, %v20539_v14 }
 0x514   :  { %18223 = vmatmul.mubr.msk.f32.vlgmr.msra.gmra.mrb[14].mxu1 %vm42_vm2, %v24770_v55 }
 0x515   :  { %20070 = vmatpush3.bf16.msra.mxu1 %v23900_v33  ;;  %18241 = vmatprep.mubr.msk.f32.mxu1 %vm20540_vm1, %v20539_v14 }
 0x516   :  { %19893 = vmatpush3.bf16.msra.mxu0 %v24348_v4  ;;  %20071 = vmatprep.subr.bf16.mxu1 %v20538_v11 }
 0x517   :  { %19894 = vmatprep.subr.bf16.mxu0 %v20538_v11 }
 0x519   :  { %20073 = vmatpush3.bf16.msra.mxu1 %v23914_v41 }
 0x51a   :  { %19896 = vmatpush3.bf16.msra.mxu0 %v24360_v62  ;;  %20074 = vmatprep.subr.bf16.mxu1 %v20538_v11 }
 0x51b   :  { %19897 = vmatprep.subr.bf16.mxu0 %v20538_v11 }
 0x51d   :  { %20076 = vmatpush3.bf16.msra.mxu1 %v23931_v29 }
 0x51e   :  { %19899 = vmatpush3.bf16.msra.mxu0 %v24370_v1  ;;  %20077 = vmatprep.subr.bf16.mxu1 %v20538_v11 }
 0x51f   :  { %19900 = vmatprep.subr.bf16.mxu0 %v20538_v11 }
 0x521   :  { %17957 = vmatmul.mubr.msk.f32.vlgmr.msra.gmra.mrb[14].mxu0 %vm42_vm2, %v10969_v40  ;;  %20079 = vmatpush3.bf16.msra.mxu1 %v23943_v42  ;;  %v12544_v40 = vrot.slane %v24799_v24, 1 }
 0x522   :  { %19902 = vmatpush3.bf16.msra.mxu0 %v24380_v16  ;;  %20080 = vmatprep.subr.bf16.mxu1 %v20538_v11 }
 0x523   :  { %19903 = vmatprep.subr.bf16.mxu0 %v20538_v11  ;;  %17975 = vmatprep.mubr.msk.f32.mxu0 %vm20540_vm1, %v20539_v14 }
 0x524   :  { %18242 = vmatmul.mubr.msk.f32.vlgmr.msra.gmra.mrb[14].mxu1 %vm42_vm2, %v24799_v24 }
 0x525   :  { %20082 = vmatpush3.bf16.msra.mxu1 %v23955_v63  ;;  %18260 = vmatprep.mubr.msk.f32.mxu1 %vm20540_vm1, %v20539_v14 }
 0x526   :  { %19905 = vmatpush3.bf16.msra.mxu0 %v24391_v25  ;;  %20083 = vmatprep.subr.bf16.mxu1 %v20538_v11 }
 0x527   :  { %19906 = vmatprep.subr.bf16.mxu0 %v20538_v11 }
 0x529   :  { %20085 = vmatpush3.bf16.msra.mxu1 %v23971_v50 }
 0x52a   :  { %19908 = vmatpush3.bf16.msra.mxu0 %v24403_v45  ;;  %20086 = vmatprep.subr.bf16.mxu1 %v20538_v11 }
 0x52b   :  { %19909 = vmatprep.subr.bf16.mxu0 %v20538_v11 }
 0x52d   :  { %20088 = vmatpush3.bf16.msra.mxu1 %v23989_v46 }
 0x52e   :  { %19911 = vmatpush3.bf16.msra.mxu0 %v24413_v0  ;;  %20089 = vmatprep.subr.bf16.mxu1 %v20538_v11 }
 0x52f   :  { %19912 = vmatprep.subr.bf16.mxu0 %v20538_v11 }
 0x531   :  { %17976 = vmatmul.mubr.msk.f32.vlgmr.msra.gmra.mrb[14].mxu0 %vm42_vm2, %v24530_v59  ;;  %20091 = vmatpush3.bf16.msra.mxu1 %v24003_v6 }
 0x532   :  { %19914 = vmatpush3.bf16.msra.mxu0 %v24423_v60  ;;  %20092 = vmatprep.subr.bf16.mxu1 %v20538_v11 }
 0x533   :  { %19915 = vmatprep.subr.bf16.mxu0 %v20538_v11  ;;  %17994 = vmatprep.mubr.msk.f32.mxu0 %vm20540_vm1, %v20539_v14 }
 0x534   :  { %18261 = vmatmul.mubr.msk.f32.vlgmr.msra.gmra.mrb[14].mxu1 %vm42_vm2, %v12544_v40 }
 0x535   :  { %20094 = vmatpush3.bf16.msra.mxu1 %v24016_v21  ;;  %18279 = vmatprep.mubr.msk.f32.mxu1 %vm20540_vm1, %v20539_v14 }
 0x536   :  { %19917 = vmatpush3.bf16.msra.mxu0 %v24434_v19  ;;  %20095 = vmatprep.subr.bf16.mxu1 %v20538_v11 }
 0x537   :  { %19918 = vmatprep.subr.bf16.mxu0 %v20538_v11 }
 0x539   :  { %20097 = vmatpush3.bf16.msra.mxu1 %v24030_v53 }
 0x53a   :  { %19920 = vmatpush3.bf16.msra.mxu0 %v24446_v3  ;;  %20098 = vmatprep.subr.bf16.mxu1 %v20538_v11 }
 0x53b   :  { %19921 = vmatprep.subr.bf16.mxu0 %v20538_v11 }
 0x53d   :  { %20100 = vmatpush3.bf16.msra.mxu1 %v24047_v23 }
 0x53e   :  { %19923 = vmatpush3.bf16.msra.mxu0 %v24456_v36  ;;  %20101 = vmatprep.subr.bf16.mxu1 %v20538_v11 }
 0x53f   :  { %19924 = vmatprep.subr.bf16.mxu0 %v20538_v11 }
 0x541   :  { %17995 = vmatmul.mubr.msk.f32.vlgmr.msra.gmra.mrb[14].mxu0 %vm42_vm2, %v11051_v26  ;;  %20103 = vmatpush3.bf16.msra.mxu1 %v24059_v22 }
 0x542   :  { %19926 = vmatpush3.bf16.msra.mxu0 %v24471_v10  ;;  %18013 = vmatprep.mubr.msk.f32.mxu0 %vm20540_vm1, %v20539_v14 }
 0x543   :  { %19927 = vmatprep.subr.bf16.mxu0 %v20538_v11  ;;  %20212 = vmatprep.subr.bf16.mxu1 %v20538_v11 }
 0x544   :  { %18280 = vmatmul.mubr.msk.f32.vlgmr.msra.gmra.mrb[14].mxu1 %vm42_vm2, %v12618_v61 }
 0x545   :  { %20214 = vmatpush3.bf16.msra.mxu1 %v24603_v5  ;;  %18469 = vmatprep.mubr.msk.f32.mxu1 %vm20540_vm1, %v20539_v14 }
 0x546   :  { %19929 = vmatpush3.bf16.msra.mxu0 %v24488_v9  ;;  %20215 = vmatprep.subr.bf16.mxu1 %v20538_v11 }
 0x547   :  { %19930 = vmatprep.subr.bf16.mxu0 %v20538_v11 }
 0x549   :  { %20217 = vmatpush3.bf16.msra.mxu1 %v24621_v15 }
 0x54a   :  { %19932 = vmatpush3.bf16.msra.mxu0 %v24501_v39  ;;  %20218 = vmatprep.subr.bf16.mxu1 %v20538_v11 }
 0x54b   :  { %19933 = vmatprep.subr.bf16.mxu0 %v20538_v11 }
 0x54d   :  { %20220 = vmatpush3.bf16.msra.mxu1 %v24633_v20 }
 0x54e   :  { %19935 = vmatpush3.bf16.msra.mxu0 %v24511_v43  ;;  %20221 = vmatprep.subr.bf16.mxu1 %v20538_v11 }
 0x54f   :  { %19936 = vmatprep.subr.bf16.mxu0 %v20538_v11 }
 0x551   :  { %18014 = vmatmul.mubr.msk.f32.vlgmr.msra.gmra.mrb[14].mxu0 %vm42_vm2, %v24652_v30  ;;  %20223 = vmatpush3.bf16.msra.mxu1 %v24644_v32 }
 0x552   :  { %19938 = vmatpush3.bf16.msra.mxu0 %v24521_v51  ;;  %18032 = vmatprep.mubr.msk.f32.mxu0 %vm20540_vm1, %v20539_v14 }
 0x553   :  { %19939 = vmatprep.subr.bf16.mxu0 %v20538_v11 }
 0x556   :  { %19941 = vmatpush3.bf16.msra.mxu0 %v24536_v48 }
 0x557   :  { %19942 = vmatprep.subr.bf16.mxu0 %v20538_v11 }
 0x55a   :  { %19944 = vmatpush3.bf16.msra.mxu0 %v24549_v31 }
 0x55b   :  { %19945 = vmatprep.subr.bf16.mxu0 %v20538_v11 }
 0x55e   :  { %19947 = vmatpush3.bf16.msra.mxu0 %v24560_v37 }
 0x55f   :  { %19948 = vmatprep.subr.bf16.mxu0 %v20538_v11 }
 0x561   :  { %18033 = vmatmul.mubr.msk.f32.vlgmr.msra.gmra.mrb[14].mxu0 %vm42_vm2, %v24666_v2 }
 0x562   :  { %19950 = vmatpush3.bf16.msra.mxu0 %v24571_v38  ;;  %18051 = vmatprep.mubr.msk.f32.mxu0 %vm20540_vm1, %v20539_v14 }
 0x563   :  { %19951 = vmatprep.subr.bf16.mxu0 %v20538_v11 }
 0x566   :  { %19953 = vmatpush3.bf16.msra.mxu0 %v24585_v17 }
 0x567   :  { %19954 = vmatprep.subr.bf16.mxu0 %v20538_v11 }
 0x56a   :  { %19956 = vmatpush3.bf16.msra.mxu0 %v23876_v27 }
 0x56b   :  { %19957 = vmatprep.subr.bf16.mxu0 %v20538_v11 }
 0x56e   :  { %19959 = vmatpush3.bf16.msra.mxu0 %v23888_v44 }
 0x56f   :  { %19960 = vmatprep.subr.bf16.mxu0 %v20538_v11 }
 0x571   :  { %18052 = vmatmul.mubr.msk.f32.vlgmr.msra.gmra.mrb[14].mxu0 %vm42_vm2, %v24681_v49 }
 0x572   :  { %19962 = vmatpush3.bf16.msra.mxu0 %v23900_v33  ;;  %18070 = vmatprep.mubr.msk.f32.mxu0 %vm20540_vm1, %v20539_v14 }
 0x573   :  { %19963 = vmatprep.subr.bf16.mxu0 %v20538_v11 }
 0x576   :  { %19965 = vmatpush3.bf16.msra.mxu0 %v23914_v41 }
 0x577   :  { %19966 = vmatprep.subr.bf16.mxu0 %v20538_v11 }
 0x57a   :  { %19968 = vmatpush3.bf16.msra.mxu0 %v23931_v29 }
 0x57b   :  { %19969 = vmatprep.subr.bf16.mxu0 %v20538_v11 }
 0x57e   :  { %19971 = vmatpush3.bf16.msra.mxu0 %v23943_v42 }
 0x57f   :  { %19972 = vmatprep.subr.bf16.mxu0 %v20538_v11 }
 0x581   :  { %18071 = vmatmul.mubr.msk.f32.vlgmr.msra.gmra.mrb[14].mxu0 %vm42_vm2, %v24736_v7 }
 0x582   :  { %19974 = vmatpush3.bf16.msra.mxu0 %v23955_v63  ;;  %18089 = vmatprep.mubr.msk.f32.mxu0 %vm20540_vm1, %v20539_v14 }
 0x583   :  { %19975 = vmatprep.subr.bf16.mxu0 %v20538_v11 }
 0x586   :  { %19977 = vmatpush3.bf16.msra.mxu0 %v23971_v50 }
 0x587   :  { %v24916_v59 = vpop.f32.mrb[12].mxu1  ;;  %19978 = vmatprep.subr.bf16.mxu0 %v20538_v11 }
 0x588   :  { %v17939_v5 = vpop.f32.mrb[13].mxu1 }
 0x58a   :  { %19980 = vmatpush3.bf16.msra.mxu0 %v23989_v46 }
 0x58b   :  { %19981 = vmatprep.subr.bf16.mxu0 %v20538_v11 }
 0x58e   :  { %19983 = vmatpush3.bf16.msra.mxu0 %v24003_v6 }
 0x58f   :  { %19984 = vmatprep.subr.bf16.mxu0 %v20538_v11 }
 0x591   :  { %18090 = vmatmul.mubr.msk.f32.vlgmr.msra.gmra.mrb[14].mxu0 %vm42_vm2, %v24753_v28 }
 0x592   :  { %19986 = vmatpush3.bf16.msra.mxu0 %v24016_v21  ;;  %18108 = vmatprep.mubr.msk.f32.mxu0 %vm20540_vm1, %v20539_v14 }
 0x593   :  { %19987 = vmatprep.subr.bf16.mxu0 %v20538_v11 }
 0x596   :  { %19989 = vmatpush3.bf16.msra.mxu0 %v24030_v53 }
 0x597   :  { %19990 = vmatprep.subr.bf16.mxu0 %v20538_v11 }
 0x59a   :  { %19992 = vmatpush3.bf16.msra.mxu0 %v24047_v23 }
 0x59b   :  { %19993 = vmatprep.subr.bf16.mxu0 %v20538_v11 }
 0x59e   :  { %19995 = vmatpush3.bf16.msra.mxu0 %v24059_v22 }
 0x59f   :  { %20104 = vmatprep.subr.bf16.mxu0 %v20538_v11 }
 0x5a1   :  { %18109 = vmatmul.mubr.msk.f32.vlgmr.msra.gmra.mrb[14].mxu0 %vm42_vm2, %v24770_v55 }
 0x5a2   :  { %20106 = vmatpush3.bf16.msra.mxu0 %v24337_v34  ;;  %18298 = vmatprep.mubr.msk.f32.mxu0 %vm20540_vm1, %v20539_v14  ;;  %v24989_v34 = vld [vmem:[%s25091_s11] sm:$0x1] }
 0x5a3   :  { %20107 = vmatprep.subr.bf16.mxu0 %v20538_v11 }
 0x5a6   :  { %20109 = vmatpush3.bf16.msra.mxu0 %v24348_v4 }
 0x5a7   :  { %20110 = vmatprep.subr.bf16.mxu0 %v20538_v11 }
 0x5aa   :  { %20112 = vmatpush3.bf16.msra.mxu0 %v24360_v62 }
 0x5ab   :  { %20113 = vmatprep.subr.bf16.mxu0 %v20538_v11 }
 0x5ae   :  { %20115 = vmatpush3.bf16.msra.mxu0 %v24370_v1 }
 0x5af   :  { %20116 = vmatprep.subr.bf16.mxu0 %v20538_v11 }
 0x5b1   :  { %18299 = vmatmul.mubr.msk.f32.vlgmr.msra.gmra.mrb[16].mxu0 %vm42_vm2, %v24753_v28 }
 0x5b2   :  { %20118 = vmatpush3.bf16.msra.mxu0 %v24380_v16  ;;  %18317 = vmatprep.mubr.msk.f32.mxu0 %vm20540_vm1, %v20539_v14 }
 0x5b3   :  { %20119 = vmatprep.subr.bf16.mxu0 %v20538_v11 }
 0x5b6   :  { %20121 = vmatpush3.bf16.msra.mxu0 %v24391_v25 }
 0x5b7   :  { %20122 = vmatprep.subr.bf16.mxu0 %v20538_v11 }
 0x5ba   :  { %20124 = vmatpush3.bf16.msra.mxu0 %v24403_v45 }
 0x5bb   :  { %20125 = vmatprep.subr.bf16.mxu0 %v20538_v11 }
 0x5be   :  { %20127 = vmatpush3.bf16.msra.mxu0 %v24413_v0 }
 0x5bf   :  { %20128 = vmatprep.subr.bf16.mxu0 %v20538_v11 }
 0x5c1   :  { %18318 = vmatmul.mubr.msk.f32.vlgmr.msra.gmra.mrb[16].mxu0 %vm42_vm2, %v24736_v7 }
 0x5c2   :  { %20130 = vmatpush3.bf16.msra.mxu0 %v24423_v60  ;;  %18336 = vmatprep.mubr.msk.f32.mxu0 %vm20540_vm1, %v20539_v14 }
 0x5c3   :  { %20131 = vmatprep.subr.bf16.mxu0 %v20538_v11 }
 0x5c6   :  { %20133 = vmatpush3.bf16.msra.mxu0 %v24434_v19 }
 0x5c7   :  { %20134 = vmatprep.subr.bf16.mxu0 %v20538_v11 }
 0x5ca   :  { %20136 = vmatpush3.bf16.msra.mxu0 %v24446_v3 }
 0x5cb   :  { %20137 = vmatprep.subr.bf16.mxu0 %v20538_v11 }
 0x5ce   :  { %20139 = vmatpush3.bf16.msra.mxu0 %v24456_v36 }
 0x5cf   :  { %20140 = vmatprep.subr.bf16.mxu0 %v20538_v11 }
 0x5d1   :  { %18337 = vmatmul.mubr.msk.f32.vlgmr.msra.gmra.mrb[16].mxu0 %vm42_vm2, %v24770_v55 }
 0x5d2   :  { %20142 = vmatpush3.bf16.msra.mxu0 %v24471_v10  ;;  %18355 = vmatprep.mubr.msk.f32.mxu0 %vm20540_vm1, %v20539_v14  ;;  %v12032_v10 = vld [vmem:[#allocation3 + $0x41] sm:$0xf] }
 0x5d3   :  { %20143 = vmatprep.subr.bf16.mxu0 %v20538_v11 }
 0x5d6   :  { %20145 = vmatpush3.bf16.msra.mxu0 %v24488_v9 }
 0x5d7   :  { %20146 = vmatprep.subr.bf16.mxu0 %v20538_v11 }
 0x5da   :  { %20148 = vmatpush3.bf16.msra.mxu0 %v24501_v39 }
 0x5db   :  { %20149 = vmatprep.subr.bf16.mxu0 %v20538_v11 }
 0x5de   :  { %20151 = vmatpush3.bf16.msra.mxu0 %v24511_v43 }
 0x5df   :  { %20152 = vmatprep.subr.bf16.mxu0 %v20538_v11 }
 0x5e1   :  { %18356 = vmatmul.mubr.msk.f32.vlgmr.msra.gmra.mrb[16].mxu0 %vm42_vm2, %v24799_v24 }
 0x5e2   :  { %20154 = vmatpush3.bf16.msra.mxu0 %v24521_v51  ;;  %18374 = vmatprep.mubr.msk.f32.mxu0 %vm20540_vm1, %v20539_v14 }
 0x5e3   :  { %20155 = vmatprep.subr.bf16.mxu0 %v20538_v11 }
 0x5e4   :  { %v10626_v4 = vpop.f32.mrb[12].mxu0 }
 0x5e5   :  { %v10627_v62 = vadd.f32 %v10626_v4, %v24989_v34  ;;  %v17768_v1 = vpop.f32.mrb[13].mxu0 }
 0x5e6   :  { %20157 = vmatpush3.bf16.msra.mxu0 %v24536_v48 }
 0x5e7   :  { %10631 = vst.msk [vmem:[#allocation5] sm:$0x1] %vm10630_vm10, %v10627_v62  ;;  %20158 = vmatprep.subr.bf16.mxu0 %v20538_v11 }
 0x5ea   :  { %20160 = vmatpush3.bf16.msra.mxu0 %v24549_v31 }
 0x5eb   :  { %20161 = vmatprep.subr.bf16.mxu0 %v20538_v11 }
 0x5ee   :  { %20163 = vmatpush3.bf16.msra.mxu0 %v24560_v37 }
 0x5ef   :  { %20164 = vmatprep.subr.bf16.mxu0 %v20538_v11 }
 0x5f1   :  { %18375 = vmatmul.mubr.msk.f32.vlgmr.msra.gmra.mrb[16].mxu0 %vm42_vm2, %v12544_v40 }
 0x5f2   :  { %20166 = vmatpush3.bf16.msra.mxu0 %v24571_v38  ;;  %18393 = vmatprep.mubr.msk.f32.mxu0 %vm20540_vm1, %v20539_v14 }
 0x5f3   :  { %20167 = vmatprep.subr.bf16.mxu0 %v20538_v11 }
 0x5f6   :  { %20169 = vmatpush3.bf16.msra.mxu0 %v24585_v17 }
 0x5f7   :  { %20170 = vmatprep.subr.bf16.mxu0 %v20538_v11 }
 0x5fa   :  { %20172 = vmatpush3.bf16.msra.mxu0 %v23876_v27  ;;  %v13130_v27 = vld [vmem:[#allocation4 + $0x58] sm:$0x3f] }
 0x5fb   :  { %20173 = vmatprep.subr.bf16.mxu0 %v20538_v11 }
 0x5fe   :  { %20175 = vmatpush3.bf16.msra.mxu0 %v23888_v44 }
 0x5ff   :  { %20176 = vmatprep.subr.bf16.mxu0 %v20538_v11 }
 0x601   :  { %18394 = vmatmul.mubr.msk.f32.vlgmr.msra.gmra.mrb[16].mxu0 %vm42_vm2, %v12618_v61 }
 0x602   :  { %20178 = vmatpush3.bf16.msra.mxu0 %v23900_v33  ;;  %18412 = vmatprep.mubr.msk.f32.mxu0 %vm20540_vm1, %v20539_v14 }
 0x603   :  { %20179 = vmatprep.subr.bf16.mxu0 %v20538_v11 }
 0x606   :  { %20181 = vmatpush3.bf16.msra.mxu0 %v23914_v41  ;;  %v13205_v41 = vrot.slane %v13130_v27, 1 }
 0x607   :  { %20182 = vmatprep.subr.bf16.mxu0 %v20538_v11 }
 0x60a   :  { %20184 = vmatpush3.bf16.msra.mxu0 %v23931_v29  ;;  %v13279_v29 = vrot.slane %v13130_v27, 2 }
 0x60b   :  { %20185 = vmatprep.subr.bf16.mxu0 %v20538_v11 }
 0x60e   :  { %20187 = vmatpush3.bf16.msra.mxu0 %v23943_v42  ;;  %v11373_v42 = vmul.f32 %v24468_v8, %v24916_v59 }
 0x60f   :  { %20188 = vmatprep.subr.bf16.mxu0 %v20538_v11 }
 0x611   :  { %18413 = vmatmul.mubr.msk.f32.vlgmr.msra.gmra.mrb[16].mxu0 %vm42_vm2, %v13130_v27 }
 0x612   :  { %20190 = vmatpush3.bf16.msra.mxu0 %v23955_v63  ;;  %18431 = vmatprep.mubr.msk.f32.mxu0 %vm20540_vm1, %v20539_v14  ;;  %v11374_v63 = vadd.f32 %v24485_v47, %v11373_v42 }
 0x613   :  { %20191 = vmatprep.subr.bf16.mxu0 %v20538_v11 }
 0x616   :  { %20193 = vmatpush3.bf16.msra.mxu0 %v23971_v50 }
 0x617   :  { %v12687_v44 = vpop.f32.mrb[14].mxu1  ;;  %20194 = vmatprep.subr.bf16.mxu0 %v20538_v11 }
 0x618   :  { %v18281_v33 = vpop.f32.mrb[15].mxu1 }
 0x61a   :  { %20196 = vmatpush3.bf16.msra.mxu0 %v23989_v46  ;;  %v11372_v46 = vld [vmem:[#allocation3 + $0x39] sm:$0xf] }
 0x61b   :  { %20197 = vmatprep.subr.bf16.mxu0 %v20538_v11 }
 0x61e   :  { %20199 = vmatpush3.bf16.msra.mxu0 %v24003_v6  ;;  %v11375_v6 = vadd.f32 %v11374_v63, %v11372_v46 }
 0x61f   :  { %20200 = vmatprep.subr.bf16.mxu0 %v20538_v11 }
 0x621   :  { %18432 = vmatmul.mubr.msk.f32.vlgmr.msra.gmra.mrb[16].mxu0 %vm42_vm2, %v13205_v41 }
 0x622   :  { %20202 = vmatpush3.bf16.msra.mxu0 %v24016_v21  ;;  %18450 = vmatprep.mubr.msk.f32.mxu0 %vm20540_vm1, %v20539_v14  ;;  %v12693_v14 = vmul.f32 %v24468_v8, %v12687_v44  ;;  %v12692_v21 = vld [vmem:[#allocation3 + $0x49] sm:$0xf] }
 0x623   :  { %20203 = vmatprep.subr.bf16.mxu0 %v20538_v11 }
 0x624   :  { %v12694_v50 = vadd.f32 %v24485_v47, %v12693_v14 }
 0x626   :  { %20205 = vmatpush3.bf16.msra.mxu0 %v24030_v53  ;;  %v12695_v53 = vadd.f32 %v12694_v50, %v12692_v21 }
 0x627   :  { %20206 = vmatprep.subr.bf16.mxu0 %v20538_v11 }
 0x62a   :  { %20208 = vmatpush3.bf16.msra.mxu0 %v24047_v23  ;;  %v11376_v23 = vmax.f32 %v11375_v6, 0.0 }
 0x62b   :  { %20209 = vmatprep.subr.bf16.mxu0 %v20538_v11  ;;  %v12696_v11 = vmax.f32 %v12695_v53, 0.0 }
 0x62c   :  { %v11377_v16 = vsel %vm2581_vm9, %v11376_v23, 0.0 }
 0x62d   :  { %v11378_v25 = vrot.slane %v11377_v16, 4 }
 0x62e   :  { %20211 = vmatpush3.bf16.msra.mxu0 %v24059_v22  ;;  %v12697_v22 = vsel %vm2581_vm9, %v12696_v11, 0.0 }
 0x62f   :  { %v12698_v19 = vrot.slane %v12697_v22, 4  ;;  %v11379_v36 = vadd.f32 %v11378_v25, %v11377_v16 }
 0x631   :  { %18451 = vmatmul.mubr.msk.f32.vlgmr.msra.gmra.mrb[16].mxu0 %vm42_vm2, %v13279_v29  ;;  %v12699_v39 = vadd.f32 %v12698_v19, %v12697_v22  ;;  %v11380_v51 = vrot.slane %v11379_v36, 2 }
 0x633   :  { %v12700_v31 = vrot.slane %v12699_v39, 2  ;;  %v11381_v38 = vadd.f32 %v11380_v51, %v11379_v36 }
 0x635   :  { %v12701_v26 = vadd.f32 %v12700_v31, %v12699_v39  ;;  %v11382_v20 = vrot.slane %v11381_v38, 1 }
 0x637   :  { %v12702_v32 = vrot.slane %v12701_v26, 1  ;;  %v11383_v2 = vadd.f32 %v11382_v20, %v11381_v38 }
 0x639   :  { %v12703_v7 = vadd.f32 %v12702_v32, %v12701_v26 }
 0x674   :  { %v12027_v45 = vpop.f32.mrb[14].mxu0 }
 0x675   :  { %v12033_v0 = vmul.f32 %v24468_v8, %v12027_v45  ;;  %v18110_v60 = vpop.f32.mrb[15].mxu0 }
 0x677   :  { %v12034_v3 = vadd.f32 %v24485_v47, %v12033_v0 }
 0x679   :  { %v12035_v9 = vadd.f32 %v12034_v3, %v12032_v10 }
 0x67b   :  { %v12036_v43 = vmax.f32 %v12035_v9, 0.0 }
 0x67d   :  { %v12037_v48 = vsel %vm2581_vm9, %v12036_v43, 0.0 }
 0x67e   :  { %v12038_v37 = vrot.slane %v12037_v48, 4 }
 0x680   :  { %v12039_v17 = vadd.f32 %v12038_v37, %v12037_v48 }
 0x682   :  { %v12040_v15 = vrot.slane %v12039_v17, 2 }
 0x684   :  { %v12041_v8 = vadd.f32 %v12040_v15, %v12039_v17 }
 0x686   :  { %v12042_v30 = vrot.slane %v12041_v8, 1 }
 0x688   :  { %v12043_v49 = vadd.f32 %v12042_v30, %v12041_v8 }
 0x68a   :  { %v12044_v56 = vadd.f32 %v12043_v49, %v11383_v2 }
 0x68c   :  { %v12704_v13 = vadd.f32 %v12703_v7, %v12044_v56 }
 0x704   :  { %v13348_v28 = vpop.f32.mrb[16].mxu0 }
 0x705   :  { %v13354_v18 = vmul.f32 %v20512_v58, %v13348_v28  ;;  %v18452_v12 = vpop.f32.mrb[17].mxu0 }
 0x707   :  { %v13355_v52 = vadd.f32 %v24485_v47, %v13354_v18 }
 0x709   :  { %v13356_v57 = vadd.f32 %v13355_v52, %v13353_v54 }
 0x70b   :  { %v13357_v35 = vmax.f32 %v13356_v57, 0.0 }
 0x70d   :  { %v13358_v55 = vsel %vm2581_vm9, %v13357_v35, 0.0 }
 0x70e   :  { %v13359_v24 = vrot.slane %v13358_v55, 4 }
 0x710   :  { %v13360_v40 = vadd.f32 %v13359_v24, %v13358_v55 }
 0x712   :  { %v13361_v61 = vrot.slane %v13360_v40, 2 }
 0x714   :  { %v13362_v59 = vadd.f32 %v13361_v61, %v13360_v40 }
 0x716   :  { %v13363_v5 = vrot.slane %v13362_v59, 1 }
 0x718   :  { %v13364_v4 = vadd.f32 %v13363_v5, %v13362_v59 }
 0x71a   :  { %v13365_v62 = vadd.f32 %v13364_v4, %v12704_v13 }
 0x71c   :  { %v13366_v1 = vmul.f32 0.0625, %v13365_v62 }
 0x71e   :  { %18470 = vmatmul.mubr.msk.f32.vlgmr.msra.gmra.mrb[16].mxu1 %vm42_vm2, %v13366_v1 }
 0x7f1   :  { %v13436_v27 = vpop.f32.mrb[16].mxu1 }
 0x7f2   :  { %v13437_v47 = vadd.f32 %v13436_v27, %v24989_v34  ;;  %v18471_v44 = vpop.f32.mrb[17].mxu1 }
 0x7f4   :  { %13440 = vst.msk [vmem:[#allocation5 + $0x1] sm:$0x1] %vm10630_vm10, %v13437_v47 }
 0x7f5   :  { %20524 = shalt.err (!%p20521_p4)
}
 0x7f6   :  { %s20525_s6 = scalar_lea.hbm %s25092_s12, 32 }
 0x7f7   :  { %p20526_p5 = scmp.ne.s32.totalorder %s25092_s12, %s20525_s6  ;;  %p20529_p6 = scmp.lt.u32.totalorder %s20525_s6, %s25092_s12 }
 0x7f9   :  { %p20531_p7 = pnand %p20529_p6, %p20526_p5 }
 0x7fb   :  { %20534 = shalt.err (!%p20531_p7)
}
 0x7fc   :  { %13450 = dma.vmem_to_hbm [thread:$0]  %s13448_s5, 32, %s25092_s12, [#allocation6]  }
 0x7fd   :  { %20535 = dma.done.wait [#allocation6], 32  }
 0x7fe   :  { %20536 = vsyncadd [#allocation6], 4294967264 }
 0x7ff   :  { %13454 = vsyncpa [#allocation6], 1 }

</bundles_post_ra>
